<compile_context>
chip_gen: v7x
topology: tpu7x:2x2x1
jax: 0.10.0
libtpu: 0.0.40
codegen_flags: <defaults>
</compile_context>

<pallas_src>
import functools

import jax
import jax.numpy as jnp
from jax.experimental import pallas as pl
from jax.experimental.pallas import tpu as pltpu


# --------------------------------------------------------------------------
# Fused kernel: one batch element per grid step.
# --------------------------------------------------------------------------
def _corner_pool_kernel(
        x_ref,                        # (1, H, W, Cin) f32
        w12_ref, s12_ref,             # fused pconv1|pconv2: (9*Cin, 2*Cmid) bf16, (1, 2*Cmid) f32
        wm1_ref, sm1_ref,             # merge1: (9*Cmid, Cin) bf16, (1, Cin) f32
        wsk_ref, ssk_ref,             # skip:   (Cin, Cin) bf16,    (1, Cin) f32
        wm2_ref, sm2_ref,             # merge2: (9*Cin, Cin) bf16,  (1, Cin) f32
        o_ref,                        # (1, H, W, Cin)
        xpad_ref,                     # VMEM (H+2, W+2, Cin)  f32   padded x
        yzpad_ref,                    # VMEM (H+2, W+2, Cmid) f32   padded y+z
        mspad_ref,                    # VMEM (H+2, W+2, Cin)  f32   padded relu(m+s)
        pool_ref,                     # VMEM (H, W, 2*Cmid)   f32   pooled y | z
        col_ref,                      # VMEM (H*W, 9*max(Cin,Cmid)) bf16  im2col LHS
        *, H, W, Cin, Cmid):
    HW = H * W
    taps = tuple((dh, dw) for dh in range(3) for dw in range(3))

    def zero_halo(ref):
        # Zero only the 1-pixel border; interiors are fully overwritten below.
        hh, ww, cc = ref.shape
        ref[0:1, :, :] = jnp.zeros((1, ww, cc), ref.dtype)
        ref[hh - 1:hh, :, :] = jnp.zeros((1, ww, cc), ref.dtype)
        ref[:, 0:1, :] = jnp.zeros((hh, 1, cc), ref.dtype)
        ref[:, ww - 1:ww, :] = jnp.zeros((hh, 1, cc), ref.dtype)

    def conv3x3(src_ref, w_ref, shift, relu):
        # im2col (bf16) then ONE (HW, 9*Cs) x (9*Cs, Cout) matmul with f32
        # accumulation.  BN scale is pre-folded into w, so the epilogue is only
        # the shift add (+ optional ReLU).
        cs = src_ref.shape[-1]
        for t, (dh, dw) in enumerate(taps):
            col_ref[:, t * cs:(t + 1) * cs] = (
                src_ref[dh:dh + H, dw:dw + W, :]
                .reshape(HW, cs).astype(jnp.bfloat16))
        acc = jnp.dot(col_ref[:, 0:9 * cs], w_ref[...],
                      preferred_element_type=jnp.float32)
        acc = acc + shift
        if relu:
            acc = jnp.maximum(acc, 0.0)
        return acc                               # (HW, Cout) f32

    def rev_cummax_inplace(ref, axis, length, c0, c1):
        # out[i] = max_{j >= i} v[j] along `axis`: log2(length)-step doubling
        # suffix-max scan, in place on the channel slice [c0:c1].
        d = 1
        while d < length:
            if axis == 0:
                ref[0:length - d, :, c0:c1] = jnp.maximum(
                    ref[0:length - d, :, c0:c1], ref[d:length, :, c0:c1])
            else:
                ref[:, 0:length - d, c0:c1] = jnp.maximum(
                    ref[:, 0:length - d, c0:c1], ref[:, d:length, c0:c1])
            d *= 2

    # --- halos (thin borders only; see header note on per-step zeroing) ------
    zero_halo(xpad_ref)
    zero_halo(yzpad_ref)
    zero_halo(mspad_ref)

    # --- stage 0: padded copy of x --------------------------------------------
    xpad_ref[1:H + 1, 1:W + 1, :] = x_ref[0]

    # --- fused pconv1|pconv2 (3x3 + BN + ReLU), one matmul ---------------------
    yz = conv3x3(xpad_ref, w12_ref, s12_ref[...], relu=True)   # (HW, 2*Cmid)
    pool_ref[...] = yz.reshape(H, W, 2 * Cmid)

    # --- TopPool on y (channels [0:Cmid]); LeftPool on z ([Cmid:2*Cmid]) -------
    rev_cummax_inplace(pool_ref, axis=0, length=H, c0=0, c1=Cmid)
    rev_cummax_inplace(pool_ref, axis=1, length=W, c0=Cmid, c1=2 * Cmid)

    # --- y + z, written straight into merge1's padded source slab --------------
    yzpad_ref[1:H + 1, 1:W + 1, :] = (
        pool_ref[:, :, 0:Cmid] + pool_ref[:, :, Cmid:2 * Cmid])

    # --- merge1: 3x3 conv + BN (no ReLU) on (y + z) -----------------------------
    m = conv3x3(yzpad_ref, wm1_ref, sm1_ref[...], relu=False)   # (HW, Cin) f32

    # --- skip: 1x1 conv + BN (no ReLU) on x -------------------------------------
    x_flat = x_ref[0].reshape(HW, Cin).astype(jnp.bfloat16)
    s = jnp.dot(x_flat, wsk_ref[...],
                preferred_element_type=jnp.float32) + ssk_ref[...]

    # --- merge2: ReLU(m + s) -> 3x3 conv + BN + ReLU -----------------------------
    mspad_ref[1:H + 1, 1:W + 1, :] = jnp.maximum(m + s, 0.0).reshape(H, W, Cin)
    out = conv3x3(mspad_ref, wm2_ref, sm2_ref[...], relu=True)  # (HW, Cin) f32
    o_ref[0] = out.reshape(H, W, Cin).astype(o_ref.dtype)


# --------------------------------------------------------------------------
# NHWC forward (no HBM transpose passes)
# --------------------------------------------------------------------------
def corner_pool_forward_nhwc(x, params):
    N, H, W, Cin = x.shape
    Cmid = params["w_p1"].shape[-1]
    bf16 = jnp.bfloat16

    def fold(w, bn):     # fold BN scale into the conv weight (per out channel)
        scale, _ = bn
        return w * scale.reshape((1,) * (w.ndim - 1) + (-1,))

    def shift_row(bn):
        return bn[1].reshape(1, -1).astype(jnp.float32)

    # Fused pconv1|pconv2: concat along the output-channel axis, tap-major K.
    w12 = jnp.concatenate([fold(params["w_p1"], params["bn_p1"]),
                           fold(params["w_p2"], params["bn_p2"])], axis=-1)
    w12 = w12.reshape(9 * Cin, 2 * Cmid).astype(bf16)
    s12 = jnp.concatenate([shift_row(params["bn_p1"]),
                           shift_row(params["bn_p2"])], axis=-1)

    wm1 = fold(params["w_m1"], params["bn_m1"]).reshape(9 * Cmid, Cin).astype(bf16)
    sm1 = shift_row(params["bn_m1"])
    wsk = fold(params["w_skip"], params["bn_skip"]).reshape(Cin, Cin).astype(bf16)
    ssk = shift_row(params["bn_skip"])
    wm2 = fold(params["w_m2"], params["bn_m2"]).reshape(9 * Cin, Cin).astype(bf16)
    sm2 = shift_row(params["bn_m2"])

    kernel = functools.partial(_corner_pool_kernel, H=H, W=W, Cin=Cin, Cmid=Cmid)
    cmax = max(Cin, Cmid)

    def rep(arr):  # resident (weight / shift) operand: same block every step
        nd = arr.ndim
        return pl.BlockSpec(arr.shape, lambda n: (0,) * nd)

    out = pl.pallas_call(
        kernel,
        out_shape=jax.ShapeDtypeStruct((N, H, W, Cin), x.dtype),
        grid=(N,),
        in_specs=[
            pl.BlockSpec((1, H, W, Cin), lambda n: (n, 0, 0, 0)),
            rep(w12), rep(s12),
            rep(wm1), rep(sm1),
            rep(wsk), rep(ssk),
            rep(wm2), rep(sm2),
        ],
        out_specs=pl.BlockSpec((1, H, W, Cin), lambda n: (n, 0, 0, 0)),
        scratch_shapes=[
            pltpu.VMEM((H + 2, W + 2, Cin), jnp.float32),      # padded x
            pltpu.VMEM((H + 2, W + 2, Cmid), jnp.float32),     # padded y + z
            pltpu.VMEM((H + 2, W + 2, Cin), jnp.float32),      # padded relu(m+s)
            pltpu.VMEM((H, W, 2 * Cmid), jnp.float32),         # pooled y | z
            pltpu.VMEM((H * W, 9 * cmax), jnp.bfloat16),       # im2col LHS
        ],
        compiler_params=pltpu.CompilerParams(
            dimension_semantics=("parallel",)),                # batch across TCs
    )(x, w12, s12, wm1, sm1, wsk, ssk, wm2, sm2)
    return out


# --------------------------------------------------------------------------
# NCHW compatibility wrapper (matches the PyTorch module interface).
# An NHWC end-to-end model should call corner_pool_forward_nhwc directly and
# skip these two HBM transpose passes.
# --------------------------------------------------------------------------
def corner_pool_forward(x_nchw, params):
    x = jnp.transpose(x_nchw, (0, 2, 3, 1))            # NCHW -> NHWC
    out = corner_pool_forward_nhwc(x, params)
    return jnp.transpose(out, (0, 3, 1, 2))            # NHWC -> NCHW


# --------------------------------------------------------------------------
# Deterministic parameter construction
# --------------------------------------------------------------------------
def bn_params(key, c, eps=1e-5):
    k1, k2, k3, k4 = jax.random.split(key, 4)
    gamma = 1.0 + 0.1 * jax.random.normal(k1, (c,), jnp.float32)
    beta = 0.1 * jax.random.normal(k2, (c,), jnp.float32)
    mean = 0.1 * jax.random.normal(k3, (c,), jnp.float32)
    var = 1.0 + 0.1 * jax.random.uniform(k4, (c,), jnp.float32)
    scale = gamma / jnp.sqrt(var + eps)
    shift = beta - mean * scale
    return scale, shift


if __name__ == "__main__":
    key = jax.random.PRNGKey(0)
    N, C, H, W = 2, 4, 16, 16
    keys = jax.random.split(key, 11)

    x = jax.random.normal(keys[0], (N, C, H, W), jnp.float32)

    params = {
        "w_p1": 0.1 * jax.random.normal(keys[1], (3, 3, C, 128), jnp.float32),
        "bn_p1": bn_params(keys[2], 128),
        "w_p2": 0.1 * jax.random.normal(keys[3], (3, 3, C, 128), jnp.float32),
        "bn_p2": bn_params(keys[4], 128),
        "w_m1": 0.1 * jax.random.normal(keys[5], (3, 3, 128, C), jnp.float32),
        "bn_m1": bn_params(keys[6], C),
        "w_skip": 0.1 * jax.random.normal(keys[7], (1, 1, C, C), jnp.float32),
        "bn_skip": bn_params(keys[8], C),
        "w_m2": 0.1 * jax.random.normal(keys[9], (3, 3, C, C), jnp.float32),
        "bn_m2": bn_params(keys[10], C),
    }

    out = jax.jit(corner_pool_forward)(x, params)
    jax.block_until_ready(out)
    assert out.shape == (N, C, H, W), out.shape
    assert bool(jnp.all(jnp.isfinite(out)))
    print("KERNEL_OK")
</pallas_src>

<mosaic_0001>
module attributes {stable_mosaic.version = 11 : i64} {
  func.func @_corner_pool_kernel(%arg0: i32, %arg1: memref<1x16x16x4xf32, #tpu.memory_space<vmem>>, %arg2: memref<36x256xbf16, #tpu.memory_space<vmem>>, %arg3: memref<1x256xf32, #tpu.memory_space<vmem>>, %arg4: memref<1152x4xbf16, #tpu.memory_space<vmem>>, %arg5: memref<1x4xf32, #tpu.memory_space<vmem>>, %arg6: memref<4x4xbf16, #tpu.memory_space<vmem>>, %arg7: memref<1x4xf32, #tpu.memory_space<vmem>>, %arg8: memref<36x4xbf16, #tpu.memory_space<vmem>>, %arg9: memref<1x4xf32, #tpu.memory_space<vmem>>, %arg10: memref<1x16x16x4xf32, #tpu.memory_space<vmem>>, %arg11: memref<18x18x4xf32, #tpu.memory_space<vmem>>, %arg12: memref<18x18x128xf32, #tpu.memory_space<vmem>>, %arg13: memref<18x18x4xf32, #tpu.memory_space<vmem>>, %arg14: memref<16x16x256xf32, #tpu.memory_space<vmem>>, %arg15: memref<256x1152xbf16, #tpu.memory_space<vmem>>) attributes {dimension_semantics = [#tpu.dimension_semantics<parallel>], iteration_bounds = array<i64: 2>, scalar_prefetch = 0 : i64, scratch_operands = 5 : i64, tpu.core_type = #tpu.core_type<tc>, window_params = [{transform_indices = @transform_0, window_bounds = array<i64: 1, 16, 16, 4>}, {pipeline_mode = #tpu.pipeline_mode<synchronous>, transform_indices = @transform_1, window_bounds = array<i64: 36, 256>}, {pipeline_mode = #tpu.pipeline_mode<synchronous>, transform_indices = @transform_2, window_bounds = array<i64: 1, 256>}, {pipeline_mode = #tpu.pipeline_mode<synchronous>, transform_indices = @transform_3, window_bounds = array<i64: 1152, 4>}, {pipeline_mode = #tpu.pipeline_mode<synchronous>, transform_indices = @transform_4, window_bounds = array<i64: 1, 4>}, {pipeline_mode = #tpu.pipeline_mode<synchronous>, transform_indices = @transform_5, window_bounds = array<i64: 4, 4>}, {pipeline_mode = #tpu.pipeline_mode<synchronous>, transform_indices = @transform_6, window_bounds = array<i64: 1, 4>}, {pipeline_mode = #tpu.pipeline_mode<synchronous>, transform_indices = @transform_7, window_bounds = array<i64: 36, 4>}, {pipeline_mode = #tpu.pipeline_mode<synchronous>, transform_indices = @transform_8, window_bounds = array<i64: 1, 4>}, {transform_indices = @transform_9, window_bounds = array<i64: 1, 16, 16, 4>}]} {
    %cst = arith.constant 0.000000e+00 : f32
    %0 = vector.broadcast %cst : f32 to vector<1x18x4xf32>
    %c0 = arith.constant 0 : index
    %c0_0 = arith.constant 0 : index
    %c0_1 = arith.constant 0 : index
    %1 = vector.load %arg11[%c0, %c0_0, %c0_1] : memref<18x18x4xf32, #tpu.memory_space<vmem>>, vector<1x18x4xf32>
    tpu.vector_store %arg11[%c0, %c0_0, %c0_1], %0 {strides = array<i32>} : memref<18x18x4xf32, #tpu.memory_space<vmem>>, vector<1x18x4xf32>,
    %cst_2 = arith.constant 0.000000e+00 : f32
    %2 = vector.broadcast %cst_2 : f32 to vector<1x18x4xf32>
    %c17 = arith.constant 17 : index
    %c0_3 = arith.constant 0 : index
    %c0_4 = arith.constant 0 : index
    %3 = vector.load %arg11[%c17, %c0_3, %c0_4] : memref<18x18x4xf32, #tpu.memory_space<vmem>>, vector<1x18x4xf32>
    tpu.vector_store %arg11[%c17, %c0_3, %c0_4], %2 {strides = array<i32>} : memref<18x18x4xf32, #tpu.memory_space<vmem>>, vector<1x18x4xf32>,
    %cst_5 = arith.constant 0.000000e+00 : f32
    %4 = vector.broadcast %cst_5 : f32 to vector<18x1x4xf32>
    %c0_6 = arith.constant 0 : index
    %c0_7 = arith.constant 0 : index
    %c0_8 = arith.constant 0 : index
    %5 = vector.load %arg11[%c0_6, %c0_7, %c0_8] : memref<18x18x4xf32, #tpu.memory_space<vmem>>, vector<18x1x4xf32>
    tpu.vector_store %arg11[%c0_6, %c0_7, %c0_8], %4 {strides = array<i32>} : memref<18x18x4xf32, #tpu.memory_space<vmem>>, vector<18x1x4xf32>,
    %cst_9 = arith.constant 0.000000e+00 : f32
    %6 = vector.broadcast %cst_9 : f32 to vector<18x1x4xf32>
    %c0_10 = arith.constant 0 : index
    %c17_11 = arith.constant 17 : index
    %c0_12 = arith.constant 0 : index
    %7 = vector.load %arg11[%c0_10, %c17_11, %c0_12] : memref<18x18x4xf32, #tpu.memory_space<vmem>>, vector<18x1x4xf32>
    tpu.vector_store %arg11[%c0_10, %c17_11, %c0_12], %6 {strides = array<i32>} : memref<18x18x4xf32, #tpu.memory_space<vmem>>, vector<18x1x4xf32>,
    %cst_13 = arith.constant 0.000000e+00 : f32
    %8 = vector.broadcast %cst_13 : f32 to vector<1x18x128xf32>
    %c0_14 = arith.constant 0 : index
    %c0_15 = arith.constant 0 : index
    %c0_16 = arith.constant 0 : index
    %9 = vector.load %arg12[%c0_14, %c0_15, %c0_16] : memref<18x18x128xf32, #tpu.memory_space<vmem>>, vector<1x18x128xf32>
    tpu.vector_store %arg12[%c0_14, %c0_15, %c0_16], %8 {strides = array<i32>} : memref<18x18x128xf32, #tpu.memory_space<vmem>>, vector<1x18x128xf32>,
    %cst_17 = arith.constant 0.000000e+00 : f32
    %10 = vector.broadcast %cst_17 : f32 to vector<1x18x128xf32>
    %c17_18 = arith.constant 17 : index
    %c0_19 = arith.constant 0 : index
    %c0_20 = arith.constant 0 : index
    %11 = vector.load %arg12[%c17_18, %c0_19, %c0_20] : memref<18x18x128xf32, #tpu.memory_space<vmem>>, vector<1x18x128xf32>
    tpu.vector_store %arg12[%c17_18, %c0_19, %c0_20], %10 {strides = array<i32>} : memref<18x18x128xf32, #tpu.memory_space<vmem>>, vector<1x18x128xf32>,
    %cst_21 = arith.constant 0.000000e+00 : f32
    %12 = vector.broadcast %cst_21 : f32 to vector<18x1x128xf32>
    %c0_22 = arith.constant 0 : index
    %c0_23 = arith.constant 0 : index
    %c0_24 = arith.constant 0 : index
    %13 = vector.load %arg12[%c0_22, %c0_23, %c0_24] : memref<18x18x128xf32, #tpu.memory_space<vmem>>, vector<18x1x128xf32>
    tpu.vector_store %arg12[%c0_22, %c0_23, %c0_24], %12 {strides = array<i32>} : memref<18x18x128xf32, #tpu.memory_space<vmem>>, vector<18x1x128xf32>,
    %cst_25 = arith.constant 0.000000e+00 : f32
    %14 = vector.broadcast %cst_25 : f32 to vector<18x1x128xf32>
    %c0_26 = arith.constant 0 : index
    %c17_27 = arith.constant 17 : index
    %c0_28 = arith.constant 0 : index
    %15 = vector.load %arg12[%c0_26, %c17_27, %c0_28] : memref<18x18x128xf32, #tpu.memory_space<vmem>>, vector<18x1x128xf32>
    tpu.vector_store %arg12[%c0_26, %c17_27, %c0_28], %14 {strides = array<i32>} : memref<18x18x128xf32, #tpu.memory_space<vmem>>, vector<18x1x128xf32>,
    %cst_29 = arith.constant 0.000000e+00 : f32
    %16 = vector.broadcast %cst_29 : f32 to vector<1x18x4xf32>
    %c0_30 = arith.constant 0 : index
    %c0_31 = arith.constant 0 : index
    %c0_32 = arith.constant 0 : index
    %17 = vector.load %arg13[%c0_30, %c0_31, %c0_32] : memref<18x18x4xf32, #tpu.memory_space<vmem>>, vector<1x18x4xf32>
    tpu.vector_store %arg13[%c0_30, %c0_31, %c0_32], %16 {strides = array<i32>} : memref<18x18x4xf32, #tpu.memory_space<vmem>>, vector<1x18x4xf32>,
    %cst_33 = arith.constant 0.000000e+00 : f32
    %18 = vector.broadcast %cst_33 : f32 to vector<1x18x4xf32>
    %c17_34 = arith.constant 17 : index
    %c0_35 = arith.constant 0 : index
    %c0_36 = arith.constant 0 : index
    %19 = vector.load %arg13[%c17_34, %c0_35, %c0_36] : memref<18x18x4xf32, #tpu.memory_space<vmem>>, vector<1x18x4xf32>
    tpu.vector_store %arg13[%c17_34, %c0_35, %c0_36], %18 {strides = array<i32>} : memref<18x18x4xf32, #tpu.memory_space<vmem>>, vector<1x18x4xf32>,
    %cst_37 = arith.constant 0.000000e+00 : f32
    %20 = vector.broadcast %cst_37 : f32 to vector<18x1x4xf32>
    %c0_38 = arith.constant 0 : index
    %c0_39 = arith.constant 0 : index
    %c0_40 = arith.constant 0 : index
    %21 = vector.load %arg13[%c0_38, %c0_39, %c0_40] : memref<18x18x4xf32, #tpu.memory_space<vmem>>, vector<18x1x4xf32>
    tpu.vector_store %arg13[%c0_38, %c0_39, %c0_40], %20 {strides = array<i32>} : memref<18x18x4xf32, #tpu.memory_space<vmem>>, vector<18x1x4xf32>,
    %cst_41 = arith.constant 0.000000e+00 : f32
    %22 = vector.broadcast %cst_41 : f32 to vector<18x1x4xf32>
    %c0_42 = arith.constant 0 : index
    %c17_43 = arith.constant 17 : index
    %c0_44 = arith.constant 0 : index
    %23 = vector.load %arg13[%c0_42, %c17_43, %c0_44] : memref<18x18x4xf32, #tpu.memory_space<vmem>>, vector<18x1x4xf32>
    tpu.vector_store %arg13[%c0_42, %c17_43, %c0_44], %22 {strides = array<i32>} : memref<18x18x4xf32, #tpu.memory_space<vmem>>, vector<18x1x4xf32>,
    %c0_45 = arith.constant 0 : index
    %c0_46 = arith.constant 0 : index
    %c0_47 = arith.constant 0 : index
    %c0_48 = arith.constant 0 : index
    %24 = vector.load %arg1[%c0_45, %c0_46, %c0_47, %c0_48] : memref<1x16x16x4xf32, #tpu.memory_space<vmem>>, vector<1x16x16x4xf32>
    %25 = vector.shape_cast %24 : vector<1x16x16x4xf32> to vector<16x16x4xf32>
    %c1 = arith.constant 1 : index
    %c1_49 = arith.constant 1 : index
    %c0_50 = arith.constant 0 : index
    %26 = vector.load %arg11[%c1, %c1_49, %c0_50] : memref<18x18x4xf32, #tpu.memory_space<vmem>>, vector<16x16x4xf32>
    tpu.vector_store %arg11[%c1, %c1_49, %c0_50], %25 {strides = array<i32>} : memref<18x18x4xf32, #tpu.memory_space<vmem>>, vector<16x16x4xf32>,
    %c0_51 = arith.constant 0 : index
    %c0_52 = arith.constant 0 : index
    %27 = vector.load %arg3[%c0_51, %c0_52] : memref<1x256xf32, #tpu.memory_space<vmem>>, vector<1x256xf32>
    %c0_53 = arith.constant 0 : index
    %c0_54 = arith.constant 0 : index
    %c0_55 = arith.constant 0 : index
    %28 = vector.load %arg11[%c0_53, %c0_54, %c0_55] : memref<18x18x4xf32, #tpu.memory_space<vmem>>, vector<16x16x4xf32>
    %29 = vector.shape_cast %28 : vector<16x16x4xf32> to vector<256x4xf32>
    %30 = arith.truncf %29 : vector<256x4xf32> to vector<256x4xbf16>
    %c0_56 = arith.constant 0 : index
    %c0_57 = arith.constant 0 : index
    %31 = vector.load %arg15[%c0_56, %c0_57] : memref<256x1152xbf16, #tpu.memory_space<vmem>>, vector<256x4xbf16>
    tpu.vector_store %arg15[%c0_56, %c0_57], %30 {strides = array<i32>} : memref<256x1152xbf16, #tpu.memory_space<vmem>>, vector<256x4xbf16>,
    %c0_58 = arith.constant 0 : index
    %c1_59 = arith.constant 1 : index
    %c0_60 = arith.constant 0 : index
    %32 = vector.load %arg11[%c0_58, %c1_59, %c0_60] : memref<18x18x4xf32, #tpu.memory_space<vmem>>, vector<16x16x4xf32>
    %33 = vector.shape_cast %32 : vector<16x16x4xf32> to vector<256x4xf32>
    %34 = arith.truncf %33 : vector<256x4xf32> to vector<256x4xbf16>
    %c0_61 = arith.constant 0 : index
    %c4 = arith.constant 4 : index
    %35 = vector.load %arg15[%c0_61, %c4] : memref<256x1152xbf16, #tpu.memory_space<vmem>>, vector<256x4xbf16>
    tpu.vector_store %arg15[%c0_61, %c4], %34 {strides = array<i32>} : memref<256x1152xbf16, #tpu.memory_space<vmem>>, vector<256x4xbf16>,
    %c0_62 = arith.constant 0 : index
    %c2 = arith.constant 2 : index
    %c0_63 = arith.constant 0 : index
    %36 = vector.load %arg11[%c0_62, %c2, %c0_63] : memref<18x18x4xf32, #tpu.memory_space<vmem>>, vector<16x16x4xf32>
    %37 = vector.shape_cast %36 : vector<16x16x4xf32> to vector<256x4xf32>
    %38 = arith.truncf %37 : vector<256x4xf32> to vector<256x4xbf16>
    %c0_64 = arith.constant 0 : index
    %c8 = arith.constant 8 : index
    %39 = vector.load %arg15[%c0_64, %c8] : memref<256x1152xbf16, #tpu.memory_space<vmem>>, vector<256x4xbf16>
    tpu.vector_store %arg15[%c0_64, %c8], %38 {strides = array<i32>} : memref<256x1152xbf16, #tpu.memory_space<vmem>>, vector<256x4xbf16>,
    %c1_65 = arith.constant 1 : index
    %c0_66 = arith.constant 0 : index
    %c0_67 = arith.constant 0 : index
    %40 = vector.load %arg11[%c1_65, %c0_66, %c0_67] : memref<18x18x4xf32, #tpu.memory_space<vmem>>, vector<16x16x4xf32>
    %41 = vector.shape_cast %40 : vector<16x16x4xf32> to vector<256x4xf32>
    %42 = arith.truncf %41 : vector<256x4xf32> to vector<256x4xbf16>
    %c0_68 = arith.constant 0 : index
    %c12 = arith.constant 12 : index
    %43 = vector.load %arg15[%c0_68, %c12] : memref<256x1152xbf16, #tpu.memory_space<vmem>>, vector<256x4xbf16>
    tpu.vector_store %arg15[%c0_68, %c12], %42 {strides = array<i32>} : memref<256x1152xbf16, #tpu.memory_space<vmem>>, vector<256x4xbf16>,
    %c1_69 = arith.constant 1 : index
    %c1_70 = arith.constant 1 : index
    %c0_71 = arith.constant 0 : index
    %44 = vector.load %arg11[%c1_69, %c1_70, %c0_71] : memref<18x18x4xf32, #tpu.memory_space<vmem>>, vector<16x16x4xf32>
    %45 = vector.shape_cast %44 : vector<16x16x4xf32> to vector<256x4xf32>
    %46 = arith.truncf %45 : vector<256x4xf32> to vector<256x4xbf16>
    %c0_72 = arith.constant 0 : index
    %c16 = arith.constant 16 : index
    %47 = vector.load %arg15[%c0_72, %c16] : memref<256x1152xbf16, #tpu.memory_space<vmem>>, vector<256x4xbf16>
    tpu.vector_store %arg15[%c0_72, %c16], %46 {strides = array<i32>} : memref<256x1152xbf16, #tpu.memory_space<vmem>>, vector<256x4xbf16>,
    %c1_73 = arith.constant 1 : index
    %c2_74 = arith.constant 2 : index
    %c0_75 = arith.constant 0 : index
    %48 = vector.load %arg11[%c1_73, %c2_74, %c0_75] : memref<18x18x4xf32, #tpu.memory_space<vmem>>, vector<16x16x4xf32>
    %49 = vector.shape_cast %48 : vector<16x16x4xf32> to vector<256x4xf32>
    %50 = arith.truncf %49 : vector<256x4xf32> to vector<256x4xbf16>
    %c0_76 = arith.constant 0 : index
    %c20 = arith.constant 20 : index
    %51 = vector.load %arg15[%c0_76, %c20] : memref<256x1152xbf16, #tpu.memory_space<vmem>>, vector<256x4xbf16>
    tpu.vector_store %arg15[%c0_76, %c20], %50 {strides = array<i32>} : memref<256x1152xbf16, #tpu.memory_space<vmem>>, vector<256x4xbf16>,
    %c2_77 = arith.constant 2 : index
    %c0_78 = arith.constant 0 : index
    %c0_79 = arith.constant 0 : index
    %52 = vector.load %arg11[%c2_77, %c0_78, %c0_79] : memref<18x18x4xf32, #tpu.memory_space<vmem>>, vector<16x16x4xf32>
    %53 = vector.shape_cast %52 : vector<16x16x4xf32> to vector<256x4xf32>
    %54 = arith.truncf %53 : vector<256x4xf32> to vector<256x4xbf16>
    %c0_80 = arith.constant 0 : index
    %c24 = arith.constant 24 : index
    %55 = vector.load %arg15[%c0_80, %c24] : memref<256x1152xbf16, #tpu.memory_space<vmem>>, vector<256x4xbf16>
    tpu.vector_store %arg15[%c0_80, %c24], %54 {strides = array<i32>} : memref<256x1152xbf16, #tpu.memory_space<vmem>>, vector<256x4xbf16>,
    %c2_81 = arith.constant 2 : index
    %c1_82 = arith.constant 1 : index
    %c0_83 = arith.constant 0 : index
    %56 = vector.load %arg11[%c2_81, %c1_82, %c0_83] : memref<18x18x4xf32, #tpu.memory_space<vmem>>, vector<16x16x4xf32>
    %57 = vector.shape_cast %56 : vector<16x16x4xf32> to vector<256x4xf32>
    %58 = arith.truncf %57 : vector<256x4xf32> to vector<256x4xbf16>
    %c0_84 = arith.constant 0 : index
    %c28 = arith.constant 28 : index
    %59 = vector.load %arg15[%c0_84, %c28] : memref<256x1152xbf16, #tpu.memory_space<vmem>>, vector<256x4xbf16>
    tpu.vector_store %arg15[%c0_84, %c28], %58 {strides = array<i32>} : memref<256x1152xbf16, #tpu.memory_space<vmem>>, vector<256x4xbf16>,
    %c2_85 = arith.constant 2 : index
    %c2_86 = arith.constant 2 : index
    %c0_87 = arith.constant 0 : index
    %60 = vector.load %arg11[%c2_85, %c2_86, %c0_87] : memref<18x18x4xf32, #tpu.memory_space<vmem>>, vector<16x16x4xf32>
    %61 = vector.shape_cast %60 : vector<16x16x4xf32> to vector<256x4xf32>
    %62 = arith.truncf %61 : vector<256x4xf32> to vector<256x4xbf16>
    %c0_88 = arith.constant 0 : index
    %c32 = arith.constant 32 : index
    %63 = vector.load %arg15[%c0_88, %c32] : memref<256x1152xbf16, #tpu.memory_space<vmem>>, vector<256x4xbf16>
    tpu.vector_store %arg15[%c0_88, %c32], %62 {strides = array<i32>} : memref<256x1152xbf16, #tpu.memory_space<vmem>>, vector<256x4xbf16>,
    %c0_89 = arith.constant 0 : index
    %c0_90 = arith.constant 0 : index
    %64 = vector.load %arg15[%c0_89, %c0_90] : memref<256x1152xbf16, #tpu.memory_space<vmem>>, vector<256x36xbf16>
    %c0_91 = arith.constant 0 : index
    %c0_92 = arith.constant 0 : index
    %65 = vector.load %arg2[%c0_91, %c0_92] : memref<36x256xbf16, #tpu.memory_space<vmem>>, vector<36x256xbf16>
    %cst_93 = arith.constant dense<0.000000e+00> : vector<256x256xf32>
    %66 = tpu.matmul %64, %65, %cst_93 {dimension_numbers = #tpu.dot_dimension_numbers<[1], [0], [0], [1], [0, 0, 1, 1], [], []>} : vector<256x36xbf16>, vector<36x256xbf16>, vector<256x256xf32> -> vector<256x256xf32>
    %67 = vector.broadcast %27 : vector<1x256xf32> to vector<256x256xf32>
    %68 = arith.addf %66, %67 : vector<256x256xf32>
    %cst_94 = arith.constant 0.000000e+00 : f32
    %69 = vector.broadcast %cst_94 : f32 to vector<256x256xf32>
    %70 = arith.maximumf %68, %69 : vector<256x256xf32>
    %71 = vector.shape_cast %70 : vector<256x256xf32> to vector<16x16x256xf32>
    %c0_95 = arith.constant 0 : index
    %c0_96 = arith.constant 0 : index
    %c0_97 = arith.constant 0 : index
    %72 = vector.load %arg14[%c0_95, %c0_96, %c0_97] : memref<16x16x256xf32, #tpu.memory_space<vmem>>, vector<16x16x256xf32>
    tpu.vector_store %arg14[%c0_95, %c0_96, %c0_97], %71 {strides = array<i32>} : memref<16x16x256xf32, #tpu.memory_space<vmem>>, vector<16x16x256xf32>,
    %c0_98 = arith.constant 0 : index
    %c0_99 = arith.constant 0 : index
    %c0_100 = arith.constant 0 : index
    %73 = vector.load %arg14[%c0_98, %c0_99, %c0_100] : memref<16x16x256xf32, #tpu.memory_space<vmem>>, vector<15x16x128xf32>
    %c1_101 = arith.constant 1 : index
    %c0_102 = arith.constant 0 : index
    %c0_103 = arith.constant 0 : index
    %74 = vector.load %arg14[%c1_101, %c0_102, %c0_103] : memref<16x16x256xf32, #tpu.memory_space<vmem>>, vector<15x16x128xf32>
    %75 = arith.maximumf %73, %74 : vector<15x16x128xf32>
    %c0_104 = arith.constant 0 : index
    %c0_105 = arith.constant 0 : index
    %c0_106 = arith.constant 0 : index
    %76 = vector.load %arg14[%c0_104, %c0_105, %c0_106] : memref<16x16x256xf32, #tpu.memory_space<vmem>>, vector<15x16x128xf32>
    tpu.vector_store %arg14[%c0_104, %c0_105, %c0_106], %75 {strides = array<i32>} : memref<16x16x256xf32, #tpu.memory_space<vmem>>, vector<15x16x128xf32>,
    %c0_107 = arith.constant 0 : index
    %c0_108 = arith.constant 0 : index
    %c0_109 = arith.constant 0 : index
    %77 = vector.load %arg14[%c0_107, %c0_108, %c0_109] : memref<16x16x256xf32, #tpu.memory_space<vmem>>, vector<14x16x128xf32>
    %c2_110 = arith.constant 2 : index
    %c0_111 = arith.constant 0 : index
    %c0_112 = arith.constant 0 : index
    %78 = vector.load %arg14[%c2_110, %c0_111, %c0_112] : memref<16x16x256xf32, #tpu.memory_space<vmem>>, vector<14x16x128xf32>
    %79 = arith.maximumf %77, %78 : vector<14x16x128xf32>
    %c0_113 = arith.constant 0 : index
    %c0_114 = arith.constant 0 : index
    %c0_115 = arith.constant 0 : index
    %80 = vector.load %arg14[%c0_113, %c0_114, %c0_115] : memref<16x16x256xf32, #tpu.memory_space<vmem>>, vector<14x16x128xf32>
    tpu.vector_store %arg14[%c0_113, %c0_114, %c0_115], %79 {strides = array<i32>} : memref<16x16x256xf32, #tpu.memory_space<vmem>>, vector<14x16x128xf32>,
    %c0_116 = arith.constant 0 : index
    %c0_117 = arith.constant 0 : index
    %c0_118 = arith.constant 0 : index
    %81 = vector.load %arg14[%c0_116, %c0_117, %c0_118] : memref<16x16x256xf32, #tpu.memory_space<vmem>>, vector<12x16x128xf32>
    %c4_119 = arith.constant 4 : index
    %c0_120 = arith.constant 0 : index
    %c0_121 = arith.constant 0 : index
    %82 = vector.load %arg14[%c4_119, %c0_120, %c0_121] : memref<16x16x256xf32, #tpu.memory_space<vmem>>, vector<12x16x128xf32>
    %83 = arith.maximumf %81, %82 : vector<12x16x128xf32>
    %c0_122 = arith.constant 0 : index
    %c0_123 = arith.constant 0 : index
    %c0_124 = arith.constant 0 : index
    %84 = vector.load %arg14[%c0_122, %c0_123, %c0_124] : memref<16x16x256xf32, #tpu.memory_space<vmem>>, vector<12x16x128xf32>
    tpu.vector_store %arg14[%c0_122, %c0_123, %c0_124], %83 {strides = array<i32>} : memref<16x16x256xf32, #tpu.memory_space<vmem>>, vector<12x16x128xf32>,
    %c0_125 = arith.constant 0 : index
    %c0_126 = arith.constant 0 : index
    %c0_127 = arith.constant 0 : index
    %85 = vector.load %arg14[%c0_125, %c0_126, %c0_127] : memref<16x16x256xf32, #tpu.memory_space<vmem>>, vector<8x16x128xf32>
    %c8_128 = arith.constant 8 : index
    %c0_129 = arith.constant 0 : index
    %c0_130 = arith.constant 0 : index
    %86 = vector.load %arg14[%c8_128, %c0_129, %c0_130] : memref<16x16x256xf32, #tpu.memory_space<vmem>>, vector<8x16x128xf32>
    %87 = arith.maximumf %85, %86 : vector<8x16x128xf32>
    %c0_131 = arith.constant 0 : index
    %c0_132 = arith.constant 0 : index
    %c0_133 = arith.constant 0 : index
    %88 = vector.load %arg14[%c0_131, %c0_132, %c0_133] : memref<16x16x256xf32, #tpu.memory_space<vmem>>, vector<8x16x128xf32>
    tpu.vector_store %arg14[%c0_131, %c0_132, %c0_133], %87 {strides = array<i32>} : memref<16x16x256xf32, #tpu.memory_space<vmem>>, vector<8x16x128xf32>,
    %c0_134 = arith.constant 0 : index
    %c0_135 = arith.constant 0 : index
    %c128 = arith.constant 128 : index
    %89 = vector.load %arg14[%c0_134, %c0_135, %c128] : memref<16x16x256xf32, #tpu.memory_space<vmem>>, vector<16x15x128xf32>
    %c0_136 = arith.constant 0 : index
    %c1_137 = arith.constant 1 : index
    %c128_138 = arith.constant 128 : index
    %90 = vector.load %arg14[%c0_136, %c1_137, %c128_138] : memref<16x16x256xf32, #tpu.memory_space<vmem>>, vector<16x15x128xf32>
    %91 = arith.maximumf %89, %90 : vector<16x15x128xf32>
    %c0_139 = arith.constant 0 : index
    %c0_140 = arith.constant 0 : index
    %c128_141 = arith.constant 128 : index
    %92 = vector.load %arg14[%c0_139, %c0_140, %c128_141] : memref<16x16x256xf32, #tpu.memory_space<vmem>>, vector<16x15x128xf32>
    tpu.vector_store %arg14[%c0_139, %c0_140, %c128_141], %91 {strides = array<i32>} : memref<16x16x256xf32, #tpu.memory_space<vmem>>, vector<16x15x128xf32>,
    %c0_142 = arith.constant 0 : index
    %c0_143 = arith.constant 0 : index
    %c128_144 = arith.constant 128 : index
    %93 = vector.load %arg14[%c0_142, %c0_143, %c128_144] : memref<16x16x256xf32, #tpu.memory_space<vmem>>, vector<16x14x128xf32>
    %c0_145 = arith.constant 0 : index
    %c2_146 = arith.constant 2 : index
    %c128_147 = arith.constant 128 : index
    %94 = vector.load %arg14[%c0_145, %c2_146, %c128_147] : memref<16x16x256xf32, #tpu.memory_space<vmem>>, vector<16x14x128xf32>
    %95 = arith.maximumf %93, %94 : vector<16x14x128xf32>
    %c0_148 = arith.constant 0 : index
    %c0_149 = arith.constant 0 : index
    %c128_150 = arith.constant 128 : index
    %96 = vector.load %arg14[%c0_148, %c0_149, %c128_150] : memref<16x16x256xf32, #tpu.memory_space<vmem>>, vector<16x14x128xf32>
    tpu.vector_store %arg14[%c0_148, %c0_149, %c128_150], %95 {strides = array<i32>} : memref<16x16x256xf32, #tpu.memory_space<vmem>>, vector<16x14x128xf32>,
    %c0_151 = arith.constant 0 : index
    %c0_152 = arith.constant 0 : index
    %c128_153 = arith.constant 128 : index
    %97 = vector.load %arg14[%c0_151, %c0_152, %c128_153] : memref<16x16x256xf32, #tpu.memory_space<vmem>>, vector<16x12x128xf32>
    %c0_154 = arith.constant 0 : index
    %c4_155 = arith.constant 4 : index
    %c128_156 = arith.constant 128 : index
    %98 = vector.load %arg14[%c0_154, %c4_155, %c128_156] : memref<16x16x256xf32, #tpu.memory_space<vmem>>, vector<16x12x128xf32>
    %99 = arith.maximumf %97, %98 : vector<16x12x128xf32>
    %c0_157 = arith.constant 0 : index
    %c0_158 = arith.constant 0 : index
    %c128_159 = arith.constant 128 : index
    %100 = vector.load %arg14[%c0_157, %c0_158, %c128_159] : memref<16x16x256xf32, #tpu.memory_space<vmem>>, vector<16x12x128xf32>
    tpu.vector_store %arg14[%c0_157, %c0_158, %c128_159], %99 {strides = array<i32>} : memref<16x16x256xf32, #tpu.memory_space<vmem>>, vector<16x12x128xf32>,
    %c0_160 = arith.constant 0 : index
    %c0_161 = arith.constant 0 : index
    %c128_162 = arith.constant 128 : index
    %101 = vector.load %arg14[%c0_160, %c0_161, %c128_162] : memref<16x16x256xf32, #tpu.memory_space<vmem>>, vector<16x8x128xf32>
    %c0_163 = arith.constant 0 : index
    %c8_164 = arith.constant 8 : index
    %c128_165 = arith.constant 128 : index
    %102 = vector.load %arg14[%c0_163, %c8_164, %c128_165] : memref<16x16x256xf32, #tpu.memory_space<vmem>>, vector<16x8x128xf32>
    %103 = arith.maximumf %101, %102 : vector<16x8x128xf32>
    %c0_166 = arith.constant 0 : index
    %c0_167 = arith.constant 0 : index
    %c128_168 = arith.constant 128 : index
    %104 = vector.load %arg14[%c0_166, %c0_167, %c128_168] : memref<16x16x256xf32, #tpu.memory_space<vmem>>, vector<16x8x128xf32>
    tpu.vector_store %arg14[%c0_166, %c0_167, %c128_168], %103 {strides = array<i32>} : memref<16x16x256xf32, #tpu.memory_space<vmem>>, vector<16x8x128xf32>,
    %c0_169 = arith.constant 0 : index
    %c0_170 = arith.constant 0 : index
    %c0_171 = arith.constant 0 : index
    %105 = vector.load %arg14[%c0_169, %c0_170, %c0_171] : memref<16x16x256xf32, #tpu.memory_space<vmem>>, vector<16x16x128xf32>
    %c0_172 = arith.constant 0 : index
    %c0_173 = arith.constant 0 : index
    %c128_174 = arith.constant 128 : index
    %106 = vector.load %arg14[%c0_172, %c0_173, %c128_174] : memref<16x16x256xf32, #tpu.memory_space<vmem>>, vector<16x16x128xf32>
    %107 = arith.addf %105, %106 : vector<16x16x128xf32>
    %c1_175 = arith.constant 1 : index
    %c1_176 = arith.constant 1 : index
    %c0_177 = arith.constant 0 : index
    %108 = vector.load %arg12[%c1_175, %c1_176, %c0_177] : memref<18x18x128xf32, #tpu.memory_space<vmem>>, vector<16x16x128xf32>
    tpu.vector_store %arg12[%c1_175, %c1_176, %c0_177], %107 {strides = array<i32>} : memref<18x18x128xf32, #tpu.memory_space<vmem>>, vector<16x16x128xf32>,
    %c0_178 = arith.constant 0 : index
    %c0_179 = arith.constant 0 : index
    %109 = vector.load %arg5[%c0_178, %c0_179] : memref<1x4xf32, #tpu.memory_space<vmem>>, vector<1x4xf32>
    %c0_180 = arith.constant 0 : index
    %c0_181 = arith.constant 0 : index
    %c0_182 = arith.constant 0 : index
    %110 = vector.load %arg12[%c0_180, %c0_181, %c0_182] : memref<18x18x128xf32, #tpu.memory_space<vmem>>, vector<16x16x128xf32>
    %111 = vector.shape_cast %110 : vector<16x16x128xf32> to vector<256x128xf32>
    %112 = arith.truncf %111 : vector<256x128xf32> to vector<256x128xbf16>
    %c0_183 = arith.constant 0 : index
    %c0_184 = arith.constant 0 : index
    %113 = vector.load %arg15[%c0_183, %c0_184] : memref<256x1152xbf16, #tpu.memory_space<vmem>>, vector<256x128xbf16>
    tpu.vector_store %arg15[%c0_183, %c0_184], %112 {strides = array<i32>} : memref<256x1152xbf16, #tpu.memory_space<vmem>>, vector<256x128xbf16>,
    %c0_185 = arith.constant 0 : index
    %c1_186 = arith.constant 1 : index
    %c0_187 = arith.constant 0 : index
    %114 = vector.load %arg12[%c0_185, %c1_186, %c0_187] : memref<18x18x128xf32, #tpu.memory_space<vmem>>, vector<16x16x128xf32>
    %115 = vector.shape_cast %114 : vector<16x16x128xf32> to vector<256x128xf32>
    %116 = arith.truncf %115 : vector<256x128xf32> to vector<256x128xbf16>
    %c0_188 = arith.constant 0 : index
    %c128_189 = arith.constant 128 : index
    %117 = vector.load %arg15[%c0_188, %c128_189] : memref<256x1152xbf16, #tpu.memory_space<vmem>>, vector<256x128xbf16>
    tpu.vector_store %arg15[%c0_188, %c128_189], %116 {strides = array<i32>} : memref<256x1152xbf16, #tpu.memory_space<vmem>>, vector<256x128xbf16>,
    %c0_190 = arith.constant 0 : index
    %c2_191 = arith.constant 2 : index
    %c0_192 = arith.constant 0 : index
    %118 = vector.load %arg12[%c0_190, %c2_191, %c0_192] : memref<18x18x128xf32, #tpu.memory_space<vmem>>, vector<16x16x128xf32>
    %119 = vector.shape_cast %118 : vector<16x16x128xf32> to vector<256x128xf32>
    %120 = arith.truncf %119 : vector<256x128xf32> to vector<256x128xbf16>
    %c0_193 = arith.constant 0 : index
    %c256 = arith.constant 256 : index
    %121 = vector.load %arg15[%c0_193, %c256] : memref<256x1152xbf16, #tpu.memory_space<vmem>>, vector<256x128xbf16>
    tpu.vector_store %arg15[%c0_193, %c256], %120 {strides = array<i32>} : memref<256x1152xbf16, #tpu.memory_space<vmem>>, vector<256x128xbf16>,
    %c1_194 = arith.constant 1 : index
    %c0_195 = arith.constant 0 : index
    %c0_196 = arith.constant 0 : index
    %122 = vector.load %arg12[%c1_194, %c0_195, %c0_196] : memref<18x18x128xf32, #tpu.memory_space<vmem>>, vector<16x16x128xf32>
    %123 = vector.shape_cast %122 : vector<16x16x128xf32> to vector<256x128xf32>
    %124 = arith.truncf %123 : vector<256x128xf32> to vector<256x128xbf16>
    %c0_197 = arith.constant 0 : index
    %c384 = arith.constant 384 : index
    %125 = vector.load %arg15[%c0_197, %c384] : memref<256x1152xbf16, #tpu.memory_space<vmem>>, vector<256x128xbf16>
    tpu.vector_store %arg15[%c0_197, %c384], %124 {strides = array<i32>} : memref<256x1152xbf16, #tpu.memory_space<vmem>>, vector<256x128xbf16>,
    %c1_198 = arith.constant 1 : index
    %c1_199 = arith.constant 1 : index
    %c0_200 = arith.constant 0 : index
    %126 = vector.load %arg12[%c1_198, %c1_199, %c0_200] : memref<18x18x128xf32, #tpu.memory_space<vmem>>, vector<16x16x128xf32>
    %127 = vector.shape_cast %126 : vector<16x16x128xf32> to vector<256x128xf32>
    %128 = arith.truncf %127 : vector<256x128xf32> to vector<256x128xbf16>
    %c0_201 = arith.constant 0 : index
    %c512 = arith.constant 512 : index
    %129 = vector.load %arg15[%c0_201, %c512] : memref<256x1152xbf16, #tpu.memory_space<vmem>>, vector<256x128xbf16>
    tpu.vector_store %arg15[%c0_201, %c512], %128 {strides = array<i32>} : memref<256x1152xbf16, #tpu.memory_space<vmem>>, vector<256x128xbf16>,
    %c1_202 = arith.constant 1 : index
    %c2_203 = arith.constant 2 : index
    %c0_204 = arith.constant 0 : index
    %130 = vector.load %arg12[%c1_202, %c2_203, %c0_204] : memref<18x18x128xf32, #tpu.memory_space<vmem>>, vector<16x16x128xf32>
    %131 = vector.shape_cast %130 : vector<16x16x128xf32> to vector<256x128xf32>
    %132 = arith.truncf %131 : vector<256x128xf32> to vector<256x128xbf16>
    %c0_205 = arith.constant 0 : index
    %c640 = arith.constant 640 : index
    %133 = vector.load %arg15[%c0_205, %c640] : memref<256x1152xbf16, #tpu.memory_space<vmem>>, vector<256x128xbf16>
    tpu.vector_store %arg15[%c0_205, %c640], %132 {strides = array<i32>} : memref<256x1152xbf16, #tpu.memory_space<vmem>>, vector<256x128xbf16>,
    %c2_206 = arith.constant 2 : index
    %c0_207 = arith.constant 0 : index
    %c0_208 = arith.constant 0 : index
    %134 = vector.load %arg12[%c2_206, %c0_207, %c0_208] : memref<18x18x128xf32, #tpu.memory_space<vmem>>, vector<16x16x128xf32>
    %135 = vector.shape_cast %134 : vector<16x16x128xf32> to vector<256x128xf32>
    %136 = arith.truncf %135 : vector<256x128xf32> to vector<256x128xbf16>
    %c0_209 = arith.constant 0 : index
    %c768 = arith.constant 768 : index
    %137 = vector.load %arg15[%c0_209, %c768] : memref<256x1152xbf16, #tpu.memory_space<vmem>>, vector<256x128xbf16>
    tpu.vector_store %arg15[%c0_209, %c768], %136 {strides = array<i32>} : memref<256x1152xbf16, #tpu.memory_space<vmem>>, vector<256x128xbf16>,
    %c2_210 = arith.constant 2 : index
    %c1_211 = arith.constant 1 : index
    %c0_212 = arith.constant 0 : index
    %138 = vector.load %arg12[%c2_210, %c1_211, %c0_212] : memref<18x18x128xf32, #tpu.memory_space<vmem>>, vector<16x16x128xf32>
    %139 = vector.shape_cast %138 : vector<16x16x128xf32> to vector<256x128xf32>
    %140 = arith.truncf %139 : vector<256x128xf32> to vector<256x128xbf16>
    %c0_213 = arith.constant 0 : index
    %c896 = arith.constant 896 : index
    %141 = vector.load %arg15[%c0_213, %c896] : memref<256x1152xbf16, #tpu.memory_space<vmem>>, vector<256x128xbf16>
    tpu.vector_store %arg15[%c0_213, %c896], %140 {strides = array<i32>} : memref<256x1152xbf16, #tpu.memory_space<vmem>>, vector<256x128xbf16>,
    %c2_214 = arith.constant 2 : index
    %c2_215 = arith.constant 2 : index
    %c0_216 = arith.constant 0 : index
    %142 = vector.load %arg12[%c2_214, %c2_215, %c0_216] : memref<18x18x128xf32, #tpu.memory_space<vmem>>, vector<16x16x128xf32>
    %143 = vector.shape_cast %142 : vector<16x16x128xf32> to vector<256x128xf32>
    %144 = arith.truncf %143 : vector<256x128xf32> to vector<256x128xbf16>
    %c0_217 = arith.constant 0 : index
    %c1024 = arith.constant 1024 : index
    %145 = vector.load %arg15[%c0_217, %c1024] : memref<256x1152xbf16, #tpu.memory_space<vmem>>, vector<256x128xbf16>
    tpu.vector_store %arg15[%c0_217, %c1024], %144 {strides = array<i32>} : memref<256x1152xbf16, #tpu.memory_space<vmem>>, vector<256x128xbf16>,
    %c0_218 = arith.constant 0 : index
    %c0_219 = arith.constant 0 : index
    %146 = vector.load %arg15[%c0_218, %c0_219] : memref<256x1152xbf16, #tpu.memory_space<vmem>>, vector<256x1152xbf16>
    %c0_220 = arith.constant 0 : index
    %c0_221 = arith.constant 0 : index
    %147 = vector.load %arg4[%c0_220, %c0_221] : memref<1152x4xbf16, #tpu.memory_space<vmem>>, vector<1152x4xbf16>
    %cst_222 = arith.constant dense<0.000000e+00> : vector<256x4xf32>
    %148 = tpu.matmul %146, %147, %cst_222 {dimension_numbers = #tpu.dot_dimension_numbers<[1], [0], [0], [1], [0, 0, 1, 1], [], []>} : vector<256x1152xbf16>, vector<1152x4xbf16>, vector<256x4xf32> -> vector<256x4xf32>
    %149 = vector.broadcast %109 : vector<1x4xf32> to vector<256x4xf32>
    %150 = arith.addf %148, %149 : vector<256x4xf32>
    %c0_223 = arith.constant 0 : index
    %c0_224 = arith.constant 0 : index
    %c0_225 = arith.constant 0 : index
    %c0_226 = arith.constant 0 : index
    %151 = vector.load %arg1[%c0_223, %c0_224, %c0_225, %c0_226] : memref<1x16x16x4xf32, #tpu.memory_space<vmem>>, vector<1x16x16x4xf32>
    %152 = vector.shape_cast %151 : vector<1x16x16x4xf32> to vector<16x16x4xf32>
    %153 = vector.shape_cast %152 : vector<16x16x4xf32> to vector<256x4xf32>
    %154 = arith.truncf %153 : vector<256x4xf32> to vector<256x4xbf16>
    %c0_227 = arith.constant 0 : index
    %c0_228 = arith.constant 0 : index
    %155 = vector.load %arg6[%c0_227, %c0_228] : memref<4x4xbf16, #tpu.memory_space<vmem>>, vector<4x4xbf16>
    %cst_229 = arith.constant dense<0.000000e+00> : vector<256x4xf32>
    %156 = tpu.matmul %154, %155, %cst_229 {dimension_numbers = #tpu.dot_dimension_numbers<[1], [0], [0], [1], [0, 0, 1, 1], [], []>} : vector<256x4xbf16>, vector<4x4xbf16>, vector<256x4xf32> -> vector<256x4xf32>
    %c0_230 = arith.constant 0 : index
    %c0_231 = arith.constant 0 : index
    %157 = vector.load %arg7[%c0_230, %c0_231] : memref<1x4xf32, #tpu.memory_space<vmem>>, vector<1x4xf32>
    %158 = vector.broadcast %157 : vector<1x4xf32> to vector<256x4xf32>
    %159 = arith.addf %156, %158 : vector<256x4xf32>
    %160 = arith.addf %150, %159 : vector<256x4xf32>
    %cst_232 = arith.constant 0.000000e+00 : f32
    %161 = vector.broadcast %cst_232 : f32 to vector<256x4xf32>
    %162 = arith.maximumf %160, %161 : vector<256x4xf32>
    %163 = vector.shape_cast %162 : vector<256x4xf32> to vector<16x16x4xf32>
    %c1_233 = arith.constant 1 : index
    %c1_234 = arith.constant 1 : index
    %c0_235 = arith.constant 0 : index
    %164 = vector.load %arg13[%c1_233, %c1_234, %c0_235] : memref<18x18x4xf32, #tpu.memory_space<vmem>>, vector<16x16x4xf32>
    tpu.vector_store %arg13[%c1_233, %c1_234, %c0_235], %163 {strides = array<i32>} : memref<18x18x4xf32, #tpu.memory_space<vmem>>, vector<16x16x4xf32>,
    %c0_236 = arith.constant 0 : index
    %c0_237 = arith.constant 0 : index
    %165 = vector.load %arg9[%c0_236, %c0_237] : memref<1x4xf32, #tpu.memory_space<vmem>>, vector<1x4xf32>
    %c0_238 = arith.constant 0 : index
    %c0_239 = arith.constant 0 : index
    %c0_240 = arith.constant 0 : index
    %166 = vector.load %arg13[%c0_238, %c0_239, %c0_240] : memref<18x18x4xf32, #tpu.memory_space<vmem>>, vector<16x16x4xf32>
    %167 = vector.shape_cast %166 : vector<16x16x4xf32> to vector<256x4xf32>
    %168 = arith.truncf %167 : vector<256x4xf32> to vector<256x4xbf16>
    %c0_241 = arith.constant 0 : index
    %c0_242 = arith.constant 0 : index
    %169 = vector.load %arg15[%c0_241, %c0_242] : memref<256x1152xbf16, #tpu.memory_space<vmem>>, vector<256x4xbf16>
    tpu.vector_store %arg15[%c0_241, %c0_242], %168 {strides = array<i32>} : memref<256x1152xbf16, #tpu.memory_space<vmem>>, vector<256x4xbf16>,
    %c0_243 = arith.constant 0 : index
    %c1_244 = arith.constant 1 : index
    %c0_245 = arith.constant 0 : index
    %170 = vector.load %arg13[%c0_243, %c1_244, %c0_245] : memref<18x18x4xf32, #tpu.memory_space<vmem>>, vector<16x16x4xf32>
    %171 = vector.shape_cast %170 : vector<16x16x4xf32> to vector<256x4xf32>
    %172 = arith.truncf %171 : vector<256x4xf32> to vector<256x4xbf16>
    %c0_246 = arith.constant 0 : index
    %c4_247 = arith.constant 4 : index
    %173 = vector.load %arg15[%c0_246, %c4_247] : memref<256x1152xbf16, #tpu.memory_space<vmem>>, vector<256x4xbf16>
    tpu.vector_store %arg15[%c0_246, %c4_247], %172 {strides = array<i32>} : memref<256x1152xbf16, #tpu.memory_space<vmem>>, vector<256x4xbf16>,
    %c0_248 = arith.constant 0 : index
    %c2_249 = arith.constant 2 : index
    %c0_250 = arith.constant 0 : index
    %174 = vector.load %arg13[%c0_248, %c2_249, %c0_250] : memref<18x18x4xf32, #tpu.memory_space<vmem>>, vector<16x16x4xf32>
    %175 = vector.shape_cast %174 : vector<16x16x4xf32> to vector<256x4xf32>
    %176 = arith.truncf %175 : vector<256x4xf32> to vector<256x4xbf16>
    %c0_251 = arith.constant 0 : index
    %c8_252 = arith.constant 8 : index
    %177 = vector.load %arg15[%c0_251, %c8_252] : memref<256x1152xbf16, #tpu.memory_space<vmem>>, vector<256x4xbf16>
    tpu.vector_store %arg15[%c0_251, %c8_252], %176 {strides = array<i32>} : memref<256x1152xbf16, #tpu.memory_space<vmem>>, vector<256x4xbf16>,
    %c1_253 = arith.constant 1 : index
    %c0_254 = arith.constant 0 : index
    %c0_255 = arith.constant 0 : index
    %178 = vector.load %arg13[%c1_253, %c0_254, %c0_255] : memref<18x18x4xf32, #tpu.memory_space<vmem>>, vector<16x16x4xf32>
    %179 = vector.shape_cast %178 : vector<16x16x4xf32> to vector<256x4xf32>
    %180 = arith.truncf %179 : vector<256x4xf32> to vector<256x4xbf16>
    %c0_256 = arith.constant 0 : index
    %c12_257 = arith.constant 12 : index
    %181 = vector.load %arg15[%c0_256, %c12_257] : memref<256x1152xbf16, #tpu.memory_space<vmem>>, vector<256x4xbf16>
    tpu.vector_store %arg15[%c0_256, %c12_257], %180 {strides = array<i32>} : memref<256x1152xbf16, #tpu.memory_space<vmem>>, vector<256x4xbf16>,
    %c1_258 = arith.constant 1 : index
    %c1_259 = arith.constant 1 : index
    %c0_260 = arith.constant 0 : index
    %182 = vector.load %arg13[%c1_258, %c1_259, %c0_260] : memref<18x18x4xf32, #tpu.memory_space<vmem>>, vector<16x16x4xf32>
    %183 = vector.shape_cast %182 : vector<16x16x4xf32> to vector<256x4xf32>
    %184 = arith.truncf %183 : vector<256x4xf32> to vector<256x4xbf16>
    %c0_261 = arith.constant 0 : index
    %c16_262 = arith.constant 16 : index
    %185 = vector.load %arg15[%c0_261, %c16_262] : memref<256x1152xbf16, #tpu.memory_space<vmem>>, vector<256x4xbf16>
    tpu.vector_store %arg15[%c0_261, %c16_262], %184 {strides = array<i32>} : memref<256x1152xbf16, #tpu.memory_space<vmem>>, vector<256x4xbf16>,
    %c1_263 = arith.constant 1 : index
    %c2_264 = arith.constant 2 : index
    %c0_265 = arith.constant 0 : index
    %186 = vector.load %arg13[%c1_263, %c2_264, %c0_265] : memref<18x18x4xf32, #tpu.memory_space<vmem>>, vector<16x16x4xf32>
    %187 = vector.shape_cast %186 : vector<16x16x4xf32> to vector<256x4xf32>
    %188 = arith.truncf %187 : vector<256x4xf32> to vector<256x4xbf16>
    %c0_266 = arith.constant 0 : index
    %c20_267 = arith.constant 20 : index
    %189 = vector.load %arg15[%c0_266, %c20_267] : memref<256x1152xbf16, #tpu.memory_space<vmem>>, vector<256x4xbf16>
    tpu.vector_store %arg15[%c0_266, %c20_267], %188 {strides = array<i32>} : memref<256x1152xbf16, #tpu.memory_space<vmem>>, vector<256x4xbf16>,
    %c2_268 = arith.constant 2 : index
    %c0_269 = arith.constant 0 : index
    %c0_270 = arith.constant 0 : index
    %190 = vector.load %arg13[%c2_268, %c0_269, %c0_270] : memref<18x18x4xf32, #tpu.memory_space<vmem>>, vector<16x16x4xf32>
    %191 = vector.shape_cast %190 : vector<16x16x4xf32> to vector<256x4xf32>
    %192 = arith.truncf %191 : vector<256x4xf32> to vector<256x4xbf16>
    %c0_271 = arith.constant 0 : index
    %c24_272 = arith.constant 24 : index
    %193 = vector.load %arg15[%c0_271, %c24_272] : memref<256x1152xbf16, #tpu.memory_space<vmem>>, vector<256x4xbf16>
    tpu.vector_store %arg15[%c0_271, %c24_272], %192 {strides = array<i32>} : memref<256x1152xbf16, #tpu.memory_space<vmem>>, vector<256x4xbf16>,
    %c2_273 = arith.constant 2 : index
    %c1_274 = arith.constant 1 : index
    %c0_275 = arith.constant 0 : index
    %194 = vector.load %arg13[%c2_273, %c1_274, %c0_275] : memref<18x18x4xf32, #tpu.memory_space<vmem>>, vector<16x16x4xf32>
    %195 = vector.shape_cast %194 : vector<16x16x4xf32> to vector<256x4xf32>
    %196 = arith.truncf %195 : vector<256x4xf32> to vector<256x4xbf16>
    %c0_276 = arith.constant 0 : index
    %c28_277 = arith.constant 28 : index
    %197 = vector.load %arg15[%c0_276, %c28_277] : memref<256x1152xbf16, #tpu.memory_space<vmem>>, vector<256x4xbf16>
    tpu.vector_store %arg15[%c0_276, %c28_277], %196 {strides = array<i32>} : memref<256x1152xbf16, #tpu.memory_space<vmem>>, vector<256x4xbf16>,
    %c2_278 = arith.constant 2 : index
    %c2_279 = arith.constant 2 : index
    %c0_280 = arith.constant 0 : index
    %198 = vector.load %arg13[%c2_278, %c2_279, %c0_280] : memref<18x18x4xf32, #tpu.memory_space<vmem>>, vector<16x16x4xf32>
    %199 = vector.shape_cast %198 : vector<16x16x4xf32> to vector<256x4xf32>
    %200 = arith.truncf %199 : vector<256x4xf32> to vector<256x4xbf16>
    %c0_281 = arith.constant 0 : index
    %c32_282 = arith.constant 32 : index
    %201 = vector.load %arg15[%c0_281, %c32_282] : memref<256x1152xbf16, #tpu.memory_space<vmem>>, vector<256x4xbf16>
    tpu.vector_store %arg15[%c0_281, %c32_282], %200 {strides = array<i32>} : memref<256x1152xbf16, #tpu.memory_space<vmem>>, vector<256x4xbf16>,
    %c0_283 = arith.constant 0 : index
    %c0_284 = arith.constant 0 : index
    %202 = vector.load %arg15[%c0_283, %c0_284] : memref<256x1152xbf16, #tpu.memory_space<vmem>>, vector<256x36xbf16>
    %c0_285 = arith.constant 0 : index
    %c0_286 = arith.constant 0 : index
    %203 = vector.load %arg8[%c0_285, %c0_286] : memref<36x4xbf16, #tpu.memory_space<vmem>>, vector<36x4xbf16>
    %cst_287 = arith.constant dense<0.000000e+00> : vector<256x4xf32>
    %204 = tpu.matmul %202, %203, %cst_287 {dimension_numbers = #tpu.dot_dimension_numbers<[1], [0], [0], [1], [0, 0, 1, 1], [], []>} : vector<256x36xbf16>, vector<36x4xbf16>, vector<256x4xf32> -> vector<256x4xf32>
    %205 = vector.broadcast %165 : vector<1x4xf32> to vector<256x4xf32>
    %206 = arith.addf %204, %205 : vector<256x4xf32>
    %cst_288 = arith.constant 0.000000e+00 : f32
    %207 = vector.broadcast %cst_288 : f32 to vector<256x4xf32>
    %208 = arith.maximumf %206, %207 : vector<256x4xf32>
    %209 = vector.shape_cast %208 : vector<256x4xf32> to vector<16x16x4xf32>
    %c0_289 = arith.constant 0 : index
    %c0_290 = arith.constant 0 : index
    %c0_291 = arith.constant 0 : index
    %c0_292 = arith.constant 0 : index
    %210 = vector.load %arg10[%c0_289, %c0_290, %c0_291, %c0_292] : memref<1x16x16x4xf32, #tpu.memory_space<vmem>>, vector<1x16x16x4xf32>
    %211 = vector.shape_cast %210 : vector<1x16x16x4xf32> to vector<16x16x4xf32>
    %212 = vector.shape_cast %209 : vector<16x16x4xf32> to vector<1x16x16x4xf32>
    tpu.vector_store %arg10[%c0_289, %c0_290, %c0_291, %c0_292], %212 {strides = array<i32>} : memref<1x16x16x4xf32, #tpu.memory_space<vmem>>, vector<1x16x16x4xf32>,
    return
  }
  func.func @transform_0(%arg0: i32) -> (i32, i32, i32, i32) {
    %c0_i32 = arith.constant 0 : i32
    %c0_i32_0 = arith.constant 0 : i32
    %c0_i32_1 = arith.constant 0 : i32
    %c0_i32_2 = arith.constant 0 : i32
    return %arg0, %c0_i32, %c0_i32_0, %c0_i32_1 : i32, i32, i32, i32
  }
  func.func @transform_1(%arg0: i32) -> (i32, i32) {
    %c0_i32 = arith.constant 0 : i32
    %c0_i32_0 = arith.constant 0 : i32
    %c0_i32_1 = arith.constant 0 : i32
    return %c0_i32, %c0_i32_0 : i32, i32
  }
  func.func @transform_2(%arg0: i32) -> (i32, i32) {
    %c0_i32 = arith.constant 0 : i32
    %c0_i32_0 = arith.constant 0 : i32
    %c0_i32_1 = arith.constant 0 : i32
    return %c0_i32, %c0_i32_0 : i32, i32
  }
  func.func @transform_3(%arg0: i32) -> (i32, i32) {
    %c0_i32 = arith.constant 0 : i32
    %c0_i32_0 = arith.constant 0 : i32
    %c0_i32_1 = arith.constant 0 : i32
    return %c0_i32, %c0_i32_0 : i32, i32
  }
  func.func @transform_4(%arg0: i32) -> (i32, i32) {
    %c0_i32 = arith.constant 0 : i32
    %c0_i32_0 = arith.constant 0 : i32
    %c0_i32_1 = arith.constant 0 : i32
    return %c0_i32, %c0_i32_0 : i32, i32
  }
  func.func @transform_5(%arg0: i32) -> (i32, i32) {
    %c0_i32 = arith.constant 0 : i32
    %c0_i32_0 = arith.constant 0 : i32
    %c0_i32_1 = arith.constant 0 : i32
    return %c0_i32, %c0_i32_0 : i32, i32
  }
  func.func @transform_6(%arg0: i32) -> (i32, i32) {
    %c0_i32 = arith.constant 0 : i32
    %c0_i32_0 = arith.constant 0 : i32
    %c0_i32_1 = arith.constant 0 : i32
    return %c0_i32, %c0_i32_0 : i32, i32
  }
  func.func @transform_7(%arg0: i32) -> (i32, i32) {
    %c0_i32 = arith.constant 0 : i32
    %c0_i32_0 = arith.constant 0 : i32
    %c0_i32_1 = arith.constant 0 : i32
    return %c0_i32, %c0_i32_0 : i32, i32
  }
  func.func @transform_8(%arg0: i32) -> (i32, i32) {
    %c0_i32 = arith.constant 0 : i32
    %c0_i32_0 = arith.constant 0 : i32
    %c0_i32_1 = arith.constant 0 : i32
    return %c0_i32, %c0_i32_0 : i32, i32
  }
  func.func @transform_9(%arg0: i32) -> (i32, i32, i32, i32) {
    %c0_i32 = arith.constant 0 : i32
    %c0_i32_0 = arith.constant 0 : i32
    %c0_i32_1 = arith.constant 0 : i32
    %c0_i32_2 = arith.constant 0 : i32
    return %arg0, %c0_i32, %c0_i32_0, %c0_i32_1 : i32, i32, i32, i32
  }
}

</mosaic_0001>

<bundles_post_ra>
// kernel: corner_pool_forward.1
= control target key start
LH: loop header
LB: loop body
LE: loop exit
PB: predicated region body
PF: predicated region fallthrough
CT: control target
= control target key end

     0   :  { %s8376_s30 = smov 0   ;;  %s11482_s0 = inlined_call_operand.vmem [shape: f32[2,16,16,4], index: 0, kind: input, shape index: {}]   ;;  %s11483_s1 = inlined_call_operand.vmem [shape: bf16[36,256], index: 1, kind: input, shape index: {}]   ;;  %s11484_s2 = inlined_call_operand.vmem [shape: f32[1,256], index: 2, kind: input, shape index: {}]   ;;  %s11485_s3 = inlined_call_operand.vmem [shape: bf16[1152,4], index: 3, kind: input, shape index: {}]   ;;  %s11486_s4 = inlined_call_operand.vmem [shape: f32[1,4], index: 4, kind: input, shape index: {}]   ;;  %s11487_s5 = inlined_call_operand.vmem [shape: bf16[4,4], index: 5, kind: input, shape index: {}]   ;;  %s11488_s6 = inlined_call_operand.vmem [shape: f32[1,4], index: 6, kind: input, shape index: {}]   ;;  %s11489_s7 = inlined_call_operand.vmem [shape: bf16[36,4], index: 7, kind: input, shape index: {}]   ;;  %s11490_s8 = inlined_call_operand.vmem [shape: f32[1,4], index: 8, kind: input, shape index: {}]   ;;  %s11491_s9 = inlined_call_operand.vmem [shape: f32[2,16,16,4], index: 9, kind: output, shape index: {}]  }
   0x1 LB: > { %s7312_s10 = sadd.s32 4294967295, %s8314_s30   ;;  %p7316_p0 = scmp.ge.s32.totalorder %s8314_s30, 1  ;;  %s8314_s30 = sphi %s8376_s30, %s19_s30  }
   0x2   : > { %p287_p1 = scmp.lt.s32.totalorder %s8314_s30, 3 }
   0x4   : > { %p288_p2 = pnand %p7316_p0, %p287_p1 }
   0x6   : > { %291 = sbr.rel (%p288_p2) target bundleno = 1855 (0x73f), region = 56 }
   0xd   : > { %vm334_vm0 = vcmask 31744   ;;  %vm337_vm1 = vcmask 25600   ;;  %vm343_vm2 = vcmask 24576   ;;  %v8316_v0 = vmov 0.0   ;;  %p323_p3 = scmp.lt.s32.totalorder %s7312_s10, 1  ;;  %s8317_s15 = smov 4  }
   0xe   : > { %335 = vst.msk [vmem:[#allocation2] sm:$0xff] %vm334_vm0, %v8316_v0  ;;  %336 = vst.msk [vmem:[#allocation2 + $0x8] sm:$0xff] %vm334_vm0, %v8316_v0  ;;  %s8318_s16 = smov 8   ;;  %s8319_s17 = smov 12   ;;  %v8323_v52 = vmov 0   ;;  %vm1735_vm3 = vcmask 1041408  }
   0xf   : > { %338 = vst.msk [vmem:[#allocation2 + $0x10] sm:$0x3] %vm337_vm1, %v8316_v0  ;;  %342 = vst.msk [vmem:[#allocation2 + $0x1a8] sm:$0x3] %vm337_vm1, %v8316_v0  ;;  %s11709_s10 = smov (!%p323_p3, %s7312_s10), 1  ;;  %s8320_s18 = smov 20   ;;  %1774 = vmatprep.mubr.bf16.mxu0 %v8323_v52  ;;  %1894 = vmatprep.mubr.bf16.mxu1 %v8323_v52 }
  0x10   : > { %340 = vst.msk [vmem:[#allocation2 + $0x198] sm:$0xff] %vm334_vm0, %v8316_v0  ;;  %341 = vst.msk [vmem:[#allocation2 + $0x1a0] sm:$0xff] %vm334_vm0, %v8316_v0  ;;  %s7456_s11 = sshll.u32 %s11709_s10, 8  ;;  %s8321_s19 = smov 16   ;;  %vm708_vm4 = vcmask 64544   ;;  %vm837_vm5 = vcmask 97344  }
  0x11   : > { %345 = vst.msk [vmem:[#allocation2 + $0x18] sm:$0x1] %vm343_vm2, %v8316_v0  ;;  %346 = vst.msk [vmem:[#allocation2 + $0x30] sm:$0x1] %vm343_vm2, %v8316_v0  ;;  %s8606_s14 = scalar_lea.vmem %s11482_s0, %s7456_s11  ;;  %s8322_s20 = smov 28   ;;  %vm966_vm6 = vcmask 130144  }
  0x12   : > { %347 = vst.msk [vmem:[#allocation2 + $0x48] sm:$0x1] %vm343_vm2, %v8316_v0  ;;  %348 = vst.msk [vmem:[#allocation2 + $0x60] sm:$0x1] %vm343_vm2, %v8316_v0  ;;  %v466_v1 = vld [vmem:[%s8606_s14] sm:$0xff]  ;;  %v467_v2 = vld [vmem:[%s8606_s14 + $0x8] sm:$0xff] }
  0x13   : > { %349 = vst.msk [vmem:[#allocation2 + $0x78] sm:$0x1] %vm343_vm2, %v8316_v0  ;;  %350 = vst.msk [vmem:[#allocation2 + $0x90] sm:$0x1] %vm343_vm2, %v8316_v0  ;;  %v468_v3 = vld [vmem:[%s8606_s14 + $0x10] sm:$0xff]  ;;  %v469_v9 = vld [vmem:[%s8606_s14 + $0x18] sm:$0xff] }
  0x14   : > { %351 = vst.msk [vmem:[#allocation2 + $0xa8] sm:$0x1] %vm343_vm2, %v8316_v0  ;;  %352 = vst.msk [vmem:[#allocation2 + $0xc0] sm:$0x1] %vm343_vm2, %v8316_v0  ;;  %v470_v10 = vld [vmem:[%s8606_s14 + $0x20] sm:$0xff]  ;;  %v471_v11 = vld [vmem:[%s8606_s14 + $0x28] sm:$0xff] }
  0x15   : > { %353 = vst.msk [vmem:[#allocation2 + $0xd8] sm:$0x1] %vm343_vm2, %v8316_v0  ;;  %354 = vst.msk [vmem:[#allocation2 + $0xf0] sm:$0x1] %vm343_vm2, %v8316_v0  ;;  %v596_v4 = vld [vmem:[#allocation2 + $0x1] sm:$0xff]  ;;  %v472_v12 = vld [vmem:[%s8606_s14 + $0x30] sm:$0xff] }
  0x16   : > { %355 = vst.msk [vmem:[#allocation2 + $0x108] sm:$0x1] %vm343_vm2, %v8316_v0  ;;  %356 = vst.msk [vmem:[#allocation2 + $0x120] sm:$0x1] %vm343_vm2, %v8316_v0  ;;  %v597_v5 = vld [vmem:[#allocation2 + $0x9] sm:$0xff]  ;;  %v473_v13 = vld [vmem:[%s8606_s14 + $0x38] sm:$0xff] }
  0x17   : > { %357 = vst.msk [vmem:[#allocation2 + $0x138] sm:$0x1] %vm343_vm2, %v8316_v0  ;;  %358 = vst.msk [vmem:[#allocation2 + $0x150] sm:$0x1] %vm343_vm2, %v8316_v0  ;;  %v725_v6 = vld [vmem:[#allocation2 + $0x2] sm:$0xff]  ;;  %v628_v7 = vpack.c.bf16 %v597_v5, %v596_v4  ;;  %v476_v17 = vld [vmem:[%s8606_s14 + $0x50] sm:$0xff] }
  0x18   : > { %359 = vst.msk [vmem:[#allocation2 + $0x168] sm:$0x1] %vm343_vm2, %v8316_v0  ;;  %360 = vst.msk [vmem:[#allocation2 + $0x180] sm:$0x1] %vm343_vm2, %v8316_v0  ;;  %v474_v15 = vld [vmem:[%s8606_s14 + $0x40] sm:$0xff]  ;;  %v475_v16 = vld [vmem:[%s8606_s14 + $0x48] sm:$0xff] }
  0x19   : > { %363 = vst.msk [vmem:[#allocation2 + $0x29] sm:$0x1] %vm343_vm2, %v8316_v0  ;;  %364 = vst.msk [vmem:[#allocation2 + $0x41] sm:$0x1] %vm343_vm2, %v8316_v0  ;;  %660 = vrot.lane.b32.xlu0 %v628_v7, %s8317_s15  ;;  %v477_v18 = vld [vmem:[%s8606_s14 + $0x58] sm:$0xff]  ;;  %v478_v19 = vld [vmem:[%s8606_s14 + $0x60] sm:$0xff] }
  0x1a   : > { %365 = vst.msk [vmem:[#allocation2 + $0x59] sm:$0x1] %vm343_vm2, %v8316_v0  ;;  %366 = vst.msk [vmem:[#allocation2 + $0x71] sm:$0x1] %vm343_vm2, %v8316_v0  ;;  %v479_v20 = vld [vmem:[%s8606_s14 + $0x68] sm:$0xff]  ;;  %v480_v21 = vld [vmem:[%s8606_s14 + $0x70] sm:$0xff] }
  0x1b   : > { %367 = vst.msk [vmem:[#allocation2 + $0x89] sm:$0x1] %vm343_vm2, %v8316_v0  ;;  %368 = vst.msk [vmem:[#allocation2 + $0xa1] sm:$0x1] %vm343_vm2, %v8316_v0  ;;  %v481_v22 = vld [vmem:[%s8606_s14 + $0x78] sm:$0xff]  ;;  %v533_v23 = vld [vmem:[#allocation2 + $0x8] sm:$0xff] }
  0x1c   : > { %369 = vst.msk [vmem:[#allocation2 + $0xb9] sm:$0x1] %vm343_vm2, %v8316_v0  ;;  %370 = vst.msk [vmem:[#allocation2 + $0xd1] sm:$0x1] %vm343_vm2, %v8316_v0  ;;  %v482_v25 = vld [vmem:[%s8606_s14 + $0x80] sm:$0xff]  ;;  %v483_v26 = vld [vmem:[%s8606_s14 + $0x88] sm:$0xff] }
  0x1d   : > { %371 = vst.msk [vmem:[#allocation2 + $0xe9] sm:$0x1] %vm343_vm2, %v8316_v0  ;;  %372 = vst.msk [vmem:[#allocation2 + $0x101] sm:$0x1] %vm343_vm2, %v8316_v0  ;;  %s8324_s21 = smov 24   ;;  %s8325_s22 = smov 32  }
  0x1e   : > { %373 = vst.msk [vmem:[#allocation2 + $0x119] sm:$0x1] %vm343_vm2, %v8316_v0  ;;  %374 = vst.msk [vmem:[#allocation2 + $0x131] sm:$0x1] %vm343_vm2, %v8316_v0  ;;  %v8210_v4 = vld [vmem:[%s11483_s1] ss:$8 sps:$4 sm:$0xff]  }
  0x1f   : > { %375 = vst.msk [vmem:[#allocation2 + $0x149] sm:$0x1] %vm343_vm2, %v8316_v0  ;;  %376 = vst.msk [vmem:[#allocation2 + $0x161] sm:$0x1] %vm343_vm2, %v8316_v0  ;;  %v8211_v5 = vld [vmem:[%s11483_s1 + $0x14] ss:$8 sps:$4 sm:$0xff]  }
  0x20   : > { %377 = vst.msk [vmem:[#allocation2 + $0x179] sm:$0x1] %vm343_vm2, %v8316_v0  ;;  %378 = vst.msk [vmem:[#allocation2 + $0x191] sm:$0x1] %vm343_vm2, %v8316_v0  ;;  %v489_v7 = vld [vmem:[%s8606_s14 + $0xb8] sm:$0xff]  ;;  %vm1095_vm7 = vcmask 162944  }
  0x21   : > { %380 = vst [vmem:[#allocation3] sm:$0xff] %v8316_v0  ;;  %381 = vst [vmem:[#allocation3 + $0x8] sm:$0xff] %v8316_v0  ;;  %vm1224_vm8 = vcmask 195744   ;;  %vm1354_vm9 = vcmask 228544   ;;  %vm1483_vm10 = vcmask 261344   ;;  %vm1612_vm11 = vcmask 294144  }
  0x22   : > { %382 = vst [vmem:[#allocation3 + $0x10] sm:$0x3] %v8316_v0  ;;  %384 = vst [vmem:[#allocation3 + $0x198] sm:$0xff] %v8316_v0  ;;  %vm1686_vm12 = vcmask 293888   ;;  %vm2555_vm13 = vcmask 1046528   ;;  %vm2796_vm14 = vcmask 1045504  }
  0x23   : > { %385 = vst [vmem:[#allocation3 + $0x1a0] sm:$0xff] %v8316_v0  ;;  %386 = vst [vmem:[#allocation3 + $0x1a8] sm:$0x3] %v8316_v0  ;;  %vm3037_vm15 = vcmask 1043456  }
  0x24   : > { %388 = vst [vmem:[#allocation3 + $0x18] sm:$0x1] %v8316_v0  ;;  %389 = vst [vmem:[#allocation3 + $0x30] sm:$0x1] %v8316_v0 }
  0x25   : > { %390 = vst [vmem:[#allocation3 + $0x48] sm:$0x1] %v8316_v0  ;;  %391 = vst [vmem:[#allocation3 + $0x60] sm:$0x1] %v8316_v0 }
  0x26   : > { %392 = vst [vmem:[#allocation3 + $0x78] sm:$0x1] %v8316_v0  ;;  %393 = vst [vmem:[#allocation3 + $0x90] sm:$0x1] %v8316_v0 }
  0x27   : > { %394 = vst [vmem:[#allocation3 + $0xa8] sm:$0x1] %v8316_v0  ;;  %395 = vst [vmem:[#allocation3 + $0xc0] sm:$0x1] %v8316_v0 }
  0x28   : > { %396 = vst [vmem:[#allocation3 + $0xd8] sm:$0x1] %v8316_v0  ;;  %397 = vst [vmem:[#allocation3 + $0xf0] sm:$0x1] %v8316_v0 }
  0x29   : > { %398 = vst [vmem:[#allocation3 + $0x108] sm:$0x1] %v8316_v0  ;;  %399 = vst [vmem:[#allocation3 + $0x120] sm:$0x1] %v8316_v0 }
  0x2a   : > { %400 = vst [vmem:[#allocation3 + $0x138] sm:$0x1] %v8316_v0  ;;  %401 = vst [vmem:[#allocation3 + $0x150] sm:$0x1] %v8316_v0 }
  0x2b   : > { %402 = vst [vmem:[#allocation3 + $0x168] sm:$0x1] %v8316_v0  ;;  %403 = vst [vmem:[#allocation3 + $0x180] sm:$0x1] %v8316_v0 }
  0x2c   : > { %406 = vst [vmem:[#allocation3 + $0x29] sm:$0x1] %v8316_v0  ;;  %407 = vst [vmem:[#allocation3 + $0x41] sm:$0x1] %v8316_v0 }
  0x2d   : > { %408 = vst [vmem:[#allocation3 + $0x59] sm:$0x1] %v8316_v0  ;;  %409 = vst [vmem:[#allocation3 + $0x71] sm:$0x1] %v8316_v0 }
  0x2e   : > { %410 = vst [vmem:[#allocation3 + $0x89] sm:$0x1] %v8316_v0  ;;  %411 = vst [vmem:[#allocation3 + $0xa1] sm:$0x1] %v8316_v0 }
  0x2f   : > { %412 = vst [vmem:[#allocation3 + $0xb9] sm:$0x1] %v8316_v0  ;;  %413 = vst [vmem:[#allocation3 + $0xd1] sm:$0x1] %v8316_v0 }
  0x30   : > { %414 = vst [vmem:[#allocation3 + $0xe9] sm:$0x1] %v8316_v0  ;;  %415 = vst [vmem:[#allocation3 + $0x101] sm:$0x1] %v8316_v0 }
  0x31   : > { %416 = vst [vmem:[#allocation3 + $0x119] sm:$0x1] %v8316_v0  ;;  %417 = vst [vmem:[#allocation3 + $0x131] sm:$0x1] %v8316_v0 }
  0x32   : > { %418 = vst [vmem:[#allocation3 + $0x149] sm:$0x1] %v8316_v0  ;;  %419 = vst [vmem:[#allocation3 + $0x161] sm:$0x1] %v8316_v0 }
  0x33   : > { %420 = vst [vmem:[#allocation3 + $0x179] sm:$0x1] %v8316_v0  ;;  %421 = vst [vmem:[#allocation3 + $0x191] sm:$0x1] %v8316_v0 }
  0x34   : > { %423 = vst.msk [vmem:[#allocation4] sm:$0xff] %vm334_vm0, %v8316_v0  ;;  %424 = vst.msk [vmem:[#allocation4 + $0x8] sm:$0xff] %vm334_vm0, %v8316_v0 }
  0x35   : > { %425 = vst.msk [vmem:[#allocation4 + $0x10] sm:$0x3] %vm337_vm1, %v8316_v0  ;;  %429 = vst.msk [vmem:[#allocation4 + $0x1a8] sm:$0x3] %vm337_vm1, %v8316_v0 }
  0x36   : > { %427 = vst.msk [vmem:[#allocation4 + $0x198] sm:$0xff] %vm334_vm0, %v8316_v0  ;;  %428 = vst.msk [vmem:[#allocation4 + $0x1a0] sm:$0xff] %vm334_vm0, %v8316_v0 }
  0x37   : > { %431 = vst.msk [vmem:[#allocation4 + $0x18] sm:$0x1] %vm343_vm2, %v8316_v0  ;;  %432 = vst.msk [vmem:[#allocation4 + $0x30] sm:$0x1] %vm343_vm2, %v8316_v0 }
  0x38   : > { %433 = vst.msk [vmem:[#allocation4 + $0x48] sm:$0x1] %vm343_vm2, %v8316_v0  ;;  %434 = vst.msk [vmem:[#allocation4 + $0x60] sm:$0x1] %vm343_vm2, %v8316_v0 }
  0x39   : > { %435 = vst.msk [vmem:[#allocation4 + $0x78] sm:$0x1] %vm343_vm2, %v8316_v0  ;;  %436 = vst.msk [vmem:[#allocation4 + $0x90] sm:$0x1] %vm343_vm2, %v8316_v0 }
  0x3a   : > { %437 = vst.msk [vmem:[#allocation4 + $0xa8] sm:$0x1] %vm343_vm2, %v8316_v0  ;;  %438 = vst.msk [vmem:[#allocation4 + $0xc0] sm:$0x1] %vm343_vm2, %v8316_v0 }
  0x3b   : > { %439 = vst.msk [vmem:[#allocation4 + $0xd8] sm:$0x1] %vm343_vm2, %v8316_v0  ;;  %440 = vst.msk [vmem:[#allocation4 + $0xf0] sm:$0x1] %vm343_vm2, %v8316_v0 }
  0x3c   : > { %441 = vst.msk [vmem:[#allocation4 + $0x108] sm:$0x1] %vm343_vm2, %v8316_v0  ;;  %442 = vst.msk [vmem:[#allocation4 + $0x120] sm:$0x1] %vm343_vm2, %v8316_v0 }
  0x3d   : > { %443 = vst.msk [vmem:[#allocation4 + $0x138] sm:$0x1] %vm343_vm2, %v8316_v0  ;;  %444 = vst.msk [vmem:[#allocation4 + $0x150] sm:$0x1] %vm343_vm2, %v8316_v0 }
  0x3e   : > { %445 = vst.msk [vmem:[#allocation4 + $0x168] sm:$0x1] %vm343_vm2, %v8316_v0  ;;  %446 = vst.msk [vmem:[#allocation4 + $0x180] sm:$0x1] %vm343_vm2, %v8316_v0 }
  0x3f   : > { %449 = vst.msk [vmem:[#allocation4 + $0x29] sm:$0x1] %vm343_vm2, %v8316_v0  ;;  %450 = vst.msk [vmem:[#allocation4 + $0x41] sm:$0x1] %vm343_vm2, %v8316_v0 }
  0x40   : > { %451 = vst.msk [vmem:[#allocation4 + $0x59] sm:$0x1] %vm343_vm2, %v8316_v0  ;;  %452 = vst.msk [vmem:[#allocation4 + $0x71] sm:$0x1] %vm343_vm2, %v8316_v0 }
  0x41   : > { %453 = vst.msk [vmem:[#allocation4 + $0x89] sm:$0x1] %vm343_vm2, %v8316_v0  ;;  %454 = vst.msk [vmem:[#allocation4 + $0xa1] sm:$0x1] %vm343_vm2, %v8316_v0 }
  0x42   : > { %455 = vst.msk [vmem:[#allocation4 + $0xb9] sm:$0x1] %vm343_vm2, %v8316_v0  ;;  %456 = vst.msk [vmem:[#allocation4 + $0xd1] sm:$0x1] %vm343_vm2, %v8316_v0 }
  0x43   : > { %457 = vst.msk [vmem:[#allocation4 + $0xe9] sm:$0x1] %vm343_vm2, %v8316_v0  ;;  %458 = vst.msk [vmem:[#allocation4 + $0x101] sm:$0x1] %vm343_vm2, %v8316_v0 }
  0x44   : > { %459 = vst.msk [vmem:[#allocation4 + $0x119] sm:$0x1] %vm343_vm2, %v8316_v0  ;;  %460 = vst.msk [vmem:[#allocation4 + $0x131] sm:$0x1] %vm343_vm2, %v8316_v0 }
  0x45   : > { %461 = vst.msk [vmem:[#allocation4 + $0x149] sm:$0x1] %vm343_vm2, %v8316_v0  ;;  %462 = vst.msk [vmem:[#allocation4 + $0x161] sm:$0x1] %vm343_vm2, %v8316_v0 }
  0x46   : > { %463 = vst.msk [vmem:[#allocation4 + $0x179] sm:$0x1] %vm343_vm2, %v8316_v0  ;;  %464 = vst.msk [vmem:[#allocation4 + $0x191] sm:$0x1] %vm343_vm2, %v8316_v0 }
  0x47   : > { %362 = vst.msk [vmem:[#allocation2 + $0x11] sm:$0x1] %vm343_vm2, %v8316_v0  ;;  %344 = vst.msk [vmem:[#allocation2] sm:$0x1] %vm343_vm2, %v8316_v0 }
  0x48   : > { %361 = vst.msk [vmem:[#allocation2 + $0x198] sm:$0x1] %vm343_vm2, %v8316_v0  ;;  %379 = vst.msk [vmem:[#allocation2 + $0x1a9] sm:$0x1] %vm343_vm2, %v8316_v0 }
  0x49   : > { %387 = vst [vmem:[#allocation3] sm:$0x1] %v8316_v0  ;;  %404 = vst [vmem:[#allocation3 + $0x198] sm:$0x1] %v8316_v0 }
  0x4a   : > { %405 = vst [vmem:[#allocation3 + $0x11] sm:$0x1] %v8316_v0  ;;  %422 = vst [vmem:[#allocation3 + $0x1a9] sm:$0x1] %v8316_v0 }
  0x4b   : > { %430 = vst.msk [vmem:[#allocation4] sm:$0x1] %vm343_vm2, %v8316_v0  ;;  %447 = vst.msk [vmem:[#allocation4 + $0x198] sm:$0x1] %vm343_vm2, %v8316_v0 }
  0x4c   : > { %448 = vst.msk [vmem:[#allocation4 + $0x11] sm:$0x1] %vm343_vm2, %v8316_v0  ;;  %465 = vst.msk [vmem:[#allocation4 + $0x1a9] sm:$0x1] %vm343_vm2, %v8316_v0 }
  0x4d   : > { %499 = vst.msk [vmem:[#allocation2 + $0x19] sm:$0xff] %vm334_vm0, %v466_v1  ;;  %500 = vst.msk [vmem:[#allocation2 + $0x21] sm:$0xff] %vm334_vm0, %v467_v2 }
  0x4e   : > { %501 = vst.msk [vmem:[#allocation2 + $0x31] sm:$0xff] %vm334_vm0, %v468_v3  ;;  %v726_v8 = vld [vmem:[#allocation2 + $0xa] sm:$0xff]  ;;  %502 = vst.msk [vmem:[#allocation2 + $0x39] sm:$0xff] %vm334_vm0, %v469_v9  ;;  %v532_v24 = vld [vmem:[#allocation2] sm:$0xff] }
  0x4f   : > { %503 = vst.msk [vmem:[#allocation2 + $0x49] sm:$0xff] %vm334_vm0, %v470_v10  ;;  %v757_v14 = vpack.c.bf16 %v726_v8, %v725_v6  ;;  %504 = vst.msk [vmem:[#allocation2 + $0x51] sm:$0xff] %vm334_vm0, %v471_v11  ;;  %v564_v30 = vpack.c.bf16 %v533_v23, %v532_v24  ;;  %v8208_v3 = vld [vmem:[%s11483_s1 + $0x4] ss:$8 sps:$4 sm:$0xff]   ;;  %v488_v6 = vld [vmem:[%s8606_s14 + $0xb0] sm:$0xff] }
  0x50   : > { %505 = vst.msk [vmem:[#allocation2 + $0x61] sm:$0xff] %vm334_vm0, %v472_v12  ;;  %506 = vst.msk [vmem:[#allocation2 + $0x69] sm:$0xff] %vm334_vm0, %v473_v13  ;;  %1742 = vmatprep.subr.bf16.mxu0 %v8208_v3  ;;  %v8213_v9 = vld [vmem:[%s11483_s1 + $0x10] ss:$8 sps:$4 sm:$0xff]   ;;  %v1649_v10 = vld [vmem:[%s11483_s1 + $0x20] sm:$0x33]  ;;  %8086 = vmatprep.subr.bf16.mxu1 %v8208_v3 }
  0x51   : > { %507 = vst.msk [vmem:[#allocation2 + $0x79] sm:$0xff] %vm334_vm0, %v474_v15  ;;  %508 = vst.msk [vmem:[#allocation2 + $0x81] sm:$0xff] %vm334_vm0, %v475_v16  ;;  %789 = vrot.lane.b32.xlu0 %v757_v14, %s8318_s16  ;;  %1743 = vmatpush1.bf16.msra.mxu0 %v8210_v4  ;;  %v490_v11 = vld [vmem:[%s8606_s14 + $0xc0] sm:$0xff]  ;;  %v7326_v12 = vcombine.high %v1649_v10, %v1649_v10  ;;  %v7325_v13 = vcombine.low %v1649_v10, %v1649_v10  ;;  %v491_v14 = vld [vmem:[%s8606_s14 + $0xc8] sm:$0xff] }
  0x52   : > { %509 = vst.msk [vmem:[#allocation2 + $0x91] sm:$0xff] %vm334_vm0, %v476_v17  ;;  %510 = vst.msk [vmem:[#allocation2 + $0x99] sm:$0xff] %vm334_vm0, %v477_v18  ;;  %1744 = vmatprep.subr.bf16.mxu0 %v8211_v5  ;;  %v484_v15 = vld [vmem:[%s8606_s14 + $0x90] sm:$0xff]  ;;  %v485_v16 = vld [vmem:[%s8606_s14 + $0x98] sm:$0xff]  ;;  %8089 = vmatpush1.bf16.msra.mxu1 %v8210_v4 }
  0x53   : > { %511 = vst.msk [vmem:[#allocation2 + $0xa9] sm:$0xff] %vm334_vm0, %v478_v19  ;;  %512 = vst.msk [vmem:[#allocation2 + $0xb1] sm:$0xff] %vm334_vm0, %v479_v20  ;;  %v492_v18 = vld [vmem:[%s8606_s14 + $0xd0] sm:$0xff]  ;;  %v493_v19 = vld [vmem:[%s8606_s14 + $0xd8] sm:$0xff]  ;;  %8087 = vmatprep.subr.bf16.mxu1 %v8211_v5 }
  0x54   : > { %513 = vst.msk [vmem:[#allocation2 + $0xc1] sm:$0xff] %vm334_vm0, %v480_v21  ;;  %514 = vst.msk [vmem:[#allocation2 + $0xc9] sm:$0xff] %vm334_vm0, %v481_v22  ;;  %v854_v27 = vld [vmem:[#allocation2 + $0x18] sm:$0xff]  ;;  %v855_v28 = vld [vmem:[#allocation2 + $0x20] sm:$0xff]  ;;  %v1737_v21 = vsel %vm1735_vm3, %v7325_v13, 0 }
  0x55   : > { %v1112_v29 = vld [vmem:[#allocation2 + $0x1a] sm:$0xff]  ;;  %515 = vst.msk [vmem:[#allocation2 + $0xd9] sm:$0xff] %vm334_vm0, %v482_v25  ;;  %516 = vst.msk [vmem:[#allocation2 + $0xe1] sm:$0xff] %vm334_vm0, %v483_v26  ;;  %v886_v31 = vpack.c.bf16 %v855_v28, %v854_v27  ;;  %v1113_v32 = vld [vmem:[#allocation2 + $0x22] sm:$0xff]  ;;  %1745 = vmatpush1.bf16.msra.mxu0 %v8213_v9 }
  0x56   : > { %v983_v33 = vld [vmem:[#allocation2 + $0x19] sm:$0xff]  ;;  %v984_v34 = vld [vmem:[#allocation2 + $0x21] sm:$0xff]  ;;  %v1144_v35 = vpack.c.bf16 %v1113_v32, %v1112_v29  ;;  %v1371_v36 = vld [vmem:[#allocation2 + $0x31] sm:$0xff]  ;;  %580 = vst.msk [vmem:[#allocation6] sm:$0xff] %vm334_vm0, %v564_v30  ;;  %7327 = vmatprep.subr.msk.bf16.mxu0 %vm1735_vm3, %v7326_v12  ;;  %8090 = vmatpush1.bf16.msra.mxu1 %v8213_v9 }
  0x57   : > { %v1372_v37 = vld [vmem:[#allocation2 + $0x39] sm:$0xff]  ;;  %v1242_v38 = vld [vmem:[#allocation2 + $0x30] sm:$0xff]  ;;  %918 = vrot.lane.b32.xlu1 %v886_v31, %s8319_s17  ;;  %v1015_v39 = vpack.c.bf16 %v984_v34, %v983_v33  ;;  %581 = vst.msk [vmem:[#allocation6 + $0x48] sm:$0xff] %vm334_vm0, %v886_v31  ;;  %v1244_v43 = vld [vmem:[#allocation2 + $0x48] sm:$0xff]  ;;  %8088 = vmatprep.subr.msk.bf16.mxu1 %vm1735_vm3, %v7326_v12 }
  0x58   : > { %v1243_v40 = vld [vmem:[#allocation2 + $0x38] sm:$0xff]  ;;  %1176 = vrot.lane.b32.xlu0 %v1144_v35, %s8320_s18  ;;  %v8650_v41 = vpack.c.bf16 %v1372_v37, %v1371_v36  ;;  %v1245_v44 = vld [vmem:[#allocation2 + $0x50] sm:$0xff]  ;;  %v1246_v46 = vld [vmem:[#allocation2 + $0x60] sm:$0xff]  ;;  %521 = vst.msk [vmem:[#allocation2 + $0x121] sm:$0xff] %vm334_vm0, %v488_v6 }
  0x59   : > { %v1274_v42 = vpack.c.bf16 %v1243_v40, %v1242_v38  ;;  %v8652_v45 = vpack.c.bf16 %v1245_v44, %v1244_v43  ;;  %v1247_v47 = vld [vmem:[#allocation2 + $0x68] sm:$0xff]  ;;  %v1500_v48 = vld [vmem:[#allocation2 + $0x32] sm:$0xff]  ;;  %v1501_v49 = vld [vmem:[#allocation2 + $0x3a] sm:$0xff]  ;;  %522 = vst.msk [vmem:[#allocation2 + $0x129] sm:$0xff] %vm334_vm0, %v489_v7  ;;  %1747 = vmatpush1.bf16.msra.mxu0 %v1737_v21 }
  0x5a   : > { %v8658_v50 = vpack.c.bf16 %v1247_v47, %v1246_v46  ;;  %v1248_v51 = vld [vmem:[#allocation2 + $0x78] sm:$0xff]  ;;  %v1249_v53 = vld [vmem:[#allocation2 + $0x80] sm:$0xff]  ;;  %v1250_v55 = vld [vmem:[#allocation2 + $0x90] sm:$0xff]  ;;  %v8669_v56 = vpack.c.bf16 %v1501_v49, %v1500_v48  ;;  %523 = vst.msk [vmem:[#allocation2 + $0x139] sm:$0xff] %vm334_vm0, %v490_v11  ;;  %8091 = vmatpush1.bf16.msra.mxu1 %v1737_v21 }
  0x5b   : > { %582 = vst.msk [vmem:[#allocation6 + $0x90] sm:$0xff] %vm334_vm0, %v1274_v42  ;;  %1047 = vrot.lane.b32.xlu1 %v1015_v39, %s8321_s19  ;;  %583 = vst.msk [vmem:[#allocation6 + $0xd8] sm:$0xff] %vm334_vm0, %v8652_v45  ;;  %v8664_v54 = vpack.c.bf16 %v1249_v53, %v1248_v51  ;;  %v1251_v57 = vld [vmem:[#allocation2 + $0x98] sm:$0xff]  ;;  %v1252_v59 = vld [vmem:[#allocation2 + $0xa8] sm:$0xff] }
  0x5c   : > { %1435 = vrot.lane.b32.xlu0 %v8650_v41, %s8322_s20  ;;  %584 = vst.msk [vmem:[#allocation6 + $0x120] sm:$0xff] %vm334_vm0, %v8658_v50  ;;  %v8672_v58 = vpack.c.bf16 %v1251_v57, %v1250_v55  ;;  %v1253_v60 = vld [vmem:[#allocation2 + $0xb0] sm:$0xff]  ;;  %v1254_v62 = vld [vmem:[#allocation2 + $0xc0] sm:$0xff]  ;;  %v1255_v63 = vld [vmem:[#allocation2 + $0xc8] sm:$0xff] }
  0x5d   : > { %585 = vst.msk [vmem:[#allocation6 + $0x168] sm:$0xff] %vm334_vm0, %v8664_v54  ;;  %v8676_v61 = vpack.c.bf16 %v1253_v60, %v1252_v59  ;;  %v1373_v0 = vld [vmem:[#allocation2 + $0x49] sm:$0xff]  ;;  %v8683_v1 = vpack.c.bf16 %v1255_v63, %v1254_v62  ;;  %v1374_v2 = vld [vmem:[#allocation2 + $0x51] sm:$0xff]  ;;  %524 = vst.msk [vmem:[#allocation2 + $0x141] sm:$0xff] %vm334_vm0, %v491_v14 }
  0x5e   : > { %586 = vst.msk [vmem:[#allocation6 + $0x1b0] sm:$0xff] %vm334_vm0, %v8672_v58  ;;  %v8703_v8 = vpack.c.bf16 %v1374_v2, %v1373_v0  ;;  %v1502_v17 = vld [vmem:[#allocation2 + $0x4a] sm:$0xff]  ;;  %517 = vst.msk [vmem:[#allocation2 + $0xf1] sm:$0xff] %vm334_vm0, %v484_v15  ;;  %v1503_v20 = vld [vmem:[#allocation2 + $0x52] sm:$0xff] }
  0x5f   : > { %1306 = vrot.lane.b32.xlu1 %v1274_v42, %s8324_s21  ;;  %587 = vst.msk [vmem:[#allocation6 + $0x1f8] sm:$0xff] %vm334_vm0, %v8676_v61  ;;  %588 = vst.msk [vmem:[#allocation6 + $0x240] sm:$0xff] %vm334_vm0, %v8683_v1  ;;  %v1533_v22 = vpack.c.bf16 %v1503_v20, %v1502_v17  ;;  %v1375_v31 = vld [vmem:[#allocation2 + $0x61] sm:$0xff]  ;;  %v1376_v32 = vld [vmem:[#allocation2 + $0x69] sm:$0xff] }
  0x60   : > { %662 = vrot.lane.b32.xlu0 %v1015_v39, %s8317_s15  ;;  %518 = vst.msk [vmem:[#allocation2 + $0xf9] sm:$0xff] %vm334_vm0, %v485_v16  ;;  %525 = vst.msk [vmem:[#allocation2 + $0x151] sm:$0xff] %vm334_vm0, %v492_v18  ;;  %v1405_v34 = vpack.c.bf16 %v1376_v32, %v1375_v31  ;;  %v1505_v36 = vld [vmem:[#allocation2 + $0x6a] sm:$0xff]  ;;  %v486_v37 = vld [vmem:[%s8606_s14 + $0xa0] sm:$0xff] }
  0x61   : > { %526 = vst.msk [vmem:[#allocation2 + $0x159] sm:$0xff] %vm334_vm0, %v493_v19  ;;  %v878_v23 = vld [vmem:[#allocation2 + $0x138] sm:$0xff]  ;;  %v487_v38 = vld [vmem:[%s8606_s14 + $0xa8] sm:$0xff]  ;;  %519 = vst.msk [vmem:[#allocation2 + $0x109] sm:$0xff] %vm334_vm0, %v486_v37 }
  0x62   : > { %520 = vst.msk [vmem:[#allocation2 + $0x111] sm:$0xff] %vm334_vm0, %v487_v38  ;;  %v494_v40 = vld [vmem:[%s8606_s14 + $0xe0] sm:$0xff]  ;;  %v1508_v60 = vld [vmem:[#allocation2 + $0x92] sm:$0xff]  ;;  %v1263_v3 = vld [vmem:[#allocation2 + $0x128] sm:$0xff] }
  0x63   : > { %1564 = vrot.lane.b32.xlu1 %v8669_v56, %s8325_s22  ;;  %527 = vst.msk [vmem:[#allocation2 + $0x169] sm:$0xff] %vm334_vm0, %v494_v40  ;;  %v1377_v44 = vld [vmem:[#allocation2 + $0x79] sm:$0xff]  ;;  %v1507_v53 = vld [vmem:[#allocation2 + $0x82] sm:$0xff]  ;;  %v496_v0 = vld [vmem:[%s8606_s14 + $0xf0] sm:$0xff] }
  0x64   : > { %920 = vrot.lane.b32.xlu0 %v1274_v42, %s8319_s17  ;;  %v879_v24 = vld [vmem:[#allocation2 + $0x140] sm:$0xff]  ;;  %v497_v2 = vld [vmem:[%s8606_s14 + $0xf8] sm:$0xff]  ;;  %529 = vst.msk [vmem:[#allocation2 + $0x181] sm:$0xff] %vm334_vm0, %v496_v0  ;;  %v1381_v4 = vld [vmem:[#allocation2 + $0xa9] sm:$0xff] }
  0x65   : > { %v1258_v25 = vld [vmem:[#allocation2 + $0xf0] sm:$0xff]  ;;  %v8736_v26 = vpack.c.bf16 %v879_v24, %v878_v23  ;;  %v1380_v57 = vld [vmem:[#allocation2 + $0x99] sm:$0xff]  ;;  %530 = vst.msk [vmem:[#allocation2 + $0x189] sm:$0xff] %vm334_vm0, %v497_v2  ;;  %v1512_v13 = vld [vmem:[#allocation2 + $0xc2] sm:$0xff] }
  0x66   : > { %v1509_v62 = vld [vmem:[#allocation2 + $0x9a] sm:$0xff]  ;;  %v1382_v5 = vld [vmem:[#allocation2 + $0xb1] sm:$0xff]  ;;  %v1384_v11 = vld [vmem:[#allocation2 + $0xc9] sm:$0xff] }
  0x67   : > { %791 = vrot.lane.b32.xlu1 %v1144_v35, %s8318_s16  ;;  %v1259_v27 = vld [vmem:[#allocation2 + $0xf8] sm:$0xff]  ;;  %v1266_v29 = vld [vmem:[#allocation2 + $0x150] sm:$0xff]  ;;  %593 = vst.msk [vmem:[#allocation6 + $0x3a8] sm:$0xff] %vm334_vm0, %v8736_v26  ;;  %v1504_v35 = vld [vmem:[#allocation2 + $0x62] sm:$0xff]  ;;  %v1536_v63 = vpack.c.bf16 %v1509_v62, %v1508_v60  ;;  %v1408_v7 = vpack.c.bf16 %v1382_v5, %v1381_v4 }
  0x68   : > { %1178 = vrot.lane.b32.xlu0 %v8669_v56, %s8320_s18  ;;  %v8739_v28 = vpack.c.bf16 %v1259_v27, %v1258_v25  ;;  %v1267_v30 = vld [vmem:[#allocation2 + $0x158] sm:$0xff]  ;;  %v1534_v39 = vpack.c.bf16 %v1505_v36, %v1504_v35  ;;  %v1260_v42 = vld [vmem:[#allocation2 + $0x108] sm:$0xff]  ;;  %v1257_v21 = vld [vmem:[#allocation2 + $0xe0] sm:$0xff] }
  0x69   : > { %v8745_v33 = vpack.c.bf16 %v1267_v30, %v1266_v29  ;;  %v1261_v43 = vld [vmem:[#allocation2 + $0x110] sm:$0xff]  ;;  %v1385_v16 = vld [vmem:[#allocation2 + $0xd9] sm:$0xff]  ;;  %v1386_v17 = vld [vmem:[#allocation2 + $0xe1] sm:$0xff] }
  0x6a   : > { %590 = vst.msk [vmem:[#allocation6 + $0x2d0] sm:$0xff] %vm334_vm0, %v8739_v28  ;;  %v8770_v46 = vpack.c.bf16 %v1261_v43, %v1260_v42  ;;  %v1268_v48 = vld [vmem:[#allocation2 + $0x168] sm:$0xff]  ;;  %v1511_v9 = vld [vmem:[#allocation2 + $0xb2] sm:$0xff]  ;;  %v8832_v19 = vpack.c.bf16 %v1386_v17, %v1385_v16  ;;  %v1514_v24 = vld [vmem:[#allocation2 + $0xda] sm:$0xff] }
  0x6b   : > { %1049 = vrot.lane.b32.xlu1 %v8650_v41, %s8321_s19  ;;  %594 = vst.msk [vmem:[#allocation6 + $0x3f0] sm:$0xff] %vm334_vm0, %v8745_v33  ;;  %v1513_v14 = vld [vmem:[#allocation2 + $0xca] sm:$0xff]  ;;  %v1256_v20 = vld [vmem:[#allocation2 + $0xd8] sm:$0xff]  ;;  %v1515_v25 = vld [vmem:[#allocation2 + $0xe2] sm:$0xff] }
  0x6c   : > { %1437 = vrot.lane.b32.xlu0 %v8703_v8, %s8322_s20  ;;  %591 = vst.msk [vmem:[#allocation6 + $0x318] sm:$0xff] %vm334_vm0, %v8770_v46  ;;  %v1538_v15 = vpack.c.bf16 %v1513_v14, %v1512_v13  ;;  %v8841_v30 = vpack.c.bf16 %v1515_v25, %v1514_v24  ;;  %v620_v31 = vld [vmem:[#allocation2 + $0x121] sm:$0xff]  ;;  %v621_v32 = vld [vmem:[#allocation2 + $0x129] sm:$0xff]  ;;  %v1387_v62 = vld [vmem:[#allocation2 + $0xf1] sm:$0xff] }
  0x6d   : > { %v8849_v36 = vpack.c.bf16 %v621_v32, %v620_v31  ;;  %v749_v37 = vld [vmem:[#allocation2 + $0x122] sm:$0xff]  ;;  %v750_v38 = vld [vmem:[#allocation2 + $0x12a] sm:$0xff]  ;;  %v550_v2 = vld [vmem:[#allocation2 + $0xd8] sm:$0xff] }
  0x6e   : > { %v3376_v42 = vld [vmem:[#allocation3] sm:$0xff]  ;;  %v1525_v16 = vld [vmem:[#allocation2 + $0x15a] sm:$0xff] }
  0x6f   : > { %1308 = vrot.lane.b32.xlu1 %v8652_v45, %s8324_s21  ;;  %v1389_v31 = vld [vmem:[#allocation2 + $0x109] sm:$0xff]  ;;  %v1390_v32 = vld [vmem:[#allocation2 + $0x111] sm:$0xff] }
  0x70   : > { %664 = vrot.lane.b32.xlu0 %v8650_v41, %s8317_s15  ;;  %v495_v41 = vld [vmem:[%s8606_s14 + $0xe8] sm:$0xff] }
  0x71   : > { %528 = vst.msk [vmem:[#allocation2 + $0x171] sm:$0xff] %vm334_vm0, %v495_v41  ;;  %v8855_v41 = vpack.c.bf16 %v750_v38, %v749_v37  ;;  %v1518_v37 = vld [vmem:[#allocation2 + $0x10a] sm:$0xff]  ;;  %v1519_v38 = vld [vmem:[#allocation2 + $0x112] sm:$0xff] }
  0x73   : > { %1566 = vrot.lane.b32.xlu1 %v1533_v22, %s8325_s22 }
  0x74   : > { %922 = vrot.lane.b32.xlu0 %v8652_v45, %s8319_s17  ;;  %v1378_v45 = vld [vmem:[#allocation2 + $0x81] sm:$0xff] }
  0x75   : > { %v1406_v47 = vpack.c.bf16 %v1378_v45, %v1377_v44  ;;  %v8291_v45 = vld [vmem:[#allocation3 + $0x8] sm:$0xff] }
  0x77   : > { %793 = vrot.lane.b32.xlu1 %v8669_v56, %s8318_s16  ;;  %v1379_v56 = vld [vmem:[#allocation2 + $0x91] sm:$0xff] }
  0x78   : > { %1180 = vrot.lane.b32.xlu0 %v1533_v22, %s8320_s18  ;;  %v1269_v49 = vld [vmem:[#allocation2 + $0x170] sm:$0xff]  ;;  %v1407_v59 = vpack.c.bf16 %v1380_v57, %v1379_v56  ;;  %v1136_v57 = vld [vmem:[#allocation2 + $0x13a] sm:$0xff] }
  0x79   : > { %v8778_v51 = vpack.c.bf16 %v1269_v49, %v1268_v48  ;;  %v1007_v48 = vld [vmem:[#allocation2 + $0x139] sm:$0xff]  ;;  %v1008_v49 = vld [vmem:[#allocation2 + $0x141] sm:$0xff] }
  0x7a   : > { %v8869_v56 = vpack.c.bf16 %v1008_v49, %v1007_v48  ;;  %v1526_v48 = vld [vmem:[#allocation2 + $0x16a] sm:$0xff]  ;;  %v1527_v49 = vld [vmem:[#allocation2 + $0x172] sm:$0xff] }
  0x7b   : > { %1051 = vrot.lane.b32.xlu1 %v8703_v8, %s8321_s19  ;;  %595 = vst.msk [vmem:[#allocation6 + $0x438] sm:$0xff] %vm334_vm0, %v8778_v51 }
  0x7c   : > { %1439 = vrot.lane.b32.xlu0 %v1405_v34, %s8322_s20 }
  0x7f   : > { %1310 = vrot.lane.b32.xlu1 %v8658_v50, %s8324_s21 }
  0x80   : > { %666 = vrot.lane.b32.xlu0 %v8703_v8, %s8317_s15  ;;  %v1510_v8 = vld [vmem:[#allocation2 + $0xaa] sm:$0xff] }
  0x81   : > { %v1537_v10 = vpack.c.bf16 %v1511_v9, %v1510_v8  ;;  %v1516_v8 = vld [vmem:[#allocation2 + $0xf2] sm:$0xff]  ;;  %v1517_v9 = vld [vmem:[#allocation2 + $0xfa] sm:$0xff] }
  0x83   : > { %1568 = vrot.lane.b32.xlu1 %v1534_v39, %s8325_s22 }
  0x84   : > { %924 = vrot.lane.b32.xlu0 %v8658_v50, %s8319_s17  ;;  %v1506_v50 = vld [vmem:[#allocation2 + $0x7a] sm:$0xff] }
  0x85   : > { %v1535_v55 = vpack.c.bf16 %v1507_v53, %v1506_v50 }
  0x87   : > { %795 = vrot.lane.b32.xlu1 %v1533_v22, %s8318_s16 }
  0x88   : > { %1182 = vrot.lane.b32.xlu0 %v1534_v39, %s8320_s18 }
  0x8b   : > { %1053 = vrot.lane.b32.xlu1 %v1405_v34, %s8321_s19 }
  0x8c   : > { %1441 = vrot.lane.b32.xlu0 %v1406_v47, %s8322_s20 }
  0x8f   : > { %1312 = vrot.lane.b32.xlu1 %v8664_v54, %s8324_s21 }
  0x90   : > { %668 = vrot.lane.b32.xlu0 %v1405_v34, %s8317_s15 }
  0x93   : > { %1570 = vrot.lane.b32.xlu1 %v1535_v55, %s8325_s22 }
  0x94   : > { %926 = vrot.lane.b32.xlu0 %v8664_v54, %s8319_s17  ;;  %v1262_v54 = vld [vmem:[#allocation2 + $0x120] sm:$0xff] }
  0x95   : > { %v8802_v6 = vpack.c.bf16 %v1263_v3, %v1262_v54  ;;  %v551_v54 = vld [vmem:[#allocation2 + $0xe0] sm:$0xff] }
  0x96   : > { %v573_v4 = vpack.c.bf16 %v551_v54, %v550_v2 }
  0x97   : > { %797 = vrot.lane.b32.xlu1 %v1534_v39, %s8318_s16  ;;  %592 = vst.msk [vmem:[#allocation6 + $0x360] sm:$0xff] %vm334_vm0, %v8802_v6 }
  0x98   : > { %1184 = vrot.lane.b32.xlu0 %v1535_v55, %s8320_s18  ;;  %589 = vst.msk [vmem:[#allocation6 + $0x288] sm:$0xff] %vm334_vm0, %v573_v4 }
  0x9b   : > { %1055 = vrot.lane.b32.xlu1 %v1406_v47, %s8321_s19 }
  0x9c   : > { %1443 = vrot.lane.b32.xlu0 %v1407_v59, %s8322_s20 }
  0x9f   : > { %1314 = vrot.lane.b32.xlu1 %v8672_v58, %s8324_s21 }
  0xa0   : > { %670 = vrot.lane.b32.xlu0 %v1406_v47, %s8317_s15  ;;  %v3408_v47 = vpack.c.bf16 %v8291_v45, %v3376_v42  ;;  %v1397_v42 = vld [vmem:[#allocation2 + $0x169] sm:$0xff] }
  0xa3   : > { %1572 = vrot.lane.b32.xlu1 %v1536_v63, %s8325_s22 }
  0xa4   : > { %928 = vrot.lane.b32.xlu0 %v8672_v58, %s8319_s17  ;;  %v1383_v58 = vld [vmem:[#allocation2 + $0xc1] sm:$0xff] }
  0xa5   : > { %v1409_v12 = vpack.c.bf16 %v1384_v11, %v1383_v58  ;;  %v8891_v58 = vpack.c.bf16 %v1517_v9, %v1516_v8  ;;  %v1395_v11 = vld [vmem:[#allocation2 + $0x151] sm:$0xff]  ;;  %v1271_v8 = vld [vmem:[#allocation2 + $0x188] sm:$0xff] }
  0xa7   : > { %799 = vrot.lane.b32.xlu1 %v1535_v55, %s8318_s16 }
  0xa8   : > { %1186 = vrot.lane.b32.xlu0 %v1536_v63, %s8320_s18 }
  0xab   : > { %1057 = vrot.lane.b32.xlu1 %v1407_v59, %s8321_s19 }
  0xac   : > { %1445 = vrot.lane.b32.xlu0 %v1408_v7, %s8322_s20 }
  0xaf   : > { %1316 = vrot.lane.b32.xlu1 %v8676_v61, %s8324_s21 }
  0xb0   : > { %672 = vrot.lane.b32.xlu0 %v1407_v59, %s8317_s15  ;;  %v1137_v59 = vld [vmem:[#allocation2 + $0x142] sm:$0xff] }
  0xb1   : > { %v8879_v3 = vpack.c.bf16 %v1137_v59, %v1136_v57  ;;  %v8966_v57 = vpack.c.bf16 %v1527_v49, %v1526_v48 }
  0xb3   : > { %1574 = vrot.lane.b32.xlu1 %v1537_v10, %s8325_s22 }
  0xb4   : > { %930 = vrot.lane.b32.xlu0 %v8676_v61, %s8319_s17  ;;  %v661_v61 = vpop.permute.xlu0 %660 }
  0xb5   : > { %709 = vst.msk [vmem:[#allocation6] sm:$0xff] %vm708_vm4, %v661_v61  ;;  %v1524_v61 = vld [vmem:[#allocation2 + $0x152] sm:$0xff] }
  0xb7   : > { %801 = vrot.lane.b32.xlu1 %v1536_v63, %s8318_s16  ;;  %v1388_v63 = vld [vmem:[#allocation2 + $0xf9] sm:$0xff] }
  0xb8   : > { %1188 = vrot.lane.b32.xlu0 %v1537_v10, %s8320_s18  ;;  %v8883_v5 = vpack.c.bf16 %v1388_v63, %v1387_v62 }
  0xbb   : > { %1059 = vrot.lane.b32.xlu1 %v1408_v7, %s8321_s19 }
  0xbc   : > { %1447 = vrot.lane.b32.xlu0 %v1409_v12, %s8322_s20 }
  0xbf   : > { %1318 = vrot.lane.b32.xlu1 %v8683_v1, %s8324_s21 }
  0xc0   : > { %674 = vrot.lane.b32.xlu0 %v1408_v7, %s8317_s15 }
  0xc3   : > { %1576 = vrot.lane.b32.xlu1 %v1538_v15, %s8325_s22  ;;  %v790_v18 = vpop.permute.xlu0 %789 }
  0xc4   : > { %932 = vrot.lane.b32.xlu0 %v8683_v1, %s8319_s17  ;;  %838 = vst.msk [vmem:[#allocation6] sm:$0xff] %vm837_vm5, %v790_v18  ;;  %v1281_v1 = vpack.c.bf16 %v1257_v21, %v1256_v20  ;;  %v8906_v21 = vpack.c.bf16 %v1525_v16, %v1524_v61  ;;  %v1528_v61 = vld [vmem:[#allocation2 + $0x182] sm:$0xff]  ;;  %v1529_v16 = vld [vmem:[#allocation2 + $0x18a] sm:$0xff] }
  0xc7   : > { %803 = vrot.lane.b32.xlu1 %v1537_v10, %s8318_s16 }
  0xc8   : > { %1190 = vrot.lane.b32.xlu0 %v1538_v15, %s8320_s18 }
  0xc9   : > { %v919_v22 = vpop.permute.xlu1 %918 }
  0xca   : > { %967 = vst.msk [vmem:[#allocation6] sm:$0xff] %vm966_vm6, %v919_v22  ;;  %v1177_v23 = vpop.permute.xlu0 %1176 }
  0xcb   : > { %1061 = vrot.lane.b32.xlu1 %v1409_v12, %s8321_s19 }
  0xcc   : > { %1449 = vrot.lane.b32.xlu0 %v8832_v19, %s8322_s20 }
  0xcd   : > { %v1048_v27 = vpop.permute.xlu1 %1047 }
  0xce   : > { %1096 = vst.msk [vmem:[#allocation6] sm:$0xff] %vm1095_vm7, %v1048_v27  ;;  %v1436_v29 = vpop.permute.xlu0 %1435 }
  0xcf   : > { %1320 = vrot.lane.b32.xlu1 %v1281_v1, %s8324_s21  ;;  %1225 = vst.msk [vmem:[#allocation6] sm:$0xff] %vm1224_vm8, %v1177_v23 }
  0xd0   : > { %676 = vrot.lane.b32.xlu0 %v1409_v12, %s8317_s15  ;;  %v1396_v12 = vld [vmem:[#allocation2 + $0x159] sm:$0xff] }
  0xd1   : > { %v1307_v34 = vpop.permute.xlu1 %1306 }
  0xd2   : > { %1355 = vst.msk [vmem:[#allocation6] sm:$0xff] %vm1354_vm9, %v1307_v34  ;;  %v663_v35 = vpop.permute.xlu0 %662 }
  0xd3   : > { %1578 = vrot.lane.b32.xlu1 %v8841_v30, %s8325_s22  ;;  %710 = vst.msk [vmem:[#allocation6 + $0x48] sm:$0xff] %vm708_vm4, %v663_v35 }
  0xd4   : > { %1484 = vst.msk [vmem:[#allocation6] sm:$0xff] %vm1483_vm10, %v1436_v29  ;;  %805 = vrot.lane.b32.xlu0 %v1538_v15, %s8318_s16  ;;  %v8897_v15 = vpack.c.bf16 %v1396_v12, %v1395_v11  ;;  %v1399_v11 = vld [vmem:[#allocation2 + $0x181] sm:$0xff]  ;;  %v1400_v12 = vld [vmem:[#allocation2 + $0x189] sm:$0xff] }
  0xd5   : > { %v1565_v39 = vpop.permute.xlu1 %1564 }
  0xd6   : > { %1613 = vst.msk [vmem:[#allocation6] sm:$0xff] %vm1612_vm11, %v1565_v39  ;;  %v921_v40 = vpop.permute.xlu0 %920 }
  0xd7   : > { %684 = vrot.lane.b32.xlu1 %v8849_v36, %s8317_s15 }
  0xd8   : > { %934 = vrot.lane.b32.xlu0 %v1281_v1, %s8319_s17 }
  0xd9   : > { %v792_v43 = vpop.permute.xlu1 %791 }
  0xda   : > { %839 = vst.msk [vmem:[#allocation6 + $0x48] sm:$0xff] %vm837_vm5, %v792_v43  ;;  %v1179_v44 = vpop.permute.xlu0 %1178  ;;  %v1398_v43 = vld [vmem:[#allocation2 + $0x171] sm:$0xff] }
  0xdb   : > { %968 = vst.msk [vmem:[#allocation6 + $0x48] sm:$0xff] %vm966_vm6, %v921_v40  ;;  %813 = vrot.lane.b32.xlu1 %v8855_v41, %s8318_s16  ;;  %v8951_v40 = vpack.c.bf16 %v1519_v38, %v1518_v37 }
  0xdc   : > { %1063 = vrot.lane.b32.xlu0 %v8832_v19, %s8321_s19 }
  0xdd   : > { %v1050_v50 = vpop.permute.xlu1 %1049  ;;  %v1629_v53 = vld [vmem:[#allocation6] sm:$0xff] }
  0xde   : > { %1097 = vst.msk [vmem:[#allocation6 + $0x48] sm:$0xff] %vm1095_vm7, %v1050_v50  ;;  %7328 = vmatmul.mubr.msk.bf16.vlgmr.msra.gmra.mrb[0].mxu0 %vm1686_vm12, %v1629_v53  ;;  %3424 = vst [vmem:[#allocation6] sm:$0xff] %v3408_v47  ;;  %v1438_v55 = vpop.permute.xlu0 %1437  ;;  %v8957_v47 = vpack.c.bf16 %v1398_v43, %v1397_v42 }
  0xdf   : > { %1226 = vst.msk [vmem:[#allocation6 + $0x48] sm:$0xff] %vm1224_vm8, %v1179_v44  ;;  %942 = vrot.lane.b32.xlu1 %v8736_v26, %s8319_s17  ;;  %1784 = vmatprep.mubr.bf16.mxu0 %v8323_v52 }
  0xe0   : > { %1192 = vrot.lane.b32.xlu0 %v8841_v30, %s8320_s18 }
  0xe1   : > { %v1309_v60 = vpop.permute.xlu1 %1308 }
  0xe2   : > { %1356 = vst.msk [vmem:[#allocation6 + $0x48] sm:$0xff] %vm1354_vm9, %v1309_v60  ;;  %v665_v0 = vpop.permute.xlu0 %664 }
  0xe3   : > { %1485 = vst.msk [vmem:[#allocation6 + $0x48] sm:$0xff] %vm1483_vm10, %v1438_v55  ;;  %1071 = vrot.lane.b32.xlu1 %v8869_v56, %s8321_s19 }
  0xe4   : > { %711 = vst.msk [vmem:[#allocation6 + $0x90] sm:$0xff] %vm708_vm4, %v665_v0  ;;  %1322 = vrot.lane.b32.xlu0 %v8739_v28, %s8324_s21 }
  0xe5   : > { %v1567_v7 = vpop.permute.xlu1 %1566 }
  0xe6   : > { %1614 = vst.msk [vmem:[#allocation6 + $0x48] sm:$0xff] %vm1612_vm11, %v1567_v7  ;;  %v923_v10 = vpop.permute.xlu0 %922 }
  0xe7   : > { %1200 = vrot.lane.b32.xlu1 %v8879_v3, %s8320_s18 }
  0xe8   : > { %1451 = vrot.lane.b32.xlu0 %v8883_v5, %s8322_s20 }
  0xe9   : > { %v794_v13 = vpop.permute.xlu1 %793 }
  0xea   : > { %840 = vst.msk [vmem:[#allocation6 + $0x90] sm:$0xff] %vm837_vm5, %v794_v13  ;;  %v1181_v14 = vpop.permute.xlu0 %1180 }
  0xeb   : > { %969 = vst.msk [vmem:[#allocation6 + $0x90] sm:$0xff] %vm966_vm6, %v923_v10  ;;  %1330 = vrot.lane.b32.xlu1 %v8745_v33, %s8324_s21 }
  0xec   : > { %1580 = vrot.lane.b32.xlu0 %v8891_v58, %s8325_s22 }
  0xed   : > { %v1052_v17 = vpop.permute.xlu1 %1051  ;;  %v1630_v18 = vld [vmem:[#allocation6 + $0x48] sm:$0xff] }
  0xee   : > { %1098 = vst.msk [vmem:[#allocation6 + $0x90] sm:$0xff] %vm1095_vm7, %v1052_v17  ;;  %7329 = vmatmul.mubr.msk.bf16.gmra.mrb[4].mxu0 %vm1686_vm12, %v1630_v18  ;;  %v1440_v20 = vpop.permute.xlu0 %1439 }
  0xef   : > { %1227 = vst.msk [vmem:[#allocation6 + $0x90] sm:$0xff] %vm1224_vm8, %v1181_v14  ;;  %1459 = vrot.lane.b32.xlu1 %v8897_v15, %s8322_s20  ;;  %1794 = vmatprep.mubr.bf16.mxu0 %v8323_v52 }
  0xf0   : > { %678 = vrot.lane.b32.xlu0 %v8832_v19, %s8317_s15 }
  0xf1   : > { %v1311_v22 = vpop.permute.xlu1 %1310 }
  0xf2   : > { %1357 = vst.msk [vmem:[#allocation6 + $0x90] sm:$0xff] %vm1354_vm9, %v1311_v22  ;;  %v667_v23 = vpop.permute.xlu0 %666 }
  0xf3   : > { %1486 = vst.msk [vmem:[#allocation6 + $0x90] sm:$0xff] %vm1483_vm10, %v1440_v20  ;;  %1588 = vrot.lane.b32.xlu1 %v8906_v21, %s8325_s22 }
  0xf4   : > { %712 = vst.msk [vmem:[#allocation6 + $0xd8] sm:$0xff] %vm708_vm4, %v667_v23  ;;  %807 = vrot.lane.b32.xlu0 %v8841_v30, %s8318_s16 }
  0xf5   : > { %v1569_v1 = vpop.permute.xlu1 %1568 }
  0xf6   : > { %1615 = vst.msk [vmem:[#allocation6 + $0x90] sm:$0xff] %vm1612_vm11, %v1569_v1  ;;  %v925_v24 = vpop.permute.xlu0 %924 }
  0xf7   : > { %686 = vrot.lane.b32.xlu1 %v8869_v56, %s8317_s15 }
  0xf8   : > { %936 = vrot.lane.b32.xlu0 %v8739_v28, %s8319_s17 }
  0xf9   : > { %v796_v19 = vpop.permute.xlu1 %795 }
  0xfa   : > { %841 = vst.msk [vmem:[#allocation6 + $0xd8] sm:$0xff] %vm837_vm5, %v796_v19  ;;  %v1183_v25 = vpop.permute.xlu0 %1182 }
  0xfb   : > { %970 = vst.msk [vmem:[#allocation6 + $0xd8] sm:$0xff] %vm966_vm6, %v925_v24  ;;  %815 = vrot.lane.b32.xlu1 %v8879_v3, %s8318_s16 }
  0xfc   : > { %1065 = vrot.lane.b32.xlu0 %v8883_v5, %s8321_s19 }
  0xfd   : > { %v1054_v27 = vpop.permute.xlu1 %1053  ;;  %v1631_v29 = vld [vmem:[#allocation6 + $0x90] sm:$0xff] }
  0xfe   : > { %1099 = vst.msk [vmem:[#allocation6 + $0xd8] sm:$0xff] %vm1095_vm7, %v1054_v27  ;;  %7330 = vmatmul.mubr.msk.bf16.gmra.mrb[8].mxu0 %vm1686_vm12, %v1631_v29  ;;  %v1442_v30 = vpop.permute.xlu0 %1441 }
  0xff   : > { %1228 = vst.msk [vmem:[#allocation6 + $0xd8] sm:$0xff] %vm1224_vm8, %v1183_v25  ;;  %944 = vrot.lane.b32.xlu1 %v8745_v33, %s8319_s17  ;;  %1804 = vmatprep.mubr.bf16.mxu0 %v8323_v52  ;;  %v8944_v33 = vpack.c.bf16 %v1390_v32, %v1389_v31  ;;  %v1273_v31 = vld [vmem:[#allocation2 + $0x1a0] sm:$0xff] }
 0x100   : > { %1194 = vrot.lane.b32.xlu0 %v8891_v58, %s8320_s18 }
 0x101   : > { %v1313_v28 = vpop.permute.xlu1 %1312 }
 0x102   : > { %1358 = vst.msk [vmem:[#allocation6 + $0xd8] sm:$0xff] %vm1354_vm9, %v1313_v28  ;;  %v669_v34 = vpop.permute.xlu0 %668  ;;  %v1272_v28 = vld [vmem:[#allocation2 + $0x198] sm:$0xff] }
 0x103   : > { %1487 = vst.msk [vmem:[#allocation6 + $0xd8] sm:$0xff] %vm1483_vm10, %v1442_v30  ;;  %1073 = vrot.lane.b32.xlu1 %v8897_v15, %s8321_s19 }
 0x104   : > { %713 = vst.msk [vmem:[#allocation6 + $0x120] sm:$0xff] %vm708_vm4, %v669_v34  ;;  %1324 = vrot.lane.b32.xlu0 %v8770_v46, %s8324_s21 }
 0x105   : > { %v1571_v35 = vpop.permute.xlu1 %1570 }
 0x106   : > { %1616 = vst.msk [vmem:[#allocation6 + $0xd8] sm:$0xff] %vm1612_vm11, %v1571_v35  ;;  %v927_v39 = vpop.permute.xlu0 %926  ;;  %v1402_v35 = vld [vmem:[#allocation2 + $0x1a1] sm:$0xff] }
 0x107   : > { %1202 = vrot.lane.b32.xlu1 %v8906_v21, %s8320_s18 }
 0x108   : > { %1453 = vrot.lane.b32.xlu0 %v8944_v33, %s8322_s20 }
 0x109   : > { %v798_v44 = vpop.permute.xlu1 %797 }
 0x10a   : > { %842 = vst.msk [vmem:[#allocation6 + $0x120] sm:$0xff] %vm837_vm5, %v798_v44  ;;  %v1185_v45 = vpop.permute.xlu0 %1184 }
 0x10b   : > { %971 = vst.msk [vmem:[#allocation6 + $0x120] sm:$0xff] %vm966_vm6, %v927_v39  ;;  %1332 = vrot.lane.b32.xlu1 %v8778_v51, %s8324_s21  ;;  %v1530_v39 = vld [vmem:[#allocation2 + $0x19a] sm:$0xff] }
 0x10c   : > { %1582 = vrot.lane.b32.xlu0 %v8951_v40, %s8325_s22 }
 0x10d   : > { %v1056_v50 = vpop.permute.xlu1 %1055  ;;  %v1632_v53 = vld [vmem:[#allocation6 + $0xd8] sm:$0xff] }
 0x10e   : > { %1100 = vst.msk [vmem:[#allocation6 + $0x120] sm:$0xff] %vm1095_vm7, %v1056_v50  ;;  %7331 = vmatmul.mubr.msk.bf16.gmra.mrb[12].mxu0 %vm1686_vm12, %v1632_v53  ;;  %v1444_v55 = vpop.permute.xlu0 %1443 }
 0x10f   : > { %1229 = vst.msk [vmem:[#allocation6 + $0x120] sm:$0xff] %vm1224_vm8, %v1185_v45  ;;  %1461 = vrot.lane.b32.xlu1 %v8957_v47, %s8322_s20  ;;  %1814 = vmatprep.mubr.bf16.mxu0 %v8323_v52 }
 0x110   : > { %680 = vrot.lane.b32.xlu0 %v8883_v5, %s8317_s15 }
 0x111   : > { %v1315_v59 = vpop.permute.xlu1 %1314 }
 0x112   : > { %1359 = vst.msk [vmem:[#allocation6 + $0x120] sm:$0xff] %vm1354_vm9, %v1315_v59  ;;  %v671_v60 = vpop.permute.xlu0 %670 }
 0x113   : > { %1488 = vst.msk [vmem:[#allocation6 + $0x120] sm:$0xff] %vm1483_vm10, %v1444_v55  ;;  %1590 = vrot.lane.b32.xlu1 %v8966_v57, %s8325_s22 }
 0x114   : > { %714 = vst.msk [vmem:[#allocation6 + $0x168] sm:$0xff] %vm708_vm4, %v671_v60  ;;  %809 = vrot.lane.b32.xlu0 %v8891_v58, %s8318_s16 }
 0x115   : > { %v1573_v62 = vpop.permute.xlu1 %1572 }
 0x116   : > { %1617 = vst.msk [vmem:[#allocation6 + $0x120] sm:$0xff] %vm1612_vm11, %v1573_v62  ;;  %v929_v63 = vpop.permute.xlu0 %928 }
 0x117   : > { %688 = vrot.lane.b32.xlu1 %v8897_v15, %s8317_s15  ;;  %v1417_v15 = vpack.c.bf16 %v1400_v12, %v1399_v11 }
 0x118   : > { %938 = vrot.lane.b32.xlu0 %v8770_v46, %s8319_s17 }
 0x119   : > { %v800_v0 = vpop.permute.xlu1 %799 }
 0x11a   : > { %843 = vst.msk [vmem:[#allocation6 + $0x168] sm:$0xff] %vm837_vm5, %v800_v0  ;;  %v1187_v2 = vpop.permute.xlu0 %1186 }
 0x11b   : > { %972 = vst.msk [vmem:[#allocation6 + $0x168] sm:$0xff] %vm966_vm6, %v929_v63  ;;  %817 = vrot.lane.b32.xlu1 %v8906_v21, %s8318_s16  ;;  %v1546_v21 = vpack.c.bf16 %v1529_v16, %v1528_v61 }
 0x11c   : > { %1067 = vrot.lane.b32.xlu0 %v8944_v33, %s8321_s19 }
 0x11d   : > { %v1058_v54 = vpop.permute.xlu1 %1057  ;;  %v1633_v4 = vld [vmem:[#allocation6 + $0x120] sm:$0xff] }
 0x11e   : > { %1101 = vst.msk [vmem:[#allocation6 + $0x168] sm:$0xff] %vm1095_vm7, %v1058_v54  ;;  %7332 = vmatmul.mubr.msk.bf16.gmra.mrb[16].mxu0 %vm1686_vm12, %v1633_v4  ;;  %v1446_v5 = vpop.permute.xlu0 %1445 }
 0x11f   : > { %1230 = vst.msk [vmem:[#allocation6 + $0x168] sm:$0xff] %vm1224_vm8, %v1187_v2  ;;  %946 = vrot.lane.b32.xlu1 %v8778_v51, %s8319_s17  ;;  %1824 = vmatprep.mubr.bf16.mxu0 %v8323_v52  ;;  %v1270_v51 = vld [vmem:[#allocation2 + $0x180] sm:$0xff] }
 0x120   : > { %1196 = vrot.lane.b32.xlu0 %v8951_v40, %s8320_s18  ;;  %v1288_v58 = vpack.c.bf16 %v1271_v8, %v1270_v51 }
 0x121   : > { %v1317_v46 = vpop.permute.xlu1 %1316 }
 0x122   : > { %1360 = vst.msk [vmem:[#allocation6 + $0x168] sm:$0xff] %vm1354_vm9, %v1317_v46  ;;  %v673_v7 = vpop.permute.xlu0 %672 }
 0x123   : > { %1489 = vst.msk [vmem:[#allocation6 + $0x168] sm:$0xff] %vm1483_vm10, %v1446_v5  ;;  %1075 = vrot.lane.b32.xlu1 %v8957_v47, %s8321_s19 }
 0x124   : > { %715 = vst.msk [vmem:[#allocation6 + $0x1b0] sm:$0xff] %vm708_vm4, %v673_v7  ;;  %1326 = vrot.lane.b32.xlu0 %v8802_v6, %s8324_s21 }
 0x125   : > { %v1575_v9 = vpop.permute.xlu1 %1574 }
 0x126   : > { %1618 = vst.msk [vmem:[#allocation6 + $0x168] sm:$0xff] %vm1612_vm11, %v1575_v9  ;;  %v931_v10 = vpop.permute.xlu0 %930 }
 0x127   : > { %1204 = vrot.lane.b32.xlu1 %v8966_v57, %s8320_s18 }
 0x128   : > { %1455 = vrot.lane.b32.xlu0 %v8849_v36, %s8322_s20 }
 0x129   : > { %v802_v13 = vpop.permute.xlu1 %801 }
 0x12a   : > { %844 = vst.msk [vmem:[#allocation6 + $0x1b0] sm:$0xff] %vm837_vm5, %v802_v13  ;;  %v1189_v14 = vpop.permute.xlu0 %1188 }
 0x12b   : > { %973 = vst.msk [vmem:[#allocation6 + $0x1b0] sm:$0xff] %vm966_vm6, %v931_v10  ;;  %1334 = vrot.lane.b32.xlu1 %v1288_v58, %s8324_s21 }
 0x12c   : > { %1584 = vrot.lane.b32.xlu0 %v8855_v41, %s8325_s22 }
 0x12d   : > { %v1060_v17 = vpop.permute.xlu1 %1059  ;;  %v1634_v18 = vld [vmem:[#allocation6 + $0x168] sm:$0xff] }
 0x12e   : > { %1102 = vst.msk [vmem:[#allocation6 + $0x1b0] sm:$0xff] %vm1095_vm7, %v1060_v17  ;;  %7333 = vmatmul.mubr.msk.bf16.gmra.mrb[20].mxu0 %vm1686_vm12, %v1634_v18  ;;  %v1448_v20 = vpop.permute.xlu0 %1447 }
 0x12f   : > { %1231 = vst.msk [vmem:[#allocation6 + $0x1b0] sm:$0xff] %vm1224_vm8, %v1189_v14  ;;  %1463 = vrot.lane.b32.xlu1 %v1417_v15, %s8322_s20  ;;  %1834 = vmatprep.mubr.bf16.mxu0 %v8323_v52 }
 0x130   : > { %682 = vrot.lane.b32.xlu0 %v8944_v33, %s8317_s15  ;;  %v1401_v33 = vld [vmem:[#allocation2 + $0x199] sm:$0xff] }
 0x131   : > { %v1319_v22 = vpop.permute.xlu1 %1318  ;;  %v1418_v38 = vpack.c.bf16 %v1402_v35, %v1401_v33 }
 0x132   : > { %1361 = vst.msk [vmem:[#allocation6 + $0x1b0] sm:$0xff] %vm1354_vm9, %v1319_v22  ;;  %v675_v23 = vpop.permute.xlu0 %674 }
 0x133   : > { %1490 = vst.msk [vmem:[#allocation6 + $0x1b0] sm:$0xff] %vm1483_vm10, %v1448_v20  ;;  %1592 = vrot.lane.b32.xlu1 %v1546_v21, %s8325_s22 }
 0x134   : > { %716 = vst.msk [vmem:[#allocation6 + $0x1f8] sm:$0xff] %vm708_vm4, %v675_v23  ;;  %811 = vrot.lane.b32.xlu0 %v8951_v40, %s8318_s16  ;;  %v1531_v40 = vld [vmem:[#allocation2 + $0x1a2] sm:$0xff] }
 0x135   : > { %v1577_v1 = vpop.permute.xlu1 %1576  ;;  %v1547_v44 = vpack.c.bf16 %v1531_v40, %v1530_v39 }
 0x136   : > { %1619 = vst.msk [vmem:[#allocation6 + $0x1b0] sm:$0xff] %vm1612_vm11, %v1577_v1  ;;  %v933_v24 = vpop.permute.xlu0 %932 }
 0x137   : > { %690 = vrot.lane.b32.xlu1 %v8957_v47, %s8317_s15 }
 0x138   : > { %940 = vrot.lane.b32.xlu0 %v8802_v6, %s8319_s17 }
 0x139   : > { %v804_v19 = vpop.permute.xlu1 %803 }
 0x13a   : > { %845 = vst.msk [vmem:[#allocation6 + $0x1f8] sm:$0xff] %vm837_vm5, %v804_v19  ;;  %v1191_v25 = vpop.permute.xlu0 %1190 }
 0x13b   : > { %974 = vst.msk [vmem:[#allocation6 + $0x1f8] sm:$0xff] %vm966_vm6, %v933_v24  ;;  %819 = vrot.lane.b32.xlu1 %v8966_v57, %s8318_s16 }
 0x13c   : > { %1069 = vrot.lane.b32.xlu0 %v8849_v36, %s8321_s19 }
 0x13d   : > { %v1062_v27 = vpop.permute.xlu1 %1061  ;;  %v1635_v29 = vld [vmem:[#allocation6 + $0x1b0] sm:$0xff] }
 0x13e   : > { %1103 = vst.msk [vmem:[#allocation6 + $0x1f8] sm:$0xff] %vm1095_vm7, %v1062_v27  ;;  %7334 = vmatmul.mubr.msk.bf16.gmra.mrb[24].mxu0 %vm1686_vm12, %v1635_v29  ;;  %v1450_v30 = vpop.permute.xlu0 %1449 }
 0x13f   : > { %1232 = vst.msk [vmem:[#allocation6 + $0x1f8] sm:$0xff] %vm1224_vm8, %v1191_v25  ;;  %948 = vrot.lane.b32.xlu1 %v1288_v58, %s8319_s17  ;;  %1844 = vmatprep.mubr.bf16.mxu0 %v8323_v52 }
 0x140   : > { %1198 = vrot.lane.b32.xlu0 %v8855_v41, %s8320_s18  ;;  %v1289_v41 = vpack.c.bf16 %v1273_v31, %v1272_v28 }
 0x141   : > { %v1321_v6 = vpop.permute.xlu1 %1320 }
 0x142   : > { %1362 = vst.msk [vmem:[#allocation6 + $0x1f8] sm:$0xff] %vm1354_vm9, %v1321_v6  ;;  %v677_v36 = vpop.permute.xlu0 %676 }
 0x143   : > { %1491 = vst.msk [vmem:[#allocation6 + $0x1f8] sm:$0xff] %vm1483_vm10, %v1450_v30  ;;  %1077 = vrot.lane.b32.xlu1 %v1417_v15, %s8321_s19 }
 0x144   : > { %717 = vst.msk [vmem:[#allocation6 + $0x240] sm:$0xff] %vm708_vm4, %v677_v36  ;;  %1328 = vrot.lane.b32.xlu0 %v8736_v26, %s8324_s21  ;;  %v1651_v36 = vlaneseq }
 0x145   : > { %v1579_v32 = vpop.permute.xlu1 %1578 }
 0x146   : > { %1620 = vst.msk [vmem:[#allocation6 + $0x1f8] sm:$0xff] %vm1612_vm11, %v1579_v32  ;;  %v806_v34 = vpop.permute.xlu0 %805 }
 0x147   : > { %1206 = vrot.lane.b32.xlu1 %v1546_v21, %s8320_s18  ;;  %846 = vst.msk [vmem:[#allocation6 + $0x240] sm:$0xff] %vm837_vm5, %v806_v34  ;;  %v1652_v34 = vshrl.u32 %v1651_v36, 7 }
 0x148   : > { %1457 = vrot.lane.b32.xlu0 %v8869_v56, %s8322_s20 }
 0x149   : > { %v685_v37 = vpop.permute.xlu1 %684  ;;  %v1657_v35 = vsub.s32 1, %v1652_v34 }
 0x14a   : > { %721 = vst.msk [vmem:[#allocation6 + $0x360] sm:$0xff] %vm708_vm4, %v685_v37  ;;  %v935_v26 = vpop.permute.xlu0 %934  ;;  %v531_v37 = vld [vmem:[%s11484_s2] sm:$0x3] }
 0x14b   : > { %1336 = vrot.lane.b32.xlu1 %v1289_v41, %s8324_s21  ;;  %975 = vst.msk [vmem:[#allocation6 + $0x240] sm:$0xff] %vm966_vm6, %v935_v26  ;;  %v9129_v40 = vrot.slane %v531_v37, %v1657_v35 }
 0x14c   : > { %1586 = vrot.lane.b32.xlu0 %v8879_v3, %s8325_s22 }
 0x14d   : > { %v814_v42 = vpop.permute.xlu1 %813  ;;  %v1636_v43 = vld [vmem:[#allocation6 + $0x1f8] sm:$0xff] }
 0x14e   : > { %850 = vst.msk [vmem:[#allocation6 + $0x360] sm:$0xff] %vm837_vm5, %v814_v42  ;;  %7335 = vmatmul.mubr.msk.bf16.gmra.mrb[28].mxu0 %vm1686_vm12, %v1636_v43  ;;  %v1064_v56 = vpop.permute.xlu0 %1063 }
 0x14f   : > { %1465 = vrot.lane.b32.xlu1 %v1418_v38, %s8322_s20  ;;  %1104 = vst.msk [vmem:[#allocation6 + $0x240] sm:$0xff] %vm1095_vm7, %v1064_v56  ;;  %1854 = vmatprep.mubr.bf16.mxu0 %v8323_v52 }
 0x151   : > { %v943_v45 = vpop.permute.xlu1 %942 }
 0x152   : > { %979 = vst.msk [vmem:[#allocation6 + $0x360] sm:$0xff] %vm966_vm6, %v943_v45  ;;  %v1193_v3 = vpop.permute.xlu0 %1192 }
 0x153   : > { %1594 = vrot.lane.b32.xlu1 %v1547_v44, %s8325_s22  ;;  %1233 = vst.msk [vmem:[#allocation6 + $0x240] sm:$0xff] %vm1224_vm8, %v1193_v3 }
 0x155   : > { %v1072_v47 = vpop.permute.xlu1 %1071 }
 0x156   : > { %1108 = vst.msk [vmem:[#allocation6 + $0x360] sm:$0xff] %vm1095_vm7, %v1072_v47  ;;  %v1323_v48 = vpop.permute.xlu0 %1322 }
 0x157   : > { %1363 = vst.msk [vmem:[#allocation6 + $0x240] sm:$0xff] %vm1354_vm9, %v1323_v48 }
 0x159   : > { %v1201_v49 = vpop.permute.xlu1 %1200 }
 0x15a   : > { %1237 = vst.msk [vmem:[#allocation6 + $0x360] sm:$0xff] %vm1224_vm8, %v1201_v49  ;;  %v1452_v50 = vpop.permute.xlu0 %1451 }
 0x15b   : > { %1492 = vst.msk [vmem:[#allocation6 + $0x240] sm:$0xff] %vm1483_vm10, %v1452_v50 }
 0x15d   : > { %v1331_v53 = vpop.permute.xlu1 %1330 }
 0x15e   : > { %1367 = vst.msk [vmem:[#allocation6 + $0x360] sm:$0xff] %vm1354_vm9, %v1331_v53  ;;  %v1581_v55 = vpop.permute.xlu0 %1580 }
 0x15f   : > { %1621 = vst.msk [vmem:[#allocation6 + $0x240] sm:$0xff] %vm1612_vm11, %v1581_v55  ;;  %v1653_v55 = vsub.s32 0, %v1652_v34 }
 0x161   : > { %v1460_v57 = vpop.permute.xlu1 %1459 }
 0x162   : > { %1496 = vst.msk [vmem:[#allocation6 + $0x360] sm:$0xff] %vm1483_vm10, %v1460_v57  ;;  %v679_v59 = vpop.permute.xlu0 %678 }
 0x163   : > { %718 = vst.msk [vmem:[#allocation6 + $0x288] sm:$0xff] %vm708_vm4, %v679_v59 }
 0x165   : > { %v1589_v60 = vpop.permute.xlu1 %1588 }
 0x166   : > { %1625 = vst.msk [vmem:[#allocation6 + $0x360] sm:$0xff] %vm1612_vm11, %v1589_v60  ;;  %v808_v62 = vpop.permute.xlu0 %807  ;;  %v1637_v63 = vld [vmem:[#allocation6 + $0x240] sm:$0xff]  ;;  %v9140_v60 = vrot.slane %v531_v37, %v1653_v55 }
 0x167   : > { %847 = vst.msk [vmem:[#allocation6 + $0x288] sm:$0xff] %vm837_vm5, %v808_v62  ;;  %7336 = vmatmul.mubr.msk.bf16.gmra.mrb[32].mxu0 %vm1686_vm12, %v1637_v63 }
 0x168   : > { %1864 = vmatprep.mubr.bf16.mxu0 %v8323_v52 }
 0x169   : > { %v687_v0 = vpop.permute.xlu1 %686 }
 0x16a   : > { %722 = vst.msk [vmem:[#allocation6 + $0x3a8] sm:$0xff] %vm708_vm4, %v687_v0  ;;  %v937_v2 = vpop.permute.xlu0 %936 }
 0x16b   : > { %976 = vst.msk [vmem:[#allocation6 + $0x288] sm:$0xff] %vm966_vm6, %v937_v2 }
 0x16d   : > { %v816_v54 = vpop.permute.xlu1 %815  ;;  %v1641_v4 = vld [vmem:[#allocation6 + $0x360] sm:$0xff] }
 0x16e   : > { %851 = vst.msk [vmem:[#allocation6 + $0x3a8] sm:$0xff] %vm837_vm5, %v816_v54  ;;  %7340 = vmatmul.mubr.msk.bf16.vlgmr.msra.gmra.mrb[0].mxu1 %vm1686_vm12, %v1641_v4  ;;  %v1066_v5 = vpop.permute.xlu0 %1065 }
 0x16f   : > { %1105 = vst.msk [vmem:[#allocation6 + $0x288] sm:$0xff] %vm1095_vm7, %v1066_v5  ;;  %1904 = vmatprep.mubr.bf16.mxu1 %v8323_v52 }
 0x171   : > { %v945_v46 = vpop.permute.xlu1 %944 }
 0x172   : > { %980 = vst.msk [vmem:[#allocation6 + $0x3a8] sm:$0xff] %vm966_vm6, %v945_v46  ;;  %v1195_v7 = vpop.permute.xlu0 %1194 }
 0x173   : > { %1234 = vst.msk [vmem:[#allocation6 + $0x288] sm:$0xff] %vm1224_vm8, %v1195_v7 }
 0x175   : > { %v1074_v51 = vpop.permute.xlu1 %1073 }
 0x176   : > { %1109 = vst.msk [vmem:[#allocation6 + $0x3a8] sm:$0xff] %vm1095_vm7, %v1074_v51  ;;  %v1325_v8 = vpop.permute.xlu0 %1324 }
 0x177   : > { %1364 = vst.msk [vmem:[#allocation6 + $0x288] sm:$0xff] %vm1354_vm9, %v1325_v8 }
 0x179   : > { %v1203_v9 = vpop.permute.xlu1 %1202 }
 0x17a   : > { %1238 = vst.msk [vmem:[#allocation6 + $0x3a8] sm:$0xff] %vm1224_vm8, %v1203_v9  ;;  %v1454_v10 = vpop.permute.xlu0 %1453 }
 0x17b   : > { %1493 = vst.msk [vmem:[#allocation6 + $0x288] sm:$0xff] %vm1483_vm10, %v1454_v10 }
 0x17d   : > { %v1333_v58 = vpop.permute.xlu1 %1332 }
 0x17e   : > { %1368 = vst.msk [vmem:[#allocation6 + $0x3a8] sm:$0xff] %vm1354_vm9, %v1333_v58  ;;  %v1583_v11 = vpop.permute.xlu0 %1582 }
 0x17f   : > { %1622 = vst.msk [vmem:[#allocation6 + $0x288] sm:$0xff] %vm1612_vm11, %v1583_v11 }
 0x181   : > { %v1462_v12 = vpop.permute.xlu1 %1461 }
 0x182   : > { %1497 = vst.msk [vmem:[#allocation6 + $0x3a8] sm:$0xff] %vm1483_vm10, %v1462_v12  ;;  %v681_v13 = vpop.permute.xlu0 %680 }
 0x183   : > { %719 = vst.msk [vmem:[#allocation6 + $0x2d0] sm:$0xff] %vm708_vm4, %v681_v13 }
 0x185   : > { %v1591_v14 = vpop.permute.xlu1 %1590 }
 0x186   : > { %1626 = vst.msk [vmem:[#allocation6 + $0x3a8] sm:$0xff] %vm1612_vm11, %v1591_v14  ;;  %v810_v15 = vpop.permute.xlu0 %809  ;;  %v1638_v61 = vld [vmem:[#allocation6 + $0x288] sm:$0xff] }
 0x187   : > { %848 = vst.msk [vmem:[#allocation6 + $0x2d0] sm:$0xff] %vm837_vm5, %v810_v15  ;;  %7337 = vmatmul.mubr.msk.bf16.gmra.mrb[36].mxu0 %vm1686_vm12, %v1638_v61 }
 0x188   : > { %1874 = vmatprep.mubr.bf16.mxu0 %v8323_v52 }
 0x189   : > { %v689_v16 = vpop.permute.xlu1 %688 }
 0x18a   : > { %723 = vst.msk [vmem:[#allocation6 + $0x3f0] sm:$0xff] %vm708_vm4, %v689_v16  ;;  %v939_v17 = vpop.permute.xlu0 %938 }
 0x18b   : > { %977 = vst.msk [vmem:[#allocation6 + $0x2d0] sm:$0xff] %vm966_vm6, %v939_v17 }
 0x18d   : > { %v818_v18 = vpop.permute.xlu1 %817  ;;  %v1642_v20 = vld [vmem:[#allocation6 + $0x3a8] sm:$0xff] }
 0x18e   : > { %852 = vst.msk [vmem:[#allocation6 + $0x3f0] sm:$0xff] %vm837_vm5, %v818_v18  ;;  %7341 = vmatmul.mubr.msk.bf16.gmra.mrb[4].mxu1 %vm1686_vm12, %v1642_v20  ;;  %v1068_v21 = vpop.permute.xlu0 %1067 }
 0x18f   : > { %1106 = vst.msk [vmem:[#allocation6 + $0x2d0] sm:$0xff] %vm1095_vm7, %v1068_v21  ;;  %1914 = vmatprep.mubr.bf16.mxu1 %v8323_v52 }
 0x191   : > { %v947_v22 = vpop.permute.xlu1 %946 }
 0x192   : > { %981 = vst.msk [vmem:[#allocation6 + $0x3f0] sm:$0xff] %vm966_vm6, %v947_v22  ;;  %v1197_v23 = vpop.permute.xlu0 %1196 }
 0x193   : > { %1235 = vst.msk [vmem:[#allocation6 + $0x2d0] sm:$0xff] %vm1224_vm8, %v1197_v23 }
 0x195   : > { %v1076_v1 = vpop.permute.xlu1 %1075 }
 0x196   : > { %1110 = vst.msk [vmem:[#allocation6 + $0x3f0] sm:$0xff] %vm1095_vm7, %v1076_v1  ;;  %v1327_v24 = vpop.permute.xlu0 %1326 }
 0x197   : > { %1365 = vst.msk [vmem:[#allocation6 + $0x2d0] sm:$0xff] %vm1354_vm9, %v1327_v24 }
 0x199   : > { %v1205_v19 = vpop.permute.xlu1 %1204 }
 0x19a   : > { %1239 = vst.msk [vmem:[#allocation6 + $0x3f0] sm:$0xff] %vm1224_vm8, %v1205_v19  ;;  %v1456_v25 = vpop.permute.xlu0 %1455 }
 0x19b   : > { %1494 = vst.msk [vmem:[#allocation6 + $0x2d0] sm:$0xff] %vm1483_vm10, %v1456_v25 }
 0x19d   : > { %v1335_v27 = vpop.permute.xlu1 %1334 }
 0x19e   : > { %1369 = vst.msk [vmem:[#allocation6 + $0x3f0] sm:$0xff] %vm1354_vm9, %v1335_v27  ;;  %v1585_v29 = vpop.permute.xlu0 %1584 }
 0x19f   : > { %1623 = vst.msk [vmem:[#allocation6 + $0x2d0] sm:$0xff] %vm1612_vm11, %v1585_v29 }
 0x1a1   : > { %v1464_v30 = vpop.permute.xlu1 %1463 }
 0x1a2   : > { %1498 = vst.msk [vmem:[#allocation6 + $0x3f0] sm:$0xff] %vm1483_vm10, %v1464_v30  ;;  %v683_v6 = vpop.permute.xlu0 %682 }
 0x1a3   : > { %720 = vst.msk [vmem:[#allocation6 + $0x318] sm:$0xff] %vm708_vm4, %v683_v6 }
 0x1a5   : > { %v1593_v28 = vpop.permute.xlu1 %1592 }
 0x1a6   : > { %1627 = vst.msk [vmem:[#allocation6 + $0x3f0] sm:$0xff] %vm1612_vm11, %v1593_v28  ;;  %v812_v31 = vpop.permute.xlu0 %811  ;;  %v1639_v32 = vld [vmem:[#allocation6 + $0x2d0] sm:$0xff] }
 0x1a7   : > { %849 = vst.msk [vmem:[#allocation6 + $0x318] sm:$0xff] %vm837_vm5, %v812_v31  ;;  %7338 = vmatmul.mubr.msk.bf16.gmra.mrb[40].mxu0 %vm1686_vm12, %v1639_v32 }
 0x1a8   : > { %1884 = vmatprep.mubr.bf16.mxu0 %v8323_v52 }
 0x1a9   : > { %v691_v41 = vpop.permute.xlu1 %690 }
 0x1aa   : > { %724 = vst.msk [vmem:[#allocation6 + $0x438] sm:$0xff] %vm708_vm4, %v691_v41  ;;  %v941_v33 = vpop.permute.xlu0 %940 }
 0x1ab   : > { %978 = vst.msk [vmem:[#allocation6 + $0x318] sm:$0xff] %vm966_vm6, %v941_v33 }
 0x1ad   : > { %v820_v26 = vpop.permute.xlu1 %819  ;;  %v1643_v38 = vld [vmem:[#allocation6 + $0x3f0] sm:$0xff] }
 0x1ae   : > { %853 = vst.msk [vmem:[#allocation6 + $0x438] sm:$0xff] %vm837_vm5, %v820_v26  ;;  %7342 = vmatmul.mubr.msk.bf16.gmra.mrb[8].mxu1 %vm1686_vm12, %v1643_v38  ;;  %v1070_v39 = vpop.permute.xlu0 %1069 }
 0x1af   : > { %1107 = vst.msk [vmem:[#allocation6 + $0x318] sm:$0xff] %vm1095_vm7, %v1070_v39  ;;  %1924 = vmatprep.mubr.bf16.mxu1 %v8323_v52 }
 0x1b1   : > { %v1776_v42 = vpop.f32.mrb[0].mxu0  ;;  %v949_v43 = vpop.permute.xlu1 %948 }
 0x1b2   : > { %982 = vst.msk [vmem:[#allocation6 + $0x438] sm:$0xff] %vm966_vm6, %v949_v43  ;;  %v1778_v56 = vpop.f32.mrb[1].mxu0  ;;  %v1199_v44 = vpop.permute.xlu0 %1198  ;;  %v1777_v4 = vadd.f32 %v1776_v42, %v9140_v60 }
 0x1b3   : > { %v1779_v45 = vadd.f32 %v1778_v56, %v9129_v40  ;;  %v1780_v3 = vpop.f32.mrb[2].mxu0  ;;  %1236 = vst.msk [vmem:[#allocation6 + $0x318] sm:$0xff] %vm1224_vm8, %v1199_v44 }
 0x1b4   : > { %v1782_v47 = vpop.f32.mrb[3].mxu0  ;;  %v1781_v9 = vadd.f32 %v1780_v3, %v9140_v60  ;;  %v1935_v14 = vmax.f32 %v1777_v4, 0.0 }
 0x1b5   : > { %v1936_v48 = vmax.f32 %v1779_v45, 0.0  ;;  %v1783_v49 = vadd.f32 %v1782_v47, %v9129_v40  ;;  %v1078_v50 = vpop.permute.xlu1 %1077 }
 0x1b6   : > { %1111 = vst.msk [vmem:[#allocation6 + $0x438] sm:$0xff] %vm1095_vm7, %v1078_v50  ;;  %v1329_v53 = vpop.permute.xlu0 %1328  ;;  %v1937_v21 = vmax.f32 %v1781_v9, 0.0 }
 0x1b7   : > { %2000 = vst [vmem:[#allocation5 + $0x8] sm:$0xff] %v1936_v48  ;;  %v1938_v52 = vmax.f32 %v1783_v49, 0.0  ;;  %1366 = vst.msk [vmem:[#allocation6 + $0x318] sm:$0xff] %vm1354_vm9, %v1329_v53 }
 0x1b9   : > { %2002 = vst [vmem:[#allocation5 + $0x18] sm:$0xff] %v1938_v52  ;;  %v1207_v57 = vpop.permute.xlu1 %1206  ;;  %v2557_v54 = vrot.slane %v1938_v52, 1 }
 0x1ba   : > { %1240 = vst.msk [vmem:[#allocation6 + $0x438] sm:$0xff] %vm1224_vm8, %v1207_v57  ;;  %v1458_v59 = vpop.permute.xlu0 %1457 }
 0x1bb   : > { %1495 = vst.msk [vmem:[#allocation6 + $0x318] sm:$0xff] %vm1483_vm10, %v1458_v59 }
 0x1bd   : > { %v1337_v62 = vpop.permute.xlu1 %1336 }
 0x1be   : > { %v2491_v63 = vld [vmem:[#allocation5 + $0x8] sm:$0xfe]  ;;  %1370 = vst.msk [vmem:[#allocation6 + $0x438] sm:$0xff] %vm1354_vm9, %v1337_v62  ;;  %v1587_v0 = vpop.permute.xlu0 %1586 }
 0x1bf   : > { %v2556_v2 = vrot.slane %v2491_v63, 1  ;;  %1624 = vst.msk [vmem:[#allocation6 + $0x318] sm:$0xff] %vm1612_vm11, %v1587_v0 }
 0x1c0   : > { %v2460_v5 = vld [vmem:[#allocation5 + $0x18] sm:$0x7f] }
 0x1c1   : > { %v2558_v46 = vsel %vm2555_vm13, %v2556_v2, %v2557_v54  ;;  %v2637_v7 = vmax.f32 %v2460_v5, %v2557_v54  ;;  %v1466_v51 = vpop.permute.xlu1 %1465  ;;  %v1786_v8 = vpop.f32.mrb[4].mxu0 }
 0x1c2   : > { %v2636_v10 = vmax.f32 %v1936_v48, %v2558_v46  ;;  %1499 = vst.msk [vmem:[#allocation6 + $0x438] sm:$0xff] %vm1483_vm10, %v1466_v51  ;;  %v1787_v58 = vadd.f32 %v1786_v8, %v9140_v60  ;;  %v1788_v11 = vpop.f32.mrb[5].mxu0 }
 0x1c3   : > { %2669 = vst [vmem:[#allocation5 + $0x18] sm:$0x7f] %v2637_v7  ;;  %v1789_v12 = vadd.f32 %v1788_v11, %v9129_v40  ;;  %v1790_v13 = vpop.f32.mrb[6].mxu0 }
 0x1c4   : > { %2668 = vst [vmem:[#allocation5 + $0x8] sm:$0xff] %v2636_v10  ;;  %v1939_v15 = vmax.f32 %v1787_v58, 0.0  ;;  %v1791_v61 = vadd.f32 %v1790_v13, %v9140_v60  ;;  %v1792_v16 = vpop.f32.mrb[7].mxu0 }
 0x1c5   : > { %v1940_v17 = vmax.f32 %v1789_v12, 0.0  ;;  %v1793_v18 = vadd.f32 %v1792_v16, %v9129_v40  ;;  %v1595_v20 = vpop.permute.xlu1 %1594 }
 0x1c6   : > { %v2124_v22 = vmax.f32 %v1935_v14, %v1939_v15  ;;  %v1941_v23 = vmax.f32 %v1791_v61, 0.0  ;;  %1628 = vst.msk [vmem:[#allocation6 + $0x438] sm:$0xff] %vm1612_vm11, %v1595_v20  ;;  %v1640_v1 = vld [vmem:[#allocation6 + $0x318] sm:$0xff] }
 0x1c7   : > { %2004 = vst [vmem:[#allocation5 + $0x28] sm:$0xff] %v1940_v17  ;;  %v1942_v24 = vmax.f32 %v1793_v18, 0.0  ;;  %7339 = vmatmul.mubr.msk.bf16.gmra.mrb[44].mxu0 %vm1686_vm12, %v1640_v1 }
 0x1c8   : > { %2154 = vst [vmem:[#allocation5] sm:$0xff] %v2124_v22  ;;  %v2125_v19 = vmax.f32 %v1937_v21, %v1941_v23 }
 0x1c9   : > { %2006 = vst [vmem:[#allocation5 + $0x38] sm:$0xff] %v1942_v24  ;;  %v2560_v33 = vrot.slane %v1942_v24, 1 }
 0x1ca   : > { %v2733_v25 = vld [vmem:[#allocation5 + $0x18] sm:$0xff]  ;;  %2155 = vst [vmem:[#allocation5 + $0x10] sm:$0xff] %v2125_v19 }
 0x1cb   : > { %v2732_v27 = vld [vmem:[#allocation5 + $0x8] sm:$0xfc]  ;;  %v2798_v29 = vrot.slane %v2733_v25, 2  ;;  %v2701_v30 = vld [vmem:[#allocation5 + $0x18] sm:$0x3f] }
 0x1cc   : > { %v2797_v6 = vrot.slane %v2732_v27, 2 }
 0x1cd   : > { %v2878_v36 = vmax.f32 %v2701_v30, %v2798_v29  ;;  %v1644_v28 = vld [vmem:[#allocation6 + $0x438] sm:$0xff] }
 0x1ce   : > { %v2799_v31 = vsel %vm2796_vm14, %v2797_v6, %v2798_v29  ;;  %v2493_v32 = vld [vmem:[#allocation5 + $0x28] sm:$0xfe]  ;;  %7343 = vmatmul.mubr.msk.bf16.gmra.mrb[12].mxu1 %vm1686_vm12, %v1644_v28 }
 0x1cf   : > { %v2877_v34 = vmax.f32 %v2636_v10, %v2799_v31  ;;  %2910 = vst [vmem:[#allocation5 + $0x18] sm:$0x3f] %v2878_v36  ;;  %v2559_v41 = vrot.slane %v2493_v32, 1 }
 0x1d0   : > { %v2462_v35 = vld [vmem:[#allocation5 + $0x38] sm:$0x7f] }
 0x1d1   : > { %2909 = vst [vmem:[#allocation5 + $0x8] sm:$0xff] %v2877_v34  ;;  %v2561_v37 = vsel %vm2555_vm13, %v2559_v41, %v2560_v33  ;;  %v2639_v26 = vmax.f32 %v2462_v35, %v2560_v33  ;;  %v1796_v38 = vpop.f32.mrb[8].mxu0 }
 0x1d2   : > { %v2638_v39 = vmax.f32 %v1940_v17, %v2561_v37  ;;  %v9158_v42 = vadd.f32 %v1796_v38, %v9140_v60  ;;  %v1798_v43 = vpop.f32.mrb[9].mxu0 }
 0x1d3   : > { %2671 = vst [vmem:[#allocation5 + $0x38] sm:$0x7f] %v2639_v26  ;;  %v1799_v56 = vadd.f32 %v1798_v43, %v9129_v40  ;;  %v1800_v44 = vpop.f32.mrb[10].mxu0 }
 0x1d4   : > { %2670 = vst [vmem:[#allocation5 + $0x28] sm:$0xff] %v2638_v39  ;;  %v1943_v45 = vmax.f32 %v9158_v42, 0.0  ;;  %v9163_v3 = vadd.f32 %v1800_v44, %v9140_v60  ;;  %v1802_v47 = vpop.f32.mrb[11].mxu0 }
 0x1d5   : > { %v1944_v48 = vmax.f32 %v1799_v56, 0.0  ;;  %v1803_v49 = vadd.f32 %v1802_v47, %v9129_v40 }
 0x1d6   : > { %v2974_v50 = vld [vmem:[#allocation5 + $0x18] sm:$0xff]  ;;  %v2126_v53 = vmax.f32 %v1939_v15, %v1943_v45  ;;  %v1945_v52 = vmax.f32 %v9163_v3, 0.0 }
 0x1d7   : > { %v3039_v55 = vrot.slane %v2974_v50, 4  ;;  %2008 = vst [vmem:[#allocation5 + $0x48] sm:$0xff] %v1944_v48  ;;  %v1946_v57 = vmax.f32 %v1803_v49, 0.0  ;;  %v2942_v59 = vld [vmem:[#allocation5 + $0x18] sm:$0xf] }
 0x1d8   : > { %v2973_v62 = vld [vmem:[#allocation5 + $0x8] sm:$0xf0]  ;;  %2156 = vst [vmem:[#allocation5 + $0x20] sm:$0xff] %v2126_v53  ;;  %v2127_v63 = vmax.f32 %v1941_v23, %v1945_v52 }
 0x1d9   : > { %v3119_v0 = vmax.f32 %v2942_v59, %v3039_v55  ;;  %2010 = vst [vmem:[#allocation5 + $0x58] sm:$0xff] %v1946_v57  ;;  %v3038_v2 = vrot.slane %v2973_v62, 4  ;;  %v2563_v12 = vrot.slane %v1946_v57, 1 }
 0x1da   : > { %v2735_v54 = vld [vmem:[#allocation5 + $0x38] sm:$0xff]  ;;  %2157 = vst [vmem:[#allocation5 + $0x30] sm:$0xff] %v2127_v63 }
 0x1db   : > { %3151 = vst [vmem:[#allocation5 + $0x18] sm:$0xf] %v3119_v0  ;;  %v2734_v4 = vld [vmem:[#allocation5 + $0x28] sm:$0xfc]  ;;  %v2801_v5 = vrot.slane %v2735_v54, 2  ;;  %v3040_v8 = vsel %vm3037_vm15, %v3038_v2, %v3039_v55 }
 0x1dc   : > { %v2703_v46 = vld [vmem:[#allocation5 + $0x38] sm:$0x3f]  ;;  %v2800_v7 = vrot.slane %v2734_v4, 2  ;;  %v3118_v14 = vmax.f32 %v2877_v34, %v3040_v8 }
 0x1dd   : > { %v2880_v51 = vmax.f32 %v2703_v46, %v2801_v5 }
 0x1de   : > { %v2802_v9 = vsel %vm2796_vm14, %v2800_v7, %v2801_v5  ;;  %v2495_v10 = vld [vmem:[#allocation5 + $0x48] sm:$0xfe] }
 0x1df   : > { %v9169_v58 = vmax.f32 %v2638_v39, %v2802_v9  ;;  %2912 = vst [vmem:[#allocation5 + $0x38] sm:$0x3f] %v2880_v51  ;;  %v2562_v11 = vrot.slane %v2495_v10, 1 }
 0x1e0   : > { %v2464_v13 = vld [vmem:[#allocation5 + $0x58] sm:$0x7f] }
 0x1e1   : > { %2911 = vst [vmem:[#allocation5 + $0x28] sm:$0xff] %v9169_v58  ;;  %v2564_v15 = vsel %vm2555_vm13, %v2562_v11, %v2563_v12  ;;  %v2641_v61 = vmax.f32 %v2464_v13, %v2563_v12  ;;  %v1806_v16 = vpop.f32.mrb[12].mxu0 }
 0x1e2   : > { %v3198_v17 = vld [vmem:[#allocation5 + $0x18] sm:$0xff]  ;;  %v2640_v18 = vmax.f32 %v1944_v48, %v2564_v15  ;;  %v9174_v20 = vadd.f32 %v1806_v16, %v9140_v60  ;;  %v1808_v21 = vpop.f32.mrb[13].mxu0 }
 0x1e3   : > { %v3214_v22 = vmax.f32 %v3118_v14, %v3198_v17  ;;  %2673 = vst [vmem:[#allocation5 + $0x58] sm:$0x7f] %v2641_v61  ;;  %v1809_v23 = vadd.f32 %v1808_v21, %v9129_v40  ;;  %v1810_v1 = vpop.f32.mrb[14].mxu0 }
 0x1e4   : > { %2672 = vst [vmem:[#allocation5 + $0x48] sm:$0xff] %v2640_v18  ;;  %v1947_v24 = vmax.f32 %v9174_v20, 0.0  ;;  %v9179_v19 = vadd.f32 %v1810_v1, %v9140_v60  ;;  %v1812_v25 = vpop.f32.mrb[15].mxu0 }
 0x1e5   : > { %3230 = vst [vmem:[#allocation5 + $0x8] sm:$0xff] %v3214_v22  ;;  %v1948_v27 = vmax.f32 %v1809_v23, 0.0  ;;  %v1813_v29 = vadd.f32 %v1812_v25, %v9129_v40 }
 0x1e6   : > { %v2976_v30 = vld [vmem:[#allocation5 + $0x38] sm:$0xff]  ;;  %v2128_v6 = vmax.f32 %v1943_v45, %v1947_v24  ;;  %v1949_v36 = vmax.f32 %v9179_v19, 0.0 }
 0x1e7   : > { %v3042_v28 = vrot.slane %v2976_v30, 4  ;;  %2012 = vst [vmem:[#allocation5 + $0x68] sm:$0xff] %v1948_v27  ;;  %v1950_v31 = vmax.f32 %v1813_v29, 0.0  ;;  %v2944_v32 = vld [vmem:[#allocation5 + $0x38] sm:$0xf] }
 0x1e8   : > { %v2975_v34 = vld [vmem:[#allocation5 + $0x28] sm:$0xf0]  ;;  %2158 = vst [vmem:[#allocation5 + $0x40] sm:$0xff] %v2128_v6  ;;  %v2129_v41 = vmax.f32 %v1945_v52, %v1949_v36 }
 0x1e9   : > { %v3121_v33 = vmax.f32 %v2944_v32, %v3042_v28  ;;  %2014 = vst [vmem:[#allocation5 + $0x78] sm:$0xff] %v1950_v31  ;;  %v3041_v35 = vrot.slane %v2975_v34, 4  ;;  %v2566_v48 = vrot.slane %v1950_v31, 1 }
 0x1ea   : > { %v2737_v37 = vld [vmem:[#allocation5 + $0x58] sm:$0xff]  ;;  %2159 = vst [vmem:[#allocation5 + $0x50] sm:$0xff] %v2129_v41 }
 0x1eb   : > { %3153 = vst [vmem:[#allocation5 + $0x38] sm:$0xf] %v3121_v33  ;;  %v2736_v26 = vld [vmem:[#allocation5 + $0x48] sm:$0xfc]  ;;  %v2804_v38 = vrot.slane %v2737_v37, 2  ;;  %v3043_v56 = vsel %vm3037_vm15, %v3041_v35, %v3042_v28 }
 0x1ec   : > { %v2705_v39 = vld [vmem:[#allocation5 + $0x58] sm:$0x3f]  ;;  %v2803_v42 = vrot.slane %v2736_v26, 2  ;;  %v3120_v50 = vmax.f32 %v9169_v58, %v3043_v56 }
 0x1ed   : > { %v2882_v43 = vmax.f32 %v2705_v39, %v2804_v38 }
 0x1ee   : > { %v2805_v44 = vsel %vm2796_vm14, %v2803_v42, %v2804_v38  ;;  %v2497_v45 = vld [vmem:[#allocation5 + $0x68] sm:$0xfe] }
 0x1ef   : > { %v9185_v3 = vmax.f32 %v2640_v18, %v2805_v44  ;;  %2914 = vst [vmem:[#allocation5 + $0x58] sm:$0x3f] %v2882_v43  ;;  %v2565_v47 = vrot.slane %v2497_v45, 1 }
 0x1f0   : > { %v2466_v49 = vld [vmem:[#allocation5 + $0x78] sm:$0x7f] }
 0x1f1   : > { %2913 = vst [vmem:[#allocation5 + $0x48] sm:$0xff] %v9185_v3  ;;  %v2567_v53 = vsel %vm2555_vm13, %v2565_v47, %v2566_v48  ;;  %v2643_v52 = vmax.f32 %v2466_v49, %v2566_v48  ;;  %v1816_v55 = vpop.f32.mrb[16].mxu0 }
 0x1f2   : > { %v3199_v57 = vld [vmem:[#allocation5 + $0x38] sm:$0xff]  ;;  %v2642_v59 = vmax.f32 %v1948_v27, %v2567_v53  ;;  %v9191_v62 = vadd.f32 %v1816_v55, %v9140_v60  ;;  %v1818_v63 = vpop.f32.mrb[17].mxu0 }
 0x1f3   : > { %v3215_v0 = vmax.f32 %v3120_v50, %v3199_v57  ;;  %2675 = vst [vmem:[#allocation5 + $0x78] sm:$0x7f] %v2643_v52  ;;  %v1819_v2 = vadd.f32 %v1818_v63, %v9129_v40  ;;  %v1820_v54 = vpop.f32.mrb[18].mxu0 }
 0x1f4   : > { %2674 = vst [vmem:[#allocation5 + $0x68] sm:$0xff] %v2642_v59  ;;  %v1951_v4 = vmax.f32 %v9191_v62, 0.0  ;;  %v9196_v5 = vadd.f32 %v1820_v54, %v9140_v60  ;;  %v1822_v46 = vpop.f32.mrb[19].mxu0 }
 0x1f5   : > { %3231 = vst [vmem:[#allocation5 + $0x28] sm:$0xff] %v3215_v0  ;;  %v1952_v7 = vmax.f32 %v1819_v2, 0.0  ;;  %v1823_v51 = vadd.f32 %v1822_v46, %v9129_v40 }
 0x1f6   : > { %v2978_v8 = vld [vmem:[#allocation5 + $0x58] sm:$0xff]  ;;  %v2130_v9 = vmax.f32 %v1947_v24, %v1951_v4  ;;  %v1953_v10 = vmax.f32 %v9196_v5, 0.0 }
 0x1f7   : > { %v3045_v58 = vrot.slane %v2978_v8, 4  ;;  %2016 = vst [vmem:[#allocation5 + $0x88] sm:$0xff] %v1952_v7  ;;  %v1954_v11 = vmax.f32 %v1823_v51, 0.0  ;;  %v2946_v12 = vld [vmem:[#allocation5 + $0x58] sm:$0xf] }
 0x1f8   : > { %v2977_v13 = vld [vmem:[#allocation5 + $0x48] sm:$0xf0]  ;;  %2160 = vst [vmem:[#allocation5 + $0x60] sm:$0xff] %v2130_v9  ;;  %v2131_v14 = vmax.f32 %v1949_v36, %v1953_v10 }
 0x1f9   : > { %v3123_v15 = vmax.f32 %v2946_v12, %v3045_v58  ;;  %2018 = vst [vmem:[#allocation5 + $0x98] sm:$0xff] %v1954_v11  ;;  %v3044_v61 = vrot.slane %v2977_v13, 4  ;;  %v2569_v27 = vrot.slane %v1954_v11, 1 }
 0x1fa   : > { %v2739_v16 = vld [vmem:[#allocation5 + $0x78] sm:$0xff]  ;;  %2161 = vst [vmem:[#allocation5 + $0x70] sm:$0xff] %v2131_v14 }
 0x1fb   : > { %3155 = vst [vmem:[#allocation5 + $0x58] sm:$0xf] %v3123_v15  ;;  %v2738_v17 = vld [vmem:[#allocation5 + $0x68] sm:$0xfc]  ;;  %v2807_v18 = vrot.slane %v2739_v16, 2  ;;  %v3046_v23 = vsel %vm3037_vm15, %v3044_v61, %v3045_v58 }
 0x1fc   : > { %v2707_v20 = vld [vmem:[#allocation5 + $0x78] sm:$0x3f]  ;;  %v2806_v21 = vrot.slane %v2738_v17, 2  ;;  %v3122_v30 = vmax.f32 %v9185_v3, %v3046_v23 }
 0x1fd   : > { %v2884_v22 = vmax.f32 %v2707_v20, %v2807_v18 }
 0x1fe   : > { %v2808_v1 = vsel %vm2796_vm14, %v2806_v21, %v2807_v18  ;;  %v2499_v24 = vld [vmem:[#allocation5 + $0x88] sm:$0xfe] }
 0x1ff   : > { %v9202_v19 = vmax.f32 %v2642_v59, %v2808_v1  ;;  %2916 = vst [vmem:[#allocation5 + $0x78] sm:$0x3f] %v2884_v22  ;;  %v2568_v25 = vrot.slane %v2499_v24, 1 }
 0x200   : > { %v2468_v29 = vld [vmem:[#allocation5 + $0x98] sm:$0x7f] }
 0x201   : > { %2915 = vst [vmem:[#allocation5 + $0x68] sm:$0xff] %v9202_v19  ;;  %v2570_v6 = vsel %vm2555_vm13, %v2568_v25, %v2569_v27  ;;  %v2645_v36 = vmax.f32 %v2468_v29, %v2569_v27  ;;  %v1826_v28 = vpop.f32.mrb[20].mxu0  ;;  %v8216_v27 = vld [vmem:[%s11485_s3 + $0x40] sm:$0xff]  }
 0x202   : > { %v3200_v31 = vld [vmem:[#allocation5 + $0x58] sm:$0xff]  ;;  %v2644_v32 = vmax.f32 %v1952_v7, %v2570_v6  ;;  %v9208_v34 = vadd.f32 %v1826_v28, %v9140_v60  ;;  %v1828_v41 = vpop.f32.mrb[21].mxu0  ;;  %7458 = vmatprep.subr.bf16.mxu1 %v8216_v27  ;;  %v8230_v27 = vld [vmem:[%s11485_s3 + $0xd0] sm:$0xff]  }
 0x203   : > { %v3216_v33 = vmax.f32 %v3122_v30, %v3200_v31  ;;  %2677 = vst [vmem:[#allocation5 + $0x98] sm:$0x7f] %v2645_v36  ;;  %v1829_v35 = vadd.f32 %v1828_v41, %v9129_v40  ;;  %v1830_v37 = vpop.f32.mrb[22].mxu0  ;;  %v8217_v36 = vld [vmem:[%s11485_s3] sm:$0xff]  }
 0x204   : > { %2676 = vst [vmem:[#allocation5 + $0x88] sm:$0xff] %v2644_v32  ;;  %v1955_v26 = vmax.f32 %v9208_v34, 0.0  ;;  %v9213_v38 = vadd.f32 %v1830_v37, %v9140_v60  ;;  %v1832_v39 = vpop.f32.mrb[23].mxu0  ;;  %7459 = vmatpush3.bf16.msra.mxu1 %v8217_v36  ;;  %v8232_v36 = vld [vmem:[%s11485_s3 + $0x90] sm:$0xff]  }
 0x205   : > { %3232 = vst [vmem:[#allocation5 + $0x48] sm:$0xff] %v3216_v33  ;;  %v1956_v42 = vmax.f32 %v1829_v35, 0.0  ;;  %v1833_v43 = vadd.f32 %v1832_v39, %v9129_v40  ;;  %v8218_v33 = vld [vmem:[%s11485_s3 + $0x48] sm:$0xff]  }
 0x206   : > { %v2980_v56 = vld [vmem:[#allocation5 + $0x78] sm:$0xff]  ;;  %v2132_v44 = vmax.f32 %v1951_v4, %v1955_v26  ;;  %v1957_v45 = vmax.f32 %v9213_v38, 0.0  ;;  %7460 = vmatprep.subr.bf16.mxu1 %v8218_v33 }
 0x207   : > { %v3048_v3 = vrot.slane %v2980_v56, 4  ;;  %2020 = vst [vmem:[#allocation5 + $0xa8] sm:$0xff] %v1956_v42  ;;  %v1958_v47 = vmax.f32 %v1833_v43, 0.0  ;;  %v2948_v48 = vld [vmem:[#allocation5 + $0x78] sm:$0xf] }
 0x208   : > { %v2979_v49 = vld [vmem:[#allocation5 + $0x68] sm:$0xf0]  ;;  %2162 = vst [vmem:[#allocation5 + $0x80] sm:$0xff] %v2132_v44  ;;  %v2133_v50 = vmax.f32 %v1953_v10, %v1957_v45 }
 0x209   : > { %v3125_v53 = vmax.f32 %v2948_v48, %v3048_v3  ;;  %2022 = vst [vmem:[#allocation5 + $0xb8] sm:$0xff] %v1958_v47  ;;  %v3047_v52 = vrot.slane %v2979_v49, 4  ;;  %v2572_v7 = vrot.slane %v1958_v47, 1  ;;  %v8221_v48 = vld [vmem:[%s11485_s3 + $0x10] sm:$0xff]  }
 0x20a   : > { %v2741_v55 = vld [vmem:[#allocation5 + $0x98] sm:$0xff]  ;;  %2163 = vst [vmem:[#allocation5 + $0x90] sm:$0xff] %v2133_v50 }
 0x20b   : > { %3157 = vst [vmem:[#allocation5 + $0x78] sm:$0xf] %v3125_v53  ;;  %v2740_v57 = vld [vmem:[#allocation5 + $0x88] sm:$0xfc]  ;;  %v2810_v59 = vrot.slane %v2741_v55, 2  ;;  %v3049_v2 = vsel %vm3037_vm15, %v3047_v52, %v3048_v3  ;;  %v8220_v3 = vld [vmem:[%s11485_s3 + $0x50] sm:$0xff]  }
 0x20c   : > { %v2709_v62 = vld [vmem:[#allocation5 + $0x98] sm:$0x3f]  ;;  %v2809_v63 = vrot.slane %v2740_v57, 2  ;;  %v3124_v8 = vmax.f32 %v9202_v19, %v3049_v2 }
 0x20d   : > { %v2886_v0 = vmax.f32 %v2709_v62, %v2810_v59 }
 0x20e   : > { %v2811_v54 = vsel %vm2796_vm14, %v2809_v63, %v2810_v59  ;;  %v2501_v4 = vld [vmem:[#allocation5 + $0xa8] sm:$0xfe] }
 0x20f   : > { %v9219_v5 = vmax.f32 %v2644_v32, %v2811_v54  ;;  %2918 = vst [vmem:[#allocation5 + $0x98] sm:$0x3f] %v2886_v0  ;;  %v2571_v46 = vrot.slane %v2501_v4, 1  ;;  %v8222_v54 = vld [vmem:[%s11485_s3 + $0xc0] sm:$0xff]   ;;  %v8223_v4 = vld [vmem:[%s11485_s3 + $0x58] sm:$0xff]  }
 0x210   : > { %v2470_v51 = vld [vmem:[#allocation5 + $0xb8] sm:$0x7f]  ;;  %7570 = vmatprep.subr.bf16.mxu0 %v8222_v54 }
 0x211   : > { %2917 = vst [vmem:[#allocation5 + $0x88] sm:$0xff] %v9219_v5  ;;  %v2573_v9 = vsel %vm2555_vm13, %v2571_v46, %v2572_v7  ;;  %v2647_v10 = vmax.f32 %v2470_v51, %v2572_v7  ;;  %v1836_v58 = vpop.f32.mrb[24].mxu0  ;;  %v8224_v51 = vld [vmem:[%s11485_s3 + $0x80] sm:$0xff]   ;;  %v8242_v54 = vld [vmem:[%s11485_s3 + $0xe8] sm:$0xff]  }
 0x212   : > { %v3201_v11 = vld [vmem:[#allocation5 + $0x78] sm:$0xff]  ;;  %v2646_v12 = vmax.f32 %v1956_v42, %v2573_v9  ;;  %v9225_v13 = vadd.f32 %v1836_v58, %v9140_v60  ;;  %v1838_v14 = vpop.f32.mrb[25].mxu0  ;;  %7571 = vmatpush3.bf16.msra.mxu0 %v8224_v51 }
 0x213   : > { %v3217_v15 = vmax.f32 %v3124_v8, %v3201_v11  ;;  %2679 = vst [vmem:[#allocation5 + $0xb8] sm:$0x7f] %v2647_v10  ;;  %v1839_v61 = vadd.f32 %v1838_v14, %v9129_v40  ;;  %v1840_v16 = vpop.f32.mrb[26].mxu0  ;;  %v8225_v8 = vld [vmem:[%s11485_s3 + $0x18] sm:$0xff]   ;;  %v8243_v51 = vld [vmem:[%s11485_s3 + $0xa8] sm:$0xff]  }
 0x214   : > { %2678 = vst [vmem:[#allocation5 + $0xa8] sm:$0xff] %v2646_v12  ;;  %v1959_v17 = vmax.f32 %v9225_v13, 0.0  ;;  %v9230_v18 = vadd.f32 %v1840_v16, %v9140_v60  ;;  %v1842_v20 = vpop.f32.mrb[27].mxu0  ;;  %v8226_v16 = vld [vmem:[%s11485_s3 + $0xc8] sm:$0xff]  }
 0x215   : > { %3233 = vst [vmem:[#allocation5 + $0x68] sm:$0xff] %v3217_v15  ;;  %v1960_v21 = vmax.f32 %v1839_v61, 0.0  ;;  %v1843_v22 = vadd.f32 %v1842_v20, %v9129_v40  ;;  %v8227_v20 = vld [vmem:[%s11485_s3 + $0x60] sm:$0xff]   ;;  %7572 = vmatprep.subr.bf16.mxu0 %v8226_v16 }
 0x216   : > { %v2982_v23 = vld [vmem:[#allocation5 + $0x98] sm:$0xff]  ;;  %v9235_v1 = vmax.f32 %v1955_v26, %v1959_v17  ;;  %v1961_v24 = vmax.f32 %v9230_v18, 0.0 }
 0x217   : > { %v3051_v19 = vrot.slane %v2982_v23, 4  ;;  %2024 = vst [vmem:[#allocation5 + $0xc8] sm:$0xff] %v1960_v21  ;;  %v1962_v25 = vmax.f32 %v1843_v22, 0.0  ;;  %v2950_v29 = vld [vmem:[#allocation5 + $0x98] sm:$0xf]  ;;  %v8229_v22 = vld [vmem:[%s11485_s3 + $0x20] sm:$0xff]  }
 0x218   : > { %v2981_v30 = vld [vmem:[#allocation5 + $0x88] sm:$0xf0]  ;;  %v2135_v6 = vmax.f32 %v1957_v45, %v1961_v24  ;;  %v8219_v26 = vld [vmem:[%s11485_s3 + $0x8] sm:$0xff]  }
 0x219   : > { %v3127_v28 = vmax.f32 %v2950_v29, %v3051_v19  ;;  %2026 = vst [vmem:[#allocation5 + $0xd8] sm:$0xff] %v1962_v25  ;;  %v3050_v31 = vrot.slane %v2981_v30, 4  ;;  %7461 = vmatpush3.bf16.msra.mxu1 %v8219_v26  ;;  %v2575_v45 = vrot.slane %v1962_v25, 1  ;;  %v8231_v29 = vld [vmem:[%s11485_s3 + $0x68] sm:$0xff]   ;;  %v8234_v26 = vld [vmem:[%s11485_s3 + $0xd8] sm:$0xff]  }
 0x21a   : > { %v2743_v32 = vld [vmem:[#allocation5 + $0xb8] sm:$0xff]  ;;  %2165 = vst [vmem:[#allocation5 + $0xb0] sm:$0xff] %v2135_v6  ;;  %7462 = vmatprep.subr.bf16.mxu1 %v8220_v3 }
 0x21b   : > { %3159 = vst [vmem:[#allocation5 + $0x98] sm:$0xf] %v3127_v28  ;;  %v2742_v34 = vld [vmem:[#allocation5 + $0xa8] sm:$0xfc]  ;;  %v2813_v41 = vrot.slane %v2743_v32, 2  ;;  %v3052_v39 = vsel %vm3037_vm15, %v3050_v31, %v3051_v19  ;;  %v8233_v28 = vld [vmem:[%s11485_s3 + $0x28] sm:$0xff]  }
 0x21c   : > { %v2711_v35 = vld [vmem:[#allocation5 + $0xb8] sm:$0x3f]  ;;  %v2812_v37 = vrot.slane %v2742_v34, 2  ;;  %v3126_v49 = vmax.f32 %v9219_v5, %v3052_v39 }
 0x21d   : > { %v2888_v38 = vmax.f32 %v2711_v35, %v2813_v41  ;;  %7463 = vmatpush3.bf16.msra.mxu1 %v8221_v48 }
 0x21e   : > { %v2814_v42 = vsel %vm2796_vm14, %v2812_v37, %v2813_v41  ;;  %v2503_v43 = vld [vmem:[#allocation5 + $0xc8] sm:$0xfe]  ;;  %7464 = vmatprep.subr.bf16.mxu1 %v8223_v4 }
 0x21f   : > { %v9254_v56 = vmax.f32 %v2646_v12, %v2814_v42  ;;  %2920 = vst [vmem:[#allocation5 + $0xb8] sm:$0x3f] %v2888_v38  ;;  %v2574_v44 = vrot.slane %v2503_v43, 1  ;;  %v8235_v38 = vld [vmem:[%s11485_s3 + $0x70] sm:$0xff]   ;;  %v8236_v42 = vld [vmem:[%s11485_s3 + $0x98] sm:$0xff]  }
 0x220   : > { %v2472_v47 = vld [vmem:[#allocation5 + $0xd8] sm:$0x7f]  ;;  %v8237_v43 = vld [vmem:[%s11485_s3 + $0x30] sm:$0xff]  }
 0x221   : > { %2919 = vst [vmem:[#allocation5 + $0xa8] sm:$0xff] %v9254_v56  ;;  %v2576_v50 = vsel %vm2555_vm13, %v2574_v44, %v2575_v45  ;;  %v2649_v53 = vmax.f32 %v2472_v47, %v2575_v45  ;;  %v1846_v52 = vpop.f32.mrb[28].mxu0  ;;  %7465 = vmatpush3.bf16.msra.mxu1 %v8225_v8 }
 0x222   : > { %v3202_v55 = vld [vmem:[#allocation5 + $0x98] sm:$0xff]  ;;  %v2648_v57 = vmax.f32 %v1960_v21, %v2576_v50  ;;  %v9266_v59 = vadd.f32 %v1846_v52, %v9140_v60  ;;  %v1848_v62 = vpop.f32.mrb[29].mxu0  ;;  %7466 = vmatprep.subr.bf16.mxu1 %v8227_v20  ;;  %v8238_v50 = vld [vmem:[%s11485_s3 + $0xe0] sm:$0xff]   ;;  %v8241_v52 = vld [vmem:[%s11485_s3 + $0x38] sm:$0xff]  }
 0x223   : > { %v3218_v63 = vmax.f32 %v3126_v49, %v3202_v55  ;;  %2681 = vst [vmem:[#allocation5 + $0xd8] sm:$0x7f] %v2649_v53  ;;  %v9269_v0 = vadd.f32 %v1848_v62, %v9129_v40  ;;  %v1850_v2 = vpop.f32.mrb[30].mxu0  ;;  %v8240_v53 = vld [vmem:[%s11485_s3 + $0xa0] sm:$0xff]   ;;  %v3440_v55 = vld [vmem:[#allocation3 + $0x1] sm:$0xff] }
 0x224   : > { %2680 = vst [vmem:[#allocation5 + $0xc8] sm:$0xff] %v2648_v57  ;;  %v1963_v5 = vmax.f32 %v9266_v59, 0.0  ;;  %v9279_v46 = vadd.f32 %v1850_v2, %v9140_v60  ;;  %v1852_v7 = vpop.f32.mrb[31].mxu0  ;;  %v8245_v20 = vld [vmem:[%s11485_s3 + $0xf0] sm:$0xff]  }
 0x225   : > { %3234 = vst [vmem:[#allocation5 + $0x88] sm:$0xff] %v3218_v63  ;;  %v1964_v9 = vmax.f32 %v9269_v0, 0.0  ;;  %v1853_v10 = vadd.f32 %v1852_v7, %v9129_v40  ;;  %7467 = vmatpush3.bf16.msra.mxu1 %v8229_v22  ;;  %v3953_v7 = vld [vmem:[#allocation6] sm:$0xff] }
 0x226   : > { %v2984_v58 = vld [vmem:[#allocation5 + $0xb8] sm:$0xff]  ;;  %v9293_v11 = vmax.f32 %v1959_v17, %v1963_v5  ;;  %v1965_v12 = vmax.f32 %v9279_v46, 0.0  ;;  %7468 = vmatprep.subr.bf16.mxu1 %v8231_v29 }
 0x227   : > { %v2952_v14 = vld [vmem:[#allocation5 + $0xb8] sm:$0xf]  ;;  %v3054_v15 = vrot.slane %v2984_v58, 4  ;;  %2028 = vst [vmem:[#allocation5 + $0xe8] sm:$0xff] %v1964_v9  ;;  %v1966_v61 = vmax.f32 %v1853_v10, 0.0 }
 0x228   : > { %v2983_v21 = vld [vmem:[#allocation5 + $0xa8] sm:$0xf0]  ;;  %v2137_v13 = vmax.f32 %v1961_v24, %v1965_v12  ;;  %v8228_v17 = vld [vmem:[%s11485_s3 + $0x88] sm:$0xff]  }
 0x229   : > { %v3129_v23 = vmax.f32 %v2952_v14, %v3054_v15  ;;  %2030 = vst [vmem:[#allocation5 + $0xf8] sm:$0xff] %v1966_v61  ;;  %v3053_v19 = vrot.slane %v2983_v21, 4  ;;  %7573 = vmatpush3.bf16.msra.mxu0 %v8228_v17  ;;  %7469 = vmatpush3.bf16.msra.mxu1 %v8233_v28  ;;  %v2578_v37 = vrot.slane %v1966_v61, 1 }
 0x22a   : > { %v2745_v25 = vld [vmem:[#allocation5 + $0xd8] sm:$0xff]  ;;  %2167 = vst [vmem:[#allocation5 + $0xd0] sm:$0xff] %v2137_v13  ;;  %7574 = vmatprep.subr.bf16.mxu0 %v8230_v27  ;;  %7470 = vmatprep.subr.bf16.mxu1 %v8235_v38 }
 0x22b   : > { %3161 = vst [vmem:[#allocation5 + $0xb8] sm:$0xf] %v3129_v23  ;;  %v2744_v18 = vld [vmem:[#allocation5 + $0xc8] sm:$0xfc]  ;;  %v2816_v24 = vrot.slane %v2745_v25, 2  ;;  %v3055_v32 = vsel %vm3037_vm15, %v3053_v19, %v3054_v15  ;;  %v8247_v23 = vld [vmem:[%s11485_s3 + $0xb0] sm:$0xff]  }
 0x22c   : > { %v2713_v30 = vld [vmem:[#allocation5 + $0xd8] sm:$0x3f]  ;;  %v2815_v6 = vrot.slane %v2744_v18, 2  ;;  %v3128_v44 = vmax.f32 %v9254_v56, %v3055_v32  ;;  %v8239_v56 = vld [vmem:[%s11485_s3 + $0x78] sm:$0xff]  }
 0x22d   : > { %v2890_v31 = vmax.f32 %v2713_v30, %v2816_v24  ;;  %7575 = vmatpush3.bf16.msra.mxu0 %v8232_v36  ;;  %7471 = vmatpush3.bf16.msra.mxu1 %v8237_v43  ;;  %v8248_v32 = vld [vmem:[%s11485_s3 + $0xf8] sm:$0xff]  }
 0x22e   : > { %v2817_v34 = vsel %vm2796_vm14, %v2815_v6, %v2816_v24  ;;  %v2505_v41 = vld [vmem:[#allocation5 + $0xe8] sm:$0xfe]  ;;  %7576 = vmatprep.subr.bf16.mxu0 %v8234_v26  ;;  %7472 = vmatprep.subr.bf16.mxu1 %v8239_v56 }
 0x22f   : > { %v9326_v33 = vmax.f32 %v2648_v57, %v2817_v34  ;;  %2922 = vst [vmem:[#allocation5 + $0xd8] sm:$0x3f] %v2890_v31  ;;  %v2577_v35 = vrot.slane %v2505_v41, 1  ;;  %v3441_v57 = vld [vmem:[#allocation3 + $0x9] sm:$0xff] }
 0x230   : > { %v2474_v39 = vld [vmem:[#allocation5 + $0xf8] sm:$0x7f]  ;;  %v3472_v63 = vpack.c.bf16 %v3441_v57, %v3440_v55  ;;  %v8249_v41 = vld [vmem:[%s11485_s3 + $0xb8] sm:$0xff]  }
 0x231   : > { %2921 = vst [vmem:[#allocation5 + $0xc8] sm:$0xff] %v9326_v33  ;;  %v2579_v45 = vsel %vm2555_vm13, %v2577_v35, %v2578_v37  ;;  %v2651_v3 = vmax.f32 %v2474_v39, %v2578_v37  ;;  %7577 = vmatpush3.bf16.msra.mxu0 %v8236_v42  ;;  %7473 = vmatpush3.bf16.msra.mxu1 %v8241_v52  ;;  %v3504_v39 = vld [vmem:[#allocation3 + $0x2] sm:$0xff] }
 0x232   : > { %v3203_v47 = vld [vmem:[#allocation5 + $0xb8] sm:$0xff]  ;;  %v2650_v48 = vmax.f32 %v1964_v9, %v2579_v45  ;;  %7578 = vmatprep.subr.bf16.mxu0 %v8238_v50  ;;  %4711 = vmatprep.mubr.bf16.mxu1 %v3472_v63 }
 0x233   : > { %v3219_v49 = vmax.f32 %v3128_v44, %v3203_v47  ;;  %2683 = vst [vmem:[#allocation5 + $0xf8] sm:$0x7f] %v2651_v3 }
 0x234   : > { %2682 = vst [vmem:[#allocation5 + $0xe8] sm:$0xff] %v2650_v48  ;;  %4712 = vmatmul.mubr.bf16.vlgmr.msra.gmra.mrb[16].mxu1 %v3953_v7 }
 0x235   : > { %3235 = vst [vmem:[#allocation5 + $0xa8] sm:$0xff] %v3219_v49  ;;  %7579 = vmatpush3.bf16.msra.mxu0 %v8240_v53 }
 0x236   : > { %v2986_v62 = vld [vmem:[#allocation5 + $0xd8] sm:$0xff]  ;;  %7580 = vmatprep.subr.bf16.mxu0 %v8242_v54 }
 0x237   : > { %v2954_v0 = vld [vmem:[#allocation5 + $0xd8] sm:$0xf]  ;;  %v3057_v2 = vrot.slane %v2986_v62, 4 }
 0x238   : > { %v2985_v4 = vld [vmem:[#allocation5 + $0xc8] sm:$0xf0] }
 0x239   : > { %v3131_v8 = vmax.f32 %v2954_v0, %v3057_v2  ;;  %v3056_v9 = vrot.slane %v2985_v4, 4  ;;  %7581 = vmatpush3.bf16.msra.mxu0 %v8243_v51 }
 0x23a   : > { %v2747_v10 = vld [vmem:[#allocation5 + $0xf8] sm:$0xff]  ;;  %v1856_v58 = vpop.f32.mrb[32].mxu0  ;;  %7582 = vmatprep.subr.bf16.mxu0 %v8245_v20 }
 0x23b   : > { %3163 = vst [vmem:[#allocation5 + $0xd8] sm:$0xf] %v3131_v8  ;;  %v2746_v14 = vld [vmem:[#allocation5 + $0xe8] sm:$0xfc]  ;;  %v2819_v15 = vrot.slane %v2747_v10, 2  ;;  %v9362_v61 = vadd.f32 %v1856_v58, %v9140_v60  ;;  %v1858_v16 = vpop.f32.mrb[33].mxu0  ;;  %v3058_v27 = vsel %vm3037_vm15, %v3056_v9, %v3057_v2 }
 0x23c   : > { %v2715_v21 = vld [vmem:[#allocation5 + $0xf8] sm:$0x3f]  ;;  %v2818_v13 = vrot.slane %v2746_v14, 2  ;;  %v1859_v17 = vadd.f32 %v1858_v16, %v9129_v40  ;;  %v1860_v22 = vpop.f32.mrb[34].mxu0  ;;  %v3130_v35 = vmax.f32 %v9326_v33, %v3058_v27  ;;  %v3505_v33 = vld [vmem:[#allocation3 + $0xa] sm:$0xff] }
 0x23d   : > { %v2892_v19 = vmax.f32 %v2715_v21, %v2819_v15  ;;  %v1967_v25 = vmax.f32 %v9362_v61, 0.0  ;;  %v9373_v18 = vadd.f32 %v1860_v22, %v9140_v60  ;;  %v1862_v24 = vpop.f32.mrb[35].mxu0  ;;  %7583 = vmatpush3.bf16.msra.mxu0 %v8247_v23  ;;  %v8252_v61 = vld [vmem:[%s11485_s3 + $0x150] sm:$0xff]  }
 0x23e   : > { %v2820_v29 = vsel %vm2796_vm14, %v2818_v13, %v2819_v15  ;;  %v1968_v30 = vmax.f32 %v1859_v17, 0.0  ;;  %v1863_v6 = vadd.f32 %v1862_v24, %v9129_v40  ;;  %7584 = vmatprep.subr.bf16.mxu0 %v8248_v32 }
 0x23f   : > { %v2891_v36 = vmax.f32 %v2650_v48, %v2820_v29  ;;  %2924 = vst [vmem:[#allocation5 + $0xf8] sm:$0x3f] %v2892_v19  ;;  %v9382_v28 = vmax.f32 %v1963_v5, %v1967_v25  ;;  %v1969_v31 = vmax.f32 %v9373_v18, 0.0  ;;  %v8253_v18 = vld [vmem:[%s11485_s3 + $0x110] sm:$0xff]  }
 0x240   : > { %2032 = vst [vmem:[#allocation5 + $0x108] sm:$0xff] %v1968_v30  ;;  %v1970_v34 = vmax.f32 %v1863_v6, 0.0 }
 0x241   : > { %2923 = vst [vmem:[#allocation5 + $0xe8] sm:$0xff] %v2891_v36  ;;  %v9396_v59 = vmax.f32 %v1965_v12, %v1969_v31  ;;  %v9398_v5 = vpop.f32.mrb[0].mxu1  ;;  %v9402_v37 = vmax.f32 %v9235_v1, %v9382_v28  ;;  %7585 = vmatpush3.bf16.msra.mxu0 %v8249_v41  ;;  %v3536_v12 = vpack.c.bf16 %v3505_v33, %v3504_v39  ;;  %v8244_v39 = vld [vmem:[%s11485_s3 + $0x140] sm:$0xff]  }
 0x242   : > { %v3204_v26 = vld [vmem:[#allocation5 + $0xd8] sm:$0xff]  ;;  %2034 = vst [vmem:[#allocation5 + $0x118] sm:$0xff] %v1970_v34  ;;  %v1898_v38 = vpop.f32.mrb[1].mxu1  ;;  %v2581_v55 = vrot.slane %v1970_v34, 1  ;;  %v8246_v33 = vld [vmem:[%s11485_s3 + $0x100] sm:$0xff]   ;;  %7682 = vmatprep.subr.bf16.mxu1 %v8244_v39 }
 0x243   : > { %v3220_v42 = vmax.f32 %v3130_v35, %v3204_v26  ;;  %v1899_v43 = vadd.f32 %v1898_v38, %v9129_v40  ;;  %v9405_v44 = vpop.f32.mrb[2].mxu1  ;;  %3552 = vst [vmem:[#allocation6 + $0x10] sm:$0xff] %v3536_v12  ;;  %7683 = vmatpush3.bf16.msra.mxu1 %v8246_v33 }
 0x244   : > { %v1902_v46 = vpop.f32.mrb[3].mxu1 }
 0x245   : > { %3236 = vst [vmem:[#allocation5 + $0xc8] sm:$0xff] %v3220_v42  ;;  %v1984_v45 = vmax.f32 %v1899_v43, 0.0  ;;  %v1903_v3 = vadd.f32 %v1902_v46, %v9129_v40  ;;  %v8250_v42 = vld [vmem:[%s11485_s3 + $0x148] sm:$0xff]  }
 0x246   : > { %v2988_v47 = vld [vmem:[#allocation5 + $0xf8] sm:$0xff]  ;;  %7684 = vmatprep.subr.bf16.mxu1 %v8250_v42 }
 0x247   : > { %v3060_v48 = vrot.slane %v2988_v47, 4  ;;  %v2507_v49 = vld [vmem:[#allocation5 + $0x108] sm:$0xfe]  ;;  %2048 = vst [vmem:[#allocation5 + $0x188] sm:$0xff] %v1984_v45  ;;  %v1986_v50 = vmax.f32 %v1903_v3, 0.0 }
 0x248   : > { %v2956_v56 = vld [vmem:[#allocation5 + $0xf8] sm:$0xf]  ;;  %v2987_v53 = vld [vmem:[#allocation5 + $0xe8] sm:$0xf0]  ;;  %v2580_v52 = vrot.slane %v2507_v49, 1 }
 0x249   : > { %v3133_v57 = vmax.f32 %v2956_v56, %v3060_v48  ;;  %v2476_v62 = vld [vmem:[#allocation5 + $0x118] sm:$0x7f]  ;;  %2050 = vst [vmem:[#allocation5 + $0x198] sm:$0xff] %v1986_v50  ;;  %v3059_v63 = vrot.slane %v2987_v53, 4  ;;  %v2593_v8 = vrot.slane %v1986_v50, 1 }
 0x24a   : > { %v2582_v0 = vsel %vm2555_vm13, %v2580_v52, %v2581_v55  ;;  %v2653_v2 = vmax.f32 %v2476_v62, %v2581_v55  ;;  %v8251_v52 = vld [vmem:[%s11485_s3 + $0x108] sm:$0xff]  }
 0x24b   : > { %3165 = vst [vmem:[#allocation5 + $0xf8] sm:$0xf] %v3133_v57  ;;  %v2652_v54 = vmax.f32 %v1968_v30, %v2582_v0  ;;  %v3061_v4 = vsel %vm3037_vm15, %v3059_v63, %v3060_v48  ;;  %v9454_v57 = vadd.f32 %v9398_v5, %v9140_v60  ;;  %7685 = vmatpush3.bf16.msra.mxu1 %v8251_v52  ;;  %v8255_v52 = vld [vmem:[%s11485_s3 + $0x118] sm:$0xff]  }
 0x24c   : > { %2685 = vst [vmem:[#allocation5 + $0x118] sm:$0x7f] %v2653_v2  ;;  %v3132_v10 = vmax.f32 %v2891_v36, %v3061_v4  ;;  %v9474_v4 = vadd.f32 %v9405_v44, %v9140_v60  ;;  %7686 = vmatprep.subr.bf16.mxu1 %v8252_v61 }
 0x24d   : > { %2684 = vst [vmem:[#allocation5 + $0x108] sm:$0xff] %v2652_v54 }
 0x24e   : > { %v2515_v7 = vld [vmem:[#allocation5 + $0x188] sm:$0xfe] }
 0x24f   : > { %v2592_v51 = vrot.slane %v2515_v7, 1  ;;  %7687 = vmatpush3.bf16.msra.mxu1 %v8253_v18 }
 0x250   : > { %v2484_v9 = vld [vmem:[#allocation5 + $0x198] sm:$0x7f] }
 0x251   : > { %v2594_v58 = vsel %vm2555_vm13, %v2592_v51, %v2593_v8  ;;  %v2661_v14 = vmax.f32 %v2484_v9, %v2593_v8 }
 0x252   : > { %v9411_v15 = vld [vmem:[#allocation5 + $0xf8] sm:$0xff]  ;;  %v2660_v16 = vmax.f32 %v1984_v45, %v2594_v58 }
 0x253   : > { %v3221_v20 = vmax.f32 %v3132_v10, %v9411_v15  ;;  %v2749_v21 = vld [vmem:[#allocation5 + $0x118] sm:$0xff]  ;;  %2693 = vst [vmem:[#allocation5 + $0x198] sm:$0x7f] %v2661_v14 }
 0x254   : > { %v2748_v13 = vld [vmem:[#allocation5 + $0x108] sm:$0xfc]  ;;  %v2822_v17 = vrot.slane %v2749_v21, 2  ;;  %2692 = vst [vmem:[#allocation5 + $0x188] sm:$0xff] %v2660_v16  ;;  %v2717_v22 = vld [vmem:[#allocation5 + $0x118] sm:$0x3f] }
 0x255   : > { %3237 = vst [vmem:[#allocation5 + $0xe8] sm:$0xff] %v3221_v20  ;;  %v2821_v23 = vrot.slane %v2748_v13, 2  ;;  %v8254_v21 = vld [vmem:[%s11485_s3 + $0x158] sm:$0xff]   ;;  %v1985_v13 = vmax.f32 %v9474_v4, 0.0 }
 0x256   : > { %v2894_v19 = vmax.f32 %v2717_v22, %v2822_v17  ;;  %7688 = vmatprep.subr.bf16.mxu1 %v8254_v21 }
 0x257   : > { %v2823_v24 = vsel %vm2796_vm14, %v2821_v23, %v2822_v17  ;;  %7689 = vmatpush3.bf16.msra.mxu1 %v8255_v52 }
 0x258   : > { %v9415_v27 = vmax.f32 %v2652_v54, %v2823_v24  ;;  %2926 = vst [vmem:[#allocation5 + $0x118] sm:$0x3f] %v2894_v19 }
 0x25a   : > { %2925 = vst [vmem:[#allocation5 + $0x108] sm:$0xff] %v9415_v27  ;;  %v2757_v29 = vld [vmem:[#allocation5 + $0x198] sm:$0xff]  ;;  %v1866_v30 = vpop.f32.mrb[36].mxu0 }
 0x25b   : > { %v2725_v6 = vld [vmem:[#allocation5 + $0x198] sm:$0x3f]  ;;  %v2756_v36 = vld [vmem:[#allocation5 + $0x188] sm:$0xfc]  ;;  %v2834_v32 = vrot.slane %v2757_v29, 2  ;;  %v9419_v34 = vadd.f32 %v1866_v30, %v9140_v60  ;;  %v1868_v41 = vpop.f32.mrb[37].mxu0 }
 0x25c   : > { %v2833_v35 = vrot.slane %v2756_v36, 2  ;;  %v9422_v26 = vadd.f32 %v1868_v41, %v9129_v40  ;;  %v1870_v38 = vpop.f32.mrb[38].mxu0 }
 0x25d   : > { %v2902_v43 = vmax.f32 %v2725_v6, %v2834_v32  ;;  %v1971_v46 = vmax.f32 %v9419_v34, 0.0  ;;  %v9435_v12 = vadd.f32 %v1870_v38, %v9140_v60  ;;  %v1872_v45 = vpop.f32.mrb[39].mxu0 }
 0x25e   : > { %v2835_v3 = vsel %vm2796_vm14, %v2833_v35, %v2834_v32  ;;  %v1972_v47 = vmax.f32 %v9422_v26, 0.0  ;;  %v1873_v48 = vadd.f32 %v1872_v45, %v9129_v40 }
 0x25f   : > { %v2990_v49 = vld [vmem:[#allocation5 + $0x118] sm:$0xff]  ;;  %v9440_v50 = vmax.f32 %v2660_v16, %v2835_v3  ;;  %2934 = vst [vmem:[#allocation5 + $0x198] sm:$0x3f] %v2902_v43  ;;  %v1973_v56 = vmax.f32 %v9435_v12, 0.0  ;;  %v9447_v53 = vmax.f32 %v1967_v25, %v1971_v46 }
 0x260   : > { %v3063_v55 = vrot.slane %v2990_v49, 4  ;;  %2036 = vst [vmem:[#allocation5 + $0x128] sm:$0xff] %v1972_v47  ;;  %v1974_v62 = vmax.f32 %v1873_v48, 0.0  ;;  %v2958_v25 = vld [vmem:[#allocation5 + $0x118] sm:$0xf] }
 0x261   : > { %v2989_v63 = vld [vmem:[#allocation5 + $0x108] sm:$0xf0]  ;;  %2933 = vst [vmem:[#allocation5 + $0x188] sm:$0xff] %v9440_v50  ;;  %v1906_v0 = vpop.f32.mrb[4].mxu1  ;;  %v9464_v2 = vmax.f32 %v9293_v11, %v9447_v53  ;;  %v9470_v5 = vmax.f32 %v1969_v31, %v1973_v56  ;;  %v1983_v31 = vmax.f32 %v9454_v57, 0.0 }
 0x262   : > { %v3135_v54 = vmax.f32 %v2958_v25, %v3063_v55  ;;  %2038 = vst [vmem:[#allocation5 + $0x138] sm:$0xff] %v1974_v62  ;;  %v9477_v7 = vadd.f32 %v1906_v0, %v9140_v60  ;;  %v1908_v51 = vpop.f32.mrb[5].mxu1  ;;  %v3062_v8 = vrot.slane %v2989_v63, 4  ;;  %v2584_v41 = vrot.slane %v1974_v62, 1 }
 0x263   : > { %v1909_v9 = vadd.f32 %v1908_v51, %v9129_v40  ;;  %v1910_v10 = vpop.f32.mrb[6].mxu1 }
 0x264   : > { %3167 = vst [vmem:[#allocation5 + $0x118] sm:$0xf] %v3135_v54  ;;  %v1987_v44 = vmax.f32 %v9477_v7, 0.0  ;;  %v9486_v58 = vadd.f32 %v1910_v10, %v9140_v60  ;;  %v1912_v14 = vpop.f32.mrb[7].mxu1  ;;  %v3064_v19 = vsel %vm3037_vm15, %v3062_v8, %v3063_v55 }
 0x265   : > { %v1988_v16 = vmax.f32 %v1909_v9, 0.0  ;;  %v1913_v20 = vadd.f32 %v1912_v14, %v9129_v40  ;;  %v3134_v33 = vmax.f32 %v9415_v27, %v3064_v19 }
 0x266   : > { %v2998_v17 = vld [vmem:[#allocation5 + $0x198] sm:$0xff]  ;;  %v1989_v22 = vmax.f32 %v9486_v58, 0.0  ;;  %v9498_v23 = vmax.f32 %v1983_v31, %v1987_v44 }
 0x267   : > { %v3075_v24 = vrot.slane %v2998_v17, 4  ;;  %v2509_v29 = vld [vmem:[#allocation5 + $0x128] sm:$0xfe]  ;;  %2052 = vst [vmem:[#allocation5 + $0x1a8] sm:$0xff] %v1988_v16  ;;  %v1990_v30 = vmax.f32 %v1913_v20, 0.0  ;;  %v8259_v58 = vld [vmem:[%s11485_s3 + $0x128] sm:$0xff]  }
 0x268   : > { %v2966_v6 = vld [vmem:[#allocation5 + $0x198] sm:$0xf]  ;;  %v2997_v36 = vld [vmem:[#allocation5 + $0x188] sm:$0xf0]  ;;  %v2583_v32 = vrot.slane %v2509_v29, 1  ;;  %v9505_v35 = vmax.f32 %v1985_v13, %v1989_v22 }
 0x269   : > { %v3143_v38 = vmax.f32 %v2966_v6, %v3075_v24  ;;  %v2478_v39 = vld [vmem:[#allocation5 + $0x138] sm:$0x7f]  ;;  %2054 = vst [vmem:[#allocation5 + $0x1b8] sm:$0xff] %v1990_v30  ;;  %v3074_v42 = vrot.slane %v2997_v36, 4  ;;  %v2596_v61 = vrot.slane %v1990_v30, 1 }
 0x26a   : > { %v2585_v43 = vsel %vm2555_vm13, %v2583_v32, %v2584_v41  ;;  %v2655_v45 = vmax.f32 %v2478_v39, %v2584_v41  ;;  %v8257_v39 = vld [vmem:[%s11485_s3 + $0x120] sm:$0xff]  }
 0x26b   : > { %v9509_v3 = vld [vmem:[#allocation5 + $0x118] sm:$0xff]  ;;  %3175 = vst [vmem:[#allocation5 + $0x198] sm:$0xf] %v3143_v38  ;;  %v2654_v48 = vmax.f32 %v1972_v47, %v2585_v43  ;;  %v3076_v27 = vsel %vm3037_vm15, %v3074_v42, %v3075_v24 }
 0x26c   : > { %v3222_v49 = vmax.f32 %v3134_v33, %v9509_v3  ;;  %2687 = vst [vmem:[#allocation5 + $0x138] sm:$0x7f] %v2655_v45  ;;  %v3142_v63 = vmax.f32 %v9440_v50, %v3076_v27  ;;  %v8256_v50 = vld [vmem:[%s11485_s3 + $0x160] sm:$0xff]  }
 0x26d   : > { %2686 = vst [vmem:[#allocation5 + $0x128] sm:$0xff] %v2654_v48  ;;  %7690 = vmatprep.subr.bf16.mxu1 %v8256_v50 }
 0x26e   : > { %3238 = vst [vmem:[#allocation5 + $0x108] sm:$0xff] %v3222_v49  ;;  %v2517_v55 = vld [vmem:[#allocation5 + $0x1a8] sm:$0xfe]  ;;  %7691 = vmatpush3.bf16.msra.mxu1 %v8257_v39 }
 0x26f   : > { %v2595_v62 = vrot.slane %v2517_v55, 1 }
 0x270   : > { %v2486_v25 = vld [vmem:[#allocation5 + $0x1b8] sm:$0x7f] }
 0x271   : > { %v2597_v26 = vsel %vm2555_vm13, %v2595_v62, %v2596_v61  ;;  %v2663_v47 = vmax.f32 %v2486_v25, %v2596_v61 }
 0x272   : > { %v9520_v0 = vld [vmem:[#allocation5 + $0x198] sm:$0xff]  ;;  %v2662_v54 = vmax.f32 %v1988_v16, %v2597_v26  ;;  %v9555_v26 = vld [vmem:[#allocation5 + $0x60] sm:$0xff] }
 0x273   : > { %v3226_v51 = vmax.f32 %v3142_v63, %v9520_v0  ;;  %v2751_v8 = vld [vmem:[#allocation5 + $0x138] sm:$0xff]  ;;  %2695 = vst [vmem:[#allocation5 + $0x1b8] sm:$0x7f] %v2663_v47 }
 0x274   : > { %v2750_v9 = vld [vmem:[#allocation5 + $0x128] sm:$0xfc]  ;;  %v2825_v10 = vrot.slane %v2751_v8, 2  ;;  %2694 = vst [vmem:[#allocation5 + $0x1a8] sm:$0xff] %v2662_v54  ;;  %v2719_v18 = vld [vmem:[#allocation5 + $0x138] sm:$0x3f]  ;;  %v2247_v8 = vmax.f32 %v9555_v26, %v9235_v1 }
 0x275   : > { %3242 = vst [vmem:[#allocation5 + $0x188] sm:$0xff] %v3226_v51  ;;  %v2824_v14 = vrot.slane %v2750_v9, 2 }
 0x276   : > { %v2896_v20 = vmax.f32 %v2719_v18, %v2825_v10 }
 0x277   : > { %v2826_v21 = vsel %vm2796_vm14, %v2824_v14, %v2825_v10 }
 0x278   : > { %v9527_v17 = vmax.f32 %v2654_v48, %v2826_v21  ;;  %2928 = vst [vmem:[#allocation5 + $0x138] sm:$0x3f] %v2896_v20 }
 0x27a   : > { %2927 = vst [vmem:[#allocation5 + $0x128] sm:$0xff] %v9527_v17  ;;  %v2759_v16 = vld [vmem:[#allocation5 + $0x1b8] sm:$0xff]  ;;  %v1876_v19 = vpop.f32.mrb[40].mxu0 }
 0x27b   : > { %v2758_v24 = vld [vmem:[#allocation5 + $0x1a8] sm:$0xfc]  ;;  %v2837_v29 = vrot.slane %v2759_v16, 2  ;;  %v9531_v30 = vadd.f32 %v1876_v19, %v9140_v60  ;;  %v1878_v6 = vpop.f32.mrb[41].mxu0  ;;  %v2727_v36 = vld [vmem:[#allocation5 + $0x1b8] sm:$0x3f] }
 0x27c   : > { %v2836_v32 = vrot.slane %v2758_v24, 2  ;;  %v9534_v41 = vadd.f32 %v1878_v6, %v9129_v40  ;;  %v1880_v38 = vpop.f32.mrb[42].mxu0  ;;  %v8258_v24 = vld [vmem:[%s11485_s3 + $0x168] sm:$0xff]  }
 0x27d   : > { %v2904_v33 = vmax.f32 %v2727_v36, %v2837_v29  ;;  %v1975_v42 = vmax.f32 %v9531_v30, 0.0  ;;  %v9541_v43 = vadd.f32 %v1880_v38, %v9140_v60  ;;  %v1882_v45 = vpop.f32.mrb[43].mxu0  ;;  %7692 = vmatprep.subr.bf16.mxu1 %v8258_v24 }
 0x27e   : > { %v2838_v48 = vsel %vm2796_vm14, %v2836_v32, %v2837_v29  ;;  %v1976_v49 = vmax.f32 %v9534_v41, 0.0  ;;  %v1883_v52 = vadd.f32 %v1882_v45, %v9129_v40  ;;  %7693 = vmatpush3.bf16.msra.mxu1 %v8259_v58  ;;  %v2186_v58 = vld [vmem:[#allocation5 + $0x20] sm:$0xff] }
 0x27f   : > { %v2992_v27 = vld [vmem:[#allocation5 + $0x138] sm:$0xff]  ;;  %v9546_v55 = vmax.f32 %v2662_v54, %v2838_v48  ;;  %2936 = vst [vmem:[#allocation5 + $0x1b8] sm:$0x3f] %v2904_v33  ;;  %v1977_v62 = vmax.f32 %v9541_v43, 0.0  ;;  %v9553_v61 = vmax.f32 %v1971_v46, %v1975_v42 }
 0x280   : > { %v3066_v25 = vrot.slane %v2992_v27, 4  ;;  %2040 = vst [vmem:[#allocation5 + $0x148] sm:$0xff] %v1976_v49  ;;  %v1978_v63 = vmax.f32 %v1883_v52, 0.0  ;;  %v2960_v47 = vld [vmem:[#allocation5 + $0x138] sm:$0xf] }
 0x281   : > { %v2991_v51 = vld [vmem:[#allocation5 + $0x128] sm:$0xf0]  ;;  %2935 = vst [vmem:[#allocation5 + $0x1a8] sm:$0xff] %v9546_v55  ;;  %v1916_v54 = vpop.f32.mrb[8].mxu1  ;;  %v9562_v9 = vmax.f32 %v9382_v28, %v9553_v61  ;;  %v9568_v34 = vmax.f32 %v1973_v56, %v1977_v62 }
 0x282   : > { %v3137_v46 = vmax.f32 %v2960_v47, %v3066_v25  ;;  %2042 = vst [vmem:[#allocation5 + $0x158] sm:$0xff] %v1978_v63  ;;  %v9571_v10 = vadd.f32 %v1916_v54, %v9140_v60  ;;  %v1918_v18 = vpop.f32.mrb[9].mxu1  ;;  %v3065_v14 = vrot.slane %v2991_v51, 4  ;;  %v2587_v52 = vrot.slane %v1978_v63, 1 }
 0x283   : > { %v1919_v50 = vadd.f32 %v1918_v18, %v9129_v40  ;;  %v1920_v1 = vpop.f32.mrb[10].mxu1  ;;  %v9575_v20 = vmax.f32 %v2247_v8, %v9562_v9  ;;  %v9579_v28 = vmax.f32 %v9396_v59, %v9568_v34 }
 0x284   : > { %3169 = vst [vmem:[#allocation5 + $0x138] sm:$0xf] %v3137_v46  ;;  %v1991_v12 = vmax.f32 %v9571_v10, 0.0  ;;  %v9583_v56 = vadd.f32 %v1920_v1, %v9140_v60  ;;  %v1922_v21 = vpop.f32.mrb[11].mxu1  ;;  %v3067_v32 = vsel %vm3037_vm15, %v3065_v14, %v3066_v25 }
 0x285   : > { %v1992_v16 = vmax.f32 %v1919_v50, 0.0  ;;  %v1923_v19 = vadd.f32 %v1922_v21, %v9129_v40  ;;  %v3136_v25 = vmax.f32 %v9527_v17, %v3067_v32 }
 0x286   : > { %v3000_v29 = vld [vmem:[#allocation5 + $0x1b8] sm:$0xff]  ;;  %v11492_v6 = vmax.f32 %v9583_v56, 0.0  ;;  %v9594_v36 = vmax.f32 %v1987_v44, %v1991_v12 }
 0x287   : > { %v3078_v41 = vrot.slane %v3000_v29, 4  ;;  %v2511_v38 = vld [vmem:[#allocation5 + $0x148] sm:$0xfe]  ;;  %2056 = vst [vmem:[#allocation5 + $0x1c8] sm:$0xff] %v1992_v16  ;;  %v1994_v39 = vmax.f32 %v1923_v19, 0.0 }
 0x288   : > { %v2968_v33 = vld [vmem:[#allocation5 + $0x1b8] sm:$0xf]  ;;  %v2999_v45 = vld [vmem:[#allocation5 + $0x1a8] sm:$0xf0]  ;;  %v2586_v48 = vrot.slane %v2511_v38, 1  ;;  %v9601_v27 = vmax.f32 %v1989_v22, %v11492_v6 }
 0x289   : > { %v3145_v7 = vmax.f32 %v2968_v33, %v3078_v41  ;;  %v2480_v44 = vld [vmem:[#allocation5 + $0x158] sm:$0x7f]  ;;  %2058 = vst [vmem:[#allocation5 + $0x1d8] sm:$0xff] %v1994_v39  ;;  %v3077_v47 = vrot.slane %v2999_v45, 4  ;;  %v2599_v14 = vrot.slane %v1994_v39, 1  ;;  %v2197_v45 = vld [vmem:[#allocation5 + $0xd0] sm:$0xff] }
 0x28a   : > { %v2588_v51 = vsel %vm2555_vm13, %v2586_v48, %v2587_v52  ;;  %v2657_v54 = vmax.f32 %v2480_v44, %v2587_v52  ;;  %v2188_v52 = vld [vmem:[#allocation5 + $0x40] sm:$0xff] }
 0x28b   : > { %v9605_v8 = vld [vmem:[#allocation5 + $0x138] sm:$0xff]  ;;  %3177 = vst [vmem:[#allocation5 + $0x1b8] sm:$0xf] %v3145_v7  ;;  %v2656_v46 = vmax.f32 %v1976_v49, %v2588_v51  ;;  %v3079_v22 = vsel %vm3037_vm15, %v3077_v47, %v3078_v41  ;;  %v2189_v7 = vld [vmem:[#allocation5 + $0x50] sm:$0xff] }
 0x28c   : > { %v3223_v63 = vmax.f32 %v3136_v25, %v9605_v8  ;;  %2689 = vst [vmem:[#allocation5 + $0x158] sm:$0x7f] %v2657_v54  ;;  %v3144_v1 = vmax.f32 %v9546_v55, %v3079_v22  ;;  %v8260_v55 = vld [vmem:[%s11485_s3 + $0x170] sm:$0xff]   ;;  %v9627_v51 = vld [vmem:[#allocation5 + $0x70] sm:$0xff] }
 0x28d   : > { %2688 = vst [vmem:[#allocation5 + $0x148] sm:$0xff] %v2656_v46  ;;  %v2184_v25 = vld [vmem:[#allocation5] sm:$0xff]  ;;  %v2193_v54 = vld [vmem:[#allocation5 + $0x90] sm:$0xff]  ;;  %7694 = vmatprep.subr.bf16.mxu1 %v8260_v55 }
 0x28e   : > { %3239 = vst [vmem:[#allocation5 + $0x128] sm:$0xff] %v3223_v63  ;;  %v2519_v17 = vld [vmem:[#allocation5 + $0x1c8] sm:$0xfe]  ;;  %v2185_v22 = vld [vmem:[#allocation5 + $0x10] sm:$0xff] }
 0x28f   : > { %v2598_v18 = vrot.slane %v2519_v17, 1  ;;  %v9631_v17 = vld [vmem:[#allocation5 + $0xb0] sm:$0xff] }
 0x290   : > { %v2488_v50 = vld [vmem:[#allocation5 + $0x1d8] sm:$0x7f] }
 0x291   : > { %v2600_v49 = vsel %vm2555_vm13, %v2598_v18, %v2599_v14  ;;  %v2665_v21 = vmax.f32 %v2488_v50, %v2599_v14  ;;  %v9633_v18 = vmax.f32 %v2193_v54, %v2197_v45  ;;  %v2241_v14 = vmax.f32 %v2184_v25, %v2188_v52 }
 0x292   : > { %v9614_v19 = vld [vmem:[#allocation5 + $0x1b8] sm:$0xff]  ;;  %v9616_v24 = vmax.f32 %v1992_v16, %v2600_v49  ;;  %v2192_v16 = vld [vmem:[#allocation5 + $0x80] sm:$0xff]  ;;  %v2243_v50 = vmax.f32 %v2186_v58, %v9555_v26  ;;  %v2242_v49 = vmax.f32 %v2185_v22, %v2189_v7 }
 0x293   : > { %v3227_v29 = vmax.f32 %v3144_v1, %v9614_v19  ;;  %v2753_v32 = vld [vmem:[#allocation5 + $0x158] sm:$0xff]  ;;  %2697 = vst [vmem:[#allocation5 + $0x1d8] sm:$0x7f] %v2665_v21  ;;  %v9625_v47 = vmax.f32 %v2192_v16, %v9293_v11  ;;  %v2187_v1 = vld [vmem:[#allocation5 + $0x30] sm:$0xff] }
 0x294   : > { %v2752_v38 = vld [vmem:[#allocation5 + $0x148] sm:$0xfc]  ;;  %v2828_v41 = vrot.slane %v2753_v32, 2  ;;  %2696 = vst [vmem:[#allocation5 + $0x1c8] sm:$0xff] %v9616_v24  ;;  %v2721_v39 = vld [vmem:[#allocation5 + $0x158] sm:$0x3f]  ;;  %v2246_v32 = vmax.f32 %v2189_v7, %v2193_v54  ;;  %v9655_v25 = vmax.f32 %v2242_v49, %v9633_v18 }
 0x295   : > { %3243 = vst [vmem:[#allocation5 + $0x1a8] sm:$0xff] %v3227_v29  ;;  %v2827_v33 = vrot.slane %v2752_v38, 2  ;;  %v2245_v29 = vmax.f32 %v2188_v52, %v2192_v16  ;;  %v9640_v38 = vmax.f32 %v9631_v17, %v9396_v59  ;;  %v9644_v26 = vmax.f32 %v2241_v14, %v9625_v47  ;;  %v8261_v54 = vld [vmem:[%s11485_s3 + $0x130] sm:$0xff]  }
 0x296   : > { %v2898_v48 = vmax.f32 %v2721_v39, %v2828_v41  ;;  %v9652_v59 = vmax.f32 %v2197_v45, %v9470_v5  ;;  %7695 = vmatpush3.bf16.msra.mxu1 %v8261_v54 }
 0x297   : > { %v2829_v44 = vsel %vm2796_vm14, %v2827_v33, %v2828_v41 }
 0x298   : > { %v9629_v63 = vmax.f32 %v2656_v46, %v2829_v44  ;;  %2930 = vst [vmem:[#allocation5 + $0x158] sm:$0x3f] %v2898_v48  ;;  %v2244_v46 = vmax.f32 %v2187_v1, %v9627_v51  ;;  %v2248_v48 = vmax.f32 %v9627_v51, %v9631_v17  ;;  %v9661_v51 = vmax.f32 %v2243_v50, %v9402_v37 }
 0x29a   : > { %2929 = vst [vmem:[#allocation5 + $0x148] sm:$0xff] %v9629_v63  ;;  %v2761_v11 = vld [vmem:[#allocation5 + $0x1d8] sm:$0xff]  ;;  %v1886_v21 = vpop.f32.mrb[44].mxu0 }
 0x29b   : > { %v2760_v41 = vld [vmem:[#allocation5 + $0x1c8] sm:$0xfc]  ;;  %v2840_v39 = vrot.slane %v2761_v11, 2  ;;  %v1887_v33 = vadd.f32 %v1886_v21, %v9140_v60  ;;  %v1888_v55 = vpop.f32.mrb[45].mxu0  ;;  %v2729_v44 = vld [vmem:[#allocation5 + $0x1d8] sm:$0x3f]  ;;  %v9667_v11 = vmax.f32 %v2244_v46, %v9640_v38  ;;  %v9683_v46 = vmax.f32 %v2246_v32, %v9652_v59 }
 0x29c   : > { %v2839_v52 = vrot.slane %v2760_v41, 2  ;;  %v9649_v16 = vadd.f32 %v1888_v55, %v9129_v40  ;;  %v1890_v7 = vpop.f32.mrb[46].mxu0 }
 0x29d   : > { %v2906_v58 = vmax.f32 %v2729_v44, %v2840_v39  ;;  %v1979_v22 = vmax.f32 %v1887_v33, 0.0  ;;  %v1891_v17 = vadd.f32 %v1890_v7, %v9140_v60  ;;  %v1892_v14 = vpop.f32.mrb[47].mxu0  ;;  %v9678_v44 = vmax.f32 %v2245_v29, %v9464_v2 }
 0x29e   : > { %v2841_v1 = vsel %vm2796_vm14, %v2839_v52, %v2840_v39  ;;  %v1980_v45 = vmax.f32 %v9649_v16, 0.0  ;;  %v1893_v49 = vadd.f32 %v1892_v14, %v9129_v40 }
 0x29f   : > { %v2994_v21 = vld [vmem:[#allocation5 + $0x158] sm:$0xff]  ;;  %v9671_v41 = vmax.f32 %v9616_v24, %v2841_v1  ;;  %2938 = vst [vmem:[#allocation5 + $0x1d8] sm:$0x3f] %v2906_v58  ;;  %v2144_v50 = vmax.f32 %v1975_v42, %v1979_v22  ;;  %v2146_v33 = vmax.f32 %v1979_v22, %v1983_v31  ;;  %v1981_v39 = vmax.f32 %v1891_v17, 0.0 }
 0x2a0   : > { %v3069_v55 = vrot.slane %v2994_v21, 4  ;;  %2044 = vst [vmem:[#allocation5 + $0x168] sm:$0xff] %v1980_v45  ;;  %v1982_v24 = vmax.f32 %v1893_v49, 0.0  ;;  %v2962_v52 = vld [vmem:[#allocation5 + $0x158] sm:$0xf] }
 0x2a1   : > { %v2993_v7 = vld [vmem:[#allocation5 + $0x148] sm:$0xf0]  ;;  %2937 = vst [vmem:[#allocation5 + $0x1c8] sm:$0xff] %v9671_v41  ;;  %v9687_v30 = vmax.f32 %v9447_v53, %v2144_v50  ;;  %v9690_v57 = vmax.f32 %v9553_v61, %v2146_v33  ;;  %v9693_v31 = vmax.f32 %v2144_v50, %v9498_v23  ;;  %v2263_v42 = vmax.f32 %v2146_v33, %v9594_v36  ;;  %v1926_v29 = vpop.f32.mrb[12].mxu1  ;;  %v8262_v50 = vld [vmem:[%s11485_s3 + $0x1c0] sm:$0xff]  }
 0x2a2   : > { %v3068_v54 = vrot.slane %v2993_v7, 4  ;;  %v3139_v32 = vmax.f32 %v2962_v52, %v3069_v55  ;;  %v2145_v58 = vmax.f32 %v1977_v62, %v1981_v39  ;;  %v2147_v22 = vmax.f32 %v1981_v39, %v1985_v13  ;;  %2046 = vst [vmem:[#allocation5 + $0x178] sm:$0xff] %v1982_v24  ;;  %v1928_v53 = vpop.f32.mrb[13].mxu1  ;;  %7794 = vmatprep.subr.bf16.mxu0 %v8262_v50 }
 0x2a3   : > { %v2360_v1 = vmax.f32 %v9562_v9, %v2263_v42  ;;  %v1930_v49 = vpop.f32.mrb[14].mxu1  ;;  %v9725_v39 = vmax.f32 %v2248_v48, %v9579_v28  ;;  %v2590_v7 = vrot.slane %v1982_v24, 1 }
 0x2a4   : > { %v3070_v43 = vsel %vm3037_vm15, %v3068_v54, %v3069_v55  ;;  %3171 = vst [vmem:[#allocation5 + $0x158] sm:$0xf] %v3139_v32  ;;  %v9709_v4 = vmax.f32 %v9470_v5, %v2145_v58  ;;  %v9712_v13 = vmax.f32 %v9568_v34, %v2147_v22  ;;  %v9715_v62 = vmax.f32 %v2145_v58, %v9505_v35  ;;  %v1932_v21 = vpop.f32.mrb[15].mxu1 }
 0x2a5   : > { %v3138_v9 = vmax.f32 %v9629_v63, %v3070_v43  ;;  %v9722_v33 = vmax.f32 %v2147_v22, %v9601_v27  ;;  %v1927_v5 = vadd.f32 %v1926_v29, %v9140_v60  ;;  %v9733_v54 = vadd.f32 %v1928_v53, %v9129_v40  ;;  %v8266_v63 = vld [vmem:[%s11485_s3 + $0x178] sm:$0xff]  }
 0x2a6   : > { %v3002_v34 = vld [vmem:[#allocation5 + $0x1d8] sm:$0xff]  ;;  %v1931_v50 = vadd.f32 %v1930_v49, %v9140_v60  ;;  %v1933_v52 = vadd.f32 %v1932_v21, %v9129_v40  ;;  %7696 = vmatprep.subr.bf16.mxu1 %v8266_v63  ;;  %v3284_v21 = vld [vmem:[#allocation5 + $0x68] sm:$0xff] }
 0x2a7   : > { %v3081_v48 = vrot.slane %v3002_v34, 4  ;;  %v2513_v32 = vld [vmem:[#allocation5 + $0x168] sm:$0xfe]  ;;  %v2361_v58 = vmax.f32 %v9579_v28, %v9722_v33  ;;  %v1995_v22 = vmax.f32 %v1927_v5, 0.0  ;;  %v2970_v43 = vld [vmem:[#allocation5 + $0x1d8] sm:$0xf] }
 0x2a8   : > { %v3001_v61 = vld [vmem:[#allocation5 + $0x1c8] sm:$0xf0]  ;;  %v2589_v24 = vrot.slane %v2513_v32, 1  ;;  %v1996_v53 = vmax.f32 %v9733_v54, 0.0  ;;  %v9788_v49 = vmax.f32 %v1931_v50, 0.0 }
 0x2a9   : > { %v3080_v55 = vrot.slane %v3001_v61, 4  ;;  %v3147_v34 = vmax.f32 %v2970_v43, %v3081_v48  ;;  %v2482_v6 = vld [vmem:[#allocation5 + $0x178] sm:$0x7f]  ;;  %2059 = vst [vmem:[#allocation5 + $0x1e0] sm:$0xff] %v1995_v22  ;;  %v2152_v29 = vmax.f32 %v1991_v12, %v1995_v22  ;;  %v2267_v28 = vmax.f32 %v9594_v36, %v1995_v22 }
 0x2aa   : > { %v2591_v5 = vsel %vm2555_vm13, %v2589_v24, %v2590_v7  ;;  %v2659_v14 = vmax.f32 %v2482_v6, %v2590_v7  ;;  %v2368_v32 = vmax.f32 %v2263_v42, %v1995_v22  ;;  %v9749_v17 = vmax.f32 %v2360_v1, %v1995_v22  ;;  %2060 = vst [vmem:[#allocation5 + $0x1e8] sm:$0xff] %v1996_v53  ;;  %v3278_v24 = vld [vmem:[#allocation5 + $0x8] sm:$0xff] }
 0x2ab   : > { %v9753_v40 = vld [vmem:[#allocation5 + $0x158] sm:$0xff]  ;;  %v9756_v60 = vsel %vm3037_vm15, %v3080_v55, %v3081_v48  ;;  %3179 = vst [vmem:[#allocation5 + $0x1d8] sm:$0xf] %v3147_v34  ;;  %v9760_v10 = vmax.f32 %v1980_v45, %v2591_v5  ;;  %2182 = vst [vmem:[#allocation5 + $0x1c0] sm:$0xff] %v2152_v29  ;;  %v9763_v12 = vmax.f32 %v9498_v23, %v2152_v29  ;;  %v8267_v45 = vld [vmem:[%s11485_s3 + $0x138] sm:$0xff]  }
 0x2ac   : > { %2295 = vst [vmem:[#allocation5 + $0x1a0] sm:$0xff] %v2267_v28  ;;  %v2364_v6 = vmax.f32 %v9690_v57, %v2267_v28  ;;  %v3224_v36 = vmax.f32 %v3138_v9, %v9753_v40  ;;  %v3146_v42 = vmax.f32 %v9671_v41, %v9756_v60  ;;  %2691 = vst [vmem:[#allocation5 + $0x178] sm:$0x7f] %v2659_v14  ;;  %v1998_v9 = vmax.f32 %v1933_v52, 0.0  ;;  %v3282_v48 = vld [vmem:[#allocation5 + $0x48] sm:$0xff] }
 0x2ad   : > { %v2366_v61 = vmax.f32 %v9693_v31, %v2152_v29  ;;  %2392 = vst [vmem:[#allocation5 + $0x160] sm:$0xff] %v2368_v32  ;;  %v2433_v16 = vmax.f32 %v9575_v20, %v2368_v32  ;;  %2690 = vst [vmem:[#allocation5 + $0x168] sm:$0xff] %v9760_v10  ;;  %v2362_v23 = vmax.f32 %v9687_v30, %v9763_v12  ;;  %7697 = vmatpush3.bf16.msra.mxu1 %v8267_v45 }
 0x2ae   : > { %2293 = vst [vmem:[#allocation5 + $0x180] sm:$0xff] %v9763_v12  ;;  %2388 = vst [vmem:[#allocation5 + $0x120] sm:$0xff] %v2364_v6  ;;  %v11548_v41 = vmax.f32 %v9402_v37, %v9690_v57  ;;  %v11549_v20 = vmax.f32 %v9464_v2, %v9693_v31  ;;  %v2429_v55 = vmax.f32 %v9661_v51, %v2364_v6  ;;  %v11550_v37 = vmax.f32 %v9583_v56, 0.0  ;;  %v3280_v51 = vld [vmem:[#allocation5 + $0x28] sm:$0xff] }
 0x2af   : > { %3240 = vst [vmem:[#allocation5 + $0x148] sm:$0xff] %v3224_v36  ;;  %2390 = vst [vmem:[#allocation5 + $0x140] sm:$0xff] %v2366_v61  ;;  %v2431_v7 = vmax.f32 %v9678_v44, %v2366_v61  ;;  %v9792_v63 = vadd.f32 %v3284_v21, %v2433_v16  ;;  %v2268_v57 = vmax.f32 %v9601_v27, %v9788_v49  ;;  %v9804_v44 = vrot.slane %v1998_v9, 1  ;;  %v8292_v61 = vld [vmem:[#allocation5 + $0x78] sm:$0xff] }
 0x2b0   : > { %v9781_v14 = vmax.f32 %v11548_v41, %v2267_v28  ;;  %v9786_v1 = vmax.f32 %v11549_v20, %v2152_v29  ;;  %2449 = vst [vmem:[#allocation5 + $0x60] sm:$0xff] %v2433_v16  ;;  %2386 = vst [vmem:[#allocation5 + $0x100] sm:$0xff] %v2362_v23  ;;  %v2153_v2 = vmax.f32 %v11550_v37, %v9788_v49  ;;  %v8293_v21 = vld [vmem:[#allocation5 + $0x38] sm:$0xff] }
 0x2b1   : > { %v2369_v31 = vmax.f32 %v9722_v33, %v9788_v49  ;;  %v9802_v52 = vmax.f32 %v2361_v58, %v9788_v49  ;;  %2062 = vst [vmem:[#allocation5 + $0x1f8] sm:$0xff] %v1998_v9  ;;  %v2427_v29 = vmax.f32 %v9644_v26, %v2362_v23  ;;  %2445 = vst [vmem:[#allocation5 + $0x20] sm:$0xff] %v2429_v55  ;;  %v2521_v27 = vld [vmem:[#allocation5 + $0x1e8] sm:$0xfe] }
 0x2b2   : > { %v9807_v22 = vadd.f32 %v3280_v51, %v2429_v55  ;;  %2447 = vst [vmem:[#allocation5 + $0x40] sm:$0xff] %v2431_v7  ;;  %v9809_v56 = vadd.f32 %v3282_v48, %v2431_v7  ;;  %3349 = vst [vmem:[#allocation3 + $0x61] sm:$0xff] %v9792_v63  ;;  %v2266_v33 = vmax.f32 %v9505_v35, %v2153_v2  ;;  %v9816_v50 = vld [vmem:[#allocation5 + $0x1d8] sm:$0xff]  ;;  %v2601_v32 = vrot.slane %v2521_v27, 1 }
 0x2b3   : > { %2183 = vst [vmem:[#allocation5 + $0x1d0] sm:$0xff] %v2153_v2  ;;  %2296 = vst [vmem:[#allocation5 + $0x1b0] sm:$0xff] %v2268_v57  ;;  %v2365_v58 = vmax.f32 %v9712_v13, %v2268_v57  ;;  %v2367_v43 = vmax.f32 %v9715_v62, %v2153_v2  ;;  %v2434_v26 = vmax.f32 %v9725_v39, %v2369_v31  ;;  %v2755_v6 = vld [vmem:[#allocation5 + $0x178] sm:$0xff] }
 0x2b4   : > { %2393 = vst [vmem:[#allocation5 + $0x170] sm:$0xff] %v2369_v31  ;;  %v11551_v34 = vmax.f32 %v9640_v38, %v9712_v13  ;;  %v11552_v5 = vmax.f32 %v9652_v59, %v9715_v62  ;;  %2443 = vst [vmem:[#allocation5] sm:$0xff] %v2427_v29  ;;  %v9828_v60 = vadd.f32 %v3278_v24, %v2427_v29  ;;  %v2754_v62 = vld [vmem:[#allocation5 + $0x168] sm:$0xfc]  ;;  %v2831_v36 = vrot.slane %v2755_v6, 2  ;;  %v8294_v7 = vld [vmem:[#allocation5 + $0x58] sm:$0xff] }
 0x2b5   : > { %3345 = vst [vmem:[#allocation3 + $0x31] sm:$0xff] %v9807_v22  ;;  %3347 = vst [vmem:[#allocation3 + $0x49] sm:$0xff] %v9809_v56  ;;  %v3228_v39 = vmax.f32 %v3146_v42, %v9816_v50  ;;  %v9834_v38 = vmax.f32 %v9709_v4, %v2266_v33  ;;  %v2430_v59 = vmax.f32 %v9667_v11, %v2365_v58  ;;  %v2830_v23 = vrot.slane %v2754_v62, 2  ;;  %v3294_v24 = vld [vmem:[#allocation5 + $0x108] sm:$0xff]  ;;  %v3272_v62 = vld [vmem:[#allocation5 + $0x1a0] sm:$0xff] }
 0x2b6   : > { %v9821_v28 = vmax.f32 %v11551_v34, %v2268_v57  ;;  %v9826_v35 = vmax.f32 %v11552_v5, %v2153_v2  ;;  %2294 = vst [vmem:[#allocation5 + $0x190] sm:$0xff] %v2266_v33  ;;  %2389 = vst [vmem:[#allocation5 + $0x130] sm:$0xff] %v2365_v58  ;;  %v2432_v13 = vmax.f32 %v9683_v46, %v2367_v43  ;;  %v2723_v46 = vld [vmem:[#allocation5 + $0x178] sm:$0x3f]  ;;  %v3264_v34 = vld [vmem:[#allocation5 + $0x120] sm:$0xff] }
 0x2b7   : > { %2391 = vst [vmem:[#allocation5 + $0x150] sm:$0xff] %v2367_v43  ;;  %2450 = vst [vmem:[#allocation5 + $0x70] sm:$0xff] %v2434_v26  ;;  %v2603_v42 = vsel %vm2555_vm13, %v2601_v32, %v9804_v44  ;;  %v9843_v16 = vadd.f32 %v8292_v61, %v2434_v26  ;;  %v11553_v11 = vmax.f32 %v9625_v47, %v9687_v30  ;;  %v8295_v57 = vld [vmem:[#allocation5 + $0x18] sm:$0xff]  ;;  %v3262_v26 = vld [vmem:[#allocation5 + $0x100] sm:$0xff] }
 0x2b8   : > { %2454 = vst [vmem:[#allocation5 + $0xb0] sm:$0xff] %v9821_v28  ;;  %2456 = vst [vmem:[#allocation5 + $0xd0] sm:$0xff] %v9826_v35  ;;  %v9851_v41 = vmax.f32 %v1996_v53, %v2603_v42  ;;  %v2428_v20 = vmax.f32 %v9655_v25, %v9834_v38  ;;  %v9855_v9 = vadd.f32 %v8293_v21, %v2430_v59  ;;  %v3286_v25 = vld [vmem:[#allocation5 + $0x88] sm:$0xff]  ;;  %v2490_v2 = vld [vmem:[#allocation5 + $0x1f8] sm:$0x7f] }
 0x2b9   : > { %3343 = vst [vmem:[#allocation3 + $0x19] sm:$0xff] %v9828_v60  ;;  %v2435_v45 = vmax.f32 %v11553_v11, %v9763_v12  ;;  %3244 = vst [vmem:[#allocation5 + $0x1c8] sm:$0xff] %v3228_v39  ;;  %v2900_v55 = vmax.f32 %v2723_v46, %v2831_v36  ;;  %v9857_v37 = vadd.f32 %v8294_v7, %v2432_v13  ;;  %v3288_v53 = vld [vmem:[#allocation5 + $0xa8] sm:$0xff]  ;;  %v8296_v58 = vld [vmem:[#allocation5 + $0x98] sm:$0xff] }
 0x2ba   : > { %2446 = vst [vmem:[#allocation5 + $0x30] sm:$0xff] %v2430_v59  ;;  %2448 = vst [vmem:[#allocation5 + $0x50] sm:$0xff] %v2432_v13  ;;  %v11554_v30 = vmax.f32 %v9633_v18, %v9709_v4  ;;  %v2832_v12 = vsel %vm2796_vm14, %v2830_v23, %v2831_v36  ;;  %v3311_v31 = vadd.f32 %v8295_v57, %v2428_v20  ;;  %v3290_v18 = vld [vmem:[#allocation5 + $0xc8] sm:$0xff]  ;;  %v8297_v32 = vld [vmem:[#allocation5 + $0xb8] sm:$0xff] }
 0x2bb   : > { %3350 = vst [vmem:[#allocation3 + $0x69] sm:$0xff] %v9843_v16  ;;  %2451 = vst [vmem:[#allocation5 + $0x80] sm:$0xff] %v2435_v45  ;;  %v3474_v51 = vpack.c.bf16 %v9855_v9, %v9807_v22  ;;  %v9870_v48 = vadd.f32 %v3286_v25, %v2435_v45  ;;  %v3292_v4 = vld [vmem:[#allocation5 + $0xe8] sm:$0xff]  ;;  %v9873_v29 = vmax.f32 %v9760_v10, %v2832_v12  ;;  %v3270_v13 = vld [vmem:[#allocation5 + $0x180] sm:$0xff] }
 0x2bc   : > { %v2436_v54 = vmax.f32 %v11554_v30, %v2266_v33  ;;  %2698 = vst [vmem:[#allocation5 + $0x1e8] sm:$0xff] %v9851_v41  ;;  %2444 = vst [vmem:[#allocation5 + $0x10] sm:$0xff] %v2428_v20  ;;  %v2667_v27 = vmax.f32 %v2490_v2, %v9804_v44  ;;  %v3475_v33 = vpack.c.bf16 %v9857_v37, %v9809_v56  ;;  %v3296_v5 = vld [vmem:[#allocation5 + $0x128] sm:$0xff]  ;;  %v8276_v36 = vld [vmem:[%s11485_s3 + $0x200] sm:$0xff]  }
 0x2bd   : > { %3346 = vst [vmem:[#allocation3 + $0x39] sm:$0xff] %v9855_v9  ;;  %2932 = vst [vmem:[#allocation5 + $0x178] sm:$0x3f] %v2900_v55  ;;  %v3473_v10 = vpack.c.bf16 %v3311_v31, %v9828_v60  ;;  %v9884_v44 = vadd.f32 %v3288_v53, %v9781_v14  ;;  %v9887_v39 = vadd.f32 %v8297_v32, %v9821_v28  ;;  %v3298_v59 = vld [vmem:[#allocation5 + $0x148] sm:$0xff]  ;;  %v8298_v28 = vld [vmem:[#allocation5 + $0xd8] sm:$0xff]  ;;  %7966 = vmatprep.subr.bf16.mxu1 %v8276_v36 }
 0x2be   : > { %3348 = vst [vmem:[#allocation3 + $0x51] sm:$0xff] %v9857_v37  ;;  %2452 = vst [vmem:[#allocation5 + $0x90] sm:$0xff] %v2436_v54  ;;  %v9879_v43 = vadd.f32 %v8296_v58, %v2436_v54  ;;  %v9890_v6 = vadd.f32 %v3290_v18, %v9786_v1  ;;  %v9900_v60 = vadd.f32 %v8298_v28, %v9826_v35  ;;  %v3265_v61 = vld [vmem:[#allocation5 + $0x130] sm:$0xff]  ;;  %v3302_v46 = vld [vmem:[#allocation5 + $0x188] sm:$0xff] }
 0x2bf   : > { %3344 = vst [vmem:[#allocation3 + $0x21] sm:$0xff] %v3311_v31  ;;  %3351 = vst [vmem:[#allocation3 + $0x79] sm:$0xff] %v9870_v48  ;;  %v9903_v1 = vadd.f32 %v3292_v4, %v9749_v17  ;;  %v9907_v42 = vadd.f32 %v9411_v15, %v9802_v52  ;;  %v3267_v11 = vld [vmem:[#allocation5 + $0x150] sm:$0xff]  ;;  %4719 = vmatprep.mubr.bf16.mxu1 %v3473_v10  ;;  %v3574_v23 = vld [vmem:[#allocation3 + $0x60] sm:$0xff]  ;;  %v9914_v17 = vadd.f32 %v3294_v24, %v3262_v26 }
 0x2c0   : > { %2931 = vst [vmem:[#allocation5 + $0x168] sm:$0xff] %v9873_v29  ;;  %2699 = vst [vmem:[#allocation5 + $0x1f8] sm:$0x7f] %v2667_v27  ;;  %v3271_v45 = vld [vmem:[#allocation5 + $0x190] sm:$0xff]  ;;  %v9918_v15 = vadd.f32 %v9509_v3, %v9834_v38  ;;  %v9920_v52 = vadd.f32 %v3296_v5, %v3264_v34  ;;  %v3266_v20 = vld [vmem:[#allocation5 + $0x140] sm:$0xff]  ;;  %v9930_v3 = vadd.f32 %v3265_v61, %v9605_v8 }
 0x2c1   : > { %3352 = vst [vmem:[#allocation3 + $0x81] sm:$0xff] %v9879_v43  ;;  %3353 = vst [vmem:[#allocation3 + $0x91] sm:$0xff] %v9884_v44  ;;  %v3273_v21 = vld [vmem:[#allocation5 + $0x1b0] sm:$0xff]  ;;  %v3304_v55 = vld [vmem:[#allocation5 + $0x1a8] sm:$0xff]  ;;  %v3330_v38 = vadd.f32 %v3298_v59, %v3266_v20  ;;  %v3331_v8 = vadd.f32 %v3267_v11, %v9753_v40  ;;  %v3334_v4 = vadd.f32 %v3302_v46, %v3270_v13 }
 0x2c2   : > { %3354 = vst [vmem:[#allocation3 + $0x99] sm:$0xff] %v9887_v39  ;;  %3355 = vst [vmem:[#allocation3 + $0xa9] sm:$0xff] %v9890_v6  ;;  %v3570_v7 = vld [vmem:[#allocation3 + $0x30] sm:$0xff]  ;;  %v3306_v53 = vld [vmem:[#allocation5 + $0x1c8] sm:$0xff]  ;;  %v3335_v27 = vadd.f32 %v3271_v45, %v9520_v0  ;;  %v3336_v40 = vadd.f32 %v3304_v55, %v3272_v62 }
 0x2c3   : > { %3356 = vst [vmem:[#allocation3 + $0xb1] sm:$0xff] %v9900_v60  ;;  %3357 = vst [vmem:[#allocation3 + $0xc1] sm:$0xff] %v9903_v1  ;;  %v3275_v25 = vld [vmem:[#allocation5 + $0x1d0] sm:$0xff]  ;;  %v3572_v12 = vld [vmem:[#allocation3 + $0x48] sm:$0xff]  ;;  %v9955_v11 = vpack.c.bf16 %v3331_v8, %v3330_v38 }
 0x2c4   : > { %3358 = vst [vmem:[#allocation3 + $0xc9] sm:$0xff] %v9907_v42  ;;  %v3575_v2 = vld [vmem:[#allocation3 + $0x68] sm:$0xff]  ;;  %3359 = vst [vmem:[#allocation3 + $0xd9] sm:$0xff] %v9914_v17  ;;  %v3274_v58 = vld [vmem:[#allocation5 + $0x1c0] sm:$0xff]  ;;  %v9957_v45 = vpack.c.bf16 %v3335_v27, %v3334_v4 }
 0x2c5   : > { %v3512_v57 = vld [vmem:[#allocation3 + $0x62] sm:$0xff]  ;;  %v3513_v31 = vld [vmem:[#allocation3 + $0x6a] sm:$0xff]  ;;  %3360 = vst [vmem:[#allocation3 + $0xe1] sm:$0xff] %v9918_v15  ;;  %3361 = vst [vmem:[#allocation3 + $0xf1] sm:$0xff] %v9920_v52  ;;  %v9943_v10 = vpack.c.bf16 %v3575_v2, %v3574_v23  ;;  %v3338_v2 = vadd.f32 %v3306_v53, %v3274_v58 }
 0x2c6   : > { %v9939_v26 = vld [vmem:[#allocation5 + $0x1e8] sm:$0xfc]  ;;  %v3568_v24 = vld [vmem:[#allocation3 + $0x18] sm:$0xff]  ;;  %v9945_v32 = vpack.c.bf16 %v3513_v31, %v3512_v57  ;;  %3362 = vst [vmem:[#allocation3 + $0xf9] sm:$0xff] %v9930_v3  ;;  %3363 = vst [vmem:[#allocation3 + $0x109] sm:$0xff] %v3330_v38 }
 0x2c7   : > { %v3571_v34 = vld [vmem:[#allocation3 + $0x38] sm:$0xff]  ;;  %v2842_v36 = vrot.slane %v9939_v26, 2  ;;  %v3573_v61 = vld [vmem:[#allocation3 + $0x50] sm:$0xff]  ;;  %3364 = vst [vmem:[#allocation3 + $0x111] sm:$0xff] %v3331_v8  ;;  %3367 = vst [vmem:[#allocation3 + $0x139] sm:$0xff] %v3334_v4 }
 0x2c8   : > { %v9941_v5 = vld [vmem:[#allocation3 + $0x32] sm:$0xff]  ;;  %v9953_v28 = vpack.c.bf16 %v3571_v34, %v3570_v7  ;;  %3368 = vst [vmem:[#allocation3 + $0x141] sm:$0xff] %v3335_v27  ;;  %v3569_v23 = vld [vmem:[#allocation3 + $0x20] sm:$0xff]  ;;  %v9964_v55 = vpack.c.bf16 %v3573_v61, %v3572_v12  ;;  %3428 = vst [vmem:[#allocation6 + $0x120] sm:$0xff] %v9943_v10  ;;  %v3337_v7 = vadd.f32 %v3273_v21, %v9614_v19 }
 0x2c9   : > { %v2964_v13 = vld [vmem:[#allocation5 + $0x178] sm:$0xf]  ;;  %v9962_v62 = vld [vmem:[#allocation3 + $0x22] sm:$0xff]  ;;  %3556 = vst [vmem:[#allocation6 + $0x130] sm:$0xff] %v9945_v32  ;;  %3369 = vst [vmem:[#allocation3 + $0x151] sm:$0xff] %v3336_v40  ;;  %v3600_v4 = vpack.c.bf16 %v3569_v23, %v3568_v24  ;;  %v3339_v21 = vadd.f32 %v3275_v25, %v9816_v50 }
 0x2ca   : > { %v9950_v0 = vld [vmem:[#allocation5 + $0x178] sm:$0xff]  ;;  %v8263_v38 = vld [vmem:[%s11485_s3 + $0x180] sm:$0xff]   ;;  %v2995_v57 = vld [vmem:[#allocation5 + $0x168] sm:$0xf0]  ;;  %3426 = vst [vmem:[#allocation6 + $0x90] sm:$0xff] %v9953_v28  ;;  %v9990_v34 = vpack.c.bf16 %v3337_v7, %v3336_v40 }
 0x2cb   : > { %v3072_v46 = vrot.slane %v9950_v0, 4  ;;  %v9960_v20 = vld [vmem:[#allocation3 + $0x1a] sm:$0xff]  ;;  %3499 = vst [vmem:[#allocation6 + $0x320] sm:$0xff] %v9955_v11  ;;  %3501 = vst [vmem:[#allocation6 + $0x3b0] sm:$0xff] %v9957_v45  ;;  %v9986_v26 = vld [vmem:[#allocation3 + $0x4a] sm:$0xff]  ;;  %v3071_v61 = vrot.slane %v2995_v57, 4  ;;  %4872 = vmatprep.mubr.bf16.mxu0 %v3600_v4  ;;  %4720 = vmatmul.mubr.bf16.gmra.mrb[20].mxu1 %v3600_v4  ;;  %v9996_v59 = vpack.c.bf16 %v3339_v21, %v3338_v2 }
 0x2cc   : > { %v2731_v31 = vld [vmem:[#allocation5 + $0x1f8] sm:$0x3f]  ;;  %v3537_v12 = vpack.c.bf16 %v9962_v62, %v9960_v20  ;;  %3427 = vst [vmem:[#allocation6 + $0xd8] sm:$0xff] %v9964_v55  ;;  %3370 = vst [vmem:[#allocation3 + $0x159] sm:$0xff] %v3337_v7  ;;  %v3577_v23 = vld [vmem:[#allocation3 + $0x80] sm:$0xff]  ;;  %4727 = vmatprep.mubr.bf16.mxu1 %v3474_v51 }
 0x2cd   : > { %v2763_v8 = vld [vmem:[#allocation5 + $0x1f8] sm:$0xff]  ;;  %v3141_v53 = vmax.f32 %v2964_v13, %v3072_v46  ;;  %3371 = vst [vmem:[#allocation3 + $0x169] sm:$0xff] %v3338_v2  ;;  %3425 = vst [vmem:[#allocation6 + $0x48] sm:$0xff] %v3600_v4  ;;  %v8299_v57 = vld [vmem:[#allocation6 + $0x10] sm:$0xff] }
 0x2ce   : > { %v8264_v19 = vld [vmem:[%s11485_s3 + $0x1c8] sm:$0xff]   ;;  %v2843_v27 = vrot.slane %v2763_v8, 2  ;;  %v3578_v8 = vld [vmem:[#allocation3 + $0x90] sm:$0xff]  ;;  %3372 = vst [vmem:[#allocation3 + $0x171] sm:$0xff] %v3339_v21  ;;  %11555 = vst [vmem:[#allocation7_spill] sm:$0xff] %v9996_v59  ;;  %4873 = vmatmul.mubr.bf16.vlgmr.msra.gmra.mrb[48].mxu0 %v8299_v57 }
 0x2cf   : > { %v9984_v58 = vld [vmem:[#allocation3 + $0x3a] sm:$0xff]  ;;  %v9988_v24 = vld [vmem:[#allocation3 + $0x52] sm:$0xff]  ;;  %3173 = vst [vmem:[#allocation5 + $0x178] sm:$0xf] %v3141_v53  ;;  %v3515_v54 = vld [vmem:[#allocation3 + $0x82] sm:$0xff]  ;;  %4880 = vmatprep.mubr.bf16.mxu0 %v9953_v28  ;;  %7795 = vmatpush3.bf16.msra.mxu0 %v8263_v38 }
 0x2d0   : > { %v3576_v13 = vld [vmem:[#allocation3 + $0x78] sm:$0xff]  ;;  %v2844_v40 = vsel %vm2796_vm14, %v2842_v36, %v2843_v27  ;;  %v2908_v7 = vmax.f32 %v2731_v31, %v2843_v27  ;;  %3502 = vst [vmem:[#allocation6 + $0x3f8] sm:$0xff] %v9990_v34  ;;  %v3580_v22 = vld [vmem:[#allocation3 + $0xa8] sm:$0xff]  ;;  %v3581_v9 = vld [vmem:[#allocation3 + $0xb0] sm:$0xff]  ;;  %7796 = vmatprep.subr.bf16.mxu0 %v8264_v19 }
 0x2d1   : > { %v3579_v4 = vld [vmem:[#allocation3 + $0x98] sm:$0xff]  ;;  %v10007_v21 = vmax.f32 %v9851_v41, %v2844_v40  ;;  %v10010_v36 = vpack.c.bf16 %v3577_v23, %v3576_v13  ;;  %v8268_v53 = vld [vmem:[%s11485_s3 + $0x1d0] sm:$0xff]   ;;  %3503 = vst [vmem:[#allocation6 + $0x440] sm:$0xff] %v9996_v59  ;;  %v10020_v41 = vpack.c.bf16 %v3581_v9, %v3580_v22  ;;  %v3583_v13 = vld [vmem:[#allocation3 + $0xc8] sm:$0xff]  ;;  %v3073_v23 = vsel %vm3037_vm15, %v3071_v61, %v3072_v46 }
 0x2d2   : > { %v3514_v18 = vld [vmem:[#allocation3 + $0x7a] sm:$0xff]  ;;  %v10012_v31 = vpack.c.bf16 %v3579_v4, %v3578_v8  ;;  %v3516_v51 = vld [vmem:[#allocation3 + $0x92] sm:$0xff]  ;;  %2940 = vst [vmem:[#allocation5 + $0x1f8] sm:$0x3f] %v2908_v7  ;;  %v3520_v46 = vld [vmem:[#allocation3 + $0xc2] sm:$0xff] }
 0x2d3   : > { %v8265_v2 = vld [vmem:[%s11485_s3 + $0x188] sm:$0xff]   ;;  %v10018_v27 = vpack.c.bf16 %v3515_v54, %v3514_v18  ;;  %v3582_v57 = vld [vmem:[#allocation3 + $0xc0] sm:$0xff]  ;;  %2939 = vst [vmem:[#allocation5 + $0x1e8] sm:$0xff] %v10007_v21  ;;  %3429 = vst [vmem:[#allocation6 + $0x168] sm:$0xff] %v10010_v36  ;;  %4728 = vmatmul.mubr.bf16.gmra.mrb[24].mxu1 %v9953_v28 }
 0x2d4   : > { %v3517_v40 = vld [vmem:[#allocation3 + $0x9a] sm:$0xff]  ;;  %3430 = vst [vmem:[#allocation6 + $0x1b0] sm:$0xff] %v10012_v31  ;;  %v10030_v54 = vpack.c.bf16 %v3583_v13, %v3582_v57  ;;  %v3518_v18 = vld [vmem:[#allocation3 + $0xaa] sm:$0xff]  ;;  %v3519_v7 = vld [vmem:[#allocation3 + $0xb2] sm:$0xff]  ;;  %7797 = vmatpush3.bf16.msra.mxu0 %v8265_v2  ;;  %4735 = vmatprep.mubr.bf16.mxu1 %v3475_v33 }
 0x2d5   : > { %v10028_v8 = vpack.c.bf16 %v3517_v40, %v3516_v51  ;;  %v3584_v4 = vld [vmem:[#allocation3 + $0xd8] sm:$0xff]  ;;  %3431 = vst [vmem:[#allocation6 + $0x1f8] sm:$0xff] %v10020_v41  ;;  %v10033_v38 = vpack.c.bf16 %v3519_v7, %v3518_v18  ;;  %v3585_v0 = vld [vmem:[#allocation3 + $0xe0] sm:$0xff]  ;;  %v3521_v61 = vld [vmem:[#allocation3 + $0xca] sm:$0xff]  ;;  %v3140_v7 = vmax.f32 %v9873_v29, %v3073_v23  ;;  %7798 = vmatprep.subr.bf16.mxu0 %v8268_v53 }
 0x2d6   : > { %v8269_v22 = vld [vmem:[%s11485_s3 + $0x190] sm:$0xff]   ;;  %3432 = vst [vmem:[#allocation6 + $0x240] sm:$0xff] %v10030_v54  ;;  %v10039_v9 = vpack.c.bf16 %v3585_v0, %v3584_v4  ;;  %v10041_v51 = vpack.c.bf16 %v3521_v61, %v3520_v46  ;;  %v3586_v40 = vld [vmem:[#allocation3 + $0xf0] sm:$0xff]  ;;  %v3587_v57 = vld [vmem:[#allocation3 + $0xf8] sm:$0xff]  ;;  %4881 = vmatmul.mubr.bf16.gmra.mrb[52].mxu0 %v3537_v12 }
 0x2d7   : > { %v3522_v19 = vld [vmem:[#allocation3 + $0xda] sm:$0xff]  ;;  %v3269_v13 = vld [vmem:[#allocation5 + $0x170] sm:$0xff]  ;;  %v8270_v18 = vld [vmem:[%s11485_s3 + $0x1d8] sm:$0xff]   ;;  %v10047_v30 = vpack.c.bf16 %v3587_v57, %v3586_v40  ;;  %4888 = vmatprep.mubr.bf16.mxu0 %v9964_v55 }
 0x2d8   : > { %v3523_v35 = vld [vmem:[#allocation3 + $0xe2] sm:$0xff]  ;;  %v3589_v25 = vld [vmem:[#allocation3 + $0x110] sm:$0xff]  ;;  %v3209_v4 = vld [vmem:[#allocation5 + $0x178] sm:$0xff]  ;;  %3433 = vst [vmem:[#allocation6 + $0x288] sm:$0xff] %v10039_v9  ;;  %7799 = vmatpush3.bf16.msra.mxu0 %v8269_v22 }
 0x2d9   : > { %v3588_v14 = vld [vmem:[#allocation3 + $0x108] sm:$0xff]  ;;  %v10051_v0 = vpack.c.bf16 %v3523_v35, %v3522_v19  ;;  %v3524_v61 = vld [vmem:[#allocation3 + $0xf2] sm:$0xff]  ;;  %v3525_v47 = vld [vmem:[#allocation3 + $0xfa] sm:$0xff]  ;;  %v3225_v50 = vmax.f32 %v3140_v7, %v3209_v4  ;;  %3434 = vst [vmem:[#allocation6 + $0x2d0] sm:$0xff] %v10047_v30  ;;  %v10064_v35 = vadd.f32 %v3269_v13, %v3209_v4  ;;  %7800 = vmatprep.subr.bf16.mxu0 %v8270_v18 }
 0x2da   : > { %v10053_v46 = vpack.c.bf16 %v3589_v25, %v3588_v14  ;;  %v10062_v29 = vpack.c.bf16 %v3525_v47, %v3524_v61  ;;  %v3526_v14 = vld [vmem:[#allocation3 + $0x10a] sm:$0xff]  ;;  %v3527_v28 = vld [vmem:[#allocation3 + $0x112] sm:$0xff]  ;;  %v3593_v37 = vld [vmem:[#allocation3 + $0x140] sm:$0xff] }
 0x2db   : > { %v3592_v25 = vld [vmem:[#allocation3 + $0x138] sm:$0xff]  ;;  %v8271_v2 = vld [vmem:[%s11485_s3 + $0x198] sm:$0xff]   ;;  %v10071_v56 = vpack.c.bf16 %v3527_v28, %v3526_v14  ;;  %v8272_v47 = vld [vmem:[%s11485_s3 + $0x1e0] sm:$0xff]   ;;  %3241 = vst [vmem:[#allocation5 + $0x168] sm:$0xff] %v3225_v50  ;;  %4736 = vmatmul.mubr.bf16.gmra.mrb[28].mxu1 %v9964_v55 }
 0x2dc   : > { %v2972_v53 = vld [vmem:[#allocation5 + $0x1f8] sm:$0xf]  ;;  %3435 = vst [vmem:[#allocation6 + $0x318] sm:$0xff] %v10053_v46  ;;  %v3003_v33 = vld [vmem:[#allocation5 + $0x1e8] sm:$0xf0]  ;;  %3366 = vst [vmem:[#allocation3 + $0x129] sm:$0xff] %v10064_v35  ;;  %v10077_v12 = vpack.c.bf16 %v3593_v37, %v3592_v25  ;;  %7801 = vmatpush3.bf16.msra.mxu0 %v8271_v2 }
 0x2dd   : > { %v3004_v20 = vld [vmem:[#allocation5 + $0x1f8] sm:$0xff]  ;;  %v3594_v23 = vld [vmem:[#allocation3 + $0x150] sm:$0xff]  ;;  %v3531_v13 = vld [vmem:[#allocation3 + $0x142] sm:$0xff]  ;;  %v3083_v22 = vrot.slane %v3003_v33, 4  ;;  %7802 = vmatprep.subr.bf16.mxu0 %v8272_v47  ;;  %v11559_v33 = vpack.c.bf16 %v9984_v58, %v9941_v5 }
 0x2de   : > { %v3084_v62 = vrot.slane %v3004_v20, 4  ;;  %v3595_v40 = vld [vmem:[#allocation3 + $0x158] sm:$0xff]  ;;  %v3596_v7 = vld [vmem:[#allocation3 + $0x168] sm:$0xff]  ;;  %3437 = vst [vmem:[#allocation6 + $0x3a8] sm:$0xff] %v10077_v12  ;;  %v3597_v50 = vld [vmem:[#allocation3 + $0x170] sm:$0xff] }
 0x2df   : > { %v10079_v57 = vpack.c.bf16 %v3595_v40, %v3594_v23  ;;  %v3530_v19 = vld [vmem:[#allocation3 + $0x13a] sm:$0xff]  ;;  %v3532_v14 = vld [vmem:[#allocation3 + $0x152] sm:$0xff]  ;;  %v10090_v37 = vpack.c.bf16 %v3597_v50, %v3596_v7  ;;  %v10096_v23 = vld [vmem:[#allocation3 + $0x22] sm:$0xff]  ;;  %4889 = vmatmul.mubr.bf16.gmra.mrb[56].mxu0 %v11559_v33 }
 0x2e0   : > { %v3149_v4 = vmax.f32 %v2972_v53, %v3084_v62  ;;  %v10082_v61 = vpack.c.bf16 %v3531_v13, %v3530_v19  ;;  %v3533_v28 = vld [vmem:[#allocation3 + $0x15a] sm:$0xff]  ;;  %v8273_v25 = vld [vmem:[%s11485_s3 + $0x1a0] sm:$0xff]   ;;  %11557 = vst [vmem:[#allocation9_spill] sm:$0xff] %v10096_v23  ;;  %4896 = vmatprep.mubr.bf16.mxu0 %v9943_v10 }
 0x2e1   : > { %v10087_v20 = vld [vmem:[#allocation3 + $0x19] sm:$0xff]  ;;  %3438 = vst [vmem:[#allocation6 + $0x3f0] sm:$0xff] %v10079_v57  ;;  %v10092_v18 = vpack.c.bf16 %v3533_v28, %v3532_v14  ;;  %v3534_v19 = vld [vmem:[#allocation3 + $0x16a] sm:$0xff]  ;;  %v10103_v59 = vld [vmem:[#allocation3 + $0x21] sm:$0xff]  ;;  %v3085_v14 = vsel %vm3037_vm15, %v3083_v22, %v3084_v62  ;;  %7803 = vmatpush3.bf16.msra.mxu0 %v8273_v25 }
 0x2e2   : > { %v10094_v53 = vld [vmem:[#allocation3 + $0x1a] sm:$0xff]  ;;  %3181 = vst [vmem:[#allocation5 + $0x1f8] sm:$0xf] %v3149_v4  ;;  %v3535_v13 = vld [vmem:[#allocation3 + $0x172] sm:$0xff]  ;;  %3439 = vst [vmem:[#allocation6 + $0x438] sm:$0xff] %v10090_v37 }
 0x2e3   : > { %11556 = vst [vmem:[#allocation8_spill] sm:$0xff] %v10094_v53  ;;  %v8274_v40 = vld [vmem:[%s11485_s3 + $0x1e8] sm:$0xff]   ;;  %v10107_v50 = vpack.c.bf16 %v3535_v13, %v3534_v19  ;;  %v11560_v53 = vpack.c.bf16 %v9843_v16, %v9792_v63  ;;  %v3268_v55 = vld [vmem:[#allocation5 + $0x160] sm:$0xff]  ;;  %v10121_v19 = vld [vmem:[#allocation3 + $0x30] sm:$0xff]  ;;  %v3148_v63 = vmax.f32 %v10007_v21, %v3085_v14 }
 0x2e4   : > { %v3698_v7 = vld [vmem:[#allocation3 + $0x32] sm:$0xff]  ;;  %v3699_v28 = vld [vmem:[#allocation3 + $0x3a] sm:$0xff]  ;;  %v3700_v16 = vld [vmem:[#allocation3 + $0x4a] sm:$0xff]  ;;  %7804 = vmatprep.subr.bf16.mxu0 %v8274_v40 }
 0x2e5   : > { %11558 = vst [vmem:[#allocation10_spill] sm:$0xff] %v10107_v50  ;;  %v3825_v4 = vld [vmem:[#allocation3 + $0x31] sm:$0xff]  ;;  %v3826_v2 = vld [vmem:[#allocation3 + $0x39] sm:$0xff]  ;;  %4743 = vmatprep.mubr.bf16.mxu1 %v11560_v53  ;;  %v10117_v23 = vpack.c.bf16 %v3699_v28, %v3698_v7  ;;  %v3300_v50 = vld [vmem:[#allocation5 + $0x168] sm:$0xff] }
 0x2e6   : > { %v10119_v47 = vpack.c.bf16 %v3826_v2, %v3825_v4  ;;  %v10123_v13 = vld [vmem:[#allocation3 + $0x38] sm:$0xff]  ;;  %v3332_v58 = vadd.f32 %v3300_v50, %v3268_v55  ;;  %v3827_v33 = vld [vmem:[#allocation3 + $0x49] sm:$0xff]  ;;  %v8277_v62 = vld [vmem:[%s11485_s3 + $0x1f0] sm:$0xff]   ;;  %4744 = vmatmul.mubr.bf16.gmra.mrb[32].mxu1 %v9943_v10 }
 0x2e7   : > { %v8275_v5 = vld [vmem:[%s11485_s3 + $0x1a8] sm:$0xff]   ;;  %v10139_v4 = vld [vmem:[#allocation3 + $0x48] sm:$0xff]  ;;  %v10141_v2 = vld [vmem:[#allocation3 + $0x50] sm:$0xff] }
 0x2e8   : > { %v3701_v53 = vld [vmem:[#allocation3 + $0x52] sm:$0xff]  ;;  %11563 = vst [vmem:[#allocation13_spill] sm:$0xff] %v10139_v4  ;;  %11564 = vst [vmem:[#allocation14_spill] sm:$0xff] %v10141_v2  ;;  %v10145_v25 = vpack.c.bf16 %v10064_v35, %v3332_v58  ;;  %v8278_v40 = vld [vmem:[%s11485_s3 + $0x1b0] sm:$0xff]   ;;  %7805 = vmatpush3.bf16.msra.mxu0 %v8275_v5  ;;  %v11567_v5 = vpack.c.bf16 %v9879_v43, %v9870_v48 }
 0x2e9   : > { %v3828_v7 = vld [vmem:[#allocation3 + $0x51] sm:$0xff]  ;;  %v10135_v22 = vpack.c.bf16 %v3701_v53, %v3700_v16  ;;  %3365 = vst [vmem:[#allocation3 + $0x121] sm:$0xff] %v3332_v58  ;;  %v3829_v55 = vld [vmem:[#allocation3 + $0x61] sm:$0xff]  ;;  %v3830_v16 = vld [vmem:[#allocation3 + $0x69] sm:$0xff]  ;;  %7806 = vmatprep.subr.bf16.mxu0 %v8277_v62 }
 0x2ea   : > { %v10137_v28 = vpack.c.bf16 %v3828_v7, %v3827_v33  ;;  %v3213_v53 = vld [vmem:[#allocation5 + $0x1f8] sm:$0xff]  ;;  %v8279_v33 = vld [vmem:[%s11485_s3 + $0x1f8] sm:$0xff]   ;;  %v10155_v7 = vpack.c.bf16 %v3830_v16, %v3829_v55  ;;  %v10157_v21 = vld [vmem:[#allocation3 + $0x60] sm:$0xff]  ;;  %4751 = vmatprep.mubr.bf16.mxu1 %v11567_v5 }
 0x2eb   : > { %11561 = vst [vmem:[#allocation11_spill] sm:$0xff] %v10135_v22  ;;  %v10159_v35 = vld [vmem:[#allocation3 + $0x68] sm:$0xff]  ;;  %v3229_v14 = vmax.f32 %v3148_v63, %v3213_v53  ;;  %v3341_v58 = vadd.f32 %v3213_v53, %v9788_v49  ;;  %v3831_v4 = vld [vmem:[#allocation3 + $0x79] sm:$0xff]  ;;  %v11566_v49 = vpack.c.bf16 %v9988_v24, %v9986_v26  ;;  %v3836_v43 = vld [vmem:[#allocation3 + $0xb1] sm:$0xff] }
 0x2ec   : > { %11562 = vst [vmem:[#allocation12_spill] sm:$0xff] %v10137_v28  ;;  %11565 = vst [vmem:[#allocation15_spill] sm:$0xff] %v10155_v7  ;;  %v3832_v2 = vld [vmem:[#allocation3 + $0x81] sm:$0xff]  ;;  %v10164_v28 = vld [vmem:[#allocation3 + $0x78] sm:$0xff]  ;;  %7807 = vmatpush3.bf16.msra.mxu0 %v8278_v40 }
 0x2ed   : > { %v10167_v55 = vpack.c.bf16 %v3832_v2, %v3831_v4  ;;  %v10169_v16 = vld [vmem:[#allocation3 + $0x80] sm:$0xff]  ;;  %v3833_v7 = vld [vmem:[#allocation3 + $0x91] sm:$0xff]  ;;  %3245 = vst [vmem:[#allocation5 + $0x1e8] sm:$0xff] %v3229_v14  ;;  %3374 = vst [vmem:[#allocation3 + $0x189] sm:$0xff] %v3341_v58  ;;  %4897 = vmatmul.mubr.bf16.gmra.mrb[60].mxu0 %v11566_v49  ;;  %7808 = vmatprep.subr.bf16.mxu0 %v8279_v33 }
 0x2ee   : > { %v3834_v22 = vld [vmem:[#allocation3 + $0x99] sm:$0xff]  ;;  %v8280_v10 = vld [vmem:[%s11485_s3 + $0x1b8] sm:$0xff]   ;;  %v10184_v4 = vld [vmem:[#allocation3 + $0x90] sm:$0xff]  ;;  %4904 = vmatprep.mubr.bf16.mxu0 %v10010_v36  ;;  %4752 = vmatmul.mubr.bf16.gmra.mrb[36].mxu1 %v10010_v36 }
 0x2ef   : > { %v10182_v62 = vpack.c.bf16 %v3834_v22, %v3833_v7  ;;  %11569 = vst [vmem:[#allocation17_spill] sm:$0xff] %v10184_v4  ;;  %v10186_v2 = vld [vmem:[#allocation3 + $0x98] sm:$0xff]  ;;  %v3835_v53 = vld [vmem:[#allocation3 + $0xa9] sm:$0xff]  ;;  %v3837_v7 = vld [vmem:[#allocation3 + $0xc1] sm:$0xff] }
 0x2f0   : > { %11570 = vst [vmem:[#allocation18_spill] sm:$0xff] %v10186_v2  ;;  %v3529_v26 = vld [vmem:[#allocation3 + $0x12a] sm:$0xff]  ;;  %v10195_v58 = vpack.c.bf16 %v3836_v43, %v3835_v53  ;;  %v10199_v5 = vld [vmem:[#allocation3 + $0xc0] sm:$0xff]  ;;  %7809 = vmatpush3.bf16.msra.mxu0 %v8280_v10  ;;  %v11578_v10 = vpack.c.bf16 %v9887_v39, %v9884_v44  ;;  %v11601_v39 = vpack.c.bf16 %v9900_v60, %v9890_v6  ;;  %v10345_v60 = vld [vmem:[#allocation3 + $0xb2] sm:$0xff] }
 0x2f1   : > { %11568 = vst [vmem:[#allocation16_spill] sm:$0xff] %v10182_v62  ;;  %v10191_v24 = vld [vmem:[#allocation3 + $0xa8] sm:$0xff]  ;;  %v10193_v14 = vld [vmem:[#allocation3 + $0xb0] sm:$0xff]  ;;  %v3590_v63 = vld [vmem:[#allocation3 + $0x120] sm:$0xff] }
 0x2f2   : > { %11571 = vst [vmem:[#allocation19_spill] sm:$0xff] %v10191_v24  ;;  %11572 = vst [vmem:[#allocation20_spill] sm:$0xff] %v10193_v14  ;;  %v3838_v49 = vld [vmem:[#allocation3 + $0xc9] sm:$0xff]  ;;  %v3839_v53 = vld [vmem:[#allocation3 + $0xd9] sm:$0xff]  ;;  %4759 = vmatprep.mubr.bf16.mxu1 %v11578_v10 }
 0x2f3   : > { %11573 = vst [vmem:[#allocation21_spill] sm:$0xff] %v10195_v58  ;;  %v3591_v50 = vld [vmem:[#allocation3 + $0x128] sm:$0xff]  ;;  %v10201_v48 = vpack.c.bf16 %v3838_v49, %v3837_v7  ;;  %v10213_v14 = vld [vmem:[#allocation3 + $0xd8] sm:$0xff]  ;;  %v10215_v58 = vld [vmem:[#allocation3 + $0xe0] sm:$0xff] }
 0x2f4   : > { %v3528_v62 = vld [vmem:[#allocation3 + $0x122] sm:$0xff]  ;;  %v10203_v4 = vpack.c.bf16 %v3591_v50, %v3590_v63  ;;  %11574 = vst [vmem:[#allocation22_spill] sm:$0xff] %v10213_v14  ;;  %v3841_v33 = vld [vmem:[#allocation3 + $0xf1] sm:$0xff]  ;;  %v3842_v63 = vld [vmem:[#allocation3 + $0xf9] sm:$0xff] }
 0x2f5   : > { %v10205_v2 = vpack.c.bf16 %v3529_v26, %v3528_v62  ;;  %v10207_v40 = vld [vmem:[#allocation3 + $0xc8] sm:$0xff]  ;;  %v10220_v62 = vld [vmem:[#allocation3 + $0xf0] sm:$0xff]  ;;  %v10222_v26 = vld [vmem:[#allocation3 + $0xf8] sm:$0xff]  ;;  %v10225_v49 = vpack.c.bf16 %v3842_v63, %v3841_v33  ;;  %4905 = vmatmul.mubr.bf16.gmra.mrb[64].mxu0 %v9945_v32  ;;  %11609 = vst [vmem:[#allocation55_spill] sm:$0xff] %v10345_v60 }
 0x2f6   : > { %v3840_v43 = vld [vmem:[#allocation3 + $0xe1] sm:$0xff]  ;;  %3436 = vst [vmem:[#allocation6 + $0x360] sm:$0xff] %v10203_v4  ;;  %11575 = vst [vmem:[#allocation23_spill] sm:$0xff] %v10220_v62  ;;  %v10231_v22 = vld [vmem:[#allocation3 + $0x111] sm:$0xff]  ;;  %4912 = vmatprep.mubr.bf16.mxu0 %v10012_v31  ;;  %4760 = vmatmul.mubr.bf16.gmra.mrb[40].mxu1 %v10012_v31 }
 0x2f7   : > { %v10211_v24 = vpack.c.bf16 %v3840_v43, %v3839_v53  ;;  %v3308_v7 = vld [vmem:[#allocation5 + $0x1e8] sm:$0xff]  ;;  %11577 = vst [vmem:[#allocation25_spill] sm:$0xff] %v10231_v22  ;;  %v8300_v50 = vld [vmem:[#allocation5 + $0x1e0] sm:$0xff]  ;;  %v10243_v63 = vld [vmem:[#allocation3 + $0x110] sm:$0xff]  ;;  %4767 = vmatprep.mubr.bf16.mxu1 %v11601_v39 }
 0x2f8   : > { %v10229_v43 = vld [vmem:[#allocation3 + $0x109] sm:$0xff]  ;;  %v10237_v14 = vadd.f32 %v8300_v50, %v3308_v7  ;;  %11581 = vst [vmem:[#allocation28_spill] sm:$0xff] %v10243_v63  ;;  %v10245_v53 = vld [vmem:[#allocation3 + $0x121] sm:$0xff]  ;;  %v10259_v7 = vld [vmem:[#allocation3 + $0x139] sm:$0xff] }
 0x2f9   : > { %11576 = vst [vmem:[#allocation24_spill] sm:$0xff] %v10229_v43  ;;  %v10241_v33 = vld [vmem:[#allocation3 + $0x108] sm:$0xff]  ;;  %11582 = vst [vmem:[#allocation29_spill] sm:$0xff] %v10245_v53  ;;  %v10252_v44 = vld [vmem:[#allocation3 + $0x120] sm:$0xff] }
 0x2fa   : > { %11579 = vst [vmem:[#allocation26_spill] sm:$0xff] %v10237_v14  ;;  %11580 = vst [vmem:[#allocation27_spill] sm:$0xff] %v10241_v33  ;;  %v10250_v62 = vld [vmem:[#allocation3 + $0x129] sm:$0xff]  ;;  %v10261_v10 = vld [vmem:[#allocation3 + $0x141] sm:$0xff] }
 0x2fb   : > { %11583 = vst [vmem:[#allocation30_spill] sm:$0xff] %v10250_v62  ;;  %11584 = vst [vmem:[#allocation31_spill] sm:$0xff] %v10252_v44  ;;  %v10257_v50 = vld [vmem:[#allocation3 + $0x128] sm:$0xff]  ;;  %v10267_v33 = vld [vmem:[#allocation3 + $0x138] sm:$0xff] }
 0x2fc   : > { %3373 = vst [vmem:[#allocation3 + $0x181] sm:$0xff] %v10237_v14  ;;  %11585 = vst [vmem:[#allocation32_spill] sm:$0xff] %v10257_v50  ;;  %v10269_v63 = vld [vmem:[#allocation3 + $0x140] sm:$0xff]  ;;  %v10271_v43 = vld [vmem:[#allocation3 + $0x151] sm:$0xff] }
 0x2fd   : > { %11586 = vst [vmem:[#allocation33_spill] sm:$0xff] %v10259_v7  ;;  %11587 = vst [vmem:[#allocation34_spill] sm:$0xff] %v10261_v10  ;;  %v10275_v53 = vld [vmem:[#allocation3 + $0x159] sm:$0xff]  ;;  %v10277_v62 = vld [vmem:[#allocation3 + $0x150] sm:$0xff]  ;;  %4913 = vmatmul.mubr.bf16.gmra.mrb[68].mxu0 %v10018_v27 }
 0x2fe   : > { %11588 = vst [vmem:[#allocation35_spill] sm:$0xff] %v10267_v33  ;;  %11589 = vst [vmem:[#allocation36_spill] sm:$0xff] %v10269_v63  ;;  %v10279_v22 = vld [vmem:[#allocation3 + $0x158] sm:$0xff]  ;;  %v10285_v7 = vld [vmem:[#allocation3 + $0x169] sm:$0xff]  ;;  %4920 = vmatprep.mubr.bf16.mxu0 %v10020_v41  ;;  %4768 = vmatmul.mubr.bf16.gmra.mrb[44].mxu1 %v10020_v41 }
 0x2ff   : > { %11590 = vst [vmem:[#allocation37_spill] sm:$0xff] %v10271_v43  ;;  %11591 = vst [vmem:[#allocation38_spill] sm:$0xff] %v10275_v53  ;;  %v10287_v10 = vld [vmem:[#allocation3 + $0x171] sm:$0xff]  ;;  %v10289_v44 = vld [vmem:[#allocation3 + $0x168] sm:$0xff] }
 0x300   : > { %11592 = vst [vmem:[#allocation39_spill] sm:$0xff] %v10277_v62  ;;  %11593 = vst [vmem:[#allocation40_spill] sm:$0xff] %v10279_v22  ;;  %v10293_v33 = vld [vmem:[#allocation3 + $0x170] sm:$0xff]  ;;  %v10302_v62 = vld [vmem:[#allocation3 + $0x62] sm:$0xff] }
 0x301   : > { %11594 = vst [vmem:[#allocation41_spill] sm:$0xff] %v10285_v7  ;;  %11595 = vst [vmem:[#allocation42_spill] sm:$0xff] %v10287_v10  ;;  %v10295_v63 = vld [vmem:[#allocation3 + $0x189] sm:$0xff]  ;;  %v10306_v53 = vld [vmem:[#allocation3 + $0x7a] sm:$0xff] }
 0x302   : > { %11596 = vst [vmem:[#allocation43_spill] sm:$0xff] %v10289_v44  ;;  %11597 = vst [vmem:[#allocation44_spill] sm:$0xff] %v10293_v33  ;;  %v3727_v43 = vld [vmem:[#allocation3 + $0x18a] sm:$0xff]  ;;  %v10314_v36 = vld [vmem:[#allocation3 + $0x82] sm:$0xff] }
 0x303   : > { %11598 = vst [vmem:[#allocation45_spill] sm:$0xff] %v10302_v62  ;;  %v10304_v22 = vld [vmem:[#allocation3 + $0x6a] sm:$0xff]  ;;  %11600 = vst [vmem:[#allocation47_spill] sm:$0xff] %v10306_v53  ;;  %v10316_v44 = vld [vmem:[#allocation3 + $0x92] sm:$0xff] }
 0x304   : > { %11599 = vst [vmem:[#allocation46_spill] sm:$0xff] %v10304_v22  ;;  %11602 = vst [vmem:[#allocation48_spill] sm:$0xff] %v10314_v36  ;;  %v10318_v32 = vld [vmem:[#allocation3 + $0x9a] sm:$0xff]  ;;  %v10323_v33 = vld [vmem:[#allocation3 + $0x188] sm:$0xff] }
 0x305   : > { %11603 = vst [vmem:[#allocation49_spill] sm:$0xff] %v10316_v44  ;;  %11604 = vst [vmem:[#allocation50_spill] sm:$0xff] %v10318_v32  ;;  %v10321_v14 = vld [vmem:[#allocation3 + $0x180] sm:$0xff]  ;;  %v10337_v10 = vld [vmem:[#allocation3 + $0x188] sm:$0xff]  ;;  %4921 = vmatmul.mubr.bf16.gmra.mrb[72].mxu0 %v10028_v8 }
 0x306   : > { %v3726_v7 = vld [vmem:[#allocation3 + $0x182] sm:$0xff]  ;;  %11607 = vst [vmem:[#allocation53_spill] sm:$0xff] %v10337_v10  ;;  %v10343_v53 = vld [vmem:[#allocation3 + $0xaa] sm:$0xff]  ;;  %v10353_v39 = vld [vmem:[#allocation3 + $0xda] sm:$0xff]  ;;  %4928 = vmatprep.mubr.bf16.mxu0 %v10030_v54 }
 0x307   : > { %v10331_v31 = vpack.c.bf16 %v3727_v43, %v3726_v7  ;;  %v10333_v62 = vld [vmem:[#allocation3 + $0x181] sm:$0xff]  ;;  %11608 = vst [vmem:[#allocation54_spill] sm:$0xff] %v10343_v53  ;;  %v10351_v7 = vld [vmem:[#allocation3 + $0xca] sm:$0xff]  ;;  %11611 = vst [vmem:[#allocation57_spill] sm:$0xff] %v10353_v39  ;;  %v11616_v43 = vpack.c.bf16 %v9907_v42, %v9903_v1  ;;  %v11617_v1 = vpack.c.bf16 %v9918_v15, %v9914_v17  ;;  %v7474_v17 = vpop.f32.mrb[16].mxu1 }
 0x308   : > { %11605 = vst [vmem:[#allocation51_spill] sm:$0xff] %v10333_v62  ;;  %v10335_v22 = vld [vmem:[#allocation3 + $0x180] sm:$0xff]  ;;  %v10361_v36 = vld [vmem:[#allocation3 + $0xf2] sm:$0xff]  ;;  %v10365_v10 = vld [vmem:[#allocation3 + $0x10a] sm:$0xff]  ;;  %v11618_v42 = vpack.c.bf16 %v9930_v3, %v9920_v52  ;;  %v7475_v15 = vpop.f32.mrb[17].mxu1 }
 0x309   : > { %11606 = vst [vmem:[#allocation52_spill] sm:$0xff] %v10335_v22  ;;  %v10347_v44 = vld [vmem:[#allocation3 + $0xc2] sm:$0xff]  ;;  %11613 = vst [vmem:[#allocation59_spill] sm:$0xff] %v10361_v36  ;;  %v10363_v22 = vld [vmem:[#allocation3 + $0xfa] sm:$0xff]  ;;  %4775 = vmatprep.mubr.bf16.mxu1 %v11616_v43 }
 0x30a   : > { %11610 = vst [vmem:[#allocation56_spill] sm:$0xff] %v10347_v44  ;;  %v10355_v32 = vld [vmem:[#allocation3 + $0xe2] sm:$0xff]  ;;  %v10369_v53 = vld [vmem:[#allocation3 + $0x112] sm:$0xff]  ;;  %v10373_v62 = vld [vmem:[#allocation3 + $0x12a] sm:$0xff]  ;;  %4776 = vmatmul.mubr.bf16.gmra.mrb[48].mxu1 %v10030_v54  ;;  %v10419_v54 = vadd.f32 %v7475_v15, %v7474_v17  ;;  %v11626_v15 = vpack.c.bf16 %v10123_v13, %v10121_v19 }
 0x30b   : > { %11612 = vst [vmem:[#allocation58_spill] sm:$0xff] %v10355_v32  ;;  %v10371_v60 = vld [vmem:[#allocation3 + $0x122] sm:$0xff]  ;;  %11615 = vst [vmem:[#allocation61_spill] sm:$0xff] %v10373_v62  ;;  %v10380_v39 = vld [vmem:[#allocation3 + $0x13a] sm:$0xff]  ;;  %4783 = vmatprep.mubr.bf16.mxu1 %v11617_v1 }
 0x30c   : > { %11614 = vst [vmem:[#allocation60_spill] sm:$0xff] %v10371_v60  ;;  %v10382_v32 = vld [vmem:[#allocation3 + $0x142] sm:$0xff]  ;;  %v10384_v44 = vld [vmem:[#allocation3 + $0x152] sm:$0xff]  ;;  %v10392_v36 = vld [vmem:[#allocation3 + $0x15a] sm:$0xff] }
 0x30d   : > { %v3932_v41 = vpack.c.bf16 %v10382_v32, %v10380_v39  ;;  %v10394_v6 = vld [vmem:[#allocation3 + $0x16a] sm:$0xff]  ;;  %v10396_v50 = vld [vmem:[#allocation3 + $0x172] sm:$0xff]  ;;  %v3933_v60 = vpack.c.bf16 %v10392_v36, %v10384_v44  ;;  %4929 = vmatmul.mubr.bf16.gmra.mrb[76].mxu0 %v10033_v38  ;;  %v11619_v52 = vld [vmem:[#allocation7_spill] sm:$0xff] }
 0x30e   : > { %v3934_v62 = vpack.c.bf16 %v10396_v50, %v10394_v6  ;;  %4936 = vmatprep.mubr.bf16.mxu0 %v10039_v9  ;;  %v11621_v3 = vld [vmem:[#allocation8_spill] sm:$0xff]  ;;  %v11629_v19 = vld [vmem:[#allocation14_spill] sm:$0xff]  ;;  %v11630_v13 = vld [vmem:[#allocation13_spill] sm:$0xff] }
 0x30f   : > { %v8283_v17 = vld [vmem:[%s11485_s3 + $0x218] sm:$0xff]  }
 0x312   : > { %4784 = vmatmul.mubr.bf16.gmra.mrb[52].mxu1 %v10039_v9  ;;  %v7477_v9 = vpop.f32.mrb[18].mxu1 }
 0x313   : > { %4791 = vmatprep.mubr.bf16.mxu1 %v11618_v42  ;;  %v7478_v43 = vpop.f32.mrb[19].mxu1 }
 0x314   : > { %v10421_v1 = vadd.f32 %v7478_v43, %v7477_v9  ;;  %v11627_v9 = vld [vmem:[#allocation11_spill] sm:$0xff]  ;;  %v11628_v43 = vld [vmem:[#allocation12_spill] sm:$0xff] }
 0x315   : > { %4937 = vmatmul.mubr.bf16.gmra.mrb[80].mxu0 %v10041_v51 }
 0x316   : > { %4944 = vmatprep.mubr.bf16.mxu0 %v10047_v30 }
 0x31a   : > { %4792 = vmatmul.mubr.bf16.gmra.mrb[56].mxu1 %v10047_v30  ;;  %v11620_v30 = vld [vmem:[#allocation9_spill] sm:$0xff] }
 0x31b   : > { %4799 = vmatprep.mubr.bf16.mxu1 %v9955_v11  ;;  %v11622_v11 = vpack.c.bf16 %v11620_v30, %v11621_v3  ;;  %v11631_v30 = vpack.c.bf16 %v11629_v19, %v11630_v13  ;;  %v8303_v3 = vld [vmem:[#allocation6 + $0x130] sm:$0xff]  ;;  %v11652_v13 = vld [vmem:[#allocation27_spill] sm:$0xff] }
 0x31d   : > { %4945 = vmatmul.mubr.bf16.gmra.mrb[84].mxu0 %v10051_v0 }
 0x31e   : > { %4952 = vmatprep.mubr.bf16.mxu0 %v10053_v46 }
 0x322   : > { %4800 = vmatmul.mubr.bf16.gmra.mrb[60].mxu1 %v10053_v46  ;;  %v11624_v46 = vpack.c.bf16 %v10103_v59, %v10087_v20  ;;  %v10468_v20 = vld [vmem:[#allocation3 + $0x198] sm:$0xff] }
 0x323   : > { %4807 = vmatprep.mubr.bf16.mxu1 %v10145_v25 }
 0x325   : > { %4953 = vmatmul.mubr.bf16.gmra.mrb[88].mxu0 %v10062_v29 }
 0x326   : > { %4960 = vmatprep.mubr.bf16.mxu0 %v10203_v4 }
 0x32a   : > { %4808 = vmatmul.mubr.bf16.gmra.mrb[64].mxu1 %v10203_v4  ;;  %v10462_v4 = vld [vmem:[#allocation3 + $0x199] sm:$0xff] }
 0x32b   : > { %4815 = vmatprep.mubr.bf16.mxu1 %v9957_v45  ;;  %v11623_v45 = vpack.c.bf16 %v10323_v33, %v10321_v14  ;;  %v10464_v14 = vld [vmem:[#allocation3 + $0x1a1] sm:$0xff] }
 0x32c   : > { %v3872_v59 = vpack.c.bf16 %v10464_v14, %v10462_v4  ;;  %v10470_v33 = vld [vmem:[#allocation3 + $0x8] sm:$0xff] }
 0x32d   : > { %4961 = vmatmul.mubr.bf16.gmra.mrb[92].mxu0 %v10071_v56  ;;  %v3808_v42 = vpack.c.bf16 %v10470_v33, %v10468_v20 }
 0x32e   : > { %4968 = vmatprep.mubr.bf16.mxu0 %v10077_v12 }
 0x332   : > { %4816 = vmatmul.mubr.bf16.gmra.mrb[68].mxu1 %v10077_v12  ;;  %v11625_v12 = vld [vmem:[#allocation10_spill] sm:$0xff] }
 0x333   : > { %4823 = vmatprep.mubr.bf16.mxu1 %v9990_v34  ;;  %v8281_v34 = vld [vmem:[%s11485_s3 + $0x208] sm:$0xff]  }
 0x335   : > { %4969 = vmatmul.mubr.bf16.gmra.mrb[96].mxu0 %v10205_v2 }
 0x336   : > { %4976 = vmatprep.mubr.bf16.mxu0 %v10079_v57 }
 0x33a   : > { %4824 = vmatmul.mubr.bf16.gmra.mrb[72].mxu1 %v10079_v57  ;;  %v8301_v57 = vld [vmem:[%s11485_s3 + $0x200] sm:$0xff]  }
 0x33b   : > { %4831 = vmatprep.mubr.bf16.mxu1 %v11619_v52  ;;  %v8284_v52 = vld [vmem:[%s11485_s3 + $0x220] sm:$0xff]  }
 0x33d   : > { %4977 = vmatmul.mubr.bf16.gmra.mrb[100].mxu0 %v10082_v61 }
 0x33e   : > { %4984 = vmatprep.mubr.bf16.mxu0 %v10090_v37 }
 0x342   : > { %4832 = vmatmul.mubr.bf16.gmra.mrb[76].mxu1 %v10090_v37  ;;  %v8282_v37 = vld [vmem:[%s11485_s3 + $0x210] sm:$0xff]  }
 0x343   : > { %5033 = vmatprep.mubr.bf16.mxu1 %v11622_v11  ;;  %v11632_v11 = vld [vmem:[#allocation15_spill] sm:$0xff] }
 0x345   : > { %4985 = vmatmul.mubr.bf16.gmra.mrb[104].mxu0 %v10092_v18 }
 0x346   : > { %4992 = vmatprep.mubr.bf16.mxu0 %v11623_v45  ;;  %v8286_v45 = vld [vmem:[%s11485_s3 + $0x230] sm:$0xff]  }
 0x34a   : > { %5034 = vmatmul.mubr.bf16.vlgmr.msra.gmra.mrb[80].mxu1 %v11624_v46  ;;  %v11633_v46 = vpack.c.bf16 %v10159_v35, %v10157_v21  ;;  %v11634_v21 = vpack.c.bf16 %v10169_v16, %v10164_v28  ;;  %v11636_v35 = vld [vmem:[#allocation18_spill] sm:$0xff]  ;;  %v10539_v16 = vld [vmem:[#allocation3 + $0x1a2] sm:$0xff] }
 0x34b   : > { %7967 = vmatpush3.bf16.msra.mxu1 %v8301_v57  ;;  %5041 = vmatprep.mubr.bf16.mxu1 %v10117_v23  ;;  %v10509_v57 = vld [vmem:[%s11487_s5] sm:$0x3] }
 0x34c   : > { %7968 = vmatprep.subr.bf16.mxu1 %v8281_v34 }
 0x34d   : > { %4993 = vmatmul.mubr.bf16.gmra.mrb[108].mxu0 %v11625_v12 }
 0x34e   : > { %5194 = vmatprep.mubr.bf16.mxu0 %v10119_v47 }
 0x34f   : > { %7969 = vmatpush3.bf16.msra.mxu1 %v8281_v34  ;;  %v8287_v34 = vld [vmem:[%s11485_s3 + $0x238] sm:$0xff]  }
 0x350   : > { %7970 = vmatprep.subr.bf16.mxu1 %v8282_v37 }
 0x352   : > { %5042 = vmatmul.mubr.bf16.gmra.mrb[84].mxu1 %v10119_v47  ;;  %v8285_v47 = vld [vmem:[%s11485_s3 + $0x228] sm:$0xff]  }
 0x353   : > { %5049 = vmatprep.mubr.bf16.mxu1 %v11627_v9  ;;  %7971 = vmatpush3.bf16.msra.mxu1 %v8282_v37  ;;  %v11637_v37 = vld [vmem:[#allocation17_spill] sm:$0xff] }
 0x354   : > { %7972 = vmatprep.subr.bf16.mxu1 %v8283_v17 }
 0x355   : > { %5195 = vmatmul.mubr.bf16.vlgmr.msra.gmra.mrb[112].mxu0 %v11626_v15  ;;  %v11639_v15 = vld [vmem:[#allocation21_spill] sm:$0xff] }
 0x356   : > { %5202 = vmatprep.mubr.bf16.mxu0 %v11628_v43 }
 0x357   : > { %7973 = vmatpush3.bf16.msra.mxu1 %v8283_v17  ;;  %v11638_v17 = vpack.c.bf16 %v11636_v35, %v11637_v37 }
 0x358   : > { %7974 = vmatprep.subr.bf16.mxu1 %v8284_v52 }
 0x35a   : > { %5050 = vmatmul.mubr.bf16.gmra.mrb[88].mxu1 %v11628_v43  ;;  %v11641_v43 = vld [vmem:[#allocation19_spill] sm:$0xff] }
 0x35b   : > { %5057 = vmatprep.mubr.bf16.mxu1 %v8303_v3  ;;  %7975 = vmatpush3.bf16.msra.mxu1 %v8284_v52  ;;  %v11657_v3 = vld [vmem:[#allocation32_spill] sm:$0xff] }
 0x35c   : > { %7976 = vmatprep.subr.bf16.mxu1 %v8285_v47 }
 0x35d   : > { %5203 = vmatmul.mubr.bf16.gmra.mrb[116].mxu0 %v11631_v30 }
 0x35e   : > { %5210 = vmatprep.mubr.bf16.mxu0 %v11632_v11 }
 0x35f   : > { %7977 = vmatpush3.bf16.msra.mxu1 %v8285_v47  ;;  %v11648_v47 = vld [vmem:[#allocation25_spill] sm:$0xff] }
 0x360   : > { %7978 = vmatprep.subr.bf16.mxu1 %v8286_v45 }
 0x362   : > { %5058 = vmatmul.mubr.bf16.gmra.mrb[92].mxu1 %v11632_v11 }
 0x363   : > { %5065 = vmatprep.mubr.bf16.mxu1 %v10018_v27  ;;  %7979 = vmatpush3.bf16.msra.mxu1 %v8286_v45  ;;  %v11635_v27 = vld [vmem:[#allocation16_spill] sm:$0xff]  ;;  %v8305_v45 = vld [vmem:[#allocation6 + $0x3b0] sm:$0xff] }
 0x364   : > { %7980 = vmatprep.subr.bf16.mxu1 %v8287_v34 }
 0x365   : > { %5211 = vmatmul.mubr.bf16.gmra.mrb[120].mxu0 %v11633_v46 }
 0x366   : > { %5218 = vmatprep.mubr.bf16.mxu0 %v10167_v55 }
 0x367   : > { %7981 = vmatpush3.bf16.msra.mxu1 %v8287_v34  ;;  %v10572_v34 = vld [vmem:[%s11486_s4] ss:$0 sm:$0xff] }
 0x368   : > { %8188 = vmatprep.subr.msk.bf16.mxu1 %vm1735_vm3, %v10509_v57  ;;  %v4714_v37 = vadd.f32 %v10419_v54, %v10572_v34 }
 0x36a   : > { %5066 = vmatmul.mubr.bf16.gmra.mrb[96].mxu1 %v10167_v55  ;;  %v11640_v55 = vld [vmem:[#allocation20_spill] sm:$0xff] }
 0x36b   : > { %5073 = vmatprep.mubr.bf16.mxu1 %v10028_v8  ;;  %v11642_v28 = vpack.c.bf16 %v11640_v55, %v11641_v43  ;;  %v11643_v8 = vpack.c.bf16 %v10207_v40, %v10199_v5  ;;  %v8304_v40 = vld [vmem:[#allocation6 + $0x320] sm:$0xff] }
 0x36d   : > { %5219 = vmatmul.mubr.bf16.gmra.mrb[124].mxu0 %v11634_v21 }
 0x36e   : > { %5226 = vmatprep.mubr.bf16.mxu0 %v11635_v27 }
 0x372   : > { %5074 = vmatmul.mubr.bf16.gmra.mrb[100].mxu1 %v11635_v27 }
 0x373   : > { %5081 = vmatprep.mubr.bf16.mxu1 %v10033_v38  ;;  %v10537_v38 = vld [vmem:[#allocation3 + $0x19a] sm:$0xff] }
 0x374   : > { %v3936_v52 = vpack.c.bf16 %v10539_v16, %v10537_v38 }
 0x375   : > { %5227 = vmatmul.mubr.bf16.gmra.mrb[128].mxu0 %v11638_v17 }
 0x376   : > { %5234 = vmatprep.mubr.bf16.mxu0 %v11639_v15 }
 0x37a   : > { %5082 = vmatmul.mubr.bf16.gmra.mrb[104].mxu1 %v11639_v15 }
 0x37b   : > { %5089 = vmatprep.mubr.bf16.mxu1 %v10041_v51  ;;  %v11644_v51 = vld [vmem:[#allocation22_spill] sm:$0xff] }
 0x37d   : > { %5235 = vmatmul.mubr.bf16.gmra.mrb[132].mxu0 %v11642_v28  ;;  %v4717_v28 = vadd.f32 %v10421_v1, %v10572_v34 }
 0x37e   : > { %5242 = vmatprep.mubr.bf16.mxu0 %v10201_v48 }
 0x382   : > { %5090 = vmatmul.mubr.bf16.gmra.mrb[108].mxu1 %v10201_v48  ;;  %v11645_v48 = vpack.c.bf16 %v10215_v58, %v11644_v51  ;;  %v11651_v58 = vld [vmem:[#allocation28_spill] sm:$0xff] }
 0x383   : > { %5097 = vmatprep.mubr.bf16.mxu1 %v10051_v0  ;;  %v11646_v0 = vld [vmem:[#allocation23_spill] sm:$0xff]  ;;  %v11653_v30 = vpack.c.bf16 %v11651_v58, %v11652_v13 }
 0x384   : > { %v11647_v5 = vpack.c.bf16 %v10222_v26, %v11646_v0  ;;  %v11661_v0 = vld [vmem:[#allocation33_spill] sm:$0xff] }
 0x385   : > { %5243 = vmatmul.mubr.bf16.gmra.mrb[136].mxu0 %v11643_v8 }
 0x386   : > { %5250 = vmatprep.mubr.bf16.mxu0 %v10211_v24 }
 0x38a   : > { %5098 = vmatmul.mubr.bf16.gmra.mrb[112].mxu1 %v10211_v24  ;;  %v11649_v24 = vld [vmem:[#allocation24_spill] sm:$0xff] }
 0x38b   : > { %5105 = vmatprep.mubr.bf16.mxu1 %v10062_v29  ;;  %v11650_v19 = vpack.c.bf16 %v11648_v47, %v11649_v24  ;;  %v11654_v29 = vld [vmem:[#allocation30_spill] sm:$0xff]  ;;  %v11664_v47 = vld [vmem:[#allocation35_spill] sm:$0xff] }
 0x38d   : > { %5251 = vmatmul.mubr.bf16.gmra.mrb[140].mxu0 %v11645_v48  ;;  %v11660_v48 = vld [vmem:[#allocation34_spill] sm:$0xff] }
 0x38e   : > { %5258 = vmatprep.mubr.bf16.mxu0 %v10225_v49 }
 0x392   : > { %5106 = vmatmul.mubr.bf16.gmra.mrb[116].mxu1 %v10225_v49  ;;  %v11655_v49 = vld [vmem:[#allocation29_spill] sm:$0xff] }
 0x393   : > { %5113 = vmatprep.mubr.bf16.mxu1 %v10071_v56  ;;  %v11656_v26 = vpack.c.bf16 %v11654_v29, %v11655_v49  ;;  %v11658_v56 = vld [vmem:[#allocation31_spill] sm:$0xff] }
 0x394   : > { %v11659_v11 = vpack.c.bf16 %v11657_v3, %v11658_v56 }
 0x395   : > { %5259 = vmatmul.mubr.bf16.gmra.mrb[144].mxu0 %v11647_v5  ;;  %v11662_v5 = vpack.c.bf16 %v11660_v48, %v11661_v0 }
 0x396   : > { %5266 = vmatprep.mubr.bf16.mxu0 %v8304_v40  ;;  %v11663_v40 = vld [vmem:[#allocation36_spill] sm:$0xff] }
 0x397   : > { %v11665_v24 = vpack.c.bf16 %v11663_v40, %v11664_v47 }
 0x39a   : > { %5114 = vmatmul.mubr.bf16.gmra.mrb[120].mxu1 %v11650_v19  ;;  %v8306_v19 = vld [vmem:[#allocation6 + $0x3f8] sm:$0xff] }
 0x39b   : > { %5121 = vmatprep.mubr.bf16.mxu1 %v10205_v2 }
 0x39d   : > { %5267 = vmatmul.mubr.bf16.gmra.mrb[148].mxu0 %v11653_v30 }
 0x39e   : > { %5274 = vmatprep.mubr.bf16.mxu0 %v10145_v25  ;;  %v7480_v2 = vpop.f32.mrb[20].mxu1 }
 0x39f   : > { %v7481_v25 = vpop.f32.mrb[21].mxu1 }
 0x3a0   : > { %v7482_v21 = vadd.f32 %v7481_v25, %v7480_v2  ;;  %v7483_v35 = vpop.f32.mrb[22].mxu1 }
 0x3a1   : > { %v7586_v46 = vpop.f32.mrb[48].mxu0  ;;  %v7484_v55 = vpop.f32.mrb[23].mxu1 }
 0x3a2   : > { %5122 = vmatmul.mubr.bf16.gmra.mrb[124].mxu1 %v11656_v26  ;;  %v7587_v27 = vpop.f32.mrb[49].mxu0  ;;  %v4722_v26 = vadd.f32 %v7482_v21, %v10572_v34 }
 0x3a3   : > { %5129 = vmatprep.mubr.bf16.mxu1 %v10082_v61  ;;  %v7588_v17 = vadd.f32 %v7587_v27, %v7586_v46  ;;  %v7589_v15 = vpop.f32.mrb[50].mxu0  ;;  %v7485_v61 = vadd.f32 %v7484_v55, %v7483_v35  ;;  %v11666_v27 = vld [vmem:[#allocation38_spill] sm:$0xff]  ;;  %v11667_v35 = vld [vmem:[#allocation37_spill] sm:$0xff] }
 0x3a4   : > { %v7590_v43 = vpop.f32.mrb[51].mxu0 }
 0x3a5   : > { %5275 = vmatmul.mubr.bf16.gmra.mrb[152].mxu0 %v11659_v11  ;;  %v10578_v8 = vadd.f32 %v7588_v17, %v4714_v37  ;;  %v7591_v51 = vadd.f32 %v7590_v43, %v7589_v15  ;;  %v4725_v46 = vadd.f32 %v7485_v61, %v10572_v34  ;;  %v11668_v37 = vpack.c.bf16 %v11666_v27, %v11667_v35  ;;  %v11669_v17 = vld [vmem:[#allocation40_spill] sm:$0xff]  ;;  %v11670_v15 = vld [vmem:[#allocation39_spill] sm:$0xff] }
 0x3a6   : > { %5282 = vmatprep.mubr.bf16.mxu0 %v8305_v45  ;;  %v7486_v58 = vpop.f32.mrb[24].mxu1  ;;  %v11671_v55 = vpack.c.bf16 %v11669_v17, %v11670_v15  ;;  %v8307_v43 = vld [vmem:[#allocation6 + $0x440] sm:$0xff] }
 0x3a7   : > { %v10587_v54 = vadd.f32 %v7591_v51, %v4717_v28  ;;  %v7487_v1 = vpop.f32.mrb[25].mxu1 }
 0x3a8   : > { %v7488_v30 = vadd.f32 %v7487_v1, %v7486_v58  ;;  %v7489_v49 = vpop.f32.mrb[26].mxu1 }
 0x3a9   : > { %v7592_v13 = vpop.f32.mrb[52].mxu0  ;;  %v7490_v11 = vpop.f32.mrb[27].mxu1 }
 0x3aa   : > { %5130 = vmatmul.mubr.bf16.gmra.mrb[128].mxu1 %v11662_v5  ;;  %v7593_v29 = vpop.f32.mrb[53].mxu0  ;;  %v7491_v45 = vadd.f32 %v7490_v11, %v7489_v49  ;;  %v4730_v40 = vadd.f32 %v7488_v30, %v10572_v34  ;;  %v11672_v49 = vld [vmem:[#allocation42_spill] sm:$0xff]  ;;  %v11676_v11 = vld [vmem:[#allocation43_spill] sm:$0xff] }
 0x3ab   : > { %5137 = vmatprep.mubr.bf16.mxu1 %v10092_v18  ;;  %v7594_v3 = vadd.f32 %v7593_v29, %v7592_v13  ;;  %v7595_v56 = vpop.f32.mrb[54].mxu0 }
 0x3ac   : > { %v7596_v2 = vpop.f32.mrb[55].mxu0  ;;  %v4733_v1 = vadd.f32 %v7491_v45, %v10572_v34 }
 0x3ad   : > { %5283 = vmatmul.mubr.bf16.gmra.mrb[156].mxu0 %v11665_v24  ;;  %v10591_v18 = vadd.f32 %v7594_v3, %v4722_v26  ;;  %v7597_v25 = vadd.f32 %v7596_v2, %v7595_v56  ;;  %v11673_v26 = vld [vmem:[#allocation41_spill] sm:$0xff]  ;;  %v11675_v56 = vld [vmem:[#allocation44_spill] sm:$0xff] }
 0x3ae   : > { %5290 = vmatprep.mubr.bf16.mxu0 %v8306_v19  ;;  %v7492_v28 = vpop.f32.mrb[28].mxu1  ;;  %v11674_v3 = vpack.c.bf16 %v11672_v49, %v11673_v26  ;;  %v11677_v2 = vpack.c.bf16 %v11675_v56, %v11676_v11 }
 0x3af   : > { %v10600_v21 = vadd.f32 %v7597_v25, %v4725_v46  ;;  %v7493_v61 = vpop.f32.mrb[29].mxu1  ;;  %v11678_v46 = vld [vmem:[#allocation26_spill] sm:$0xff] }
 0x3b0   : > { %v7494_v48 = vadd.f32 %v7493_v61, %v7492_v28  ;;  %v7495_v5 = vpop.f32.mrb[30].mxu1  ;;  %v11679_v25 = vpack.c.bf16 %v10295_v63, %v11678_v46 }
 0x3b1   : > { %v7496_v19 = vpop.f32.mrb[31].mxu1 }
 0x3b2   : > { %5138 = vmatmul.mubr.bf16.gmra.mrb[132].mxu1 %v11668_v37  ;;  %v7598_v51 = vpop.f32.mrb[56].mxu0  ;;  %v7497_v58 = vadd.f32 %v7496_v19, %v7495_v5 }
 0x3b3   : > { %5145 = vmatprep.mubr.bf16.mxu1 %v11625_v12  ;;  %v7599_v0 = vpop.f32.mrb[57].mxu0 }
 0x3b4   : > { %v7600_v47 = vadd.f32 %v7599_v0, %v7598_v51  ;;  %v7601_v24 = vpop.f32.mrb[58].mxu0  ;;  %v4741_v5 = vadd.f32 %v7497_v58, %v10572_v34 }
 0x3b5   : > { %5291 = vmatmul.mubr.bf16.gmra.mrb[160].mxu0 %v11671_v55  ;;  %v7602_v13 = vpop.f32.mrb[59].mxu0  ;;  %v4738_v55 = vadd.f32 %v7494_v48, %v10572_v34 }
 0x3b6   : > { %5298 = vmatprep.mubr.bf16.mxu0 %v8307_v43  ;;  %v10604_v12 = vadd.f32 %v7600_v47, %v4730_v40  ;;  %v7603_v29 = vadd.f32 %v7602_v13, %v7601_v24  ;;  %v11680_v24 = vld [vmem:[#allocation51_spill] sm:$0xff]  ;;  %v11682_v13 = vld [vmem:[#allocation53_spill] sm:$0xff] }
 0x3b7   : > { %v11681_v19 = vpack.c.bf16 %v10295_v63, %v11680_v24 }
 0x3b8   : > { %v10613_v30 = vadd.f32 %v7603_v29, %v4733_v1  ;;  %v11683_v1 = vld [vmem:[#allocation52_spill] sm:$0xff] }
 0x3b9   : > { %v7498_v45 = vpop.f32.mrb[32].mxu1  ;;  %v11684_v29 = vpack.c.bf16 %v11682_v13, %v11683_v1  ;;  %v11688_v13 = vld [vmem:[#allocation48_spill] sm:$0xff]  ;;  %v11689_v1 = vld [vmem:[#allocation47_spill] sm:$0xff] }
 0x3ba   : > { %5146 = vmatmul.mubr.bf16.gmra.mrb[136].mxu1 %v11674_v3  ;;  %v7499_v35 = vpop.f32.mrb[33].mxu1 }
 0x3bb   : > { %5153 = vmatprep.mubr.bf16.mxu1 %v10331_v31  ;;  %v7500_v37 = vadd.f32 %v7499_v35, %v7498_v45  ;;  %v7501_v15 = vpop.f32.mrb[34].mxu1 }
 0x3bc   : > { %v7502_v51 = vpop.f32.mrb[35].mxu1 }
 0x3bd   : > { %5299 = vmatmul.mubr.bf16.gmra.mrb[164].mxu0 %v11677_v2  ;;  %v7503_v61 = vadd.f32 %v7502_v51, %v7501_v15  ;;  %v4746_v63 = vadd.f32 %v7500_v37, %v10572_v34  ;;  %v11685_v37 = vld [vmem:[#allocation46_spill] sm:$0xff] }
 0x3be   : > { %5306 = vmatprep.mubr.bf16.mxu0 %v11679_v25 }
 0x3bf   : > { %v4749_v35 = vadd.f32 %v7503_v61, %v10572_v34 }
 0x3c0   : > { %v7604_v27 = vpop.f32.mrb[60].mxu0 }
 0x3c1   : > { %v7605_v17 = vpop.f32.mrb[61].mxu0  ;;  %v7504_v58 = vpop.f32.mrb[36].mxu1 }
 0x3c2   : > { %v7606_v43 = vadd.f32 %v7605_v17, %v7604_v27  ;;  %v7607_v28 = vpop.f32.mrb[62].mxu0  ;;  %5154 = vmatmul.mubr.bf16.gmra.mrb[140].mxu1 %v11681_v19  ;;  %v7505_v26 = vpop.f32.mrb[37].mxu1  ;;  %v11686_v17 = vld [vmem:[#allocation45_spill] sm:$0xff] }
 0x3c3   : > { %v7608_v0 = vpop.f32.mrb[63].mxu0  ;;  %7982 = vmatprep.mubr.bf16.mxu1 %v10117_v23  ;;  %v7506_v3 = vadd.f32 %v7505_v26, %v7504_v58  ;;  %v7507_v11 = vpop.f32.mrb[38].mxu1  ;;  %v5589_v23 = vsel %vm1735_vm3, %v10509_v57, 0  ;;  %v11687_v15 = vpack.c.bf16 %v11685_v37, %v11686_v17  ;;  %v11691_v58 = vld [vmem:[#allocation50_spill] sm:$0xff] }
 0x3c4   : > { %v10620_v40 = vadd.f32 %v7606_v43, %v4738_v55  ;;  %v7609_v47 = vadd.f32 %v7608_v0, %v7607_v28  ;;  %v7508_v25 = vpop.f32.mrb[39].mxu1 }
 0x3c5   : > { %5307 = vmatmul.mubr.bf16.gmra.mrb[168].mxu0 %v11684_v29  ;;  %v7509_v45 = vadd.f32 %v7508_v25, %v7507_v11  ;;  %v4754_v0 = vadd.f32 %v7506_v3, %v10572_v34  ;;  %v11690_v29 = vpack.c.bf16 %v11688_v13, %v11689_v1 }
 0x3c6   : > { %v10629_v48 = vadd.f32 %v7609_v47, %v4741_v5  ;;  %5314 = vmatprep.mubr.bf16.mxu0 %v3872_v59 }
 0x3c8   : > { %v7610_v49 = vpop.f32.mrb[64].mxu0 }
 0x3c9   : > { %v7611_v56 = vpop.f32.mrb[65].mxu0  ;;  %v7510_v57 = vpop.f32.mrb[40].mxu1 }
 0x3ca   : > { %v7612_v2 = vadd.f32 %v7611_v56, %v7610_v49  ;;  %v7613_v46 = vpop.f32.mrb[66].mxu0  ;;  %7983 = vmatmul.mubr.bf16.vlgmr.msra.gmra.mrb[144].mxu1 %v11627_v9  ;;  %v7511_v43 = vpop.f32.mrb[41].mxu1  ;;  %v11692_v49 = vld [vmem:[#allocation49_spill] sm:$0xff] }
 0x3cb   : > { %v7614_v27 = vpop.f32.mrb[67].mxu0  ;;  %8015 = vmatpush3.bf16.msra.mxu1 %v5589_v23  ;;  %7986 = vmatprep.mubr.bf16.mxu1 %v11687_v15  ;;  %v7512_v28 = vadd.f32 %v7511_v43, %v7510_v57  ;;  %v7513_v61 = vpop.f32.mrb[42].mxu1  ;;  %v11693_v26 = vpack.c.bf16 %v11691_v58, %v11692_v49  ;;  %v11695_v43 = vld [vmem:[#allocation54_spill] sm:$0xff] }
 0x3cc   : > { %v10638_v4 = vadd.f32 %v7612_v2, %v4746_v63  ;;  %v7615_v14 = vadd.f32 %v7614_v27, %v7613_v46  ;;  %v7514_v47 = vpop.f32.mrb[43].mxu1 }
 0x3cd   : > { %5315 = vmatmul.mubr.bf16.gmra.mrb[172].mxu0 %v3808_v42  ;;  %v7515_v20 = vadd.f32 %v7514_v47, %v7513_v61  ;;  %v4757_v42 = vadd.f32 %v7509_v45, %v10572_v34  ;;  %v4762_v23 = vadd.f32 %v7512_v28, %v10572_v34  ;;  %v11697_v61 = vld [vmem:[#allocation56_spill] sm:$0xff] }
 0x3ce   : > { %v10644_v59 = vadd.f32 %v7615_v14, %v4749_v35 }
 0x3cf   : > { %v4765_v17 = vadd.f32 %v7515_v20, %v10572_v34 }
 0x3d0   : > { %v7616_v55 = vpop.f32.mrb[68].mxu0 }
 0x3d1   : > { %v7617_v51 = vpop.f32.mrb[69].mxu0  ;;  %v7516_v3 = vpop.f32.mrb[44].mxu1 }
 0x3d2   : > { %v7618_v9 = vadd.f32 %v7617_v51, %v7616_v55  ;;  %v7619_v5 = vpop.f32.mrb[70].mxu0  ;;  %7987 = vmatmul.mubr.bf16.gmra.mrb[148].mxu1 %v11690_v29  ;;  %v7517_v63 = vpop.f32.mrb[45].mxu1  ;;  %v11694_v55 = vld [vmem:[#allocation55_spill] sm:$0xff] }
 0x3d3   : > { %v7620_v33 = vpop.f32.mrb[71].mxu0  ;;  %7990 = vmatprep.mubr.bf16.mxu1 %v11693_v26  ;;  %v7518_v2 = vadd.f32 %v7517_v63, %v7516_v3  ;;  %v7519_v25 = vpop.f32.mrb[46].mxu1  ;;  %v11696_v51 = vpack.c.bf16 %v11694_v55, %v11695_v43  ;;  %v11700_v63 = vld [vmem:[#allocation57_spill] sm:$0xff] }
 0x3d4   : > { %v10651_v24 = vadd.f32 %v7618_v9, %v4754_v0  ;;  %v7621_v19 = vadd.f32 %v7620_v33, %v7619_v5  ;;  %v7520_v35 = vpop.f32.mrb[47].mxu1  ;;  %v11698_v0 = vpack.c.bf16 %v10351_v7, %v11697_v61 }
 0x3d5   : > { %v7521_v14 = vadd.f32 %v7520_v35, %v7519_v25  ;;  %v4770_v20 = vadd.f32 %v7518_v2, %v10572_v34  ;;  %v11702_v25 = vld [vmem:[#allocation59_spill] sm:$0xff] }
 0x3d6   : > { %v10659_v56 = vadd.f32 %v7621_v19, %v4757_v42 }
 0x3d7   : > { %v4773_v26 = vadd.f32 %v7521_v14, %v10572_v34 }
 0x3d8   : > { %v7622_v11 = vpop.f32.mrb[72].mxu0 }
 0x3d9   : > { %v7623_v46 = vpop.f32.mrb[73].mxu0 }
 0x3da   : > { %v7624_v45 = vadd.f32 %v7623_v46, %v7622_v11  ;;  %v7625_v27 = vpop.f32.mrb[74].mxu0  ;;  %7991 = vmatmul.mubr.bf16.gmra.mrb[152].mxu1 %v11696_v51  ;;  %v11699_v11 = vld [vmem:[#allocation58_spill] sm:$0xff] }
 0x3db   : > { %v7626_v37 = vpop.f32.mrb[75].mxu0  ;;  %7994 = vmatprep.mubr.bf16.mxu1 %v11698_v0  ;;  %v11701_v46 = vpack.c.bf16 %v11699_v11, %v11700_v63 }
 0x3dc   : > { %v10663_v15 = vadd.f32 %v7624_v45, %v4762_v23  ;;  %v7627_v57 = vadd.f32 %v7626_v37, %v7625_v27  ;;  %v11703_v23 = vpack.c.bf16 %v10363_v22, %v11702_v25 }
 0x3dd   : > { %v7522_v28 = vpop.f32.mrb[48].mxu1 }
 0x3de   : > { %v10671_v9 = vadd.f32 %v7627_v57, %v4765_v17  ;;  %v7523_v47 = vpop.f32.mrb[49].mxu1 }
 0x3df   : > { %v7524_v33 = vadd.f32 %v7523_v47, %v7522_v28  ;;  %v7525_v19 = vpop.f32.mrb[50].mxu1  ;;  %v11704_v47 = vpack.c.bf16 %v10369_v53, %v10365_v10 }
 0x3e0   : > { %v7628_v5 = vpop.f32.mrb[76].mxu0  ;;  %v7526_v29 = vpop.f32.mrb[51].mxu1 }
 0x3e1   : > { %v7629_v42 = vpop.f32.mrb[77].mxu0  ;;  %v7527_v58 = vadd.f32 %v7526_v29, %v7525_v19  ;;  %v4778_v14 = vadd.f32 %v7524_v33, %v10572_v34  ;;  %v11706_v19 = vld [vmem:[#allocation60_spill] sm:$0xff] }
 0x3e2   : > { %v7630_v13 = vadd.f32 %v7629_v42, %v7628_v5  ;;  %v7631_v1 = vpop.f32.mrb[78].mxu0  ;;  %7995 = vmatmul.mubr.bf16.gmra.mrb[156].mxu1 %v11701_v46  ;;  %v11705_v42 = vld [vmem:[#allocation61_spill] sm:$0xff] }
 0x3e3   : > { %v7632_v49 = vpop.f32.mrb[79].mxu0  ;;  %7998 = vmatprep.mubr.bf16.mxu1 %v11703_v23  ;;  %v4781_v28 = vadd.f32 %v7527_v58, %v10572_v34 }
 0x3e4   : > { %v10675_v3 = vadd.f32 %v7630_v13, %v4770_v20  ;;  %v7633_v7 = vadd.f32 %v7632_v49, %v7631_v1  ;;  %v11707_v20 = vpack.c.bf16 %v11705_v42, %v11706_v19 }
 0x3e5   : > { %v7528_v2 = vpop.f32.mrb[52].mxu1 }
 0x3e6   : > { %v10683_v45 = vadd.f32 %v7633_v7, %v4773_v26  ;;  %v7529_v35 = vpop.f32.mrb[53].mxu1 }
 0x3e7   : > { %v7530_v37 = vadd.f32 %v7529_v35, %v7528_v2  ;;  %v7531_v57 = vpop.f32.mrb[54].mxu1 }
 0x3e8   : > { %v7634_v27 = vpop.f32.mrb[80].mxu0  ;;  %v7532_v51 = vpop.f32.mrb[55].mxu1 }
 0x3e9   : > { %v7635_v17 = vpop.f32.mrb[81].mxu0  ;;  %v7533_v61 = vadd.f32 %v7532_v51, %v7531_v57  ;;  %v4786_v58 = vadd.f32 %v7530_v37, %v10572_v34 }
 0x3ea   : > { %v7636_v55 = vadd.f32 %v7635_v17, %v7634_v27  ;;  %v7637_v43 = vpop.f32.mrb[82].mxu0  ;;  %7999 = vmatmul.mubr.bf16.gmra.mrb[160].mxu1 %v11704_v47 }
 0x3eb   : > { %v7638_v0 = vpop.f32.mrb[83].mxu0  ;;  %8002 = vmatprep.mubr.bf16.mxu1 %v11707_v20  ;;  %v4789_v10 = vadd.f32 %v7533_v61, %v10572_v34 }
 0x3ec   : > { %v10687_v5 = vadd.f32 %v7636_v55, %v4778_v14  ;;  %v7639_v22 = vadd.f32 %v7638_v0, %v7637_v43 }
 0x3ed   : > { %v7534_v33 = vpop.f32.mrb[56].mxu1 }
 0x3ee   : > { %v10695_v13 = vadd.f32 %v7639_v22, %v4781_v28  ;;  %v7535_v29 = vpop.f32.mrb[57].mxu1  ;;  %v5484_v28 = vld [vmem:[%s8606_s14] sm:$0xff]  ;;  %v5485_v22 = vld [vmem:[%s8606_s14 + $0x8] sm:$0xff] }
 0x3ef   : > { %v7536_v49 = vadd.f32 %v7535_v29, %v7534_v33  ;;  %v7537_v7 = vpop.f32.mrb[58].mxu1  ;;  %v5516_v29 = vpack.c.bf16 %v5485_v22, %v5484_v28  ;;  %v5491_v28 = vld [vmem:[%s8606_s14 + $0x38] sm:$0xff] }
 0x3f0   : > { %v7640_v1 = vpop.f32.mrb[84].mxu0  ;;  %v7538_v46 = vpop.f32.mrb[59].mxu1 }
 0x3f1   : > { %v7641_v26 = vpop.f32.mrb[85].mxu0  ;;  %v7539_v25 = vadd.f32 %v7538_v46, %v7537_v7  ;;  %v4794_v43 = vadd.f32 %v7536_v49, %v10572_v34  ;;  %v5487_v46 = vld [vmem:[%s8606_s14 + $0x18] sm:$0xff] }
 0x3f2   : > { %v7642_v11 = vadd.f32 %v7641_v26, %v7640_v1  ;;  %v7643_v63 = vpop.f32.mrb[86].mxu0  ;;  %8003 = vmatmul.mubr.bf16.gmra.mrb[164].mxu1 %v3932_v41 }
 0x3f3   : > { %v7644_v53 = vpop.f32.mrb[87].mxu0  ;;  %8006 = vmatprep.mubr.bf16.mxu1 %v3933_v60  ;;  %v4797_v36 = vadd.f32 %v7539_v25, %v10572_v34 }
 0x3f4   : > { %v10699_v23 = vadd.f32 %v7642_v11, %v4786_v58  ;;  %v7645_v2 = vadd.f32 %v7644_v53, %v7643_v63  ;;  %v5486_v63 = vld [vmem:[%s8606_s14 + $0x10] sm:$0xff]  ;;  %v5488_v53 = vld [vmem:[%s8606_s14 + $0x20] sm:$0xff] }
 0x3f5   : > { %v7540_v35 = vpop.f32.mrb[60].mxu1 }
 0x3f6   : > { %v10707_v27 = vadd.f32 %v7645_v2, %v4789_v10  ;;  %v7541_v17 = vpop.f32.mrb[61].mxu1  ;;  %v5489_v10 = vld [vmem:[%s8606_s14 + $0x28] sm:$0xff] }
 0x3f7   : > { %v7542_v57 = vadd.f32 %v7541_v17, %v7540_v35  ;;  %v7543_v55 = vpop.f32.mrb[62].mxu1  ;;  %v5517_v17 = vpack.c.bf16 %v5487_v46, %v5486_v63  ;;  %v5518_v38 = vpack.c.bf16 %v5489_v10, %v5488_v53 }
 0x3f8   : > { %v7646_v37 = vpop.f32.mrb[88].mxu0  ;;  %v7544_v32 = vpop.f32.mrb[63].mxu1 }
 0x3f9   : > { %v7647_v14 = vpop.f32.mrb[89].mxu0  ;;  %v7545_v39 = vadd.f32 %v7544_v32, %v7543_v55  ;;  %v4802_v50 = vadd.f32 %v7542_v57, %v10572_v34 }
 0x3fa   : > { %v7648_v51 = vadd.f32 %v7647_v14, %v7646_v37  ;;  %v7649_v61 = vpop.f32.mrb[90].mxu0  ;;  %8007 = vmatmul.mubr.bf16.gmra.mrb[168].mxu1 %v3934_v62 }
 0x3fb   : > { %v7650_v41 = vpop.f32.mrb[91].mxu0  ;;  %8010 = vmatprep.mubr.bf16.mxu1 %v10331_v31  ;;  %v4805_v7 = vadd.f32 %v7545_v39, %v10572_v34 }
 0x3fc   : > { %v10711_v44 = vadd.f32 %v7648_v51, %v4794_v43  ;;  %v7651_v60 = vadd.f32 %v7650_v41, %v7649_v61 }
 0x3fd   : > { %v7546_v47 = vpop.f32.mrb[64].mxu1 }
 0x3fe   : > { %v10717_v0 = vadd.f32 %v7651_v60, %v4797_v36  ;;  %v7547_v19 = vpop.f32.mrb[65].mxu1  ;;  %v5490_v60 = vld [vmem:[%s8606_s14 + $0x30] sm:$0xff] }
 0x3ff   : > { %v7548_v20 = vadd.f32 %v7547_v19, %v7546_v47  ;;  %v7549_v1 = vpop.f32.mrb[66].mxu1  ;;  %v5492_v47 = vld [vmem:[%s8606_s14 + $0x40] sm:$0xff] }
 0x400   : > { %v7652_v42 = vpop.f32.mrb[92].mxu0  ;;  %v7550_v31 = vpop.f32.mrb[67].mxu1 }
 0x401   : > { %v7653_v33 = vpop.f32.mrb[93].mxu0  ;;  %v7551_v49 = vadd.f32 %v7550_v31, %v7549_v1  ;;  %v4810_v16 = vadd.f32 %v7548_v20, %v10572_v34  ;;  %v5519_v1 = vpack.c.bf16 %v5491_v28, %v5490_v60 }
 0x402   : > { %v7654_v62 = vadd.f32 %v7653_v33, %v7652_v42  ;;  %v7655_v6 = vpop.f32.mrb[94].mxu0  ;;  %8011 = vmatmul.mubr.bf16.gmra.mrb[172].mxu1 %v3936_v52  ;;  %v5493_v42 = vld [vmem:[%s8606_s14 + $0x48] sm:$0xff] }
 0x403   : > { %v7656_v26 = vpop.f32.mrb[95].mxu0  ;;  %8016 = vmatprep.mubr.msk.bf16.mxu1 %vm334_vm0, %v5516_v29  ;;  %v4813_v39 = vadd.f32 %v7551_v49, %v10572_v34 }
 0x404   : > { %v10723_v58 = vadd.f32 %v7654_v62, %v4802_v50  ;;  %v7657_v11 = vadd.f32 %v7656_v26, %v7655_v6  ;;  %v5520_v6 = vpack.c.bf16 %v5493_v42, %v5492_v47 }
 0x405   : > { %v7552_v2 = vpop.f32.mrb[68].mxu1 }
 0x406   : > { %v10731_v25 = vadd.f32 %v7657_v11, %v4805_v7  ;;  %v7553_v37 = vpop.f32.mrb[69].mxu1 }
 0x407   : > { %v7554_v57 = vadd.f32 %v7553_v37, %v7552_v2  ;;  %v7555_v55 = vpop.f32.mrb[70].mxu1  ;;  %v5494_v2 = vld [vmem:[%s8606_s14 + $0x50] sm:$0xff] }
 0x408   : > { %v7658_v35 = vpop.f32.mrb[96].mxu0  ;;  %v7556_v51 = vpop.f32.mrb[71].mxu1 }
 0x409   : > { %v7659_v14 = vpop.f32.mrb[97].mxu0  ;;  %v7557_v61 = vadd.f32 %v7556_v51, %v7555_v55  ;;  %v4818_v31 = vadd.f32 %v7554_v57, %v10572_v34  ;;  %v5497_v57 = vld [vmem:[%s8606_s14 + $0x68] sm:$0xff] }
 0x40a   : > { %v7660_v52 = vadd.f32 %v7659_v14, %v7658_v35  ;;  %v7661_v43 = vpop.f32.mrb[98].mxu0  ;;  %8017 = vmatmul.mubr.msk.bf16.vlgmr.msra.gmra.mrb[144].mxu1 %vm334_vm0, %v5517_v17  ;;  %v5495_v35 = vld [vmem:[%s8606_s14 + $0x58] sm:$0xff]  ;;  %v5496_v17 = vld [vmem:[%s8606_s14 + $0x60] sm:$0xff] }
 0x40b   : > { %v7662_v32 = vpop.f32.mrb[99].mxu0  ;;  %8020 = vmatprep.mubr.msk.bf16.mxu1 %vm334_vm0, %v5518_v38  ;;  %v4821_v46 = vadd.f32 %v7557_v61, %v10572_v34  ;;  %v5522_v61 = vpack.c.bf16 %v5497_v57, %v5496_v17 }
 0x40c   : > { %v10737_v41 = vadd.f32 %v7660_v52, %v4810_v16  ;;  %v7663_v36 = vadd.f32 %v7662_v32, %v7661_v43  ;;  %v5521_v16 = vpack.c.bf16 %v5495_v35, %v5494_v2 }
 0x40d   : > { %v7558_v19 = vpop.f32.mrb[72].mxu1 }
 0x40e   : > { %v10743_v22 = vadd.f32 %v7663_v36, %v4813_v39  ;;  %v7559_v33 = vpop.f32.mrb[73].mxu1 }
 0x40f   : > { %v7560_v29 = vadd.f32 %v7559_v33, %v7558_v19  ;;  %v7561_v62 = vpop.f32.mrb[74].mxu1  ;;  %v5498_v33 = vld [vmem:[%s8606_s14 + $0x70] sm:$0xff] }
 0x410   : > { %v7664_v20 = vpop.f32.mrb[100].mxu0  ;;  %v7562_v7 = vpop.f32.mrb[75].mxu1 }
 0x411   : > { %v7665_v50 = vpop.f32.mrb[101].mxu0  ;;  %v7563_v11 = vadd.f32 %v7562_v7, %v7561_v62  ;;  %v4826_v32 = vadd.f32 %v7560_v29, %v10572_v34  ;;  %v5500_v62 = vld [vmem:[%s8606_s14 + $0x80] sm:$0xff]  ;;  %v5501_v29 = vld [vmem:[%s8606_s14 + $0x88] sm:$0xff] }
 0x412   : > { %v7666_v49 = vadd.f32 %v7665_v50, %v7664_v20  ;;  %v7667_v26 = vpop.f32.mrb[102].mxu0  ;;  %8021 = vmatmul.mubr.msk.bf16.gmra.mrb[148].mxu1 %vm334_vm0, %v5519_v1  ;;  %v5499_v1 = vld [vmem:[%s8606_s14 + $0x78] sm:$0xff] }
 0x413   : > { %v7668_v63 = vpop.f32.mrb[103].mxu0  ;;  %8024 = vmatprep.mubr.msk.bf16.mxu1 %vm334_vm0, %v5520_v6  ;;  %v4829_v42 = vadd.f32 %v7563_v11, %v10572_v34 }
 0x414   : > { %v10749_v53 = vadd.f32 %v7666_v49, %v4818_v31  ;;  %v7669_v10 = vadd.f32 %v7668_v63, %v7667_v26  ;;  %v5523_v26 = vpack.c.bf16 %v5499_v1, %v5498_v33 }
 0x415   : > { %v7564_v14 = vpop.f32.mrb[76].mxu1 }
 0x416   : > { %v10755_v37 = vadd.f32 %v7669_v10, %v4821_v46  ;;  %v7565_v38 = vpop.f32.mrb[77].mxu1  ;;  %v5524_v46 = vpack.c.bf16 %v5501_v29, %v5500_v62 }
 0x417   : > { %v7566_v52 = vadd.f32 %v7565_v38, %v7564_v14  ;;  %v7567_v51 = vpop.f32.mrb[78].mxu1 }
 0x418   : > { %v7670_v55 = vpop.f32.mrb[104].mxu0  ;;  %v7568_v60 = vpop.f32.mrb[79].mxu1 }
 0x419   : > { %v7671_v43 = vpop.f32.mrb[105].mxu0  ;;  %v7569_v28 = vadd.f32 %v7568_v60, %v7567_v51  ;;  %v4834_v10 = vadd.f32 %v7566_v52, %v10572_v34  ;;  %v5502_v52 = vld [vmem:[%s8606_s14 + $0x90] sm:$0xff] }
 0x41a   : > { %v7672_v39 = vadd.f32 %v7671_v43, %v7670_v55  ;;  %v7673_v36 = vpop.f32.mrb[106].mxu0  ;;  %8025 = vmatmul.mubr.msk.bf16.gmra.mrb[152].mxu1 %vm334_vm0, %v5521_v16 }
 0x41b   : > { %v7674_v47 = vpop.f32.mrb[107].mxu0  ;;  %8028 = vmatprep.mubr.msk.bf16.mxu1 %vm334_vm0, %v5522_v61  ;;  %v4837_v38 = vadd.f32 %v7569_v28, %v10572_v34  ;;  %v5503_v61 = vld [vmem:[%s8606_s14 + $0x98] sm:$0xff] }
 0x41c   : > { %v10761_v19 = vadd.f32 %v7672_v39, %v4826_v32  ;;  %v7675_v20 = vadd.f32 %v7674_v47, %v7673_v36  ;;  %v5504_v39 = vld [vmem:[%s8606_s14 + $0xa0] sm:$0xff]  ;;  %v5505_v36 = vld [vmem:[%s8606_s14 + $0xa8] sm:$0xff] }
 0x41d   : > { %v7698_v6 = vpop.f32.mrb[80].mxu1  ;;  %v5526_v33 = vpack.c.bf16 %v5505_v36, %v5504_v39 }
 0x41e   : > { %v10767_v50 = vadd.f32 %v7675_v20, %v4829_v42  ;;  %v7699_v49 = vpop.f32.mrb[81].mxu1  ;;  %v5525_v42 = vpack.c.bf16 %v5503_v61, %v5502_v52 }
 0x41f   : > { %v7700_v63 = vadd.f32 %v7699_v49, %v7698_v6  ;;  %v7701_v11 = vpop.f32.mrb[82].mxu1 }
 0x420   : > { %v7676_v31 = vpop.f32.mrb[108].mxu0  ;;  %v7702_v17 = vpop.f32.mrb[83].mxu1 }
 0x421   : > { %v7677_v7 = vpop.f32.mrb[109].mxu0  ;;  %v5036_v57 = vadd.f32 %v7700_v63, %v10578_v8  ;;  %v7703_v55 = vadd.f32 %v7702_v17, %v7701_v11  ;;  %v5506_v63 = vld [vmem:[%s8606_s14 + $0xb0] sm:$0xff]  ;;  %v5507_v11 = vld [vmem:[%s8606_s14 + $0xb8] sm:$0xff] }
 0x422   : > { %v7678_v2 = vadd.f32 %v7677_v7, %v7676_v31  ;;  %v7679_v35 = vpop.f32.mrb[110].mxu0  ;;  %8029 = vmatmul.mubr.msk.bf16.gmra.mrb[156].mxu1 %vm334_vm0, %v5523_v26 }
 0x423   : > { %v7680_v14 = vpop.f32.mrb[111].mxu0  ;;  %v5039_v51 = vadd.f32 %v7703_v55, %v10587_v54  ;;  %8032 = vmatprep.mubr.msk.bf16.mxu1 %vm334_vm0, %v5524_v46 }
 0x424   : > { %v10774_v16 = vadd.f32 %v7678_v2, %v4834_v10  ;;  %v7681_v43 = vadd.f32 %v7680_v14, %v7679_v35  ;;  %v5508_v10 = vld [vmem:[%s8606_s14 + $0xc0] sm:$0xff]  ;;  %v5509_v2 = vld [vmem:[%s8606_s14 + $0xc8] sm:$0xff]  ;;  %v5527_v14 = vpack.c.bf16 %v5507_v11, %v5506_v63 }
 0x425   : > { %v7704_v8 = vpop.f32.mrb[84].mxu1 }
 0x426   : > { %v10781_v32 = vadd.f32 %v7681_v43, %v4837_v38  ;;  %v7705_v47 = vpop.f32.mrb[85].mxu1  ;;  %v5528_v43 = vpack.c.bf16 %v5509_v2, %v5508_v10 }
 0x427   : > { %v7706_v34 = vadd.f32 %v7705_v47, %v7704_v8  ;;  %v7707_v20 = vpop.f32.mrb[86].mxu1 }
 0x428   : > { %v7810_v60 = vpop.f32.mrb[112].mxu0  ;;  %v7708_v62 = vpop.f32.mrb[87].mxu1 }
 0x429   : > { %v7811_v28 = vpop.f32.mrb[113].mxu0  ;;  %v5044_v29 = vadd.f32 %v7706_v34, %v10591_v18  ;;  %v7709_v6 = vadd.f32 %v7708_v62, %v7707_v20  ;;  %v5511_v34 = vld [vmem:[%s8606_s14 + $0xd8] sm:$0xff]  ;;  %v5512_v20 = vld [vmem:[%s8606_s14 + $0xe0] sm:$0xff] }
 0x42a   : > { %v7812_v54 = vadd.f32 %v7811_v28, %v7810_v60  ;;  %v7813_v1 = vpop.f32.mrb[114].mxu0  ;;  %8033 = vmatmul.mubr.msk.bf16.gmra.mrb[160].mxu1 %vm334_vm0, %v5525_v42  ;;  %v5510_v42 = vld [vmem:[%s8606_s14 + $0xd0] sm:$0xff] }
 0x42b   : > { %v7814_v31 = vpop.f32.mrb[115].mxu0  ;;  %v5047_v7 = vadd.f32 %v7709_v6, %v10600_v21  ;;  %8036 = vmatprep.mubr.msk.bf16.mxu1 %vm334_vm0, %v5526_v33  ;;  %v5513_v33 = vld [vmem:[%s8606_s14 + $0xe8] sm:$0xff]  ;;  %v5529_v62 = vpack.c.bf16 %v5511_v34, %v5510_v42 }
 0x42c   : > { %v7815_v49 = vadd.f32 %v7814_v31, %v7813_v1  ;;  %v10787_v26 = vadd.f32 %v7812_v54, %v5036_v57 }
 0x42d   : > { %v7710_v35 = vpop.f32.mrb[88].mxu1 }
 0x42e   : > { %v10793_v46 = vadd.f32 %v7815_v49, %v5039_v51  ;;  %v7711_v18 = vpop.f32.mrb[89].mxu1  ;;  %v5530_v49 = vpack.c.bf16 %v5513_v33, %v5512_v20 }
 0x42f   : > { %v7712_v55 = vadd.f32 %v7711_v18, %v7710_v35  ;;  %v7713_v57 = vpop.f32.mrb[90].mxu1 }
 0x430   : > { %v7816_v17 = vpop.f32.mrb[116].mxu0  ;;  %v7714_v61 = vpop.f32.mrb[91].mxu1 }
 0x431   : > { %v7817_v38 = vpop.f32.mrb[117].mxu0  ;;  %v5052_v51 = vadd.f32 %v7712_v55, %v10604_v12  ;;  %v7715_v39 = vadd.f32 %v7714_v61, %v7713_v57  ;;  %v5515_v55 = vld [vmem:[%s8606_s14 + $0xf8] sm:$0xff] }
 0x432   : > { %v7818_v21 = vadd.f32 %v7817_v38, %v7816_v17  ;;  %v7819_v52 = vpop.f32.mrb[118].mxu0  ;;  %8037 = vmatmul.mubr.msk.bf16.gmra.mrb[164].mxu1 %vm334_vm0, %v5527_v14  ;;  %v5514_v14 = vld [vmem:[%s8606_s14 + $0xf0] sm:$0xff] }
 0x433   : > { %v7820_v36 = vpop.f32.mrb[119].mxu0  ;;  %v5055_v47 = vadd.f32 %v7715_v39, %v10613_v30  ;;  %8040 = vmatprep.mubr.msk.bf16.mxu1 %vm334_vm0, %v5528_v43 }
 0x434   : > { %v7821_v8 = vadd.f32 %v7820_v36, %v7819_v52  ;;  %v10799_v60 = vadd.f32 %v7818_v21, %v5044_v29  ;;  %v5531_v52 = vpack.c.bf16 %v5515_v55, %v5514_v14 }
 0x435   : > { %v7716_v54 = vpop.f32.mrb[92].mxu1 }
 0x436   : > { %v10805_v28 = vadd.f32 %v7821_v8, %v5047_v7  ;;  %v7717_v12 = vpop.f32.mrb[93].mxu1 }
 0x437   : > { %v7718_v6 = vadd.f32 %v7717_v12, %v7716_v54  ;;  %v7719_v29 = vpop.f32.mrb[94].mxu1 }
 0x438   : > { %v7822_v1 = vpop.f32.mrb[120].mxu0  ;;  %v7720_v11 = vpop.f32.mrb[95].mxu1 }
 0x439   : > { %v7823_v31 = vpop.f32.mrb[121].mxu0  ;;  %v5060_v10 = vadd.f32 %v7718_v6, %v10620_v40  ;;  %v7721_v2 = vadd.f32 %v7720_v11, %v7719_v29 }
 0x43a   : > { %v7824_v63 = vadd.f32 %v7823_v31, %v7822_v1  ;;  %v7825_v30 = vpop.f32.mrb[122].mxu0  ;;  %8041 = vmatmul.mubr.msk.bf16.gmra.mrb[168].mxu1 %vm334_vm0, %v5529_v62 }
 0x43b   : > { %v7826_v7 = vpop.f32.mrb[123].mxu0  ;;  %v5063_v18 = vadd.f32 %v7721_v2, %v10629_v48  ;;  %8044 = vmatprep.mubr.msk.bf16.mxu1 %vm334_vm0, %v5530_v49 }
 0x43c   : > { %v10810_v35 = vadd.f32 %v7824_v63, %v5052_v51  ;;  %v7827_v17 = vadd.f32 %v7826_v7, %v7825_v30 }
 0x43d   : > { %v7722_v57 = vpop.f32.mrb[96].mxu1 }
 0x43e   : > { %v10817_v38 = vadd.f32 %v7827_v17, %v5055_v47  ;;  %v7723_v21 = vpop.f32.mrb[97].mxu1 }
 0x43f   : > { %v7724_v40 = vadd.f32 %v7723_v21, %v7722_v57  ;;  %v7725_v39 = vpop.f32.mrb[98].mxu1 }
 0x440   : > { %v7828_v43 = vpop.f32.mrb[124].mxu0  ;;  %v7726_v8 = vpop.f32.mrb[99].mxu1 }
 0x441   : > { %v7829_v61 = vpop.f32.mrb[125].mxu0  ;;  %v5068_v42 = vadd.f32 %v7724_v40, %v10638_v4  ;;  %v7727_v34 = vadd.f32 %v7726_v8, %v7725_v39 }
 0x442   : > { %v7830_v51 = vadd.f32 %v7829_v61, %v7828_v43  ;;  %v7831_v36 = vpop.f32.mrb[126].mxu0  ;;  %8045 = vmatmul.mubr.msk.bf16.gmra.mrb[172].mxu1 %vm334_vm0, %v5531_v52 }
 0x443   : > { %v7832_v48 = vpop.f32.mrb[127].mxu0  ;;  %v5071_v47 = vadd.f32 %v7727_v34, %v10644_v59 }
 0x444   : > { %v10820_v20 = vadd.f32 %v7830_v51, %v5060_v10  ;;  %v7833_v33 = vadd.f32 %v7832_v48, %v7831_v36 }
 0x445   : > { %v7728_v1 = vpop.f32.mrb[100].mxu1 }
 0x446   : > { %v10824_v54 = vadd.f32 %v7833_v33, %v5063_v18  ;;  %v7729_v62 = vpop.f32.mrb[101].mxu1 }
 0x447   : > { %v7730_v6 = vadd.f32 %v7729_v62, %v7728_v1  ;;  %v7731_v29 = vpop.f32.mrb[102].mxu1 }
 0x448   : > { %v7834_v12 = vpop.f32.mrb[128].mxu0  ;;  %v7732_v4 = vpop.f32.mrb[103].mxu1 }
 0x449   : > { %v7835_v31 = vpop.f32.mrb[129].mxu0  ;;  %v5076_v30 = vadd.f32 %v7730_v6, %v10651_v24  ;;  %v7733_v11 = vadd.f32 %v7732_v4, %v7731_v29 }
 0x44a   : > { %v7836_v49 = vadd.f32 %v7835_v31, %v7834_v12  ;;  %v7837_v63 = vpop.f32.mrb[130].mxu0 }
 0x44b   : > { %v7838_v10 = vpop.f32.mrb[131].mxu0  ;;  %v5079_v59 = vadd.f32 %v7733_v11, %v10659_v56 }
 0x44c   : > { %v10827_v2 = vadd.f32 %v7836_v49, %v5068_v42  ;;  %v7839_v7 = vadd.f32 %v7838_v10, %v7837_v63 }
 0x44d   : > { %v7734_v18 = vpop.f32.mrb[104].mxu1 }
 0x44e   : > { %v10830_v17 = vadd.f32 %v7839_v7, %v5071_v47  ;;  %v7735_v55 = vpop.f32.mrb[105].mxu1 }
 0x44f   : > { %v7736_v57 = vadd.f32 %v7735_v55, %v7734_v18  ;;  %v7737_v21 = vpop.f32.mrb[106].mxu1 }
 0x450   : > { %v7840_v14 = vpop.f32.mrb[132].mxu0  ;;  %v7738_v61 = vpop.f32.mrb[107].mxu1 }
 0x451   : > { %v7841_v43 = vpop.f32.mrb[133].mxu0  ;;  %v5084_v24 = vadd.f32 %v7736_v57, %v10663_v15  ;;  %v7739_v39 = vadd.f32 %v7738_v61, %v7737_v21 }
 0x452   : > { %v7842_v52 = vadd.f32 %v7841_v43, %v7840_v14  ;;  %v7843_v40 = vpop.f32.mrb[134].mxu0 }
 0x453   : > { %v7844_v51 = vpop.f32.mrb[135].mxu0  ;;  %v5087_v56 = vadd.f32 %v7739_v39, %v10671_v9 }
 0x454   : > { %v10833_v36 = vadd.f32 %v7842_v52, %v5076_v30  ;;  %v7845_v8 = vadd.f32 %v7844_v51, %v7843_v40 }
 0x455   : > { %v7740_v34 = vpop.f32.mrb[108].mxu1 }
 0x456   : > { %v10836_v42 = vadd.f32 %v7845_v8, %v5079_v59  ;;  %v7741_v33 = vpop.f32.mrb[109].mxu1 }
 0x457   : > { %v7742_v47 = vadd.f32 %v7741_v33, %v7740_v34  ;;  %v7743_v12 = vpop.f32.mrb[110].mxu1 }
 0x458   : > { %v7846_v48 = vpop.f32.mrb[136].mxu0  ;;  %v7744_v31 = vpop.f32.mrb[111].mxu1 }
 0x459   : > { %v7847_v1 = vpop.f32.mrb[137].mxu0  ;;  %v5092_v15 = vadd.f32 %v7742_v47, %v10675_v3  ;;  %v7745_v29 = vadd.f32 %v7744_v31, %v7743_v12 }
 0x45a   : > { %v7848_v62 = vadd.f32 %v7847_v1, %v7846_v48  ;;  %v7849_v6 = vpop.f32.mrb[138].mxu0 }
 0x45b   : > { %v7850_v49 = vpop.f32.mrb[139].mxu0  ;;  %v5095_v9 = vadd.f32 %v7745_v29, %v10683_v45 }
 0x45c   : > { %v10839_v63 = vadd.f32 %v7848_v62, %v5084_v24  ;;  %v7851_v4 = vadd.f32 %v7850_v49, %v7849_v6 }
 0x45d   : > { %v7746_v11 = vpop.f32.mrb[112].mxu1 }
 0x45e   : > { %v10842_v30 = vadd.f32 %v7851_v4, %v5087_v56  ;;  %v7747_v7 = vpop.f32.mrb[113].mxu1 }
 0x45f   : > { %v7748_v59 = vadd.f32 %v7747_v7, %v7746_v11  ;;  %v7749_v14 = vpop.f32.mrb[114].mxu1  ;;  %v6585_v11 = vld [vmem:[#allocation4 + $0x198] sm:$0xff]  ;;  %v6042_v7 = vld [vmem:[#allocation4 + $0x2] sm:$0xff] }
 0x460   : > { %v7852_v10 = vpop.f32.mrb[140].mxu0  ;;  %v7750_v43 = vpop.f32.mrb[115].mxu1 }
 0x461   : > { %v7853_v18 = vpop.f32.mrb[141].mxu0  ;;  %v5100_v3 = vadd.f32 %v7748_v59, %v10687_v5  ;;  %v7751_v21 = vadd.f32 %v7750_v43, %v7749_v14  ;;  %v6043_v14 = vld [vmem:[#allocation4 + $0xa] sm:$0xff] }
 0x462   : > { %v7854_v55 = vadd.f32 %v7853_v18, %v7852_v10  ;;  %v7855_v57 = vpop.f32.mrb[142].mxu0  ;;  %v6586_v10 = vld [vmem:[#allocation4 + $0x1a0] sm:$0xff] }
 0x463   : > { %v7856_v52 = vpop.f32.mrb[143].mxu0  ;;  %v5103_v45 = vadd.f32 %v7751_v21, %v10695_v13  ;;  %v5915_v13 = vld [vmem:[#allocation4 + $0x9] sm:$0xff]  ;;  %v6602_v18 = vpack.c.bf16 %v6586_v10, %v6585_v11 }
 0x464   : > { %v10845_v40 = vadd.f32 %v7854_v55, %v5092_v15  ;;  %v7857_v61 = vadd.f32 %v7856_v52, %v7855_v57  ;;  %v5914_v15 = vld [vmem:[#allocation4 + $0x1] sm:$0xff] }
 0x465   : > { %v7752_v39 = vpop.f32.mrb[116].mxu1  ;;  %v5946_v49 = vpack.c.bf16 %v5915_v13, %v5914_v15  ;;  %6649 = vrot.lane.b32.xlu1 %v6602_v18, %s8324_s21 }
 0x466   : > { %v10848_v24 = vadd.f32 %v7857_v61, %v5095_v9  ;;  %v7753_v8 = vpop.f32.mrb[117].mxu1 }
 0x467   : > { %v7754_v56 = vadd.f32 %v7753_v8, %v7752_v39  ;;  %v7755_v48 = vpop.f32.mrb[118].mxu1  ;;  %5978 = vrot.lane.b32.xlu0 %v5946_v49, %s8317_s15 }
 0x468   : > { %v7858_v51 = vpop.f32.mrb[144].mxu0  ;;  %v7756_v1 = vpop.f32.mrb[119].mxu1 }
 0x469   : > { %v7859_v34 = vpop.f32.mrb[145].mxu0  ;;  %v5108_v5 = vadd.f32 %v7754_v56, %v10699_v23  ;;  %v7757_v12 = vadd.f32 %v7756_v1, %v7755_v48 }
 0x46a   : > { %v7860_v33 = vadd.f32 %v7859_v34, %v7858_v51  ;;  %v7861_v47 = vpop.f32.mrb[146].mxu0 }
 0x46b   : > { %v7862_v62 = vpop.f32.mrb[147].mxu0  ;;  %v5111_v29 = vadd.f32 %v7757_v12, %v10707_v27 }
 0x46c   : > { %v10851_v6 = vadd.f32 %v7860_v33, %v5100_v3  ;;  %v7863_v31 = vadd.f32 %v7862_v62, %v7861_v47  ;;  %v6074_v3 = vpack.c.bf16 %v6043_v14, %v6042_v7 }
 0x46d   : > { %v7758_v9 = vpop.f32.mrb[120].mxu1 }
 0x46e   : > { %v10854_v4 = vadd.f32 %v7863_v31, %v5103_v45  ;;  %v7759_v23 = vpop.f32.mrb[121].mxu1  ;;  %6106 = vrot.lane.b32.xlu0 %v6074_v3, %s8318_s16 }
 0x46f   : > { %v7760_v55 = vadd.f32 %v7759_v23, %v7758_v9  ;;  %v7761_v43 = vpop.f32.mrb[122].mxu1 }
 0x470   : > { %v7864_v59 = vpop.f32.mrb[148].mxu0  ;;  %v7762_v27 = vpop.f32.mrb[123].mxu1 }
 0x471   : > { %v7865_v57 = vpop.f32.mrb[149].mxu0  ;;  %v5116_v61 = vadd.f32 %v7760_v55, %v10711_v44  ;;  %v7763_v45 = vadd.f32 %v7762_v27, %v7761_v43 }
 0x472   : > { %v7866_v21 = vadd.f32 %v7865_v57, %v7864_v59  ;;  %v7867_v52 = vpop.f32.mrb[150].mxu0 }
 0x473   : > { %v7868_v39 = vpop.f32.mrb[151].mxu0  ;;  %v5119_v56 = vadd.f32 %v7763_v45, %v10717_v0 }
 0x474   : > { %v10860_v51 = vadd.f32 %v7866_v21, %v5108_v5  ;;  %v7869_v8 = vadd.f32 %v7868_v39, %v7867_v52 }
 0x475   : > { %v7764_v48 = vpop.f32.mrb[124].mxu1 }
 0x476   : > { %v10863_v34 = vadd.f32 %v7869_v8, %v5111_v29  ;;  %v7765_v47 = vpop.f32.mrb[125].mxu1 }
 0x477   : > { %v7766_v1 = vadd.f32 %v7765_v47, %v7764_v48  ;;  %v7767_v62 = vpop.f32.mrb[126].mxu1 }
 0x478   : > { %v7870_v33 = vpop.f32.mrb[152].mxu0  ;;  %v7768_v44 = vpop.f32.mrb[127].mxu1 }
 0x479   : > { %v7871_v12 = vpop.f32.mrb[153].mxu0  ;;  %v5124_v13 = vadd.f32 %v7766_v1, %v10723_v58  ;;  %v7769_v49 = vadd.f32 %v7768_v44, %v7767_v62 }
 0x47a   : > { %v7872_v31 = vadd.f32 %v7871_v12, %v7870_v33  ;;  %v7873_v15 = vpop.f32.mrb[154].mxu0 }
 0x47b   : > { %v7874_v9 = vpop.f32.mrb[155].mxu0  ;;  %v5127_v0 = vadd.f32 %v7769_v49, %v10731_v25 }
 0x47c   : > { %v10866_v5 = vadd.f32 %v7872_v31, %v5116_v61  ;;  %v7875_v11 = vadd.f32 %v7874_v9, %v7873_v15 }
 0x47d   : > { %v7770_v10 = vpop.f32.mrb[128].mxu1 }
 0x47e   : > { %v10869_v29 = vadd.f32 %v7875_v11, %v5119_v56  ;;  %v7771_v59 = vpop.f32.mrb[129].mxu1 }
 0x47f   : > { %v7772_v23 = vadd.f32 %v7771_v59, %v7770_v10  ;;  %v7773_v14 = vpop.f32.mrb[130].mxu1 }
 0x480   : > { %v7876_v7 = vpop.f32.mrb[156].mxu0  ;;  %v7774_v43 = vpop.f32.mrb[131].mxu1 }
 0x481   : > { %v7877_v18 = vpop.f32.mrb[157].mxu0  ;;  %v5132_v58 = vadd.f32 %v7772_v23, %v10737_v41  ;;  %v7775_v3 = vadd.f32 %v7774_v43, %v7773_v14 }
 0x482   : > { %v7878_v55 = vadd.f32 %v7877_v18, %v7876_v7  ;;  %v7879_v57 = vpop.f32.mrb[158].mxu0 }
 0x483   : > { %v7880_v21 = vpop.f32.mrb[159].mxu0  ;;  %v5135_v25 = vadd.f32 %v7775_v3, %v10743_v22 }
 0x484   : > { %v10872_v52 = vadd.f32 %v7878_v55, %v5124_v13  ;;  %v7881_v27 = vadd.f32 %v7880_v21, %v7879_v57 }
 0x485   : > { %v7776_v45 = vpop.f32.mrb[132].mxu1 }
 0x486   : > { %v10875_v61 = vadd.f32 %v7881_v27, %v5127_v0  ;;  %v7777_v8 = vpop.f32.mrb[133].mxu1 }
 0x487   : > { %v7778_v56 = vadd.f32 %v7777_v8, %v7776_v45  ;;  %v7779_v33 = vpop.f32.mrb[134].mxu1 }
 0x488   : > { %v7882_v39 = vpop.f32.mrb[160].mxu0  ;;  %v7780_v12 = vpop.f32.mrb[135].mxu1 }
 0x489   : > { %v7883_v48 = vpop.f32.mrb[161].mxu0  ;;  %v5140_v41 = vadd.f32 %v7778_v56, %v10749_v53  ;;  %v7781_v62 = vadd.f32 %v7780_v12, %v7779_v33 }
 0x48a   : > { %v7884_v47 = vadd.f32 %v7883_v48, %v7882_v39  ;;  %v7885_v1 = vpop.f32.mrb[162].mxu0 }
 0x48b   : > { %v7886_v31 = vpop.f32.mrb[163].mxu0  ;;  %v5143_v22 = vadd.f32 %v7781_v62, %v10755_v37 }
 0x48c   : > { %v10878_v15 = vadd.f32 %v7884_v47, %v5132_v58  ;;  %v7887_v44 = vadd.f32 %v7886_v31, %v7885_v1 }
 0x48d   : > { %v7782_v49 = vpop.f32.mrb[136].mxu1 }
 0x48e   : > { %v10881_v13 = vadd.f32 %v7887_v44, %v5135_v25  ;;  %v7783_v11 = vpop.f32.mrb[137].mxu1 }
 0x48f   : > { %v7784_v0 = vadd.f32 %v7783_v11, %v7782_v49  ;;  %v7785_v7 = vpop.f32.mrb[138].mxu1 }
 0x490   : > { %v7888_v9 = vpop.f32.mrb[164].mxu0  ;;  %v7786_v18 = vpop.f32.mrb[139].mxu1 }
 0x491   : > { %v7889_v10 = vpop.f32.mrb[165].mxu0  ;;  %v5148_v53 = vadd.f32 %v7784_v0, %v10761_v19  ;;  %v7787_v14 = vadd.f32 %v7786_v18, %v7785_v7 }
 0x492   : > { %v7890_v59 = vadd.f32 %v7889_v10, %v7888_v9  ;;  %v7891_v23 = vpop.f32.mrb[166].mxu0  ;;  %v5851_v10 = vld [vmem:[#allocation4 + $0x8] sm:$0xff] }
 0x493   : > { %v7892_v55 = vpop.f32.mrb[167].mxu0  ;;  %v5151_v37 = vadd.f32 %v7787_v14, %v10767_v50 }
 0x494   : > { %v10884_v57 = vadd.f32 %v7890_v59, %v5140_v41  ;;  %v7893_v43 = vadd.f32 %v7892_v55, %v7891_v23 }
 0x495   : > { %v7788_v3 = vpop.f32.mrb[140].mxu1 }
 0x496   : > { %v10887_v58 = vadd.f32 %v7893_v43, %v5143_v22  ;;  %v7789_v27 = vpop.f32.mrb[141].mxu1 }
 0x497   : > { %v7790_v25 = vadd.f32 %v7789_v27, %v7788_v3  ;;  %v7791_v39 = vpop.f32.mrb[142].mxu1 }
 0x498   : > { %v7894_v21 = vpop.f32.mrb[168].mxu0  ;;  %v7792_v48 = vpop.f32.mrb[143].mxu1 }
 0x499   : > { %v7895_v45 = vpop.f32.mrb[169].mxu0  ;;  %v5156_v19 = vadd.f32 %v7790_v25, %v10774_v16  ;;  %v7793_v33 = vadd.f32 %v7792_v48, %v7791_v39  ;;  %v5850_v16 = vld [vmem:[#allocation4] sm:$0xff] }
 0x49a   : > { %v7896_v8 = vadd.f32 %v7895_v45, %v7894_v21  ;;  %v7897_v56 = vpop.f32.mrb[170].mxu0  ;;  %v5882_v7 = vpack.c.bf16 %v5851_v10, %v5850_v16 }
 0x49b   : > { %v7898_v47 = vpop.f32.mrb[171].mxu0  ;;  %v5159_v50 = vadd.f32 %v7793_v33, %v10781_v32  ;;  %v10903_v32 = vld [vmem:[%s11488_s6] ss:$0 sm:$0xff] }
 0x49c   : > { %v10890_v1 = vadd.f32 %v7896_v8, %v5148_v53  ;;  %v7899_v12 = vadd.f32 %v7898_v47, %v7897_v56  ;;  %5898 = vst.msk [vmem:[#allocation6] sm:$0xff] %vm334_vm0, %v5882_v7  ;;  %v8096_v53 = vadd.f32 %v10903_v32, %v10805_v28  ;;  %v8098_v43 = vadd.f32 %v10903_v32, %v10793_v46 }
 0x49d   : > { %v8102_v48 = vadd.f32 %v10903_v32, %v10810_v35  ;;  %v8104_v47 = vadd.f32 %v10903_v32, %v10824_v54  ;;  %v8108_v54 = vadd.f32 %v10903_v32, %v10833_v36  ;;  %v8112_v36 = vadd.f32 %v10903_v32, %v10836_v42 }
 0x49e   : > { %v10893_v41 = vadd.f32 %v7899_v12, %v5151_v37 }
 0x4a0   : > { %v7900_v62 = vpop.f32.mrb[172].mxu0 }
 0x4a1   : > { %v7901_v31 = vpop.f32.mrb[173].mxu0 }
 0x4a2   : > { %v7902_v44 = vadd.f32 %v7901_v31, %v7900_v62  ;;  %v7903_v22 = vpop.f32.mrb[174].mxu0 }
 0x4a3   : > { %v7904_v49 = vpop.f32.mrb[175].mxu0 }
 0x4a4   : > { %v10895_v9 = vadd.f32 %v7902_v44, %v5156_v19  ;;  %v7905_v11 = vadd.f32 %v7904_v49, %v7903_v22 }
 0x4a6   : > { %v10897_v0 = vadd.f32 %v7905_v11, %v5159_v50 }
 0x4d9   : > { %v5979_v37 = vpop.permute.xlu0 %5978 }
 0x4da   : > { %6026 = vst.msk [vmem:[#allocation6] sm:$0xff] %vm708_vm4, %v5979_v37 }
 0x4dd   : > { %v8018_v59 = vpop.f32.mrb[144].mxu1 }
 0x4de   : > { %v8092_v23 = vadd.f32 %v8018_v59, %v10799_v60  ;;  %v5625_v18 = vpop.f32.mrb[145].mxu1 }
 0x4df   : > { %v8094_v14 = vadd.f32 %v5625_v18, %v10787_v26  ;;  %v8019_v55 = vpop.f32.mrb[146].mxu1  ;;  %v8100_v26 = vadd.f32 %v10903_v32, %v10820_v20  ;;  %v8106_v20 = vadd.f32 %v10903_v32, %v10817_v38 }
 0x4e0   : > { %v8093_v3 = vadd.f32 %v8092_v23, %v10903_v32  ;;  %v8097_v21 = vadd.f32 %v8096_v53, %v8019_v55  ;;  %v5628_v27 = vpop.f32.mrb[147].mxu1  ;;  %v6107_v56 = vpop.permute.xlu0 %6106  ;;  %v8110_v23 = vadd.f32 %v10903_v32, %v10827_v2  ;;  %v8114_v2 = vadd.f32 %v10903_v32, %v10830_v17 }
 0x4e1   : > { %v8095_v25 = vadd.f32 %v8094_v14, %v10903_v32  ;;  %v8099_v60 = vadd.f32 %v8098_v43, %v5628_v27  ;;  %6154 = vst.msk [vmem:[#allocation6] sm:$0xff] %vm837_vm5, %v6107_v56 }
 0x4e2   : > { %v5786_v45 = vmax.f32 %v8093_v3, 0.0  ;;  %v5787_v39 = vmax.f32 %v8097_v21, 0.0 }
 0x4e3   : > { %v5784_v8 = vmax.f32 %v8095_v25, 0.0  ;;  %v5785_v28 = vmax.f32 %v8099_v60, 0.0 }
 0x4e4   : > { %5819 = vst.msk [vmem:[#allocation4 + $0x31] sm:$0xff] %vm334_vm0, %v5786_v45  ;;  %5820 = vst.msk [vmem:[#allocation4 + $0x39] sm:$0xff] %vm334_vm0, %v5787_v39 }
 0x4e5   : > { %5817 = vst.msk [vmem:[#allocation4 + $0x19] sm:$0xff] %vm334_vm0, %v5784_v8  ;;  %5818 = vst.msk [vmem:[#allocation4 + $0x21] sm:$0xff] %vm334_vm0, %v5785_v28  ;;  %v8022_v46 = vpop.f32.mrb[148].mxu1 }
 0x4e6   : > { %v8101_v19 = vadd.f32 %v8100_v26, %v8022_v46  ;;  %v5641_v33 = vpop.f32.mrb[149].mxu1 }
 0x4e7   : > { %v8103_v12 = vadd.f32 %v8102_v48, %v5641_v33  ;;  %v8023_v50 = vpop.f32.mrb[150].mxu1  ;;  %v8116_v48 = vadd.f32 %v10903_v32, %v10845_v40  ;;  %v8120_v40 = vadd.f32 %v10903_v32, %v10848_v24 }
 0x4e8   : > { %v5790_v62 = vmax.f32 %v8101_v19, 0.0  ;;  %v8105_v31 = vadd.f32 %v8104_v47, %v8023_v50  ;;  %v5644_v44 = vpop.f32.mrb[151].mxu1 }
 0x4e9   : > { %v5788_v22 = vmax.f32 %v8103_v12, 0.0  ;;  %v8107_v49 = vadd.f32 %v8106_v20, %v5644_v44  ;;  %v8118_v20 = vadd.f32 %v10903_v32, %v10839_v63 }
 0x4ea   : > { %5823 = vst.msk [vmem:[#allocation4 + $0x61] sm:$0xff] %vm334_vm0, %v5790_v62  ;;  %v5791_v11 = vmax.f32 %v8105_v31, 0.0 }
 0x4eb   : > { %5821 = vst.msk [vmem:[#allocation4 + $0x49] sm:$0xff] %vm334_vm0, %v5788_v22  ;;  %v5789_v35 = vmax.f32 %v8107_v49, 0.0  ;;  %v6555_v16 = vld [vmem:[#allocation4 + $0x30] sm:$0xff]  ;;  %v6556_v10 = vld [vmem:[#allocation4 + $0x38] sm:$0xff] }
 0x4ec   : > { %5824 = vst.msk [vmem:[#allocation4 + $0x69] sm:$0xff] %vm334_vm0, %v5791_v11  ;;  %v6587_v7 = vpack.c.bf16 %v6556_v10, %v6555_v16  ;;  %v6683_v38 = vld [vmem:[#allocation4 + $0x31] sm:$0xff]  ;;  %v6684_v18 = vld [vmem:[#allocation4 + $0x39] sm:$0xff]  ;;  %v8122_v11 = vadd.f32 %v10903_v32, %v10842_v30 }
 0x4ed   : > { %5822 = vst.msk [vmem:[#allocation4 + $0x51] sm:$0xff] %vm334_vm0, %v5789_v35  ;;  %v8026_v59 = vpop.f32.mrb[152].mxu1  ;;  %v6170_v53 = vld [vmem:[#allocation4 + $0x18] sm:$0xff]  ;;  %v6171_v14 = vld [vmem:[#allocation4 + $0x20] sm:$0xff]  ;;  %v6715_v45 = vpack.c.bf16 %v6684_v18, %v6683_v38  ;;  %v8124_v18 = vadd.f32 %v10903_v32, %v10860_v51  ;;  %v8128_v51 = vadd.f32 %v10903_v32, %v10863_v34 }
 0x4ee   : > { %v8109_v55 = vadd.f32 %v8108_v54, %v8026_v59  ;;  %v5657_v43 = vpop.f32.mrb[153].mxu1  ;;  %6619 = vrot.lane.b32.xlu0 %v6587_v7, %s8324_s21  ;;  %6236 = vrot.lane.b32.xlu1 %v6587_v7, %s8319_s17  ;;  %v10939_v37 = vpack.c.bf16 %v6171_v14, %v6170_v53  ;;  %5900 = vst.msk [vmem:[#allocation6 + $0x90] sm:$0xff] %vm334_vm0, %v6587_v7  ;;  %v6811_v28 = vld [vmem:[#allocation4 + $0x32] sm:$0xff]  ;;  %v6812_v42 = vld [vmem:[#allocation4 + $0x3a] sm:$0xff] }
 0x4ef   : > { %v8111_v3 = vadd.f32 %v8110_v23, %v5657_v43  ;;  %v8027_v21 = vpop.f32.mrb[154].mxu1  ;;  %v6843_v19 = vpack.c.bf16 %v6812_v42, %v6811_v28  ;;  %v5916_v7 = vld [vmem:[#allocation4 + $0x19] sm:$0xff]  ;;  %v5917_v38 = vld [vmem:[#allocation4 + $0x21] sm:$0xff] }
 0x4f0   : > { %v5794_v27 = vmax.f32 %v8109_v55, 0.0  ;;  %v8113_v25 = vadd.f32 %v8112_v36, %v8027_v21  ;;  %v5660_v60 = vpop.f32.mrb[155].mxu1  ;;  %5899 = vst.msk [vmem:[#allocation6 + $0x48] sm:$0xff] %vm334_vm0, %v10939_v37  ;;  %v5947_v53 = vpack.c.bf16 %v5917_v38, %v5916_v7  ;;  %v6044_v21 = vld [vmem:[#allocation4 + $0x1a] sm:$0xff] }
 0x4f1   : > { %v5792_v39 = vmax.f32 %v8111_v3, 0.0  ;;  %v8115_v8 = vadd.f32 %v8114_v2, %v5660_v60  ;;  %v6176_v26 = vld [vmem:[#allocation4 + $0x60] sm:$0xff]  ;;  %v8126_v3 = vadd.f32 %v10903_v32, %v10851_v6  ;;  %v8130_v6 = vadd.f32 %v10903_v32, %v10854_v4 }
 0x4f2   : > { %5827 = vst.msk [vmem:[#allocation4 + $0x91] sm:$0xff] %vm334_vm0, %v5794_v27  ;;  %v5795_v56 = vmax.f32 %v8113_v25, 0.0  ;;  %6747 = vrot.lane.b32.xlu0 %v6715_v45, %s8322_s20  ;;  %6364 = vrot.lane.b32.xlu1 %v6715_v45, %s8321_s19  ;;  %v6557_v47 = vld [vmem:[#allocation4 + $0x48] sm:$0xff] }
 0x4f3   : > { %5825 = vst.msk [vmem:[#allocation4 + $0x79] sm:$0xff] %vm334_vm0, %v5792_v39  ;;  %v5793_v17 = vmax.f32 %v8115_v8, 0.0  ;;  %v6177_v46 = vld [vmem:[#allocation4 + $0x68] sm:$0xff] }
 0x4f4   : > { %5828 = vst.msk [vmem:[#allocation4 + $0x99] sm:$0xff] %vm334_vm0, %v5795_v56  ;;  %v10953_v33 = vpack.c.bf16 %v6177_v46, %v6176_v26  ;;  %v6558_v12 = vld [vmem:[#allocation4 + $0x50] sm:$0xff]  ;;  %v6045_v2 = vld [vmem:[#allocation4 + $0x22] sm:$0xff] }
 0x4f5   : > { %5826 = vst.msk [vmem:[#allocation4 + $0x81] sm:$0xff] %vm334_vm0, %v5793_v17  ;;  %v8030_v50 = vpop.f32.mrb[156].mxu1  ;;  %v10958_v62 = vpack.c.bf16 %v6558_v12, %v6557_v47 }
 0x4f6   : > { %v8117_v31 = vadd.f32 %v8116_v48, %v8030_v50  ;;  %v5673_v44 = vpop.f32.mrb[157].mxu1  ;;  %6875 = vrot.lane.b32.xlu0 %v6843_v19, %s8325_s22  ;;  %6492 = vrot.lane.b32.xlu1 %v6843_v19, %s8320_s18  ;;  %5902 = vst.msk [vmem:[#allocation6 + $0x120] sm:$0xff] %vm334_vm0, %v10953_v33  ;;  %v8132_v48 = vadd.f32 %v10903_v32, %v10872_v52 }
 0x4f7   : > { %v8119_v22 = vadd.f32 %v8118_v20, %v5673_v44  ;;  %v8031_v49 = vpop.f32.mrb[158].mxu1  ;;  %5901 = vst.msk [vmem:[#allocation6 + $0xd8] sm:$0xff] %vm334_vm0, %v10958_v62  ;;  %v8134_v20 = vadd.f32 %v10903_v32, %v10866_v5  ;;  %v8136_v52 = vadd.f32 %v10903_v32, %v10875_v61  ;;  %v8138_v5 = vadd.f32 %v10903_v32, %v10869_v29  ;;  %v6433_v61 = vld [vmem:[#allocation4 + $0x6a] sm:$0xff] }
 0x4f8   : > { %v5798_v63 = vmax.f32 %v8117_v31, 0.0  ;;  %v8121_v35 = vadd.f32 %v8120_v40, %v8031_v49  ;;  %v5676_v16 = vpop.f32.mrb[159].mxu1  ;;  %v6305_v31 = vld [vmem:[#allocation4 + $0x69] sm:$0xff] }
 0x4f9   : > { %v5796_v10 = vmax.f32 %v8119_v22, 0.0  ;;  %v8123_v54 = vadd.f32 %v8122_v11, %v5676_v16  ;;  %v6180_v59 = vld [vmem:[#allocation4 + $0x90] sm:$0xff] }
 0x4fa   : > { %5831 = vst.msk [vmem:[#allocation4 + $0xc1] sm:$0xff] %vm334_vm0, %v5798_v63  ;;  %v5799_v24 = vmax.f32 %v8121_v35, 0.0  ;;  %6110 = vrot.lane.b32.xlu0 %v6843_v19, %s8318_s16  ;;  %5982 = vrot.lane.b32.xlu1 %v6715_v45, %s8317_s15  ;;  %v6561_v55 = vld [vmem:[#allocation4 + $0x78] sm:$0xff]  ;;  %v6304_v63 = vld [vmem:[#allocation4 + $0x61] sm:$0xff] }
 0x4fb   : > { %5829 = vst.msk [vmem:[#allocation4 + $0xa9] sm:$0xff] %vm334_vm0, %v5796_v10  ;;  %v5797_v30 = vmax.f32 %v8123_v54, 0.0  ;;  %v6181_v23 = vld [vmem:[#allocation4 + $0x98] sm:$0xff]  ;;  %v6333_v54 = vpack.c.bf16 %v6305_v31, %v6304_v63  ;;  %v6685_v63 = vld [vmem:[#allocation4 + $0x49] sm:$0xff] }
 0x4fc   : > { %5832 = vst.msk [vmem:[#allocation4 + $0xc9] sm:$0xff] %vm334_vm0, %v5799_v24  ;;  %v10977_v14 = vpack.c.bf16 %v6181_v23, %v6180_v59  ;;  %v6562_v43 = vld [vmem:[#allocation4 + $0x80] sm:$0xff]  ;;  %v6814_v31 = vld [vmem:[#allocation4 + $0x52] sm:$0xff] }
 0x4fd   : > { %5830 = vst.msk [vmem:[#allocation4 + $0xb1] sm:$0xff] %vm334_vm0, %v5797_v30  ;;  %v8034_v36 = vpop.f32.mrb[160].mxu1  ;;  %v10982_v27 = vpack.c.bf16 %v6562_v43, %v6561_v55  ;;  %v6432_v24 = vld [vmem:[#allocation4 + $0x62] sm:$0xff] }
 0x4fe   : > { %v8125_v25 = vadd.f32 %v8124_v18, %v8034_v36  ;;  %v5689_v60 = vpop.f32.mrb[161].mxu1  ;;  %6234 = vrot.lane.b32.xlu0 %v10939_v37, %s8319_s17  ;;  %5980 = vrot.lane.b32.xlu1 %v5947_v53, %s8317_s15  ;;  %5904 = vst.msk [vmem:[#allocation6 + $0x1b0] sm:$0xff] %vm334_vm0, %v10977_v14  ;;  %v6075_v37 = vpack.c.bf16 %v6045_v2, %v6044_v21  ;;  %v8288_v30 = vld [vmem:[%s11489_s7] sm:$0xff]  }
 0x4ff   : > { %v8127_v45 = vadd.f32 %v8126_v3, %v5689_v60  ;;  %v8035_v39 = vpop.f32.mrb[162].mxu1  ;;  %5903 = vst.msk [vmem:[#allocation6 + $0x168] sm:$0xff] %vm334_vm0, %v10982_v27  ;;  %8048 = vmatprep.subr.bf16.mxu0 %v8288_v30  ;;  %v6461_v55 = vpack.c.bf16 %v6433_v61, %v6432_v24  ;;  %v8142_v21 = vadd.f32 %v10903_v32, %v10878_v15 }
 0x500   : > { %v5802_v8 = vmax.f32 %v8125_v25, 0.0  ;;  %v8129_v28 = vadd.f32 %v8128_v51, %v8035_v39  ;;  %v5692_v42 = vpop.f32.mrb[163].mxu1  ;;  %8049 = vmatpush3.bf16.msra.mxu0 %v8288_v30  ;;  %v8289_v51 = vld [vmem:[%s11489_s7 + $0x8] sm:$0xff]   ;;  %v8146_v39 = vadd.f32 %v10903_v32, %v10881_v13 }
 0x501   : > { %v5800_v56 = vmax.f32 %v8127_v45, 0.0  ;;  %v8131_v17 = vadd.f32 %v8130_v6, %v5692_v42  ;;  %v6184_v4 = vld [vmem:[#allocation4 + $0xc0] sm:$0xff]  ;;  %8050 = vmatprep.subr.bf16.mxu0 %v8289_v51 }
 0x502   : > { %5835 = vst.msk [vmem:[#allocation4 + $0xf1] sm:$0xff] %vm334_vm0, %v5802_v8  ;;  %v5803_v34 = vmax.f32 %v8129_v28, 0.0  ;;  %6362 = vrot.lane.b32.xlu0 %v5947_v53, %s8321_s19  ;;  %6108 = vrot.lane.b32.xlu1 %v6075_v37, %s8318_s16  ;;  %v6565_v47 = vld [vmem:[#allocation4 + $0xa8] sm:$0xff]  ;;  %v8140_v53 = vadd.f32 %v10903_v32, %v10884_v57  ;;  %v8144_v57 = vadd.f32 %v10903_v32, %v10887_v58 }
 0x503   : > { %5833 = vst.msk [vmem:[#allocation4 + $0xd9] sm:$0xff] %vm334_vm0, %v5800_v56  ;;  %v5801_v26 = vmax.f32 %v8131_v17, 0.0  ;;  %v6185_v46 = vld [vmem:[#allocation4 + $0xc8] sm:$0xff] }
 0x504   : > { %5836 = vst.msk [vmem:[#allocation4 + $0xf9] sm:$0xff] %vm334_vm0, %v5803_v34  ;;  %v11002_v19 = vpack.c.bf16 %v6185_v46, %v6184_v4  ;;  %v6566_v12 = vld [vmem:[#allocation4 + $0xb0] sm:$0xff]  ;;  %8051 = vmatpush3.bf16.msra.mxu0 %v8289_v51  ;;  %v8148_v4 = vadd.f32 %v10903_v32, %v10895_v9  ;;  %v8152_v9 = vadd.f32 %v10903_v32, %v10897_v0  ;;  %v6690_v51 = vld [vmem:[#allocation4 + $0x81] sm:$0xff] }
 0x505   : > { %5834 = vst.msk [vmem:[#allocation4 + $0xe1] sm:$0xff] %vm334_vm0, %v5801_v26  ;;  %v8038_v50 = vpop.f32.mrb[164].mxu1  ;;  %v11007_v44 = vpack.c.bf16 %v6566_v12, %v6565_v47 }
 0x506   : > { %v8133_v40 = vadd.f32 %v8132_v48, %v8038_v50  ;;  %v5705_v22 = vpop.f32.mrb[165].mxu1  ;;  %6490 = vrot.lane.b32.xlu0 %v6075_v37, %s8320_s18  ;;  %6240 = vrot.lane.b32.xlu1 %v10953_v33, %s8319_s17  ;;  %5906 = vst.msk [vmem:[#allocation6 + $0x240] sm:$0xff] %vm334_vm0, %v11002_v19  ;;  %v8290_v37 = vld [vmem:[%s11489_s7 + $0x10] ss:$0 sps:$4 sm:$0x33]   ;;  %v8150_v50 = vadd.f32 %v10903_v32, %v10890_v1 }
 0x507   : > { %v8135_v49 = vadd.f32 %v8134_v20, %v5705_v22  ;;  %v8039_v11 = vpop.f32.mrb[166].mxu1  ;;  %5905 = vst.msk [vmem:[#allocation6 + $0x1f8] sm:$0xff] %vm334_vm0, %v11007_v44  ;;  %8189 = vmatprep.subr.msk.bf16.mxu0 %vm1735_vm3, %v8290_v37  ;;  %v7030_v26 = vsel %vm1735_vm3, %v8290_v37, 0  ;;  %v6813_v20 = vld [vmem:[#allocation4 + $0x4a] sm:$0xff]  ;;  %v6822_v37 = vld [vmem:[#allocation4 + $0xb2] sm:$0xff] }
 0x508   : > { %v5806_v35 = vmax.f32 %v8133_v40, 0.0  ;;  %v8137_v16 = vadd.f32 %v8136_v52, %v8039_v11  ;;  %v5708_v10 = vpop.f32.mrb[167].mxu1  ;;  %v6686_v40 = vld [vmem:[#allocation4 + $0x51] sm:$0xff]  ;;  %8053 = vmatpush3.bf16.msra.mxu0 %v7030_v26 }
 0x509   : > { %v5804_v7 = vmax.f32 %v8135_v49, 0.0  ;;  %v8139_v38 = vadd.f32 %v8138_v5, %v5708_v10  ;;  %v6188_v23 = vld [vmem:[#allocation4 + $0xf0] sm:$0xff]  ;;  %v8154_v5 = vadd.f32 %v10903_v32, %v10893_v41 }
 0x50a   : > { %5839 = vst.msk [vmem:[#allocation4 + $0x121] sm:$0xff] %vm334_vm0, %v5806_v35  ;;  %v5807_v59 = vmax.f32 %v8137_v16, 0.0  ;;  %6623 = vrot.lane.b32.xlu0 %v10953_v33, %s8324_s21  ;;  %6368 = vrot.lane.b32.xlu1 %v6333_v54, %s8321_s19  ;;  %v6569_v36 = vld [vmem:[#allocation4 + $0xd8] sm:$0xff] }
 0x50b   : > { %5837 = vst.msk [vmem:[#allocation4 + $0x109] sm:$0xff] %vm334_vm0, %v5804_v7  ;;  %v5805_v29 = vmax.f32 %v8139_v38, 0.0  ;;  %v6189_v18 = vld [vmem:[#allocation4 + $0xf8] sm:$0xff]  ;;  %v6716_v7 = vpack.c.bf16 %v6686_v40, %v6685_v63 }
 0x50c   : > { %5840 = vst.msk [vmem:[#allocation4 + $0x129] sm:$0xff] %vm334_vm0, %v5807_v59  ;;  %v11031_v43 = vpack.c.bf16 %v6189_v18, %v6188_v23  ;;  %v6570_v3 = vld [vmem:[#allocation4 + $0xe0] sm:$0xff]  ;;  %v6444_v40 = vld [vmem:[#allocation4 + $0xf2] sm:$0xff] }
 0x50d   : > { %5838 = vst.msk [vmem:[#allocation4 + $0x111] sm:$0xff] %vm334_vm0, %v5805_v29  ;;  %v8042_v33 = vpop.f32.mrb[168].mxu1  ;;  %v11036_v2 = vpack.c.bf16 %v6570_v3, %v6569_v36  ;;  %v6309_v18 = vld [vmem:[#allocation4 + $0x99] sm:$0xff]  ;;  %v6308_v36 = vld [vmem:[#allocation4 + $0x91] sm:$0xff] }
 0x50e   : > { %v8141_v25 = vadd.f32 %v8140_v53, %v8042_v33  ;;  %v5721_v60 = vpop.f32.mrb[169].mxu1  ;;  %6751 = vrot.lane.b32.xlu0 %v6333_v54, %s8322_s20  ;;  %6496 = vrot.lane.b32.xlu1 %v6461_v55, %s8320_s18  ;;  %5908 = vst.msk [vmem:[#allocation6 + $0x2d0] sm:$0xff] %vm334_vm0, %v11031_v43  ;;  %v6335_v3 = vpack.c.bf16 %v6309_v18, %v6308_v36  ;;  %v6436_v33 = vld [vmem:[#allocation4 + $0x92] sm:$0xff] }
 0x50f   : > { %v8143_v45 = vadd.f32 %v8142_v21, %v5721_v60  ;;  %v8043_v15 = vpop.f32.mrb[170].mxu1  ;;  %5907 = vst.msk [vmem:[#allocation6 + $0x288] sm:$0xff] %vm334_vm0, %v11036_v2  ;;  %v6437_v21 = vld [vmem:[#allocation4 + $0x9a] sm:$0xff] }
 0x510   : > { %v5810_v6 = vmax.f32 %v8141_v25, 0.0  ;;  %v8145_v8 = vadd.f32 %v8144_v57, %v8043_v15  ;;  %v5724_v28 = vpop.f32.mrb[171].mxu1  ;;  %v6463_v25 = vpack.c.bf16 %v6437_v21, %v6436_v33  ;;  %v6817_v60 = vld [vmem:[#allocation4 + $0x7a] sm:$0xff]  ;;  %v6818_v57 = vld [vmem:[#allocation4 + $0x82] sm:$0xff] }
 0x511   : > { %v5808_v58 = vmax.f32 %v8143_v45, 0.0  ;;  %v8147_v42 = vadd.f32 %v8146_v39, %v5724_v28  ;;  %v6192_v17 = vld [vmem:[#allocation4 + $0x120] sm:$0xff]  ;;  %v6846_v45 = vpack.c.bf16 %v6818_v57, %v6817_v60  ;;  %v6313_v39 = vld [vmem:[#allocation4 + $0xc9] sm:$0xff] }
 0x512   : > { %5843 = vst.msk [vmem:[#allocation4 + $0x151] sm:$0xff] %vm334_vm0, %v5810_v6  ;;  %v5811_v56 = vmax.f32 %v8145_v8, 0.0  ;;  %6879 = vrot.lane.b32.xlu0 %v6461_v55, %s8325_s22  ;;  %5986 = vrot.lane.b32.xlu1 %v6333_v54, %s8317_s15  ;;  %v6573_v48 = vld [vmem:[#allocation4 + $0x108] sm:$0xff]  ;;  %v6844_v54 = vpack.c.bf16 %v6814_v31, %v6813_v20 }
 0x513   : > { %5841 = vst.msk [vmem:[#allocation4 + $0x139] sm:$0xff] %vm334_vm0, %v5808_v58  ;;  %v5809_v13 = vmax.f32 %v8147_v42, 0.0  ;;  %v6193_v34 = vld [vmem:[#allocation4 + $0x128] sm:$0xff] }
 0x514   : > { %5844 = vst.msk [vmem:[#allocation4 + $0x159] sm:$0xff] %vm334_vm0, %v5811_v56  ;;  %v11063_v46 = vpack.c.bf16 %v6193_v34, %v6192_v17  ;;  %v6574_v47 = vld [vmem:[#allocation4 + $0x110] sm:$0xff]  ;;  %v6312_v6 = vld [vmem:[#allocation4 + $0xc1] sm:$0xff]  ;;  %v11139_v34 = vpop.permute.xlu1 %6649 }
 0x515   : > { %5842 = vst.msk [vmem:[#allocation4 + $0x141] sm:$0xff] %vm334_vm0, %v5809_v13  ;;  %v8046_v12 = vpop.f32.mrb[172].mxu1  ;;  %v11068_v22 = vpack.c.bf16 %v6574_v47, %v6573_v48  ;;  %v6337_v8 = vpack.c.bf16 %v6313_v39, %v6312_v6  ;;  %v6440_v28 = vld [vmem:[#allocation4 + $0xc2] sm:$0xff]  ;;  %v6441_v58 = vld [vmem:[#allocation4 + $0xca] sm:$0xff] }
 0x516   : > { %v8149_v52 = vadd.f32 %v8148_v4, %v8046_v12  ;;  %v5737_v49 = vpop.f32.mrb[173].mxu1  ;;  %6114 = vrot.lane.b32.xlu0 %v6461_v55, %s8318_s16  ;;  %6621 = vrot.lane.b32.xlu1 %v10958_v62, %s8324_s21  ;;  %5910 = vst.msk [vmem:[#allocation6 + $0x360] sm:$0xff] %vm334_vm0, %v11063_v46  ;;  %v6821_v42 = vld [vmem:[#allocation4 + $0xaa] sm:$0xff]  ;;  %v6317_v12 = vld [vmem:[#allocation4 + $0xf9] sm:$0xff]  ;;  %v6448_v21 = vld [vmem:[#allocation4 + $0x122] sm:$0xff] }
 0x517   : > { %v8151_v1 = vadd.f32 %v8150_v50, %v5737_v49  ;;  %v8047_v11 = vpop.f32.mrb[174].mxu1  ;;  %5909 = vst.msk [vmem:[#allocation6 + $0x318] sm:$0xff] %vm334_vm0, %v11068_v22  ;;  %v6694_v56 = vld [vmem:[#allocation4 + $0xb1] sm:$0xff]  ;;  %v6848_v13 = vpack.c.bf16 %v6822_v37, %v6821_v42  ;;  %v6701_v37 = vld [vmem:[#allocation4 + $0x109] sm:$0xff] }
 0x518   : > { %v5814_v35 = vmax.f32 %v8149_v52, 0.0  ;;  %v8153_v16 = vadd.f32 %v8152_v9, %v8047_v11  ;;  %v5740_v10 = vpop.f32.mrb[175].mxu1  ;;  %v6316_v50 = vld [vmem:[#allocation4 + $0xf1] sm:$0xff]  ;;  %v6445_v52 = vld [vmem:[#allocation4 + $0xfa] sm:$0xff] }
 0x519   : > { %v5812_v38 = vmax.f32 %v8151_v1, 0.0  ;;  %v8155_v24 = vadd.f32 %v8154_v5, %v5740_v10  ;;  %v6196_v32 = vld [vmem:[#allocation4 + $0x150] sm:$0xff]  ;;  %v6467_v1 = vpack.c.bf16 %v6445_v52, %v6444_v40  ;;  %v6698_v10 = vld [vmem:[#allocation4 + $0xe1] sm:$0xff] }
 0x51a   : > { %5847 = vst.msk [vmem:[#allocation4 + $0x181] sm:$0xff] %vm334_vm0, %v5814_v35  ;;  %v5815_v0 = vmax.f32 %v8153_v16, 0.0  ;;  %6877 = vrot.lane.b32.xlu0 %v6844_v54, %s8325_s22  ;;  %6749 = vrot.lane.b32.xlu1 %v6716_v7, %s8322_s20  ;;  %v6577_v59 = vld [vmem:[#allocation4 + $0x138] sm:$0xff]  ;;  %v6826_v16 = vld [vmem:[#allocation4 + $0xe2] sm:$0xff]  ;;  %v6829_v6 = vld [vmem:[#allocation4 + $0x10a] sm:$0xff] }
 0x51b   : > { %5845 = vst.msk [vmem:[#allocation4 + $0x169] sm:$0xff] %vm334_vm0, %v5812_v38  ;;  %v5813_v41 = vmax.f32 %v8155_v24, 0.0  ;;  %v6197_v61 = vld [vmem:[#allocation4 + $0x158] sm:$0xff] }
 0x51c   : > { %5848 = vst.msk [vmem:[#allocation4 + $0x189] sm:$0xff] %vm334_vm0, %v5815_v0  ;;  %v11086_v30 = vpack.c.bf16 %v6197_v61, %v6196_v32  ;;  %v6578_v29 = vld [vmem:[#allocation4 + $0x140] sm:$0xff] }
 0x51d   : > { %5846 = vst.msk [vmem:[#allocation4 + $0x171] sm:$0xff] %vm334_vm0, %v5813_v41  ;;  %v11089_v23 = vpack.c.bf16 %v6578_v29, %v6577_v59  ;;  %v6825_v35 = vld [vmem:[#allocation4 + $0xda] sm:$0xff] }
 0x51e   : > { %6238 = vrot.lane.b32.xlu0 %v10958_v62, %s8319_s17  ;;  %5984 = vrot.lane.b32.xlu1 %v6716_v7, %s8317_s15  ;;  %5912 = vst.msk [vmem:[#allocation6 + $0x3f0] sm:$0xff] %vm334_vm0, %v11086_v30  ;;  %v6850_v24 = vpack.c.bf16 %v6826_v16, %v6825_v35  ;;  %v6453_v40 = vld [vmem:[#allocation4 + $0x15a] sm:$0xff]  ;;  %v6834_v35 = vld [vmem:[#allocation4 + $0x142] sm:$0xff] }
 0x51f   : > { %5911 = vst.msk [vmem:[#allocation6 + $0x3a8] sm:$0xff] %vm334_vm0, %v11089_v23  ;;  %v6706_v16 = vld [vmem:[#allocation4 + $0x141] sm:$0xff] }
 0x522   : > { %6366 = vrot.lane.b32.xlu0 %v6716_v7, %s8321_s19  ;;  %6112 = vrot.lane.b32.xlu1 %v6844_v54, %s8318_s16  ;;  %v6581_v53 = vld [vmem:[#allocation4 + $0x168] sm:$0xff] }
 0x524   : > { %v6582_v55 = vld [vmem:[#allocation4 + $0x170] sm:$0xff] }
 0x525   : > { %v11103_v62 = vpack.c.bf16 %v6582_v55, %v6581_v53  ;;  %v6321_v55 = vld [vmem:[#allocation4 + $0x129] sm:$0xff] }
 0x526   : > { %6494 = vrot.lane.b32.xlu0 %v6844_v54, %s8320_s18  ;;  %6244 = vrot.lane.b32.xlu1 %v10977_v14, %s8319_s17  ;;  %v6697_v54 = vld [vmem:[#allocation4 + $0xd9] sm:$0xff] }
 0x527   : > { %5913 = vst.msk [vmem:[#allocation6 + $0x438] sm:$0xff] %vm334_vm0, %v11103_v62  ;;  %v6722_v0 = vpack.c.bf16 %v6698_v10, %v6697_v54 }
 0x52a   : > { %6627 = vrot.lane.b32.xlu0 %v10977_v14, %s8324_s21  ;;  %6372 = vrot.lane.b32.xlu1 %v6335_v3, %s8321_s19  ;;  %v6689_v14 = vld [vmem:[#allocation4 + $0x79] sm:$0xff] }
 0x52b   : > { %v6718_v15 = vpack.c.bf16 %v6690_v51, %v6689_v14 }
 0x52e   : > { %6755 = vrot.lane.b32.xlu0 %v6335_v3, %s8322_s20  ;;  %6500 = vrot.lane.b32.xlu1 %v6463_v25, %s8320_s18 }
 0x532   : > { %6883 = vrot.lane.b32.xlu0 %v6463_v25, %s8325_s22  ;;  %5990 = vrot.lane.b32.xlu1 %v6335_v3, %s8317_s15 }
 0x536   : > { %6118 = vrot.lane.b32.xlu0 %v6463_v25, %s8318_s16  ;;  %6625 = vrot.lane.b32.xlu1 %v10982_v27, %s8324_s21  ;;  %v6449_v25 = vld [vmem:[#allocation4 + $0x12a] sm:$0xff] }
 0x537   : > { %v6469_v51 = vpack.c.bf16 %v6449_v25, %v6448_v21  ;;  %v6456_v25 = vld [vmem:[#allocation4 + $0x182] sm:$0xff] }
 0x53a   : > { %6881 = vrot.lane.b32.xlu0 %v6846_v45, %s8325_s22  ;;  %6753 = vrot.lane.b32.xlu1 %v6718_v15, %s8322_s20 }
 0x53e   : > { %6242 = vrot.lane.b32.xlu0 %v10982_v27, %s8319_s17  ;;  %5988 = vrot.lane.b32.xlu1 %v6718_v15, %s8317_s15  ;;  %v6465_v27 = vpack.c.bf16 %v6441_v58, %v6440_v28  ;;  %v6702_v28 = vld [vmem:[#allocation4 + $0x111] sm:$0xff] }
 0x542   : > { %6370 = vrot.lane.b32.xlu0 %v6718_v15, %s8321_s19  ;;  %6116 = vrot.lane.b32.xlu1 %v6846_v45, %s8318_s16 }
 0x546   : > { %6498 = vrot.lane.b32.xlu0 %v6846_v45, %s8320_s18  ;;  %6248 = vrot.lane.b32.xlu1 %v11002_v19, %s8319_s17 }
 0x54a   : > { %6631 = vrot.lane.b32.xlu0 %v11002_v19, %s8324_s21  ;;  %6376 = vrot.lane.b32.xlu1 %v6337_v8, %s8321_s19  ;;  %v6693_v19 = vld [vmem:[#allocation4 + $0xa9] sm:$0xff] }
 0x54b   : > { %v6720_v17 = vpack.c.bf16 %v6694_v56, %v6693_v19  ;;  %v6724_v56 = vpack.c.bf16 %v6702_v28, %v6701_v37 }
 0x54e   : > { %6759 = vrot.lane.b32.xlu0 %v6337_v8, %s8322_s20  ;;  %6504 = vrot.lane.b32.xlu1 %v6465_v27, %s8320_s18 }
 0x552   : > { %6887 = vrot.lane.b32.xlu0 %v6465_v27, %s8325_s22  ;;  %5994 = vrot.lane.b32.xlu1 %v6337_v8, %s8317_s15  ;;  %v6830_v8 = vld [vmem:[#allocation4 + $0x112] sm:$0xff] }
 0x553   : > { %v6852_v42 = vpack.c.bf16 %v6830_v8, %v6829_v6  ;;  %v6710_v8 = vld [vmem:[#allocation4 + $0x171] sm:$0xff] }
 0x556   : > { %6122 = vrot.lane.b32.xlu0 %v6465_v27, %s8318_s16  ;;  %6629 = vrot.lane.b32.xlu1 %v11007_v44, %s8324_s21 }
 0x55a   : > { %6885 = vrot.lane.b32.xlu0 %v6848_v13, %s8325_s22  ;;  %6757 = vrot.lane.b32.xlu1 %v6720_v17, %s8322_s20 }
 0x55e   : > { %6246 = vrot.lane.b32.xlu0 %v11007_v44, %s8319_s17  ;;  %5992 = vrot.lane.b32.xlu1 %v6720_v17, %s8317_s15  ;;  %v6339_v44 = vpack.c.bf16 %v6317_v12, %v6316_v50  ;;  %v6325_v12 = vld [vmem:[#allocation4 + $0x159] sm:$0xff] }
 0x560   : > { %v6620_v26 = vpop.permute.xlu0 %6619  ;;  %v6237_v4 = vpop.permute.xlu1 %6236 }
 0x562   : > { %6374 = vrot.lane.b32.xlu0 %v6720_v17, %s8321_s19  ;;  %6120 = vrot.lane.b32.xlu1 %v6848_v13, %s8318_s16 }
 0x564   : > { %v6748_v48 = vpop.permute.xlu0 %6747  ;;  %v6365_v47 = vpop.permute.xlu1 %6364 }
 0x566   : > { %6502 = vrot.lane.b32.xlu0 %v6848_v13, %s8320_s18  ;;  %6252 = vrot.lane.b32.xlu1 %v11031_v43, %s8319_s17 }
 0x568   : > { %v6876_v20 = vpop.permute.xlu0 %6875  ;;  %v6493_v31 = vpop.permute.xlu1 %6492 }
 0x56a   : > { %6635 = vrot.lane.b32.xlu0 %v11031_v43, %s8324_s21  ;;  %6380 = vrot.lane.b32.xlu1 %v6339_v44, %s8321_s19 }
 0x56c   : > { %v6111_v49 = vpop.permute.xlu0 %6110  ;;  %v5983_v9 = vpop.permute.xlu1 %5982 }
 0x56d   : > { %6028 = vst.msk [vmem:[#allocation6 + $0x90] sm:$0xff] %vm708_vm4, %v5983_v9 }
 0x56e   : > { %6156 = vst.msk [vmem:[#allocation6 + $0x90] sm:$0xff] %vm837_vm5, %v6111_v49  ;;  %6763 = vrot.lane.b32.xlu0 %v6339_v44, %s8322_s20  ;;  %6508 = vrot.lane.b32.xlu1 %v6467_v1, %s8320_s18 }
 0x570   : > { %v6235_v11 = vpop.permute.xlu0 %6234  ;;  %v5981_v5 = vpop.permute.xlu1 %5980 }
 0x571   : > { %6282 = vst.msk [vmem:[#allocation6] sm:$0xff] %vm966_vm6, %v6235_v11 }
 0x572   : > { %6027 = vst.msk [vmem:[#allocation6 + $0x48] sm:$0xff] %vm708_vm4, %v5981_v5  ;;  %6891 = vrot.lane.b32.xlu0 %v6467_v1, %s8325_s22  ;;  %5998 = vrot.lane.b32.xlu1 %v6339_v44, %s8317_s15  ;;  %v6452_v44 = vld [vmem:[#allocation4 + $0x152] sm:$0xff] }
 0x573   : > { %v6471_v9 = vpack.c.bf16 %v6453_v40, %v6452_v44 }
 0x574   : > { %v6363_v43 = vpop.permute.xlu0 %6362  ;;  %v6109_v63 = vpop.permute.xlu1 %6108 }
 0x575   : > { %6410 = vst.msk [vmem:[#allocation6] sm:$0xff] %vm1095_vm7, %v6363_v43 }
 0x576   : > { %6155 = vst.msk [vmem:[#allocation6 + $0x48] sm:$0xff] %vm837_vm5, %v6109_v63  ;;  %6126 = vrot.lane.b32.xlu0 %v6467_v1, %s8318_s16  ;;  %6633 = vrot.lane.b32.xlu1 %v11036_v2, %s8324_s21  ;;  %v6833_v63 = vld [vmem:[#allocation4 + $0x13a] sm:$0xff] }
 0x577   : > { %6283 = vst.msk [vmem:[#allocation6 + $0x48] sm:$0xff] %vm966_vm6, %v6237_v4 }
 0x578   : > { %6411 = vst.msk [vmem:[#allocation6 + $0x48] sm:$0xff] %vm1095_vm7, %v6365_v47  ;;  %v6491_v7 = vpop.permute.xlu0 %6490  ;;  %v6241_v38 = vpop.permute.xlu1 %6240 }
 0x579   : > { %6539 = vst.msk [vmem:[#allocation6 + $0x48] sm:$0xff] %vm1224_vm8, %v6493_v31  ;;  %6538 = vst.msk [vmem:[#allocation6] sm:$0xff] %vm1224_vm8, %v6491_v7  ;;  %v6854_v7 = vpack.c.bf16 %v6834_v35, %v6833_v63 }
 0x57a   : > { %6667 = vst.msk [vmem:[#allocation6] sm:$0xff] %vm1354_vm9, %v6620_v26  ;;  %6889 = vrot.lane.b32.xlu0 %v6850_v24, %s8325_s22  ;;  %6761 = vrot.lane.b32.xlu1 %v6722_v0, %s8322_s20 }
 0x57b   : > { %6795 = vst.msk [vmem:[#allocation6] sm:$0xff] %vm1483_vm10, %v6748_v48 }
 0x57c   : > { %6923 = vst.msk [vmem:[#allocation6] sm:$0xff] %vm1612_vm11, %v6876_v20  ;;  %v6624_v41 = vpop.permute.xlu0 %6623  ;;  %v6369_v32 = vpop.permute.xlu1 %6368  ;;  %v6324_v20 = vld [vmem:[#allocation4 + $0x151] sm:$0xff] }
 0x57d   : > { %v6343_v31 = vpack.c.bf16 %v6325_v12, %v6324_v20  ;;  %v6841_v12 = vld [vmem:[#allocation4 + $0x19a] sm:$0xff] }
 0x57e   : > { %6250 = vrot.lane.b32.xlu0 %v11036_v2, %s8319_s17  ;;  %5996 = vrot.lane.b32.xlu1 %v6722_v0, %s8317_s15  ;;  %v6320_v2 = vld [vmem:[#allocation4 + $0x121] sm:$0xff] }
 0x57f   : > { %v6341_v33 = vpack.c.bf16 %v6321_v55, %v6320_v2  ;;  %v6200_v55 = vld [vmem:[#allocation4 + $0x180] sm:$0xff] }
 0x580   : > { %v6752_v61 = vpop.permute.xlu0 %6751  ;;  %v6497_v59 = vpop.permute.xlu1 %6496 }
 0x582   : > { %6378 = vrot.lane.b32.xlu0 %v6722_v0, %s8321_s19  ;;  %6124 = vrot.lane.b32.xlu1 %v6850_v24, %s8318_s16 }
 0x583   : > { %v6939_v29 = vld [vmem:[#allocation6] sm:$0xff] }
 0x584   : > { %8054 = vmatprep.mubr.msk.bf16.mxu0 %vm1686_vm12, %v6939_v29  ;;  %v6880_v18 = vpop.permute.xlu0 %6879  ;;  %v5987_v53 = vpop.permute.xlu1 %5986 }
 0x585   : > { %6030 = vst.msk [vmem:[#allocation6 + $0x120] sm:$0xff] %vm708_vm4, %v5987_v53 }
 0x586   : > { %6506 = vrot.lane.b32.xlu0 %v6850_v24, %s8320_s18  ;;  %6256 = vrot.lane.b32.xlu1 %v11063_v46, %s8319_s17 }
 0x588   : > { %v6115_v36 = vpop.permute.xlu0 %6114  ;;  %v6622_v3 = vpop.permute.xlu1 %6621 }
 0x589   : > { %6158 = vst.msk [vmem:[#allocation6 + $0x120] sm:$0xff] %vm837_vm5, %v6115_v36 }
 0x58a   : > { %6668 = vst.msk [vmem:[#allocation6 + $0x48] sm:$0xff] %vm1354_vm9, %v6622_v3  ;;  %6639 = vrot.lane.b32.xlu0 %v11063_v46, %s8324_s21  ;;  %6384 = vrot.lane.b32.xlu1 %v6341_v33, %s8321_s19 }
 0x58c   : > { %v6878_v60 = vpop.permute.xlu0 %6877  ;;  %v6750_v57 = vpop.permute.xlu1 %6749 }
 0x58d   : > { %6796 = vst.msk [vmem:[#allocation6 + $0x48] sm:$0xff] %vm1483_vm10, %v6750_v57 }
 0x58e   : > { %6924 = vst.msk [vmem:[#allocation6 + $0x48] sm:$0xff] %vm1612_vm11, %v6878_v60  ;;  %6767 = vrot.lane.b32.xlu0 %v6341_v33, %s8322_s20  ;;  %6512 = vrot.lane.b32.xlu1 %v6469_v51, %s8320_s18  ;;  %v6457_v60 = vld [vmem:[#allocation4 + $0x18a] sm:$0xff] }
 0x590   : > { %v6239_v14 = vpop.permute.xlu0 %6238  ;;  %v5985_v45 = vpop.permute.xlu1 %5984 }
 0x591   : > { %6284 = vst.msk [vmem:[#allocation6 + $0x90] sm:$0xff] %vm966_vm6, %v6239_v14  ;;  %v6473_v14 = vpack.c.bf16 %v6457_v60, %v6456_v25 }
 0x592   : > { %6029 = vst.msk [vmem:[#allocation6 + $0xd8] sm:$0xff] %vm708_vm4, %v5985_v45  ;;  %6895 = vrot.lane.b32.xlu0 %v6469_v51, %s8325_s22  ;;  %6002 = vrot.lane.b32.xlu1 %v6341_v33, %s8317_s15  ;;  %v6328_v33 = vld [vmem:[#allocation4 + $0x181] sm:$0xff]  ;;  %v6837_v45 = vld [vmem:[#allocation4 + $0x16a] sm:$0xff] }
 0x594   : > { %v6367_v46 = vpop.permute.xlu0 %6366  ;;  %v6113_v15 = vpop.permute.xlu1 %6112 }
 0x595   : > { %6412 = vst.msk [vmem:[#allocation6 + $0x90] sm:$0xff] %vm1095_vm7, %v6367_v46  ;;  %v6940_v39 = vld [vmem:[#allocation6 + $0x48] sm:$0xff] }
 0x596   : > { %6157 = vst.msk [vmem:[#allocation6 + $0xd8] sm:$0xff] %vm837_vm5, %v6113_v15  ;;  %8055 = vmatmul.mubr.msk.bf16.vlgmr.msra.gmra.mrb[176].mxu0 %vm1686_vm12, %v6940_v39  ;;  %6130 = vrot.lane.b32.xlu0 %v6469_v51, %s8318_s16  ;;  %v6838_v46 = vld [vmem:[#allocation4 + $0x172] sm:$0xff] }
 0x597   : > { %6285 = vst.msk [vmem:[#allocation6 + $0xd8] sm:$0xff] %vm966_vm6, %v6241_v38  ;;  %6637 = vrot.lane.b32.xlu1 %v11068_v22, %s8324_s21  ;;  %v6705_v38 = vld [vmem:[#allocation4 + $0x139] sm:$0xff]  ;;  %v6856_v6 = vpack.c.bf16 %v6838_v46, %v6837_v45 }
 0x598   : > { %6413 = vst.msk [vmem:[#allocation6 + $0xd8] sm:$0xff] %vm1095_vm7, %v6369_v32  ;;  %v6495_v58 = vpop.permute.xlu0 %6494  ;;  %v6245_v27 = vpop.permute.xlu1 %6244  ;;  %v6726_v24 = vpack.c.bf16 %v6706_v16, %v6705_v38 }
 0x599   : > { %6541 = vst.msk [vmem:[#allocation6 + $0xd8] sm:$0xff] %vm1224_vm8, %v6497_v59  ;;  %6540 = vst.msk [vmem:[#allocation6 + $0x90] sm:$0xff] %vm1224_vm8, %v6495_v58  ;;  %v6201_v59 = vld [vmem:[#allocation4 + $0x188] sm:$0xff] }
 0x59a   : > { %6669 = vst.msk [vmem:[#allocation6 + $0x90] sm:$0xff] %vm1354_vm9, %v6624_v41  ;;  %6893 = vrot.lane.b32.xlu0 %v6852_v42, %s8325_s22  ;;  %v6217_v2 = vpack.c.bf16 %v6201_v59, %v6200_v55 }
 0x59b   : > { %6797 = vst.msk [vmem:[#allocation6 + $0x90] sm:$0xff] %vm1483_vm10, %v6752_v61  ;;  %6765 = vrot.lane.b32.xlu1 %v6724_v56, %s8322_s20 }
 0x59c   : > { %6925 = vst.msk [vmem:[#allocation6 + $0x90] sm:$0xff] %vm1612_vm11, %v6880_v18  ;;  %v6628_v19 = vpop.permute.xlu0 %6627  ;;  %v6373_v13 = vpop.permute.xlu1 %6372 }
 0x59e   : > { %6254 = vrot.lane.b32.xlu0 %v11068_v22, %s8319_s17 }
 0x59f   : > { %6000 = vrot.lane.b32.xlu1 %v6724_v56, %s8317_s15 }
 0x5a0   : > { %v6756_v17 = vpop.permute.xlu0 %6755  ;;  %v6501_v26 = vpop.permute.xlu1 %6500 }
 0x5a2   : > { %6382 = vrot.lane.b32.xlu0 %v6724_v56, %s8321_s19 }
 0x5a3   : > { %6128 = vrot.lane.b32.xlu1 %v6852_v42, %s8318_s16  ;;  %v6941_v4 = vld [vmem:[#allocation6 + $0x90] sm:$0xff] }
 0x5a4   : > { %8058 = vmatprep.mubr.msk.bf16.mxu0 %vm1686_vm12, %v6941_v4  ;;  %v6884_v48 = vpop.permute.xlu0 %6883  ;;  %v5991_v47 = vpop.permute.xlu1 %5990 }
 0x5a5   : > { %6032 = vst.msk [vmem:[#allocation6 + $0x1b0] sm:$0xff] %vm708_vm4, %v5991_v47 }
 0x5a6   : > { %6510 = vrot.lane.b32.xlu0 %v6852_v42, %s8320_s18 }
 0x5a7   : > { %6260 = vrot.lane.b32.xlu1 %v11086_v30, %s8319_s17 }
 0x5a8   : > { %v6119_v22 = vpop.permute.xlu0 %6118  ;;  %v6626_v50 = vpop.permute.xlu1 %6625 }
 0x5a9   : > { %6160 = vst.msk [vmem:[#allocation6 + $0x1b0] sm:$0xff] %vm837_vm5, %v6119_v22  ;;  %v6842_v22 = vld [vmem:[#allocation4 + $0x1a2] sm:$0xff] }
 0x5aa   : > { %6670 = vst.msk [vmem:[#allocation6 + $0xd8] sm:$0xff] %vm1354_vm9, %v6626_v50  ;;  %6643 = vrot.lane.b32.xlu0 %v11086_v30, %s8324_s21  ;;  %v6858_v20 = vpack.c.bf16 %v6842_v22, %v6841_v12 }
 0x5ab   : > { %6388 = vrot.lane.b32.xlu1 %v6343_v31, %s8321_s19 }
 0x5ac   : > { %v6882_v52 = vpop.permute.xlu0 %6881  ;;  %v6754_v49 = vpop.permute.xlu1 %6753 }
 0x5ad   : > { %6798 = vst.msk [vmem:[#allocation6 + $0xd8] sm:$0xff] %vm1483_vm10, %v6754_v49 }
 0x5ae   : > { %6926 = vst.msk [vmem:[#allocation6 + $0xd8] sm:$0xff] %vm1612_vm11, %v6882_v52  ;;  %6771 = vrot.lane.b32.xlu0 %v6343_v31, %s8322_s20 }
 0x5af   : > { %6516 = vrot.lane.b32.xlu1 %v6471_v9, %s8320_s18 }
 0x5b0   : > { %v6243_v1 = vpop.permute.xlu0 %6242  ;;  %v5989_v11 = vpop.permute.xlu1 %5988 }
 0x5b1   : > { %6286 = vst.msk [vmem:[#allocation6 + $0x120] sm:$0xff] %vm966_vm6, %v6243_v1 }
 0x5b2   : > { %6031 = vst.msk [vmem:[#allocation6 + $0x168] sm:$0xff] %vm708_vm4, %v5989_v11  ;;  %6899 = vrot.lane.b32.xlu0 %v6471_v9, %s8325_s22 }
 0x5b3   : > { %6006 = vrot.lane.b32.xlu1 %v6343_v31, %s8317_s15 }
 0x5b4   : > { %v6371_v30 = vpop.permute.xlu0 %6370  ;;  %v6117_v5 = vpop.permute.xlu1 %6116 }
 0x5b5   : > { %6414 = vst.msk [vmem:[#allocation6 + $0x120] sm:$0xff] %vm1095_vm7, %v6371_v30  ;;  %v6942_v43 = vld [vmem:[#allocation6 + $0xd8] sm:$0xff] }
 0x5b6   : > { %6159 = vst.msk [vmem:[#allocation6 + $0x168] sm:$0xff] %vm837_vm5, %v6117_v5  ;;  %6134 = vrot.lane.b32.xlu0 %v6471_v9, %s8318_s16  ;;  %8059 = vmatmul.mubr.msk.bf16.gmra.mrb[180].mxu0 %vm1686_vm12, %v6942_v43 }
 0x5b7   : > { %6287 = vst.msk [vmem:[#allocation6 + $0x168] sm:$0xff] %vm966_vm6, %v6245_v27  ;;  %6641 = vrot.lane.b32.xlu1 %v11089_v23, %s8324_s21  ;;  %v6709_v27 = vld [vmem:[#allocation4 + $0x169] sm:$0xff] }
 0x5b8   : > { %6415 = vst.msk [vmem:[#allocation6 + $0x168] sm:$0xff] %vm1095_vm7, %v6373_v13  ;;  %v6499_v10 = vpop.permute.xlu0 %6498  ;;  %v11244_v54 = vpop.permute.xlu1 %6248  ;;  %v6728_v42 = vpack.c.bf16 %v6710_v8, %v6709_v27 }
 0x5b9   : > { %6543 = vst.msk [vmem:[#allocation6 + $0x168] sm:$0xff] %vm1224_vm8, %v6501_v26  ;;  %6542 = vst.msk [vmem:[#allocation6 + $0x120] sm:$0xff] %vm1224_vm8, %v6499_v10  ;;  %v6714_v26 = vld [vmem:[#allocation4 + $0x1a1] sm:$0xff] }
 0x5ba   : > { %6671 = vst.msk [vmem:[#allocation6 + $0x120] sm:$0xff] %vm1354_vm9, %v6628_v19  ;;  %6897 = vrot.lane.b32.xlu0 %v6854_v7, %s8325_s22 }
 0x5bb   : > { %6799 = vst.msk [vmem:[#allocation6 + $0x120] sm:$0xff] %vm1483_vm10, %v6756_v17  ;;  %6769 = vrot.lane.b32.xlu1 %v6726_v24, %s8322_s20  ;;  %v6713_v17 = vld [vmem:[#allocation4 + $0x199] sm:$0xff] }
 0x5bc   : > { %6927 = vst.msk [vmem:[#allocation6 + $0x120] sm:$0xff] %vm1612_vm11, %v6884_v48  ;;  %v6632_v0 = vpop.permute.xlu0 %6631  ;;  %v6377_v41 = vpop.permute.xlu1 %6376  ;;  %v6730_v4 = vpack.c.bf16 %v6714_v26, %v6713_v17 }
 0x5be   : > { %6258 = vrot.lane.b32.xlu0 %v11089_v23, %s8319_s17  ;;  %v6329_v23 = vld [vmem:[#allocation4 + $0x189] sm:$0xff] }
 0x5bf   : > { %6004 = vrot.lane.b32.xlu1 %v6726_v24, %s8317_s15  ;;  %v6345_v21 = vpack.c.bf16 %v6329_v23, %v6328_v33 }
 0x5c0   : > { %v6760_v32 = vpop.permute.xlu0 %6759  ;;  %v6505_v61 = vpop.permute.xlu1 %6504 }
 0x5c2   : > { %6386 = vrot.lane.b32.xlu0 %v6726_v24, %s8321_s19 }
 0x5c3   : > { %6132 = vrot.lane.b32.xlu1 %v6854_v7, %s8318_s16  ;;  %v6943_v29 = vld [vmem:[#allocation6 + $0x120] sm:$0xff] }
 0x5c4   : > { %v6888_v18 = vpop.permute.xlu0 %6887  ;;  %v5995_v53 = vpop.permute.xlu1 %5994  ;;  %8062 = vmatprep.mubr.msk.bf16.mxu0 %vm1686_vm12, %v6943_v29 }
 0x5c5   : > { %6034 = vst.msk [vmem:[#allocation6 + $0x240] sm:$0xff] %vm708_vm4, %v5995_v53 }
 0x5c6   : > { %6514 = vrot.lane.b32.xlu0 %v6854_v7, %s8320_s18 }
 0x5c7   : > { %6264 = vrot.lane.b32.xlu1 %v6217_v2, %s8319_s17 }
 0x5c8   : > { %v6123_v36 = vpop.permute.xlu0 %6122  ;;  %v6630_v3 = vpop.permute.xlu1 %6629 }
 0x5c9   : > { %6162 = vst.msk [vmem:[#allocation6 + $0x240] sm:$0xff] %vm837_vm5, %v6123_v36 }
 0x5ca   : > { %6672 = vst.msk [vmem:[#allocation6 + $0x168] sm:$0xff] %vm1354_vm9, %v6630_v3  ;;  %6647 = vrot.lane.b32.xlu0 %v6217_v2, %s8324_s21 }
 0x5cb   : > { %6392 = vrot.lane.b32.xlu1 %v6345_v21, %s8321_s19 }
 0x5cc   : > { %v6886_v57 = vpop.permute.xlu0 %6885  ;;  %v6758_v51 = vpop.permute.xlu1 %6757 }
 0x5cd   : > { %6800 = vst.msk [vmem:[#allocation6 + $0x168] sm:$0xff] %vm1483_vm10, %v6758_v51 }
 0x5ce   : > { %6928 = vst.msk [vmem:[#allocation6 + $0x168] sm:$0xff] %vm1612_vm11, %v6886_v57  ;;  %6775 = vrot.lane.b32.xlu0 %v6345_v21, %s8322_s20 }
 0x5cf   : > { %6520 = vrot.lane.b32.xlu1 %v6473_v14, %s8320_s18 }
 0x5d0   : > { %v6247_v15 = vpop.permute.xlu0 %6246  ;;  %v5993_v39 = vpop.permute.xlu1 %5992 }
 0x5d1   : > { %6288 = vst.msk [vmem:[#allocation6 + $0x1b0] sm:$0xff] %vm966_vm6, %v6247_v15 }
 0x5d2   : > { %6033 = vst.msk [vmem:[#allocation6 + $0x1f8] sm:$0xff] %vm708_vm4, %v5993_v39  ;;  %6901 = vrot.lane.b32.xlu0 %v6856_v6, %s8325_s22 }
 0x5d3   : > { %6645 = vrot.lane.b32.xlu1 %v11103_v62, %s8324_s21 }
 0x5d4   : > { %v6375_v28 = vpop.permute.xlu0 %6374  ;;  %v6121_v58 = vpop.permute.xlu1 %6120 }
 0x5d5   : > { %6416 = vst.msk [vmem:[#allocation6 + $0x1b0] sm:$0xff] %vm1095_vm7, %v6375_v28  ;;  %v6944_v37 = vld [vmem:[#allocation6 + $0x168] sm:$0xff] }
 0x5d6   : > { %6161 = vst.msk [vmem:[#allocation6 + $0x1f8] sm:$0xff] %vm837_vm5, %v6121_v58  ;;  %6262 = vrot.lane.b32.xlu0 %v11103_v62, %s8319_s17  ;;  %8063 = vmatmul.mubr.msk.bf16.gmra.mrb[184].mxu0 %vm1686_vm12, %v6944_v37 }
 0x5d7   : > { %6289 = vst.msk [vmem:[#allocation6 + $0x1f8] sm:$0xff] %vm966_vm6, %v11244_v54  ;;  %6773 = vrot.lane.b32.xlu1 %v6728_v42, %s8322_s20 }
 0x5d8   : > { %6417 = vst.msk [vmem:[#allocation6 + $0x1f8] sm:$0xff] %vm1095_vm7, %v6377_v41  ;;  %v6503_v56 = vpop.permute.xlu0 %6502  ;;  %v6253_v19 = vpop.permute.xlu1 %6252 }
 0x5d9   : > { %6545 = vst.msk [vmem:[#allocation6 + $0x1f8] sm:$0xff] %vm1224_vm8, %v6505_v61  ;;  %6544 = vst.msk [vmem:[#allocation6 + $0x1b0] sm:$0xff] %vm1224_vm8, %v6503_v56 }
 0x5da   : > { %6673 = vst.msk [vmem:[#allocation6 + $0x1b0] sm:$0xff] %vm1354_vm9, %v6632_v0  ;;  %6390 = vrot.lane.b32.xlu0 %v6728_v42, %s8321_s19  ;;  %s11382_s19 = scalar_lea.vmem %s11491_s9, %s7456_s11 }
 0x5db   : > { %6801 = vst.msk [vmem:[#allocation6 + $0x1b0] sm:$0xff] %vm1483_vm10, %v6760_v32  ;;  %6008 = vrot.lane.b32.xlu1 %v6728_v42, %s8317_s15 }
 0x5dc   : > { %6929 = vst.msk [vmem:[#allocation6 + $0x1b0] sm:$0xff] %vm1612_vm11, %v6888_v18  ;;  %v6636_v62 = vpop.permute.xlu0 %6635  ;;  %v6381_v13 = vpop.permute.xlu1 %6380 }
 0x5de   : > { %6518 = vrot.lane.b32.xlu0 %v6856_v6, %s8320_s18 }
 0x5df   : > { %6136 = vrot.lane.b32.xlu1 %v6856_v6, %s8318_s16 }
 0x5e0   : > { %v6764_v48 = vpop.permute.xlu0 %6763  ;;  %v6509_v47 = vpop.permute.xlu1 %6508 }
 0x5e2   : > { %6903 = vrot.lane.b32.xlu0 %v6473_v14, %s8325_s22 }
 0x5e3   : > { %6777 = vrot.lane.b32.xlu1 %v6730_v4, %s8322_s20  ;;  %v6945_v50 = vld [vmem:[#allocation6 + $0x1b0] sm:$0xff] }
 0x5e4   : > { %v6892_v31 = vpop.permute.xlu0 %6891  ;;  %v5999_v44 = vpop.permute.xlu1 %5998  ;;  %8066 = vmatprep.mubr.msk.bf16.mxu0 %vm1686_vm12, %v6945_v50 }
 0x5e5   : > { %6036 = vst.msk [vmem:[#allocation6 + $0x2d0] sm:$0xff] %vm708_vm4, %v5999_v44 }
 0x5e7   : > { %6905 = vrot.lane.b32.xlu1 %v6858_v20, %s8325_s22 }
 0x5e8   : > { %v6127_v40 = vpop.permute.xlu0 %6126  ;;  %v6634_v52 = vpop.permute.xlu1 %6633 }
 0x5e9   : > { %6164 = vst.msk [vmem:[#allocation6 + $0x2d0] sm:$0xff] %vm837_vm5, %v6127_v40 }
 0x5ea   : > { %6674 = vst.msk [vmem:[#allocation6 + $0x1f8] sm:$0xff] %vm1354_vm9, %v6634_v52 }
 0x5ec   : > { %v6890_v49 = vpop.permute.xlu0 %6889  ;;  %v6762_v9 = vpop.permute.xlu1 %6761 }
 0x5ed   : > { %6802 = vst.msk [vmem:[#allocation6 + $0x1f8] sm:$0xff] %vm1483_vm10, %v6762_v9  ;;  %v11374_v9 = vld [vmem:[%s11490_s8] ss:$0 sm:$0xff] }
 0x5ee   : > { %6930 = vst.msk [vmem:[#allocation6 + $0x1f8] sm:$0xff] %vm1612_vm11, %v6890_v49 }
 0x5f0   : > { %v6251_v1 = vpop.permute.xlu0 %6250  ;;  %v5997_v11 = vpop.permute.xlu1 %5996 }
 0x5f1   : > { %6290 = vst.msk [vmem:[#allocation6 + $0x240] sm:$0xff] %vm966_vm6, %v6251_v1 }
 0x5f2   : > { %6035 = vst.msk [vmem:[#allocation6 + $0x288] sm:$0xff] %vm708_vm4, %v5997_v11 }
 0x5f4   : > { %v6379_v30 = vpop.permute.xlu0 %6378  ;;  %v6125_v5 = vpop.permute.xlu1 %6124 }
 0x5f5   : > { %6418 = vst.msk [vmem:[#allocation6 + $0x240] sm:$0xff] %vm1095_vm7, %v6379_v30  ;;  %v6946_v43 = vld [vmem:[#allocation6 + $0x1f8] sm:$0xff] }
 0x5f6   : > { %6163 = vst.msk [vmem:[#allocation6 + $0x288] sm:$0xff] %vm837_vm5, %v6125_v5  ;;  %8067 = vmatmul.mubr.msk.bf16.gmra.mrb[188].mxu0 %vm1686_vm12, %v6946_v43 }
 0x5f7   : > { %6291 = vst.msk [vmem:[#allocation6 + $0x288] sm:$0xff] %vm966_vm6, %v6253_v19 }
 0x5f8   : > { %6419 = vst.msk [vmem:[#allocation6 + $0x288] sm:$0xff] %vm1095_vm7, %v6381_v13  ;;  %v6507_v63 = vpop.permute.xlu0 %6506  ;;  %v6257_v35 = vpop.permute.xlu1 %6256 }
 0x5f9   : > { %6547 = vst.msk [vmem:[#allocation6 + $0x288] sm:$0xff] %vm1224_vm8, %v6509_v47  ;;  %6546 = vst.msk [vmem:[#allocation6 + $0x240] sm:$0xff] %vm1224_vm8, %v6507_v63 }
 0x5fa   : > { %6675 = vst.msk [vmem:[#allocation6 + $0x240] sm:$0xff] %vm1354_vm9, %v6636_v62 }
 0x5fb   : > { %6803 = vst.msk [vmem:[#allocation6 + $0x240] sm:$0xff] %vm1483_vm10, %v6764_v48 }
 0x5fc   : > { %6931 = vst.msk [vmem:[#allocation6 + $0x240] sm:$0xff] %vm1612_vm11, %v6892_v31  ;;  %v6640_v16 = vpop.permute.xlu0 %6639  ;;  %v6385_v10 = vpop.permute.xlu1 %6384 }
 0x600   : > { %v6768_v54 = vpop.permute.xlu0 %6767  ;;  %v6513_v7 = vpop.permute.xlu1 %6512 }
 0x603   : > { %v6947_v38 = vld [vmem:[#allocation6 + $0x240] sm:$0xff] }
 0x604   : > { %v6896_v24 = vpop.permute.xlu0 %6895  ;;  %v6003_v0 = vpop.permute.xlu1 %6002  ;;  %8070 = vmatprep.mubr.msk.bf16.mxu0 %vm1686_vm12, %v6947_v38 }
 0x605   : > { %6038 = vst.msk [vmem:[#allocation6 + $0x360] sm:$0xff] %vm708_vm4, %v6003_v0 }
 0x608   : > { %v6131_v41 = vpop.permute.xlu0 %6130 }
 0x609   : > { %6166 = vst.msk [vmem:[#allocation6 + $0x360] sm:$0xff] %vm837_vm5, %v6131_v41  ;;  %v6638_v32 = vpop.permute.xlu1 %6637 }
 0x60a   : > { %6676 = vst.msk [vmem:[#allocation6 + $0x288] sm:$0xff] %vm1354_vm9, %v6638_v32 }
 0x60c   : > { %v6894_v61 = vpop.permute.xlu0 %6893 }
 0x60d   : > { %v6766_v59 = vpop.permute.xlu1 %6765 }
 0x60e   : > { %6804 = vst.msk [vmem:[#allocation6 + $0x288] sm:$0xff] %vm1483_vm10, %v6766_v59 }
 0x60f   : > { %6932 = vst.msk [vmem:[#allocation6 + $0x288] sm:$0xff] %vm1612_vm11, %v6894_v61 }
 0x610   : > { %v6255_v29 = vpop.permute.xlu0 %6254 }
 0x611   : > { %6292 = vst.msk [vmem:[#allocation6 + $0x2d0] sm:$0xff] %vm966_vm6, %v6255_v29  ;;  %v6001_v18 = vpop.permute.xlu1 %6000 }
 0x612   : > { %6037 = vst.msk [vmem:[#allocation6 + $0x318] sm:$0xff] %vm708_vm4, %v6001_v18 }
 0x614   : > { %v6383_v53 = vpop.permute.xlu0 %6382 }
 0x615   : > { %6420 = vst.msk [vmem:[#allocation6 + $0x2d0] sm:$0xff] %vm1095_vm7, %v6383_v53  ;;  %v6129_v55 = vpop.permute.xlu1 %6128 }
 0x616   : > { %6165 = vst.msk [vmem:[#allocation6 + $0x318] sm:$0xff] %vm837_vm5, %v6129_v55  ;;  %v6948_v2 = vld [vmem:[#allocation6 + $0x288] sm:$0xff] }
 0x617   : > { %6293 = vst.msk [vmem:[#allocation6 + $0x318] sm:$0xff] %vm966_vm6, %v6257_v35  ;;  %8071 = vmatmul.mubr.msk.bf16.gmra.mrb[192].mxu0 %vm1686_vm12, %v6948_v2 }
 0x618   : > { %6421 = vst.msk [vmem:[#allocation6 + $0x318] sm:$0xff] %vm1095_vm7, %v6385_v10  ;;  %v6511_v23 = vpop.permute.xlu0 %6510 }
 0x619   : > { %6549 = vst.msk [vmem:[#allocation6 + $0x318] sm:$0xff] %vm1224_vm8, %v6513_v7  ;;  %6548 = vst.msk [vmem:[#allocation6 + $0x2d0] sm:$0xff] %vm1224_vm8, %v6511_v23  ;;  %v6261_v36 = vpop.permute.xlu1 %6260 }
 0x61a   : > { %6677 = vst.msk [vmem:[#allocation6 + $0x2d0] sm:$0xff] %vm1354_vm9, %v6640_v16 }
 0x61b   : > { %6805 = vst.msk [vmem:[#allocation6 + $0x2d0] sm:$0xff] %vm1483_vm10, %v6768_v54 }
 0x61c   : > { %6933 = vst.msk [vmem:[#allocation6 + $0x2d0] sm:$0xff] %vm1612_vm11, %v6896_v24  ;;  %v6644_v3 = vpop.permute.xlu0 %6643 }
 0x61d   : > { %v6389_v33 = vpop.permute.xlu1 %6388 }
 0x620   : > { %v6772_v21 = vpop.permute.xlu0 %6771 }
 0x621   : > { %v6517_v25 = vpop.permute.xlu1 %6516 }
 0x623   : > { %v6949_v60 = vld [vmem:[#allocation6 + $0x2d0] sm:$0xff] }
 0x624   : > { %v6900_v57 = vpop.permute.xlu0 %6899  ;;  %8074 = vmatprep.mubr.msk.bf16.mxu0 %vm1686_vm12, %v6949_v60 }
 0x625   : > { %v6007_v51 = vpop.permute.xlu1 %6006 }
 0x626   : > { %6040 = vst.msk [vmem:[#allocation6 + $0x3f0] sm:$0xff] %vm708_vm4, %v6007_v51 }
 0x628   : > { %v6135_v14 = vpop.permute.xlu0 %6134 }
 0x629   : > { %6168 = vst.msk [vmem:[#allocation6 + $0x3f0] sm:$0xff] %vm837_vm5, %v6135_v14  ;;  %v6642_v45 = vpop.permute.xlu1 %6641 }
 0x62a   : > { %6678 = vst.msk [vmem:[#allocation6 + $0x318] sm:$0xff] %vm1354_vm9, %v6642_v45 }
 0x62c   : > { %v6898_v46 = vpop.permute.xlu0 %6897 }
 0x62d   : > { %v6770_v15 = vpop.permute.xlu1 %6769 }
 0x62e   : > { %6806 = vst.msk [vmem:[#allocation6 + $0x318] sm:$0xff] %vm1483_vm10, %v6770_v15 }
 0x62f   : > { %6934 = vst.msk [vmem:[#allocation6 + $0x318] sm:$0xff] %vm1612_vm11, %v6898_v46 }
 0x630   : > { %v6259_v39 = vpop.permute.xlu0 %6258 }
 0x631   : > { %6294 = vst.msk [vmem:[#allocation6 + $0x360] sm:$0xff] %vm966_vm6, %v6259_v39  ;;  %v6005_v6 = vpop.permute.xlu1 %6004 }
 0x632   : > { %6039 = vst.msk [vmem:[#allocation6 + $0x3a8] sm:$0xff] %vm708_vm4, %v6005_v6 }
 0x634   : > { %v6387_v8 = vpop.permute.xlu0 %6386 }
 0x635   : > { %6422 = vst.msk [vmem:[#allocation6 + $0x360] sm:$0xff] %vm1095_vm7, %v6387_v8  ;;  %v6133_v28 = vpop.permute.xlu1 %6132 }
 0x636   : > { %6167 = vst.msk [vmem:[#allocation6 + $0x3a8] sm:$0xff] %vm837_vm5, %v6133_v28  ;;  %v6950_v58 = vld [vmem:[#allocation6 + $0x318] sm:$0xff] }
 0x637   : > { %6295 = vst.msk [vmem:[#allocation6 + $0x3a8] sm:$0xff] %vm966_vm6, %v6261_v36  ;;  %8075 = vmatmul.mubr.msk.bf16.gmra.mrb[196].mxu0 %vm1686_vm12, %v6950_v58 }
 0x638   : > { %6423 = vst.msk [vmem:[#allocation6 + $0x3a8] sm:$0xff] %vm1095_vm7, %v6389_v33  ;;  %v6515_v27 = vpop.permute.xlu0 %6514 }
 0x639   : > { %6551 = vst.msk [vmem:[#allocation6 + $0x3a8] sm:$0xff] %vm1224_vm8, %v6517_v25  ;;  %6550 = vst.msk [vmem:[#allocation6 + $0x360] sm:$0xff] %vm1224_vm8, %v6515_v27  ;;  %v6265_v42 = vpop.permute.xlu1 %6264 }
 0x63a   : > { %6679 = vst.msk [vmem:[#allocation6 + $0x360] sm:$0xff] %vm1354_vm9, %v6644_v3 }
 0x63b   : > { %6807 = vst.msk [vmem:[#allocation6 + $0x360] sm:$0xff] %vm1483_vm10, %v6772_v21 }
 0x63c   : > { %6935 = vst.msk [vmem:[#allocation6 + $0x360] sm:$0xff] %vm1612_vm11, %v6900_v57  ;;  %v6648_v37 = vpop.permute.xlu0 %6647 }
 0x63d   : > { %v6393_v56 = vpop.permute.xlu1 %6392 }
 0x640   : > { %v6776_v19 = vpop.permute.xlu0 %6775 }
 0x641   : > { %v6521_v62 = vpop.permute.xlu1 %6520 }
 0x643   : > { %v6951_v13 = vld [vmem:[#allocation6 + $0x360] sm:$0xff] }
 0x644   : > { %v6902_v17 = vpop.permute.xlu0 %6901  ;;  %8078 = vmatprep.mubr.msk.bf16.mxu0 %vm1686_vm12, %v6951_v13 }
 0x645   : > { %v6646_v26 = vpop.permute.xlu1 %6645 }
 0x646   : > { %6680 = vst.msk [vmem:[#allocation6 + $0x3a8] sm:$0xff] %vm1354_vm9, %v6646_v26 }
 0x648   : > { %v6263_v4 = vpop.permute.xlu0 %6262 }
 0x649   : > { %6296 = vst.msk [vmem:[#allocation6 + $0x3f0] sm:$0xff] %vm966_vm6, %v6263_v4  ;;  %v6774_v48 = vpop.permute.xlu1 %6773 }
 0x64a   : > { %6808 = vst.msk [vmem:[#allocation6 + $0x3a8] sm:$0xff] %vm1483_vm10, %v6774_v48 }
 0x64b   : > { %6936 = vst.msk [vmem:[#allocation6 + $0x3a8] sm:$0xff] %vm1612_vm11, %v6902_v17 }
 0x64c   : > { %v6391_v47 = vpop.permute.xlu0 %6390 }
 0x64d   : > { %6424 = vst.msk [vmem:[#allocation6 + $0x3f0] sm:$0xff] %vm1095_vm7, %v6391_v47  ;;  %v6009_v12 = vpop.permute.xlu1 %6008 }
 0x64e   : > { %6041 = vst.msk [vmem:[#allocation6 + $0x438] sm:$0xff] %vm708_vm4, %v6009_v12 }
 0x650   : > { %v6519_v22 = vpop.permute.xlu0 %6518 }
 0x651   : > { %6552 = vst.msk [vmem:[#allocation6 + $0x3f0] sm:$0xff] %vm1224_vm8, %v6519_v22  ;;  %v6137_v50 = vpop.permute.xlu1 %6136 }
 0x652   : > { %6681 = vst.msk [vmem:[#allocation6 + $0x3f0] sm:$0xff] %vm1354_vm9, %v6648_v37  ;;  %v6952_v20 = vld [vmem:[#allocation6 + $0x3a8] sm:$0xff] }
 0x653   : > { %6169 = vst.msk [vmem:[#allocation6 + $0x438] sm:$0xff] %vm837_vm5, %v6137_v50  ;;  %8079 = vmatmul.mubr.msk.bf16.gmra.mrb[200].mxu0 %vm1686_vm12, %v6952_v20 }
 0x654   : > { %6809 = vst.msk [vmem:[#allocation6 + $0x3f0] sm:$0xff] %vm1483_vm10, %v6776_v19  ;;  %v6904_v31 = vpop.permute.xlu0 %6903 }
 0x655   : > { %6297 = vst.msk [vmem:[#allocation6 + $0x438] sm:$0xff] %vm966_vm6, %v6265_v42  ;;  %v6778_v44 = vpop.permute.xlu1 %6777 }
 0x656   : > { %6425 = vst.msk [vmem:[#allocation6 + $0x438] sm:$0xff] %vm1095_vm7, %v6393_v56 }
 0x657   : > { %6553 = vst.msk [vmem:[#allocation6 + $0x438] sm:$0xff] %vm1224_vm8, %v6521_v62 }
 0x658   : > { %6937 = vst.msk [vmem:[#allocation6 + $0x3f0] sm:$0xff] %vm1612_vm11, %v6904_v31 }
 0x659   : > { %6682 = vst.msk [vmem:[#allocation6 + $0x438] sm:$0xff] %vm1354_vm9, %v11139_v34  ;;  %v6906_v40 = vpop.permute.xlu1 %6905 }
 0x65a   : > { %6810 = vst.msk [vmem:[#allocation6 + $0x438] sm:$0xff] %vm1483_vm10, %v6778_v44 }
 0x65b   : > { %6938 = vst.msk [vmem:[#allocation6 + $0x438] sm:$0xff] %vm1612_vm11, %v6906_v40 }
 0x65f   : > { %v6953_v52 = vld [vmem:[#allocation6 + $0x3f0] sm:$0xff] }
 0x660   : > { %8082 = vmatprep.mubr.msk.bf16.mxu0 %vm1686_vm12, %v6953_v52 }
 0x662   : > { %v6954_v49 = vld [vmem:[#allocation6 + $0x438] sm:$0xff] }
 0x663   : > { %8083 = vmatmul.mubr.msk.bf16.gmra.mrb[204].mxu0 %vm1686_vm12, %v6954_v49 }
 0x669   : > { %v8056_v1 = vpop.f32.mrb[176].mxu0 }
 0x66a   : > { %v7075_v11 = vadd.f32 %v8056_v1, %v11374_v9  ;;  %v7066_v34 = vpop.f32.mrb[177].mxu0 }
 0x66b   : > { %v7067_v30 = vadd.f32 %v11374_v9, %v7066_v34  ;;  %v8057_v5 = vpop.f32.mrb[178].mxu0 }
 0x66c   : > { %v7195_v43 = vmax.f32 %v7075_v11, 0.0  ;;  %v7078_v63 = vadd.f32 %v8057_v5, %v11374_v9  ;;  %v7069_v35 = vpop.f32.mrb[179].mxu0 }
 0x66d   : > { %v7193_v16 = vmax.f32 %v7067_v30, 0.0  ;;  %v7070_v10 = vadd.f32 %v11374_v9, %v7069_v35 }
 0x66e   : > { %7227 = vst.msk [vmem:[%s11382_s19 + $0x10] sm:$0xff] %vm334_vm0, %v7195_v43  ;;  %v7196_v54 = vmax.f32 %v7078_v63, 0.0 }
 0x66f   : > { %7225 = vst.msk [vmem:[%s11382_s19] sm:$0xff] %vm334_vm0, %v7193_v16  ;;  %v7194_v7 = vmax.f32 %v7070_v10, 0.0 }
 0x670   : > { %7228 = vst.msk [vmem:[%s11382_s19 + $0x18] sm:$0xff] %vm334_vm0, %v7196_v54 }
 0x671   : > { %7226 = vst.msk [vmem:[%s11382_s19 + $0x8] sm:$0xff] %vm334_vm0, %v7194_v7 }
 0x689   : > { %v8060_v38 = vpop.f32.mrb[180].mxu0 }
 0x68a   : > { %v7091_v24 = vadd.f32 %v8060_v38, %v11374_v9  ;;  %v7082_v0 = vpop.f32.mrb[181].mxu0 }
 0x68b   : > { %v7083_v41 = vadd.f32 %v11374_v9, %v7082_v0  ;;  %v8061_v32 = vpop.f32.mrb[182].mxu0 }
 0x68c   : > { %v7199_v61 = vmax.f32 %v7091_v24, 0.0  ;;  %v7094_v59 = vadd.f32 %v8061_v32, %v11374_v9  ;;  %v7085_v29 = vpop.f32.mrb[183].mxu0 }
 0x68d   : > { %v7197_v18 = vmax.f32 %v7083_v41, 0.0  ;;  %v7086_v53 = vadd.f32 %v11374_v9, %v7085_v29 }
 0x68e   : > { %7231 = vst.msk [vmem:[%s11382_s19 + $0x30] sm:$0xff] %vm334_vm0, %v7199_v61  ;;  %v7200_v55 = vmax.f32 %v7094_v59, 0.0 }
 0x68f   : > { %7229 = vst.msk [vmem:[%s11382_s19 + $0x20] sm:$0xff] %vm334_vm0, %v7197_v18  ;;  %v7198_v2 = vmax.f32 %v7086_v53, 0.0 }
 0x690   : > { %7232 = vst.msk [vmem:[%s11382_s19 + $0x38] sm:$0xff] %vm334_vm0, %v7200_v55 }
 0x691   : > { %7230 = vst.msk [vmem:[%s11382_s19 + $0x28] sm:$0xff] %vm334_vm0, %v7198_v2 }
 0x6a9   : > { %v8064_v23 = vpop.f32.mrb[184].mxu0 }
 0x6aa   : > { %v7107_v36 = vadd.f32 %v8064_v23, %v11374_v9  ;;  %v7098_v3 = vpop.f32.mrb[185].mxu0 }
 0x6ab   : > { %v7099_v33 = vadd.f32 %v11374_v9, %v7098_v3  ;;  %v8065_v21 = vpop.f32.mrb[186].mxu0 }
 0x6ac   : > { %v7203_v25 = vmax.f32 %v7107_v36, 0.0  ;;  %v7110_v60 = vadd.f32 %v8065_v21, %v11374_v9  ;;  %v7101_v57 = vpop.f32.mrb[187].mxu0 }
 0x6ad   : > { %v7201_v51 = vmax.f32 %v7099_v33, 0.0  ;;  %v7102_v14 = vadd.f32 %v11374_v9, %v7101_v57 }
 0x6ae   : > { %7235 = vst.msk [vmem:[%s11382_s19 + $0x50] sm:$0xff] %vm334_vm0, %v7203_v25  ;;  %v7204_v45 = vmax.f32 %v7110_v60, 0.0 }
 0x6af   : > { %7233 = vst.msk [vmem:[%s11382_s19 + $0x40] sm:$0xff] %vm334_vm0, %v7201_v51  ;;  %v7202_v46 = vmax.f32 %v7102_v14, 0.0 }
 0x6b0   : > { %7236 = vst.msk [vmem:[%s11382_s19 + $0x58] sm:$0xff] %vm334_vm0, %v7204_v45 }
 0x6b1   : > { %7234 = vst.msk [vmem:[%s11382_s19 + $0x48] sm:$0xff] %vm334_vm0, %v7202_v46 }
 0x6c9   : > { %v8068_v15 = vpop.f32.mrb[188].mxu0 }
 0x6ca   : > { %v7123_v39 = vadd.f32 %v8068_v15, %v11374_v9  ;;  %v7114_v6 = vpop.f32.mrb[189].mxu0 }
 0x6cb   : > { %v7115_v8 = vadd.f32 %v11374_v9, %v7114_v6  ;;  %v8069_v28 = vpop.f32.mrb[190].mxu0 }
 0x6cc   : > { %v7207_v58 = vmax.f32 %v7123_v39, 0.0  ;;  %v7126_v27 = vadd.f32 %v8069_v28, %v11374_v9  ;;  %v7117_v42 = vpop.f32.mrb[191].mxu0 }
 0x6cd   : > { %v7205_v37 = vmax.f32 %v7115_v8, 0.0  ;;  %v7118_v56 = vadd.f32 %v11374_v9, %v7117_v42 }
 0x6ce   : > { %7239 = vst.msk [vmem:[%s11382_s19 + $0x70] sm:$0xff] %vm334_vm0, %v7207_v58  ;;  %v7208_v19 = vmax.f32 %v7126_v27, 0.0 }
 0x6cf   : > { %7237 = vst.msk [vmem:[%s11382_s19 + $0x60] sm:$0xff] %vm334_vm0, %v7205_v37  ;;  %v7206_v62 = vmax.f32 %v7118_v56, 0.0 }
 0x6d0   : > { %7240 = vst.msk [vmem:[%s11382_s19 + $0x78] sm:$0xff] %vm334_vm0, %v7208_v19 }
 0x6d1   : > { %7238 = vst.msk [vmem:[%s11382_s19 + $0x68] sm:$0xff] %vm334_vm0, %v7206_v62 }
 0x6ea   : > { %v8072_v13 = vpop.f32.mrb[192].mxu0 }
 0x6eb   : > { %v7139_v17 = vadd.f32 %v8072_v13, %v11374_v9  ;;  %v7130_v26 = vpop.f32.mrb[193].mxu0 }
 0x6ec   : > { %v7131_v4 = vadd.f32 %v11374_v9, %v7130_v26  ;;  %v8073_v48 = vpop.f32.mrb[194].mxu0 }
 0x6ed   : > { %v7211_v47 = vmax.f32 %v7139_v17, 0.0  ;;  %v7142_v12 = vadd.f32 %v8073_v48, %v11374_v9  ;;  %v7133_v22 = vpop.f32.mrb[195].mxu0 }
 0x6ee   : > { %v7209_v50 = vmax.f32 %v7131_v4, 0.0  ;;  %v7134_v20 = vadd.f32 %v11374_v9, %v7133_v22 }
 0x6ef   : > { %7243 = vst.msk [vmem:[%s11382_s19 + $0x90] sm:$0xff] %vm334_vm0, %v7211_v47  ;;  %v7212_v31 = vmax.f32 %v7142_v12, 0.0 }
 0x6f0   : > { %7241 = vst.msk [vmem:[%s11382_s19 + $0x80] sm:$0xff] %vm334_vm0, %v7209_v50  ;;  %v7210_v44 = vmax.f32 %v7134_v20, 0.0 }
 0x6f1   : > { %7244 = vst.msk [vmem:[%s11382_s19 + $0x98] sm:$0xff] %vm334_vm0, %v7212_v31 }
 0x6f2   : > { %7242 = vst.msk [vmem:[%s11382_s19 + $0x88] sm:$0xff] %vm334_vm0, %v7210_v44 }
 0x70a   : > { %v8076_v40 = vpop.f32.mrb[196].mxu0 }
 0x70b   : > { %v7155_v52 = vadd.f32 %v8076_v40, %v11374_v9  ;;  %v7146_v49 = vpop.f32.mrb[197].mxu0 }
 0x70c   : > { %v7147_v1 = vadd.f32 %v11374_v9, %v7146_v49  ;;  %v8077_v11 = vpop.f32.mrb[198].mxu0 }
 0x70d   : > { %v7215_v34 = vmax.f32 %v7155_v52, 0.0  ;;  %v7158_v30 = vadd.f32 %v8077_v11, %v11374_v9  ;;  %v7149_v5 = vpop.f32.mrb[199].mxu0 }
 0x70e   : > { %v7213_v43 = vmax.f32 %v7147_v1, 0.0  ;;  %v7150_v63 = vadd.f32 %v11374_v9, %v7149_v5 }
 0x70f   : > { %7247 = vst.msk [vmem:[%s11382_s19 + $0xb0] sm:$0xff] %vm334_vm0, %v7215_v34  ;;  %v7216_v35 = vmax.f32 %v7158_v30, 0.0 }
 0x710   : > { %7245 = vst.msk [vmem:[%s11382_s19 + $0xa0] sm:$0xff] %vm334_vm0, %v7213_v43  ;;  %v7214_v16 = vmax.f32 %v7150_v63, 0.0 }
 0x711   : > { %7248 = vst.msk [vmem:[%s11382_s19 + $0xb8] sm:$0xff] %vm334_vm0, %v7216_v35 }
 0x712   : > { %7246 = vst.msk [vmem:[%s11382_s19 + $0xa8] sm:$0xff] %vm334_vm0, %v7214_v16 }
 0x726   : > { %v8080_v10 = vpop.f32.mrb[200].mxu0 }
 0x727   : > { %v7171_v54 = vadd.f32 %v8080_v10, %v11374_v9  ;;  %v7162_v7 = vpop.f32.mrb[201].mxu0 }
 0x728   : > { %v7163_v38 = vadd.f32 %v11374_v9, %v7162_v7  ;;  %v8081_v24 = vpop.f32.mrb[202].mxu0 }
 0x729   : > { %v7219_v0 = vmax.f32 %v7171_v54, 0.0  ;;  %v7174_v41 = vadd.f32 %v8081_v24, %v11374_v9  ;;  %v7165_v32 = vpop.f32.mrb[203].mxu0 }
 0x72a   : > { %v7217_v61 = vmax.f32 %v7163_v38, 0.0  ;;  %v7166_v59 = vadd.f32 %v11374_v9, %v7165_v32 }
 0x72b   : > { %7251 = vst.msk [vmem:[%s11382_s19 + $0xd0] sm:$0xff] %vm334_vm0, %v7219_v0  ;;  %v7220_v29 = vmax.f32 %v7174_v41, 0.0 }
 0x72c   : > { %7249 = vst.msk [vmem:[%s11382_s19 + $0xc0] sm:$0xff] %vm334_vm0, %v7217_v61  ;;  %v7218_v18 = vmax.f32 %v7166_v59, 0.0 }
 0x72d   : > { %7252 = vst.msk [vmem:[%s11382_s19 + $0xd8] sm:$0xff] %vm334_vm0, %v7220_v29 }
 0x72e   : > { %7250 = vst.msk [vmem:[%s11382_s19 + $0xc8] sm:$0xff] %vm334_vm0, %v7218_v18 }
 0x736   : > { %v8084_v53 = vpop.f32.mrb[204].mxu0 }
 0x737   : > { %v7187_v55 = vadd.f32 %v8084_v53, %v11374_v9  ;;  %v7178_v2 = vpop.f32.mrb[205].mxu0 }
 0x738   : > { %v7179_v23 = vadd.f32 %v11374_v9, %v7178_v2  ;;  %v8085_v36 = vpop.f32.mrb[206].mxu0 }
 0x739   : > { %v7223_v3 = vmax.f32 %v7187_v55, 0.0  ;;  %v7190_v33 = vadd.f32 %v8085_v36, %v11374_v9  ;;  %v7181_v21 = vpop.f32.mrb[207].mxu0 }
 0x73a   : > { %v7221_v25 = vmax.f32 %v7179_v23, 0.0  ;;  %v7182_v60 = vadd.f32 %v11374_v9, %v7181_v21 }
 0x73b   : > { %7255 = vst.msk [vmem:[%s11382_s19 + $0xf0] sm:$0xff] %vm334_vm0, %v7223_v3  ;;  %v7224_v57 = vmax.f32 %v7190_v33, 0.0 }
 0x73c   : > { %7253 = vst.msk [vmem:[%s11382_s19 + $0xe0] sm:$0xff] %vm334_vm0, %v7221_v25  ;;  %v7222_v51 = vmax.f32 %v7182_v60, 0.0 }
 0x73d   : > { %7256 = vst.msk [vmem:[%s11382_s19 + $0xf8] sm:$0xff] %vm334_vm0, %v7224_v57 }
 0x73e   : > { %7254 = vst.msk [vmem:[%s11382_s19 + $0xe8] sm:$0xff] %vm334_vm0, %v7222_v51 }
 0x73f PF: > { %s19_s30 = sadd.s32 1, %s8314_s30  }
 0x740   : > { %p16_p4 = scmp.ge.s32.totalorder %s19_s30, 4  }
 0x742   :  { %18 = sbr.rel (!%p16_p4) target bundleno = 1 (0x1), region = 99 }

</bundles_post_ra>
